<compile_context>
chip_gen: v5e
topology: v5e:2x2
jax: 0.10.0
libtpu: 0.0.40
codegen_flags: <defaults>
</compile_context>

<pallas_src>
import functools

import jax
import jax.numpy as jnp
import numpy as np
from jax.experimental import pallas as pl
from jax.experimental.pallas import tpu as pltpu


def dag_kernel(xe_ref, mask_ref,
               w_front_ref, w_fused_ref, w_ext_ref, b_all_ref,
               out_ref,
               col_ref,
               *, C_in, ns, H, W, B_blk):
    """One grid step == B_blk batch images packed along the lane axis."""
    L = B_blk * H * W

    xe = xe_ref[...]                    # (2*C_in, L)   rows: [x ; edge]
    masks = mask_ref[...]               # (9, 1, L) boundary masks, tiled per image
    b_all = b_all_ref[...]              # (12*ns, 1)

    # ---- conv_state + conv_proj + conv_proj_2: ONE block-diagonal matmul -----
    sp = jnp.dot(w_front_ref[...], xe,
                 preferred_element_type=jnp.float32) + b_all[:3 * ns]
    x_state = sp[0:ns]                  # (ns, L)
    x_proj = sp[ns:2 * ns]              # (ns, L)
    y = sp[2 * ns:3 * ns]               # (ns, L)

    # ---- im2col of y into the VMEM scratch column buffer ---------------------
    # Tap k = ki*3 + kj reads pixel (h + ki - 1, w + kj - 1), i.e. flat offset
    # off = (ki-1)*W + (kj-1) within an image.  Implemented as a lane roll (XLU)
    # modulo L + precomputed mask: valid taps never cross an image boundary and
    # every wrapped / cross-image lane is masked to zero (padding semantics).
    for k in range(9):
        ki, kj = divmod(k, 3)
        off = (ki - 1) * W + (kj - 1)
        if off == 0:
            col_ref[pl.ds(k * ns, ns), :] = y
        else:
            sh = (-off) % L             # out[p] = src[(p + off) mod L]
            col_ref[pl.ds(k * ns, ns), :] = pltpu.roll(y, sh, 1) * masks[k]

    # ---- fused generate_kernel: single K = 9*ns matmul ------------------------
    # gk rows are tap-major: row k*ns + c == PyTorch output channel c*9 + k.
    gk = jnp.dot(w_fused_ref[...], col_ref[...],
                 preferred_element_type=jnp.float32) + b_all[3 * ns:]   # (9ns, L)

    # ---- dynamic conv: unfold(x_proj) * kernel, summed over the 9 taps -------
    # Re-roll x_proj per tap here (XLU slot has slack) instead of keeping nine
    # shifted copies alive across the big matmul.
    dyn = x_proj * gk[4 * ns:5 * ns]    # centre tap (k == 4, zero offset)
    for k in range(9):
        if k == 4:
            continue
        ki, kj = divmod(k, 3)
        off = (ki - 1) * W + (kj - 1)
        sh = (-off) % L
        x_sh = pltpu.roll(x_proj, sh, 1) * masks[k]
        dyn = dyn + x_sh * gk[k * ns:(k + 1) * ns]                       # (ns, L)

    # ---- softmax over the num_s (sublane) axis --------------------------------
    mx = jnp.max(dyn, axis=0, keepdims=True)
    ex = jnp.exp(dyn - mx)
    soft = ex * pl.reciprocal(jnp.sum(ex, axis=0, keepdims=True), approx=False)

    # ---- gate the state, conv_extend (1x1, no bias), residual -----------------
    gated = soft * x_state
    out_ref[...] = xe[:C_in] + jnp.dot(w_ext_ref[...], gated,
                                       preferred_element_type=jnp.float32)


def _choose_b_blk(N, max_b=8):
    """Largest divisor of N that is <= max_b, preferring a grid length >= 2
    (keeps both v7x TensorCores busy).  max_b ~ 8 stays well inside the v7x
    64 MiB VMEM / 32 MiB scoped default at these channel counts."""
    divisors = [d for d in range(1, min(N, max_b) + 1) if N % d == 0]
    pref = [d for d in divisors if N // d >= 2]
    return max(pref) if pref else max(divisors)


def dag_forward(x_nchw, e_nchw, params, *, max_images_per_block=8):
    N, C_in, H, W = x_nchw.shape
    ns = params["w_state"].shape[0]
    HW = H * W

    B_blk = _choose_b_blk(N, max_images_per_block)
    NB = N // B_blk
    L = B_blk * HW

    # ---- lane-pack B_blk images per grid step: (NB, 2*C_in, B_blk*HW) --------
    xe = jnp.concatenate([x_nchw.reshape(N, C_in, HW),
                          e_nchw.reshape(N, C_in, HW)], axis=1)      # (N, 2C, HW)
    xe = (xe.reshape(NB, B_blk, 2 * C_in, HW)
            .transpose(0, 2, 1, 3)
            .reshape(NB, 2 * C_in, L))

    # ---- boundary masks for the 9 taps, tiled per packed image ----------------
    hh, ww = np.meshgrid(np.arange(H), np.arange(W), indexing="ij")
    masks_np = np.zeros((9, 1, HW), np.float32)
    for k in range(9):
        ki, kj = divmod(k, 3)
        di, dj = ki - 1, kj - 1
        valid = (hh + di >= 0) & (hh + di < H) & (ww + dj >= 0) & (ww + dj < W)
        masks_np[k, 0] = valid.reshape(-1).astype(np.float32)
    masks = jnp.asarray(np.tile(masks_np, (1, 1, B_blk)))            # (9, 1, L)

    # ---- weight restacking / pre-fusion (all done once, host/XLA side) --------
    zeros_nc = jnp.zeros((ns, C_in), jnp.float32)
    # block-diagonal front matmul on [x ; edge]: rows = [state ; proj ; proj_2]
    w_front = jnp.concatenate([
        jnp.concatenate([params["w_state"], zeros_nc], axis=1),
        jnp.concatenate([params["w_proj"], zeros_nc], axis=1),
        jnp.concatenate([zeros_nc, params["w_proj2"]], axis=1)], axis=0)  # (3ns, 2C)
    b_front = jnp.concatenate([params["b_state"], params["b_proj"],
                               params["b_proj2"]])                        # (3ns,)

    # generate_kernel pre-fusion:
    #   3x3 conv weight (9, out, in) -> (out, 9*in), tap-major K (im2col order)
    w_gk1_col = jnp.transpose(params["w_gk1"], (1, 0, 2)).reshape(ns, 9 * ns)
    #   1x1 weight: PyTorch row order o = c*9 + k  ->  rows k*ns + c
    w_gk2_perm = params["w_gk2"].reshape(ns, 9, ns).transpose(1, 0, 2).reshape(9 * ns, ns)
    b_gk2_perm = params["b_gk2"].reshape(ns, 9).T.reshape(9 * ns)
    w_fused = jnp.dot(w_gk2_perm, w_gk1_col)                              # (9ns, 9ns)
    b_fused = jnp.dot(w_gk2_perm, params["b_gk1"]) + b_gk2_perm           # (9ns,)

    b_all = jnp.concatenate([b_front, b_fused]).reshape(12 * ns, 1)       # (12ns, 1)
    w_ext = params["w_ext"]                                               # (C_in, ns)

    args = (xe, masks, w_front, w_fused, w_ext, b_all)

    def bspec(a):   # batched over the leading (grid) axis
        return pl.BlockSpec((None,) + a.shape[1:], lambda n: (n, 0, 0))

    def fspec(a):   # full array, same block every grid step (fetched once)
        nd = a.ndim
        return pl.BlockSpec(a.shape, lambda n, _nd=nd: (0,) * _nd)

    in_specs = [bspec(xe)] + [fspec(a) for a in args[1:]]

    kernel = functools.partial(dag_kernel, C_in=C_in, ns=ns, H=H, W=W, B_blk=B_blk)

    out = pl.pallas_call(
        kernel,
        out_shape=jax.ShapeDtypeStruct((NB, C_in, L), jnp.float32),
        grid_spec=pltpu.PrefetchScalarGridSpec(
            num_scalar_prefetch=0,
            grid=(NB,),
            in_specs=in_specs,
            out_specs=pl.BlockSpec((None, C_in, L), lambda n: (n, 0, 0)),
            scratch_shapes=[pltpu.VMEM((9 * ns, L), jnp.float32)],   # im2col(y)
        ),
        compiler_params=pltpu.CompilerParams(
            dimension_semantics=("parallel",)),   # blocks independent -> megacore split
    )(*args)

    out = (out.reshape(NB, C_in, B_blk, HW)
              .transpose(0, 2, 1, 3)
              .reshape(N, C_in, H, W))
    return out


def reference_nchw(x, edge, p):
    """Pure-JAX NCHW reference matching the PyTorch DAG module semantics."""
    N, C, H, W = x.shape
    ns = p["w_state"].shape[0]

    def conv1x1(z, w, b=None):
        out = jnp.einsum("oc,nchw->nohw", w, z)
        if b is not None:
            out = out + b.reshape(1, -1, 1, 1)
        return out

    x_state = conv1x1(x, p["w_state"], p["b_state"])
    x_proj = conv1x1(x, p["w_proj"], p["b_proj"])
    y = conv1x1(edge, p["w_proj2"], p["b_proj2"])

    # generate_kernel: 3x3 conv (pad=1) then 1x1 conv
    yp = jnp.pad(y, ((0, 0), (0, 0), (1, 1), (1, 1)))
    y_conv = jnp.zeros_like(y) + p["b_gk1"].reshape(1, -1, 1, 1)
    for k in range(9):
        ki, kj = divmod(k, 3)
        y_conv = y_conv + jnp.einsum("oc,nchw->nohw", p["w_gk1"][k],
                                     yp[:, :, ki:ki + H, kj:kj + W])
    gk = conv1x1(y_conv, p["w_gk2"], p["b_gk2"])      # channel index = c*9 + k

    # unfold(x_proj) * kernel, sum over taps
    xpp = jnp.pad(x_proj, ((0, 0), (0, 0), (1, 1), (1, 1)))
    dyn = jnp.zeros((N, ns, H, W), jnp.float32)
    for k in range(9):
        ki, kj = divmod(k, 3)
        dyn = dyn + xpp[:, :, ki:ki + H, kj:kj + W] * gk[:, k::9]

    soft = jax.nn.softmax(dyn, axis=1)                # softmax over num_s dim
    gated = soft * x_state
    return x + conv1x1(gated, p["w_ext"])


if __name__ == "__main__":
    # num_in = plane_mid = 32 (module default); N=4 exercises lane-packing
    # (B_blk=2) AND a multi-step grid (NB=2).
    N, C_in, H, W = 4, 32, 16, 16
    ns = 32

    key = jax.random.PRNGKey(0)
    ks = jax.random.split(key, 13)

    def init(k, shape, scale=0.1):
        return scale * jax.random.normal(k, shape, jnp.float32)

    params = dict(
        w_state=init(ks[0], (ns, C_in)),   b_state=init(ks[1], (ns,)),
        w_proj=init(ks[2], (ns, C_in)),    b_proj=init(ks[3], (ns,)),
        w_proj2=init(ks[4], (ns, C_in)),   b_proj2=init(ks[5], (ns,)),
        w_gk1=init(ks[6], (9, ns, ns)),    b_gk1=init(ks[7], (ns,)),
        w_gk2=init(ks[8], (ns * 9, ns)),   b_gk2=init(ks[9], (ns * 9,)),
        w_ext=init(ks[10], (C_in, ns)),
    )

    x_nchw = init(ks[11], (N, C_in, H, W), 1.0)
    e_nchw = init(ks[12], (N, C_in, H, W), 1.0)

    out = dag_forward(x_nchw, e_nchw, params)
    jax.block_until_ready(out)

    ref = reference_nchw(x_nchw, e_nchw, params)
    np.testing.assert_allclose(np.asarray(out), np.asarray(ref),
                               rtol=1e-4, atol=1e-4)
    print("KERNEL_OK")
</pallas_src>

<mosaic_0001>
module attributes {stable_mosaic.version = 11 : i64} {
  func.func @dag_kernel(%arg0: i32, %arg1: memref<1x64x512xf32, #tpu.memory_space<vmem>>, %arg2: memref<9x1x512xf32, #tpu.memory_space<vmem>>, %arg3: memref<96x64xf32, #tpu.memory_space<vmem>>, %arg4: memref<288x288xf32, #tpu.memory_space<vmem>>, %arg5: memref<32x32xf32, #tpu.memory_space<vmem>>, %arg6: memref<384x1xf32, #tpu.memory_space<vmem>>, %arg7: memref<1x32x512xf32, #tpu.memory_space<vmem>>, %arg8: memref<288x512xf32, #tpu.memory_space<vmem>>) attributes {dimension_semantics = [#tpu.dimension_semantics<parallel>], iteration_bounds = array<i64: 2>, scalar_prefetch = 0 : i64, scratch_operands = 1 : i64, tpu.core_type = #tpu.core_type<tc>, window_params = [{transform_indices = @transform_0, window_bounds = array<i64: 1, 64, 512>}, {pipeline_mode = #tpu.pipeline_mode<synchronous>, transform_indices = @transform_1, window_bounds = array<i64: 9, 1, 512>}, {pipeline_mode = #tpu.pipeline_mode<synchronous>, transform_indices = @transform_2, window_bounds = array<i64: 96, 64>}, {pipeline_mode = #tpu.pipeline_mode<synchronous>, transform_indices = @transform_3, window_bounds = array<i64: 288, 288>}, {pipeline_mode = #tpu.pipeline_mode<synchronous>, transform_indices = @transform_4, window_bounds = array<i64: 32, 32>}, {pipeline_mode = #tpu.pipeline_mode<synchronous>, transform_indices = @transform_5, window_bounds = array<i64: 384, 1>}, {transform_indices = @transform_6, window_bounds = array<i64: 1, 32, 512>}]} {
    %c0 = arith.constant 0 : index
    %c0_0 = arith.constant 0 : index
    %c0_1 = arith.constant 0 : index
    %0 = vector.load %arg1[%c0, %c0_0, %c0_1] : memref<1x64x512xf32, #tpu.memory_space<vmem>>, vector<1x64x512xf32>
    %1 = vector.shape_cast %0 : vector<1x64x512xf32> to vector<64x512xf32>
    %c0_2 = arith.constant 0 : index
    %c0_3 = arith.constant 0 : index
    %c0_4 = arith.constant 0 : index
    %2 = vector.load %arg2[%c0_2, %c0_3, %c0_4] : memref<9x1x512xf32, #tpu.memory_space<vmem>>, vector<9x1x512xf32>
    %c0_5 = arith.constant 0 : index
    %c0_6 = arith.constant 0 : index
    %3 = vector.load %arg6[%c0_5, %c0_6] : memref<384x1xf32, #tpu.memory_space<vmem>>, vector<384x1xf32>
    %c0_7 = arith.constant 0 : index
    %c0_8 = arith.constant 0 : index
    %4 = vector.load %arg3[%c0_7, %c0_8] : memref<96x64xf32, #tpu.memory_space<vmem>>, vector<96x64xf32>
    %cst = arith.constant dense<0.000000e+00> : vector<96x512xf32>
    %5 = tpu.matmul %4, %1, %cst {dimension_numbers = #tpu.dot_dimension_numbers<[1], [0], [0], [1], [0, 0, 1, 1], [], []>} : vector<96x64xf32>, vector<64x512xf32>, vector<96x512xf32> -> vector<96x512xf32>
    %6 = vector.extract_strided_slice %3 {offsets = [0, 0], sizes = [96, 1], strides = [1, 1]} : vector<384x1xf32> to vector<96x1xf32>
    %7 = vector.broadcast %6 : vector<96x1xf32> to vector<96x512xf32>
    %8 = arith.addf %5, %7 : vector<96x512xf32>
    %9 = vector.extract_strided_slice %8 {offsets = [0, 0], sizes = [32, 512], strides = [1, 1]} : vector<96x512xf32> to vector<32x512xf32>
    %10 = vector.extract_strided_slice %8 {offsets = [32, 0], sizes = [32, 512], strides = [1, 1]} : vector<96x512xf32> to vector<32x512xf32>
    %11 = vector.extract_strided_slice %8 {offsets = [64, 0], sizes = [32, 512], strides = [1, 1]} : vector<96x512xf32> to vector<32x512xf32>
    %c17_i32 = arith.constant 17 : i32
    %12 = tpu.dynamic_rotate %11 by %c17_i32 dim 1 : vector<32x512xf32>, i32 -> vector<32x512xf32>
    %13 = vector.extract_strided_slice %2 {offsets = [0, 0, 0], sizes = [1, 1, 512], strides = [1, 1, 1]} : vector<9x1x512xf32> to vector<1x1x512xf32>
    %14 = vector.shape_cast %13 : vector<1x1x512xf32> to vector<1x512xf32>
    %15 = vector.broadcast %14 : vector<1x512xf32> to vector<32x512xf32>
    %16 = arith.mulf %12, %15 : vector<32x512xf32>
    %c0_9 = arith.constant 0 : index
    %c0_10 = arith.constant 0 : index
    %17 = vector.load %arg8[%c0_9, %c0_10] : memref<288x512xf32, #tpu.memory_space<vmem>>, vector<32x512xf32>
    tpu.vector_store %arg8[%c0_9, %c0_10], %16 {strides = array<i32>} : memref<288x512xf32, #tpu.memory_space<vmem>>, vector<32x512xf32>,
    %c16_i32 = arith.constant 16 : i32
    %18 = tpu.dynamic_rotate %11 by %c16_i32 dim 1 : vector<32x512xf32>, i32 -> vector<32x512xf32>
    %19 = vector.extract_strided_slice %2 {offsets = [1, 0, 0], sizes = [1, 1, 512], strides = [1, 1, 1]} : vector<9x1x512xf32> to vector<1x1x512xf32>
    %20 = vector.shape_cast %19 : vector<1x1x512xf32> to vector<1x512xf32>
    %21 = vector.broadcast %20 : vector<1x512xf32> to vector<32x512xf32>
    %22 = arith.mulf %18, %21 : vector<32x512xf32>
    %c32 = arith.constant 32 : index
    %c0_11 = arith.constant 0 : index
    %23 = vector.load %arg8[%c32, %c0_11] : memref<288x512xf32, #tpu.memory_space<vmem>>, vector<32x512xf32>
    tpu.vector_store %arg8[%c32, %c0_11], %22 {strides = array<i32>} : memref<288x512xf32, #tpu.memory_space<vmem>>, vector<32x512xf32>,
    %c15_i32 = arith.constant 15 : i32
    %24 = tpu.dynamic_rotate %11 by %c15_i32 dim 1 : vector<32x512xf32>, i32 -> vector<32x512xf32>
    %25 = vector.extract_strided_slice %2 {offsets = [2, 0, 0], sizes = [1, 1, 512], strides = [1, 1, 1]} : vector<9x1x512xf32> to vector<1x1x512xf32>
    %26 = vector.shape_cast %25 : vector<1x1x512xf32> to vector<1x512xf32>
    %27 = vector.broadcast %26 : vector<1x512xf32> to vector<32x512xf32>
    %28 = arith.mulf %24, %27 : vector<32x512xf32>
    %c64 = arith.constant 64 : index
    %c0_12 = arith.constant 0 : index
    %29 = vector.load %arg8[%c64, %c0_12] : memref<288x512xf32, #tpu.memory_space<vmem>>, vector<32x512xf32>
    tpu.vector_store %arg8[%c64, %c0_12], %28 {strides = array<i32>} : memref<288x512xf32, #tpu.memory_space<vmem>>, vector<32x512xf32>,
    %c1_i32 = arith.constant 1 : i32
    %30 = tpu.dynamic_rotate %11 by %c1_i32 dim 1 : vector<32x512xf32>, i32 -> vector<32x512xf32>
    %31 = vector.extract_strided_slice %2 {offsets = [3, 0, 0], sizes = [1, 1, 512], strides = [1, 1, 1]} : vector<9x1x512xf32> to vector<1x1x512xf32>
    %32 = vector.shape_cast %31 : vector<1x1x512xf32> to vector<1x512xf32>
    %33 = vector.broadcast %32 : vector<1x512xf32> to vector<32x512xf32>
    %34 = arith.mulf %30, %33 : vector<32x512xf32>
    %c96 = arith.constant 96 : index
    %c0_13 = arith.constant 0 : index
    %35 = vector.load %arg8[%c96, %c0_13] : memref<288x512xf32, #tpu.memory_space<vmem>>, vector<32x512xf32>
    tpu.vector_store %arg8[%c96, %c0_13], %34 {strides = array<i32>} : memref<288x512xf32, #tpu.memory_space<vmem>>, vector<32x512xf32>,
    %c128 = arith.constant 128 : index
    %c0_14 = arith.constant 0 : index
    %36 = vector.load %arg8[%c128, %c0_14] : memref<288x512xf32, #tpu.memory_space<vmem>>, vector<32x512xf32>
    tpu.vector_store %arg8[%c128, %c0_14], %11 {strides = array<i32>} : memref<288x512xf32, #tpu.memory_space<vmem>>, vector<32x512xf32>,
    %c511_i32 = arith.constant 511 : i32
    %37 = tpu.dynamic_rotate %11 by %c511_i32 dim 1 : vector<32x512xf32>, i32 -> vector<32x512xf32>
    %38 = vector.extract_strided_slice %2 {offsets = [5, 0, 0], sizes = [1, 1, 512], strides = [1, 1, 1]} : vector<9x1x512xf32> to vector<1x1x512xf32>
    %39 = vector.shape_cast %38 : vector<1x1x512xf32> to vector<1x512xf32>
    %40 = vector.broadcast %39 : vector<1x512xf32> to vector<32x512xf32>
    %41 = arith.mulf %37, %40 : vector<32x512xf32>
    %c160 = arith.constant 160 : index
    %c0_15 = arith.constant 0 : index
    %42 = vector.load %arg8[%c160, %c0_15] : memref<288x512xf32, #tpu.memory_space<vmem>>, vector<32x512xf32>
    tpu.vector_store %arg8[%c160, %c0_15], %41 {strides = array<i32>} : memref<288x512xf32, #tpu.memory_space<vmem>>, vector<32x512xf32>,
    %c497_i32 = arith.constant 497 : i32
    %43 = tpu.dynamic_rotate %11 by %c497_i32 dim 1 : vector<32x512xf32>, i32 -> vector<32x512xf32>
    %44 = vector.extract_strided_slice %2 {offsets = [6, 0, 0], sizes = [1, 1, 512], strides = [1, 1, 1]} : vector<9x1x512xf32> to vector<1x1x512xf32>
    %45 = vector.shape_cast %44 : vector<1x1x512xf32> to vector<1x512xf32>
    %46 = vector.broadcast %45 : vector<1x512xf32> to vector<32x512xf32>
    %47 = arith.mulf %43, %46 : vector<32x512xf32>
    %c192 = arith.constant 192 : index
    %c0_16 = arith.constant 0 : index
    %48 = vector.load %arg8[%c192, %c0_16] : memref<288x512xf32, #tpu.memory_space<vmem>>, vector<32x512xf32>
    tpu.vector_store %arg8[%c192, %c0_16], %47 {strides = array<i32>} : memref<288x512xf32, #tpu.memory_space<vmem>>, vector<32x512xf32>,
    %c496_i32 = arith.constant 496 : i32
    %49 = tpu.dynamic_rotate %11 by %c496_i32 dim 1 : vector<32x512xf32>, i32 -> vector<32x512xf32>
    %50 = vector.extract_strided_slice %2 {offsets = [7, 0, 0], sizes = [1, 1, 512], strides = [1, 1, 1]} : vector<9x1x512xf32> to vector<1x1x512xf32>
    %51 = vector.shape_cast %50 : vector<1x1x512xf32> to vector<1x512xf32>
    %52 = vector.broadcast %51 : vector<1x512xf32> to vector<32x512xf32>
    %53 = arith.mulf %49, %52 : vector<32x512xf32>
    %c224 = arith.constant 224 : index
    %c0_17 = arith.constant 0 : index
    %54 = vector.load %arg8[%c224, %c0_17] : memref<288x512xf32, #tpu.memory_space<vmem>>, vector<32x512xf32>
    tpu.vector_store %arg8[%c224, %c0_17], %53 {strides = array<i32>} : memref<288x512xf32, #tpu.memory_space<vmem>>, vector<32x512xf32>,
    %c495_i32 = arith.constant 495 : i32
    %55 = tpu.dynamic_rotate %11 by %c495_i32 dim 1 : vector<32x512xf32>, i32 -> vector<32x512xf32>
    %56 = vector.extract_strided_slice %2 {offsets = [8, 0, 0], sizes = [1, 1, 512], strides = [1, 1, 1]} : vector<9x1x512xf32> to vector<1x1x512xf32>
    %57 = vector.shape_cast %56 : vector<1x1x512xf32> to vector<1x512xf32>
    %58 = vector.broadcast %57 : vector<1x512xf32> to vector<32x512xf32>
    %59 = arith.mulf %55, %58 : vector<32x512xf32>
    %c256 = arith.constant 256 : index
    %c0_18 = arith.constant 0 : index
    %60 = vector.load %arg8[%c256, %c0_18] : memref<288x512xf32, #tpu.memory_space<vmem>>, vector<32x512xf32>
    tpu.vector_store %arg8[%c256, %c0_18], %59 {strides = array<i32>} : memref<288x512xf32, #tpu.memory_space<vmem>>, vector<32x512xf32>,
    %c0_19 = arith.constant 0 : index
    %c0_20 = arith.constant 0 : index
    %61 = vector.load %arg4[%c0_19, %c0_20] : memref<288x288xf32, #tpu.memory_space<vmem>>, vector<288x288xf32>
    %c0_21 = arith.constant 0 : index
    %c0_22 = arith.constant 0 : index
    %62 = vector.load %arg8[%c0_21, %c0_22] : memref<288x512xf32, #tpu.memory_space<vmem>>, vector<288x512xf32>
    %cst_23 = arith.constant dense<0.000000e+00> : vector<288x512xf32>
    %63 = tpu.matmul %61, %62, %cst_23 {dimension_numbers = #tpu.dot_dimension_numbers<[1], [0], [0], [1], [0, 0, 1, 1], [], []>} : vector<288x288xf32>, vector<288x512xf32>, vector<288x512xf32> -> vector<288x512xf32>
    %64 = vector.extract_strided_slice %3 {offsets = [96, 0], sizes = [288, 1], strides = [1, 1]} : vector<384x1xf32> to vector<288x1xf32>
    %65 = vector.broadcast %64 : vector<288x1xf32> to vector<288x512xf32>
    %66 = arith.addf %63, %65 : vector<288x512xf32>
    %67 = vector.extract_strided_slice %66 {offsets = [128, 0], sizes = [32, 512], strides = [1, 1]} : vector<288x512xf32> to vector<32x512xf32>
    %68 = arith.mulf %10, %67 : vector<32x512xf32>
    %c17_i32_24 = arith.constant 17 : i32
    %69 = tpu.dynamic_rotate %10 by %c17_i32_24 dim 1 : vector<32x512xf32>, i32 -> vector<32x512xf32>
    %70 = vector.extract_strided_slice %2 {offsets = [0, 0, 0], sizes = [1, 1, 512], strides = [1, 1, 1]} : vector<9x1x512xf32> to vector<1x1x512xf32>
    %71 = vector.shape_cast %70 : vector<1x1x512xf32> to vector<1x512xf32>
    %72 = vector.broadcast %71 : vector<1x512xf32> to vector<32x512xf32>
    %73 = arith.mulf %69, %72 : vector<32x512xf32>
    %74 = vector.extract_strided_slice %66 {offsets = [0, 0], sizes = [32, 512], strides = [1, 1]} : vector<288x512xf32> to vector<32x512xf32>
    %75 = arith.mulf %73, %74 : vector<32x512xf32>
    %76 = arith.addf %68, %75 : vector<32x512xf32>
    %c16_i32_25 = arith.constant 16 : i32
    %77 = tpu.dynamic_rotate %10 by %c16_i32_25 dim 1 : vector<32x512xf32>, i32 -> vector<32x512xf32>
    %78 = vector.extract_strided_slice %2 {offsets = [1, 0, 0], sizes = [1, 1, 512], strides = [1, 1, 1]} : vector<9x1x512xf32> to vector<1x1x512xf32>
    %79 = vector.shape_cast %78 : vector<1x1x512xf32> to vector<1x512xf32>
    %80 = vector.broadcast %79 : vector<1x512xf32> to vector<32x512xf32>
    %81 = arith.mulf %77, %80 : vector<32x512xf32>
    %82 = vector.extract_strided_slice %66 {offsets = [32, 0], sizes = [32, 512], strides = [1, 1]} : vector<288x512xf32> to vector<32x512xf32>
    %83 = arith.mulf %81, %82 : vector<32x512xf32>
    %84 = arith.addf %76, %83 : vector<32x512xf32>
    %c15_i32_26 = arith.constant 15 : i32
    %85 = tpu.dynamic_rotate %10 by %c15_i32_26 dim 1 : vector<32x512xf32>, i32 -> vector<32x512xf32>
    %86 = vector.extract_strided_slice %2 {offsets = [2, 0, 0], sizes = [1, 1, 512], strides = [1, 1, 1]} : vector<9x1x512xf32> to vector<1x1x512xf32>
    %87 = vector.shape_cast %86 : vector<1x1x512xf32> to vector<1x512xf32>
    %88 = vector.broadcast %87 : vector<1x512xf32> to vector<32x512xf32>
    %89 = arith.mulf %85, %88 : vector<32x512xf32>
    %90 = vector.extract_strided_slice %66 {offsets = [64, 0], sizes = [32, 512], strides = [1, 1]} : vector<288x512xf32> to vector<32x512xf32>
    %91 = arith.mulf %89, %90 : vector<32x512xf32>
    %92 = arith.addf %84, %91 : vector<32x512xf32>
    %c1_i32_27 = arith.constant 1 : i32
    %93 = tpu.dynamic_rotate %10 by %c1_i32_27 dim 1 : vector<32x512xf32>, i32 -> vector<32x512xf32>
    %94 = vector.extract_strided_slice %2 {offsets = [3, 0, 0], sizes = [1, 1, 512], strides = [1, 1, 1]} : vector<9x1x512xf32> to vector<1x1x512xf32>
    %95 = vector.shape_cast %94 : vector<1x1x512xf32> to vector<1x512xf32>
    %96 = vector.broadcast %95 : vector<1x512xf32> to vector<32x512xf32>
    %97 = arith.mulf %93, %96 : vector<32x512xf32>
    %98 = vector.extract_strided_slice %66 {offsets = [96, 0], sizes = [32, 512], strides = [1, 1]} : vector<288x512xf32> to vector<32x512xf32>
    %99 = arith.mulf %97, %98 : vector<32x512xf32>
    %100 = arith.addf %92, %99 : vector<32x512xf32>
    %c511_i32_28 = arith.constant 511 : i32
    %101 = tpu.dynamic_rotate %10 by %c511_i32_28 dim 1 : vector<32x512xf32>, i32 -> vector<32x512xf32>
    %102 = vector.extract_strided_slice %2 {offsets = [5, 0, 0], sizes = [1, 1, 512], strides = [1, 1, 1]} : vector<9x1x512xf32> to vector<1x1x512xf32>
    %103 = vector.shape_cast %102 : vector<1x1x512xf32> to vector<1x512xf32>
    %104 = vector.broadcast %103 : vector<1x512xf32> to vector<32x512xf32>
    %105 = arith.mulf %101, %104 : vector<32x512xf32>
    %106 = vector.extract_strided_slice %66 {offsets = [160, 0], sizes = [32, 512], strides = [1, 1]} : vector<288x512xf32> to vector<32x512xf32>
    %107 = arith.mulf %105, %106 : vector<32x512xf32>
    %108 = arith.addf %100, %107 : vector<32x512xf32>
    %c497_i32_29 = arith.constant 497 : i32
    %109 = tpu.dynamic_rotate %10 by %c497_i32_29 dim 1 : vector<32x512xf32>, i32 -> vector<32x512xf32>
    %110 = vector.extract_strided_slice %2 {offsets = [6, 0, 0], sizes = [1, 1, 512], strides = [1, 1, 1]} : vector<9x1x512xf32> to vector<1x1x512xf32>
    %111 = vector.shape_cast %110 : vector<1x1x512xf32> to vector<1x512xf32>
    %112 = vector.broadcast %111 : vector<1x512xf32> to vector<32x512xf32>
    %113 = arith.mulf %109, %112 : vector<32x512xf32>
    %114 = vector.extract_strided_slice %66 {offsets = [192, 0], sizes = [32, 512], strides = [1, 1]} : vector<288x512xf32> to vector<32x512xf32>
    %115 = arith.mulf %113, %114 : vector<32x512xf32>
    %116 = arith.addf %108, %115 : vector<32x512xf32>
    %c496_i32_30 = arith.constant 496 : i32
    %117 = tpu.dynamic_rotate %10 by %c496_i32_30 dim 1 : vector<32x512xf32>, i32 -> vector<32x512xf32>
    %118 = vector.extract_strided_slice %2 {offsets = [7, 0, 0], sizes = [1, 1, 512], strides = [1, 1, 1]} : vector<9x1x512xf32> to vector<1x1x512xf32>
    %119 = vector.shape_cast %118 : vector<1x1x512xf32> to vector<1x512xf32>
    %120 = vector.broadcast %119 : vector<1x512xf32> to vector<32x512xf32>
    %121 = arith.mulf %117, %120 : vector<32x512xf32>
    %122 = vector.extract_strided_slice %66 {offsets = [224, 0], sizes = [32, 512], strides = [1, 1]} : vector<288x512xf32> to vector<32x512xf32>
    %123 = arith.mulf %121, %122 : vector<32x512xf32>
    %124 = arith.addf %116, %123 : vector<32x512xf32>
    %c495_i32_31 = arith.constant 495 : i32
    %125 = tpu.dynamic_rotate %10 by %c495_i32_31 dim 1 : vector<32x512xf32>, i32 -> vector<32x512xf32>
    %126 = vector.extract_strided_slice %2 {offsets = [8, 0, 0], sizes = [1, 1, 512], strides = [1, 1, 1]} : vector<9x1x512xf32> to vector<1x1x512xf32>
    %127 = vector.shape_cast %126 : vector<1x1x512xf32> to vector<1x512xf32>
    %128 = vector.broadcast %127 : vector<1x512xf32> to vector<32x512xf32>
    %129 = arith.mulf %125, %128 : vector<32x512xf32>
    %130 = vector.extract_strided_slice %66 {offsets = [256, 0], sizes = [32, 512], strides = [1, 1]} : vector<288x512xf32> to vector<32x512xf32>
    %131 = arith.mulf %129, %130 : vector<32x512xf32>
    %132 = arith.addf %124, %131 : vector<32x512xf32>
    %cst_32 = arith.constant dense<0xFF800000> : vector<512xf32>
    %133 = vector.multi_reduction <maximumf>, %132, %cst_32 [0] : vector<32x512xf32> to vector<512xf32>
    %134 = vector.shape_cast %133 : vector<512xf32> to vector<1x512xf32>
    %135 = vector.broadcast %134 : vector<1x512xf32> to vector<32x512xf32>
    %136 = arith.subf %132, %135 : vector<32x512xf32>
    %137 = math.exp %136 : vector<32x512xf32>
    %cst_33 = arith.constant dense<0.000000e+00> : vector<512xf32>
    %138 = vector.multi_reduction <add>, %137, %cst_33 [0] : vector<32x512xf32> to vector<512xf32>
    %139 = vector.shape_cast %138 : vector<512xf32> to vector<1x512xf32>
    %140 = tpu.reciprocal %139 : vector<1x512xf32> -> vector<1x512xf32>
    %141 = vector.broadcast %140 : vector<1x512xf32> to vector<32x512xf32>
    %142 = arith.mulf %137, %141 : vector<32x512xf32>
    %143 = arith.mulf %142, %9 : vector<32x512xf32>
    %144 = vector.extract_strided_slice %1 {offsets = [0, 0], sizes = [32, 512], strides = [1, 1]} : vector<64x512xf32> to vector<32x512xf32>
    %c0_34 = arith.constant 0 : index
    %c0_35 = arith.constant 0 : index
    %145 = vector.load %arg5[%c0_34, %c0_35] : memref<32x32xf32, #tpu.memory_space<vmem>>, vector<32x32xf32>
    %cst_36 = arith.constant dense<0.000000e+00> : vector<32x512xf32>
    %146 = tpu.matmul %145, %143, %cst_36 {dimension_numbers = #tpu.dot_dimension_numbers<[1], [0], [0], [1], [0, 0, 1, 1], [], []>} : vector<32x32xf32>, vector<32x512xf32>, vector<32x512xf32> -> vector<32x512xf32>
    %147 = arith.addf %144, %146 : vector<32x512xf32>
    %c0_37 = arith.constant 0 : index
    %c0_38 = arith.constant 0 : index
    %c0_39 = arith.constant 0 : index
    %148 = vector.load %arg7[%c0_37, %c0_38, %c0_39] : memref<1x32x512xf32, #tpu.memory_space<vmem>>, vector<1x32x512xf32>
    %149 = vector.shape_cast %148 : vector<1x32x512xf32> to vector<32x512xf32>
    %150 = vector.shape_cast %147 : vector<32x512xf32> to vector<1x32x512xf32>
    tpu.vector_store %arg7[%c0_37, %c0_38, %c0_39], %150 {strides = array<i32>} : memref<1x32x512xf32, #tpu.memory_space<vmem>>, vector<1x32x512xf32>,
    return
  }
  func.func @transform_0(%arg0: i32) -> (i32, i32, i32) {
    %c0_i32 = arith.constant 0 : i32
    %c0_i32_0 = arith.constant 0 : i32
    %c0_i32_1 = arith.constant 0 : i32
    return %arg0, %c0_i32, %c0_i32_0 : i32, i32, i32
  }
  func.func @transform_1(%arg0: i32) -> (i32, i32, i32) {
    %c0_i32 = arith.constant 0 : i32
    %c0_i32_0 = arith.constant 0 : i32
    %c0_i32_1 = arith.constant 0 : i32
    %c0_i32_2 = arith.constant 0 : i32
    return %c0_i32, %c0_i32_0, %c0_i32_1 : i32, i32, i32
  }
  func.func @transform_2(%arg0: i32) -> (i32, i32) {
    %c0_i32 = arith.constant 0 : i32
    %c0_i32_0 = arith.constant 0 : i32
    %c0_i32_1 = arith.constant 0 : i32
    return %c0_i32, %c0_i32_0 : i32, i32
  }
  func.func @transform_3(%arg0: i32) -> (i32, i32) {
    %c0_i32 = arith.constant 0 : i32
    %c0_i32_0 = arith.constant 0 : i32
    %c0_i32_1 = arith.constant 0 : i32
    return %c0_i32, %c0_i32_0 : i32, i32
  }
  func.func @transform_4(%arg0: i32) -> (i32, i32) {
    %c0_i32 = arith.constant 0 : i32
    %c0_i32_0 = arith.constant 0 : i32
    %c0_i32_1 = arith.constant 0 : i32
    return %c0_i32, %c0_i32_0 : i32, i32
  }
  func.func @transform_5(%arg0: i32) -> (i32, i32) {
    %c0_i32 = arith.constant 0 : i32
    %c0_i32_0 = arith.constant 0 : i32
    %c0_i32_1 = arith.constant 0 : i32
    return %c0_i32, %c0_i32_0 : i32, i32
  }
  func.func @transform_6(%arg0: i32) -> (i32, i32, i32) {
    %c0_i32 = arith.constant 0 : i32
    %c0_i32_0 = arith.constant 0 : i32
    %c0_i32_1 = arith.constant 0 : i32
    return %arg0, %c0_i32, %c0_i32_0 : i32, i32, i32
  }
}

</mosaic_0001>

<bundles_post_ra>
// kernel: tpu_custom_call.1
= control target key start
LH: loop header
LB: loop body
LE: loop exit
PB: predicated region body
PF: predicated region fallthrough
CT: control target
= control target key end

     0   :  { %11 = vsyncpa [#allocation4], 0  ;;  %s9973_s0 = inlined_call_operand.vmem [shape: f32[2,64,512], index: 0, kind: input, shape index: {}]   ;;  %s9974_s1 = inlined_call_operand.hbm [shape: f32[9,1,512], index: 1, kind: input, shape index: {}]   ;;  %s9975_s2 = inlined_call_operand.vmem [shape: f32[96,64], index: 2, kind: input, shape index: {}]   ;;  %s9976_s3 = inlined_call_operand.hbm [shape: f32[288,288], index: 3, kind: input, shape index: {}]   ;;  %s9977_s4 = inlined_call_operand.vmem [shape: f32[32,32], index: 4, kind: input, shape index: {}]   ;;  %s9978_s5 = inlined_call_operand.vmem [shape: f32[384,1], index: 5, kind: input, shape index: {}]   ;;  %s9979_s6 = inlined_call_operand.hbm [shape: f32[2,32,512], index: 6, kind: output, shape index: {}]  }
   0x1   :  { %12 = vsyncpa [#allocation7], 0 }
   0x2   :  { %13 = vsyncpa [#allocation5], 0 }
   0x3   :  { %15 = vsyncpa [#allocation5 + $0x1], 0  ;;  %s5495_s21 = smov 0   ;;  %s5497_s22 = smov 0  }
   0x4   :  { %s5499_s23 = smov 0   ;;  %s5501_s24 = smov 0  }
   0x5 LB: > { %s5516_s25 = sadd.s32 4294967295, %s5441_s24   ;;  %s4728_s26 = sadd.s32 4294967294, %s5441_s24   ;;  %s5441_s24 = sphi %s5501_s24, %s11067_s24   ;;  %s5437_s23 = sphi %s5499_s23, %s11066_s23   ;;  %s5433_s22 = sphi %s5497_s22, %s11065_s22   ;;  %s5429_s21 = sphi %s5495_s21, %s11064_s21  }
   0x6   : > { %s5520_s27 = sadd.s32 1, %s5441_s24   ;;  %s159_s28 = sadd.s32 1, %s5437_s23 }
   0x7   : > { %s156_s29 = ssub.s32 %s5441_s24, %s5520_s27  ;;  %p169_p0 = scmp.ne.s32.totalorder %s5437_s23, %s5433_s22 }
   0x8   : > { %p157_p1 = scmp.eq.s32.totalorder %s156_s29, 0  ;;  %p170_p2 = scmp.eq.s32.totalorder %s5516_s25, 1 }
   0x9   : > { %p175_p3 = scmp.ne.s32.totalorder %s5433_s22, %s5429_s21  ;;  %p176_p4 = scmp.eq.s32.totalorder %s4728_s26, 1 }
   0xa   : > { %s5531_s30 = scalar_select %p157_p1, %s5437_s23, %s159_s28  }
   0xb   : > { %p5533_p5 = por %p170_p2, %p169_p0  ;;  %p5537_p6 = por %p176_p4, %p175_p3 }
   0xc   : > { %p4729_p7 = scmp.ge.s32.totalorder %s5441_s24, 1  ;;  %p183_p8 = scmp.lt.s32.totalorder %s5441_s24, 3 }
   0xd   : > { %p4975_p9 = scmp.eq.s32.totalorder %s5516_s25, 0  ;;  %s194_s12 = sshll.u32 %s9974_s1, 4  ;;  %s195_s12 = int_to_ptr.hbm [resolvable:$true] %s194_s12 }
   0xe   : > { %p5544_p10 = pnand %p4729_p7, %p183_p8  ;;  %s5443_s13 = smov [#allocation3]  }
   0xf   : > { %s196_s14 = sshll.u32 %s5443_s13, 4  ;;  %s211_s17 = sshll.u32 %s9976_s3, 4  ;;  %s197_s14 = int_to_ptr.vmem [resolvable:$true] %s196_s14  ;;  %s212_s17 = int_to_ptr.hbm [resolvable:$true] %s211_s17 }
  0x10   : > { %p4964_p11 = pneg %p5544_p10  ;;  %s5444_s18 = smov 64  }
  0x11   : > { %s5445_s19 = smov 4   ;;  %s5446_s20 = smov [#allocation6]  }
  0x12   : > { %p4965_p12 = pnand %p4975_p9, %p4964_p11  ;;  %s213_s26 = sshll.u32 %s5446_s20, 4  ;;  %s214_s26 = int_to_ptr.vmem [resolvable:$true] %s213_s26 }
  0x13   : > { %s5447_s28 = smov 384   ;;  %s5448_s29 = smov 24  }
  0x14   : > { %4967 = dma.hbm_to_vmem [thread:$0]  (!%p4965_p12), %s195_s12, 576, %s197_s14, [#allocation4], %s5444_s18, %s5444_s18, %s5445_s19  }
  0x15   : > { %4970 = dma.hbm_to_vmem [thread:$0]  (!%p4965_p12), %s212_s17, 13824, %s214_s26, [#allocation7], %s5447_s28, %s5447_s28, %s5448_s29  }
  0x16   : > { %243 = sbr.rel (%p5544_p10) target bundleno = 1797 (0x705), region = 44 }
  0x1b   : > { %5416 = dma.done.wait (%p4975_p9), [#allocation4], 576  }
  0x1c   : > { %5418 = vsyncadd (%p4975_p9), [#allocation4], 4294966720 }
  0x1d   : > { %5420 = dma.done.wait (%p4975_p9), [#allocation7], 13824  }
  0x1e   : > { %5422 = vsyncadd (%p4975_p9), [#allocation7], 4294953472  ;;  %p279_p13 = scmp.lt.s32.totalorder %s5516_s25, 1  ;;  %v372_v32 = vld [vmem:[%s9975_s2] sm:$0xff]  ;;  %vm444_vm0 = vcmask 523264   ;;  %v373_v33 = vld [vmem:[%s9975_s2 + $0x8] sm:$0xff] }
  0x1f   : > { %v374_v34 = vld [vmem:[%s9975_s2 + $0x10] sm:$0xff]  ;;  %v375_v35 = vld [vmem:[%s9975_s2 + $0x18] sm:$0xff]  ;;  %v333_v36 = vld [vmem:[%s9978_s5 + $0x48] sm:$0xff]  ;;  %v5449_v37 = vmov 0   ;;  %s5450_s18 = smov 1   ;;  %s5451_s19 = smov 112  }
  0x20   : > { %s280_s10 = scalar_select %p279_p13, %s5516_s25, 1  ;;  %5030 = vset.pattern.permute.xlu1 %v5449_v37  ;;  %5029 = vset.pattern.permute.xlu0 %v5449_v37  ;;  %v376_v38 = vld [vmem:[%s9975_s2 + $0x20] sm:$0xff]  ;;  %v377_v40 = vld [vmem:[%s9975_s2 + $0x28] sm:$0xff]  ;;  %v378_v41 = vld [vmem:[%s9975_s2 + $0x30] sm:$0xff]  ;;  %vm1863_vm9 = vcmask 261120  }
  0x21   : > { %431 = vperm.xlu1 %5030, %v333_v36   ;;  %5031 = vset.pattern.permute.xlu2 %v5449_v37  ;;  %v332_v39 = vld [vmem:[%s9978_s5 + $0x40] sm:$0xff]  ;;  %v379_v42 = vld [vmem:[%s9975_s2 + $0x38] sm:$0xff]  ;;  %v381_v45 = vld [vmem:[%s9975_s2 + $0x48] sm:$0xff]  ;;  %s5452_s20 = smov 113   ;;  %s5453_s26 = smov 15  }
  0x22   : > { %s4952_s11 = sshll.u32 %s280_s10, 8  ;;  %v335_v43 = vld [vmem:[%s9978_s5 + $0x58] sm:$0xff]  ;;  %v380_v44 = vld [vmem:[%s9975_s2 + $0x40] sm:$0xff]  ;;  %v382_v46 = vld [vmem:[%s9975_s2 + $0x50] sm:$0xff]  ;;  %s5454_s28 = smov 16  }
  0x23   : > { %s5573_s13 = scalar_lea.vmem %s9973_s0, %s4952_s11  ;;  %441 = vperm.xlu0 %5029, %v335_v43   ;;  %v383_v47 = vld [vmem:[%s9975_s2 + $0x58] sm:$0xff]  ;;  %v334_v48 = vld [vmem:[%s9978_s5 + $0x50] sm:$0xff]  ;;  %s5455_s29 = smov 127  }
  0x24   : > { %v312_v0 = vld [vmem:[%s5573_s13 + $0xe0] sm:$0xff]  ;;  %v313_v1 = vld [vmem:[%s5573_s13 + $0xe8] sm:$0xff]  ;;  %v314_v2 = vld [vmem:[%s5573_s13 + $0xf0] sm:$0xff]  ;;  %s5456_s10 = smov 111   ;;  %s5457_s11 = smov 17  }
  0x25   : > { %489 = vmatpush.msra.mxu0 %v312_v0  ;;  %542 = vmatpush.msra.mxu1 %v313_v1  ;;  %v315_v3 = vld [vmem:[%s5573_s13 + $0xf8] sm:$0xff]  ;;  %v308_v4 = vld [vmem:[%s5573_s13 + $0xc0] sm:$0xff]  ;;  %v309_v5 = vld [vmem:[%s5573_s13 + $0xc8] sm:$0xff]  ;;  %s276_s16 = sand.u32 1, %s5433_s22   ;;  %s4953_s9 = sshll.u32 %s5516_s25, 7 }
  0x26   : > { %595 = vmatpush.msra.mxu2 %v314_v2  ;;  %648 = vmatpush.msra.mxu3 %v315_v3  ;;  %v310_v6 = vld [vmem:[%s5573_s13 + $0xd0] sm:$0xff]  ;;  %v311_v7 = vld [vmem:[%s5573_s13 + $0xd8] sm:$0xff]  ;;  %v304_v8 = vld [vmem:[%s5573_s13 + $0xa0] sm:$0xff]  ;;  %s4736_s17 = sshll.u32 %s276_s16, 7  ;;  %s4629_s25 = scalar_lea.sflag [#allocation5], %s276_s16 }
  0x27   : > { %490 = vmatpush.msra.mxu0 %v308_v4  ;;  %543 = vmatpush.msra.mxu1 %v309_v5  ;;  %v305_v9 = vld [vmem:[%s5573_s13 + $0xa8] sm:$0xff]  ;;  %v306_v10 = vld [vmem:[%s5573_s13 + $0xb0] sm:$0xff]  ;;  %v307_v11 = vld [vmem:[%s5573_s13 + $0xb8] sm:$0xff]  ;;  %s9907_s12 = scalar_lea.vmem [#allocation8], %s4736_s17 }
  0x28   : > { %596 = vmatpush.msra.mxu2 %v310_v6  ;;  %649 = vmatpush.msra.mxu3 %v311_v7  ;;  %v300_v12 = vld [vmem:[%s5573_s13 + $0x80] sm:$0xff]  ;;  %v301_v13 = vld [vmem:[%s5573_s13 + $0x88] sm:$0xff]  ;;  %v302_v14 = vld [vmem:[%s5573_s13 + $0x90] sm:$0xff] }
  0x29   : > { %491 = vmatpush.msra.mxu0 %v304_v8  ;;  %544 = vmatpush.msra.mxu1 %v305_v9  ;;  %v303_v15 = vld [vmem:[%s5573_s13 + $0x98] sm:$0xff]  ;;  %v296_v16 = vld [vmem:[%s5573_s13 + $0x60] sm:$0xff]  ;;  %v297_v17 = vld [vmem:[%s5573_s13 + $0x68] sm:$0xff] }
  0x2a   : > { %597 = vmatpush.msra.mxu2 %v306_v10  ;;  %650 = vmatpush.msra.mxu3 %v307_v11  ;;  %v298_v18 = vld [vmem:[%s5573_s13 + $0x70] sm:$0xff]  ;;  %v299_v19 = vld [vmem:[%s5573_s13 + $0x78] sm:$0xff]  ;;  %v292_v20 = vld [vmem:[%s5573_s13 + $0x40] sm:$0xff] }
  0x2b   : > { %492 = vmatpush.msra.mxu0 %v300_v12  ;;  %545 = vmatpush.msra.mxu1 %v301_v13  ;;  %v293_v21 = vld [vmem:[%s5573_s13 + $0x48] sm:$0xff]  ;;  %v294_v22 = vld [vmem:[%s5573_s13 + $0x50] sm:$0xff]  ;;  %v295_v23 = vld [vmem:[%s5573_s13 + $0x58] sm:$0xff] }
  0x2c   : > { %598 = vmatpush.msra.mxu2 %v302_v14  ;;  %651 = vmatpush.msra.mxu3 %v303_v15  ;;  %v288_v24 = vld [vmem:[%s5573_s13 + $0x20] sm:$0xff]  ;;  %v289_v25 = vld [vmem:[%s5573_s13 + $0x28] sm:$0xff]  ;;  %v290_v26 = vld [vmem:[%s5573_s13 + $0x30] sm:$0xff] }
  0x2d   : > { %493 = vmatpush.msra.mxu0 %v296_v16  ;;  %546 = vmatpush.msra.mxu1 %v297_v17  ;;  %v291_v27 = vld [vmem:[%s5573_s13 + $0x38] sm:$0xff]  ;;  %v284_v28 = vld [vmem:[%s5573_s13] sm:$0xff]  ;;  %v285_v29 = vld [vmem:[%s5573_s13 + $0x8] sm:$0xff] }
  0x2e   : > { %599 = vmatpush.msra.mxu2 %v298_v18  ;;  %652 = vmatpush.msra.mxu3 %v299_v19  ;;  %v286_v30 = vld [vmem:[%s5573_s13 + $0x10] sm:$0xff]  ;;  %v287_v31 = vld [vmem:[%s5573_s13 + $0x18] sm:$0xff] }
  0x2f   : > { %494 = vmatpush.msra.mxu0 %v292_v20  ;;  %547 = vmatpush.msra.mxu1 %v293_v21 }
  0x30   : > { %600 = vmatpush.msra.mxu2 %v294_v22  ;;  %653 = vmatpush.msra.mxu3 %v295_v23 }
  0x31   : > { %495 = vmatpush.msra.mxu0 %v288_v24  ;;  %548 = vmatpush.msra.mxu1 %v289_v25 }
  0x32   : > { %601 = vmatpush.msra.mxu2 %v290_v26  ;;  %654 = vmatpush.msra.mxu3 %v291_v27 }
  0x33   : > { %496 = vmatpush.msra.mxu0 %v284_v28  ;;  %549 = vmatpush.msra.mxu1 %v285_v29 }
  0x34   : > { %602 = vmatpush.msra.mxu2 %v286_v30  ;;  %655 = vmatpush.msra.mxu3 %v287_v31 }
  0x35   : > { %4739 = vmatmul.msk.f32.vlgmr.msra.gmra.mxu0 %vm444_vm0, %v372_v32  ;;  %4751 = vmatmul.msk.f32.vlgmr.msra.gmra.mxu1 %vm444_vm0, %v372_v32 }
  0x36   : > { %4763 = vmatmul.msk.f32.vlgmr.msra.gmra.mxu2 %vm444_vm0, %v372_v32  ;;  %4775 = vmatmul.msk.f32.vlgmr.msra.gmra.mxu3 %vm444_vm0, %v372_v32 }
  0x37   : > { %426 = vperm.xlu1 %5030, %v332_v39   ;;  %436 = vperm.xlu0 %5029, %v334_v48  }
  0x3d   : > { %4740 = vmatmul.msk.f32.gmra.mxu0 %vm444_vm0, %v373_v33  ;;  %4752 = vmatmul.msk.f32.gmra.mxu1 %vm444_vm0, %v373_v33 }
  0x3e   : > { %4764 = vmatmul.msk.f32.gmra.mxu2 %vm444_vm0, %v373_v33  ;;  %4776 = vmatmul.msk.f32.gmra.mxu3 %vm444_vm0, %v373_v33 }
  0x45   : > { %4741 = vmatmul.msk.f32.gmra.mxu0 %vm444_vm0, %v374_v34  ;;  %4753 = vmatmul.msk.f32.gmra.mxu1 %vm444_vm0, %v374_v34 }
  0x46   : > { %4765 = vmatmul.msk.f32.gmra.mxu2 %vm444_vm0, %v374_v34  ;;  %4777 = vmatmul.msk.f32.gmra.mxu3 %vm444_vm0, %v374_v34 }
  0x4d   : > { %4742 = vmatmul.msk.f32.gmra.mxu0 %vm444_vm0, %v375_v35  ;;  %4754 = vmatmul.msk.f32.gmra.mxu1 %vm444_vm0, %v375_v35 }
  0x4e   : > { %4766 = vmatmul.msk.f32.gmra.mxu2 %vm444_vm0, %v375_v35  ;;  %4778 = vmatmul.msk.f32.gmra.mxu3 %vm444_vm0, %v375_v35 }
  0x55   : > { %4743 = vmatmul.msk.f32.gmra.mxu0 %vm444_vm0, %v376_v38  ;;  %4755 = vmatmul.msk.f32.gmra.mxu1 %vm444_vm0, %v376_v38 }
  0x56   : > { %4767 = vmatmul.msk.f32.gmra.mxu2 %vm444_vm0, %v376_v38  ;;  %4779 = vmatmul.msk.f32.gmra.mxu3 %vm444_vm0, %v376_v38 }
  0x5d   : > { %4744 = vmatmul.msk.f32.gmra.mxu0 %vm444_vm0, %v377_v40  ;;  %4756 = vmatmul.msk.f32.gmra.mxu1 %vm444_vm0, %v377_v40 }
  0x5e   : > { %4768 = vmatmul.msk.f32.gmra.mxu2 %vm444_vm0, %v377_v40  ;;  %4780 = vmatmul.msk.f32.gmra.mxu3 %vm444_vm0, %v377_v40 }
  0x65   : > { %4745 = vmatmul.msk.f32.gmra.mxu0 %vm444_vm0, %v378_v41  ;;  %4757 = vmatmul.msk.f32.gmra.mxu1 %vm444_vm0, %v378_v41 }
  0x66   : > { %4769 = vmatmul.msk.f32.gmra.mxu2 %vm444_vm0, %v378_v41  ;;  %4781 = vmatmul.msk.f32.gmra.mxu3 %vm444_vm0, %v378_v41 }
  0x6d   : > { %4746 = vmatmul.msk.f32.gmra.mxu0 %vm444_vm0, %v379_v42  ;;  %4758 = vmatmul.msk.f32.gmra.mxu1 %vm444_vm0, %v379_v42 }
  0x6e   : > { %4770 = vmatmul.msk.f32.gmra.mxu2 %vm444_vm0, %v379_v42  ;;  %4782 = vmatmul.msk.f32.gmra.mxu3 %vm444_vm0, %v379_v42 }
  0x75   : > { %4747 = vmatmul.msk.f32.gmra.mxu0 %vm444_vm0, %v380_v44  ;;  %4759 = vmatmul.msk.f32.gmra.mxu1 %vm444_vm0, %v380_v44 }
  0x76   : > { %4771 = vmatmul.msk.f32.gmra.mxu2 %vm444_vm0, %v380_v44  ;;  %4783 = vmatmul.msk.f32.gmra.mxu3 %vm444_vm0, %v380_v44 }
  0x7d   : > { %4748 = vmatmul.msk.f32.gmra.mxu0 %vm444_vm0, %v381_v45  ;;  %4760 = vmatmul.msk.f32.gmra.mxu1 %vm444_vm0, %v381_v45 }
  0x7e   : > { %4772 = vmatmul.msk.f32.gmra.mxu2 %vm444_vm0, %v381_v45  ;;  %4784 = vmatmul.msk.f32.gmra.mxu3 %vm444_vm0, %v381_v45 }
  0x85   : > { %4749 = vmatmul.msk.f32.gmra.mxu0 %vm444_vm0, %v382_v46  ;;  %4761 = vmatmul.msk.f32.gmra.mxu1 %vm444_vm0, %v382_v46 }
  0x86   : > { %4773 = vmatmul.msk.f32.gmra.mxu2 %vm444_vm0, %v382_v46  ;;  %4785 = vmatmul.msk.f32.gmra.mxu3 %vm444_vm0, %v382_v46 }
  0x8d   : > { %4750 = vmatmul.msk.f32.gmra.mxu0 %vm444_vm0, %v383_v47  ;;  %4762 = vmatmul.msk.f32.gmra.mxu1 %vm444_vm0, %v383_v47 }
  0x8e   : > { %4774 = vmatmul.msk.f32.gmra.mxu2 %vm444_vm0, %v383_v47  ;;  %4786 = vmatmul.msk.f32.gmra.mxu3 %vm444_vm0, %v383_v47 }
  0x93   : > { %v5741_v4 = vpop.permute.xlu1 %431 }
  0x95   : > { %v5810_v21 = vpop.permute.xlu0 %441 }
  0xa9   : > { %v5749_v8 = vpop.permute.xlu1 %426  ;;  %v5820_v22 = vpop.permute.xlu0 %436 }
  0xb2   : > { %v5703_v49 = vpop.f32.mrf.mxu0  ;;  %v5705_v50 = vpop.f32.mrf.mxu1 }
  0xb3   : > { %10281 = vst [vmem:[#allocation12_spill] sm:$0xff] %v5703_v49 }
  0xb4   : > { %10282 = vst [vmem:[#allocation13_spill] sm:$0xff] %v5705_v50 }
  0xb9   : > { %v5707_v51 = vpop.f32.mrf.mxu3  ;;  %v5863_v30 = vpop.f32.mrf.mxu2 }
  0xba   : > { %10283 = vst [vmem:[#allocation14_spill] sm:$0xff] %v5707_v51  ;;  %v5709_v52 = vpop.f32.mrf.mxu0  ;;  %v5711_v53 = vpop.f32.mrf.mxu1 }
  0xbb   : > { %10284 = vst [vmem:[#allocation15_spill] sm:$0xff] %v5709_v52 }
  0xbc   : > { %10285 = vst [vmem:[#allocation16_spill] sm:$0xff] %v5711_v53 }
  0xbd   : > { %10314 = vst [vmem:[#allocation45_spill] sm:$0xff] %v5863_v30 }
  0xc1   : > { %v5713_v54 = vpop.f32.mrf.mxu3  ;;  %v5875_v33 = vpop.f32.mrf.mxu2 }
  0xc2   : > { %10286 = vst [vmem:[#allocation17_spill] sm:$0xff] %v5713_v54  ;;  %v5715_v55 = vpop.f32.mrf.mxu0  ;;  %v5717_v56 = vpop.f32.mrf.mxu1 }
  0xc3   : > { %10287 = vst [vmem:[#allocation18_spill] sm:$0xff] %v5715_v55 }
  0xc4   : > { %10288 = vst [vmem:[#allocation19_spill] sm:$0xff] %v5717_v56 }
  0xc5   : > { %10316 = vst [vmem:[#allocation47_spill] sm:$0xff] %v5875_v33 }
  0xc9   : > { %v5723_v59 = vpop.f32.mrf.mxu3  ;;  %v5892_v39 = vpop.f32.mrf.mxu2 }
  0xca   : > { %v5719_v57 = vpop.f32.mrf.mxu0  ;;  %v5721_v58 = vpop.f32.mrf.mxu1  ;;  %10291 = vst [vmem:[#allocation22_spill] sm:$0xff] %v5723_v59 }
  0xcb   : > { %10289 = vst [vmem:[#allocation20_spill] sm:$0xff] %v5719_v57 }
  0xcc   : > { %10290 = vst [vmem:[#allocation21_spill] sm:$0xff] %v5721_v58 }
  0xcd   : > { %10320 = vst [vmem:[#allocation51_spill] sm:$0xff] %v5892_v39 }
  0xd1   : > { %v5729_v62 = vpop.f32.mrf.mxu3  ;;  %v5913_v45 = vpop.f32.mrf.mxu2 }
  0xd2   : > { %v5725_v60 = vpop.f32.mrf.mxu0  ;;  %v5727_v61 = vpop.f32.mrf.mxu1  ;;  %10294 = vst [vmem:[#allocation25_spill] sm:$0xff] %v5729_v62 }
  0xd3   : > { %10292 = vst [vmem:[#allocation23_spill] sm:$0xff] %v5725_v60 }
  0xd4   : > { %10293 = vst [vmem:[#allocation24_spill] sm:$0xff] %v5727_v61 }
  0xd5   : > { %10323 = vst [vmem:[#allocation54_spill] sm:$0xff] %v5913_v45 }
  0xd9   : > { %v5735_v1 = vpop.f32.mrf.mxu3 }
  0xda   : > { %v5731_v63 = vpop.f32.mrf.mxu0  ;;  %v5733_v0 = vpop.f32.mrf.mxu1  ;;  %10297 = vst [vmem:[#allocation28_spill] sm:$0xff] %v5735_v1 }
  0xdb   : > { %10295 = vst [vmem:[#allocation26_spill] sm:$0xff] %v5731_v63 }
  0xdc   : > { %10296 = vst [vmem:[#allocation27_spill] sm:$0xff] %v5733_v0 }
  0xe1   : > { %v5743_v5 = vpop.f32.mrf.mxu3 }
  0xe2   : > { %v5737_v2 = vpop.f32.mrf.mxu0  ;;  %v5739_v3 = vpop.f32.mrf.mxu1  ;;  %10300 = vst [vmem:[#allocation31_spill] sm:$0xff] %v5743_v5 }
  0xe3   : > { %10298 = vst [vmem:[#allocation29_spill] sm:$0xff] %v5737_v2 }
  0xe4   : > { %10299 = vst [vmem:[#allocation30_spill] sm:$0xff] %v5739_v3 }
  0xe9   : > { %v5757_v13 = vpop.f32.mrf.mxu3 }
  0xea   : > { %v5745_v6 = vpop.f32.mrf.mxu0  ;;  %v5747_v7 = vpop.f32.mrf.mxu1  ;;  %10305 = vst [vmem:[#allocation36_spill] sm:$0xff] %v5757_v13 }
  0xeb   : > { %10301 = vst [vmem:[#allocation32_spill] sm:$0xff] %v5745_v6 }
  0xec   : > { %10302 = vst [vmem:[#allocation33_spill] sm:$0xff] %v5747_v7 }
  0xf1   : > { %v5769_v14 = vpop.f32.mrf.mxu3 }
  0xf2   : > { %v522_v9 = vpop.f32.mrf.mxu0  ;;  %v575_v10 = vpop.f32.mrf.mxu1  ;;  %10306 = vst [vmem:[#allocation37_spill] sm:$0xff] %v5769_v14 }
  0xf3   : > { %v5752_v11 = vadd.f32 %v522_v9, %v5749_v8  ;;  %v5755_v12 = vadd.f32 %v575_v10, %v5749_v8 }
  0xf5   : > { %10303 = vst [vmem:[#allocation34_spill] sm:$0xff] %v5752_v11  ;;  %973 = vrot.lane.b32.xlu0 %v5755_v12, %s5450_s18  ;;  %1251 = vrot.lane.b32.xlu1 %v5752_v11, %s5451_s19 }
  0xf6   : > { %10304 = vst [vmem:[#allocation35_spill] sm:$0xff] %v5755_v12  ;;  %965 = vrot.lane.b32.xlu2 %v5752_v11, %s5450_s18 }
  0xf9   : > { %v681_v15 = vpop.f32.mrf.mxu3 }
  0xfa   : > { %v5780_v16 = vadd.f32 %v681_v15, %v5749_v8  ;;  %v578_v17 = vpop.f32.mrf.mxu1  ;;  %v525_v19 = vpop.f32.mrf.mxu0 }
  0xfb   : > { %v5789_v18 = vadd.f32 %v578_v17, %v5741_v4  ;;  %v5798_v20 = vadd.f32 %v525_v19, %v5741_v4 }
  0xfc   : > { %10307 = vst [vmem:[#allocation38_spill] sm:$0xff] %v5780_v16 }
  0xfd   : > { %1161 = vrot.lane.b32.xlu0 %v5752_v11, %s5452_s20  ;;  %875 = vrot.lane.b32.xlu1 %v5752_v11, %s5453_s26  ;;  %10308 = vst [vmem:[#allocation39_spill] sm:$0xff] %v5789_v18 }
  0xfe   : > { %1259 = vrot.lane.b32.xlu2 %v5755_v12, %s5451_s19  ;;  %10309 = vst [vmem:[#allocation40_spill] sm:$0xff] %v5798_v20 }
 0x101   : > { %v684_v25 = vpop.f32.mrf.mxu3 }
 0x102   : > { %v528_v23 = vpop.f32.mrf.mxu0  ;;  %v5838_v26 = vadd.f32 %v684_v25, %v5741_v4  ;;  %v581_v27 = vpop.f32.mrf.mxu1 }
 0x103   : > { %v5823_v24 = vadd.f32 %v528_v23, %v5820_v22  ;;  %v5847_v28 = vadd.f32 %v581_v27, %v5820_v22  ;;  %v5938_v23 = vpop.f32.mrf.mxu2 }
 0x104   : > { %10311 = vst [vmem:[#allocation42_spill] sm:$0xff] %v5838_v26 }
 0x105   : > { %785 = vrot.lane.b32.xlu0 %v5752_v11, %s5454_s28  ;;  %1169 = vrot.lane.b32.xlu1 %v5755_v12, %s5452_s20  ;;  %10310 = vst [vmem:[#allocation41_spill] sm:$0xff] %v5823_v24 }
 0x106   : > { %883 = vrot.lane.b32.xlu2 %v5755_v12, %s5453_s26  ;;  %10312 = vst [vmem:[#allocation43_spill] sm:$0xff] %v5847_v28 }
 0x107   : > { %10328 = vst [vmem:[#allocation59_spill] sm:$0xff] %v5938_v23 }
 0x109   : > { %v687_v37 = vpop.f32.mrf.mxu3 }
 0x10a   : > { %v5890_v38 = vadd.f32 %v687_v37, %v5820_v22  ;;  %v531_v43 = vpop.f32.mrf.mxu0  ;;  %v584_v48 = vpop.f32.mrf.mxu1 }
 0x10b   : > { %v5907_v44 = vadd.f32 %v531_v43, %v5810_v21  ;;  %v5924_v10 = vadd.f32 %v584_v48, %v5810_v21  ;;  %v5952_v43 = vpop.f32.mrf.mxu2 }
 0x10c   : > { %10319 = vst [vmem:[#allocation50_spill] sm:$0xff] %v5890_v38 }
 0x10d   : > { %899 = vrot.lane.b32.xlu0 %v5780_v16, %s5453_s26  ;;  %793 = vrot.lane.b32.xlu1 %v5755_v12, %s5454_s28  ;;  %10325 = vst [vmem:[#allocation56_spill] sm:$0xff] %v5924_v10 }
 0x10e   : > { %1079 = vrot.lane.b32.xlu2 %v5755_v12, %s5455_s29  ;;  %10330 = vst [vmem:[#allocation61_spill] sm:$0xff] %v5952_v43 }
 0x111   : > { %v690_v54 = vpop.f32.mrf.mxu3 }
 0x112   : > { %v5981_v62 = vadd.f32 %v690_v54, %v5810_v21 }
 0x113   : > { %v5970_v39 = vpop.f32.mrf.mxu2 }
 0x114   : > { %10334 = vst [vmem:[#allocation65_spill] sm:$0xff] %v5970_v39 }
 0x115   : > { %1261 = vrot.lane.b32.xlu0 %v5789_v18, %s5451_s19  ;;  %1071 = vrot.lane.b32.xlu1 %v5752_v11, %s5455_s29  ;;  %10337 = vst [vmem:[#allocation68_spill] sm:$0xff] %v5981_v62 }
 0x116   : > { %975 = vrot.lane.b32.xlu2 %v5789_v18, %s5450_s18 }
 0x11b   : > { %v5995_v58 = vpop.f32.mrf.mxu2 }
 0x11c   : > { %10340 = vst [vmem:[#allocation71_spill] sm:$0xff] %v5995_v58 }
 0x11d   : > { %885 = vrot.lane.b32.xlu0 %v5789_v18, %s5453_s26  ;;  %989 = vrot.lane.b32.xlu1 %v5780_v16, %s5450_s18 }
 0x11e   : > { %1253 = vrot.lane.b32.xlu2 %v5798_v20, %s5451_s19 }
 0x123   : > { %v628_v55 = vpop.f32.mrf.mxu2 }
 0x125   : > { %1073 = vrot.lane.b32.xlu0 %v5798_v20, %s5455_s29  ;;  %967 = vrot.lane.b32.xlu1 %v5798_v20, %s5450_s18 }
 0x126   : > { %877 = vrot.lane.b32.xlu2 %v5798_v20, %s5453_s26 }
 0x12b   : > { %v631_v1 = vpop.f32.mrf.mxu2 }
 0x12c   : > { %v6061_v63 = vadd.f32 %v631_v1, %v5741_v4  ;;  %v725_v1 = vlaneseq  ;;  %v6079_v4 = vadd.f32 %v628_v55, %v5749_v8 }
 0x12d   : > { %1351 = vrot.lane.b32.xlu0 %v5789_v18, %s5456_s10  ;;  %1163 = vrot.lane.b32.xlu1 %v5798_v20, %s5452_s20 }
 0x12e   : > { %1171 = vrot.lane.b32.xlu2 %v5789_v18, %s5452_s20 }
 0x133   : > { %v634_v39 = vpop.f32.mrf.mxu2 }
 0x134   : > { %v6046_v0 = vadd.f32 %v634_v39, %v5820_v22 }
 0x135   : > { %969 = vrot.lane.b32.xlu0 %v5823_v24, %s5450_s18  ;;  %787 = vrot.lane.b32.xlu1 %v5798_v20, %s5454_s28 }
 0x136   : > { %795 = vrot.lane.b32.xlu2 %v5789_v18, %s5454_s28 }
 0x13b   : > { %v637_v61 = vpop.f32.mrf.mxu2 }
 0x13c   : > { %v6064_v22 = vadd.f32 %v637_v61, %v5810_v21  ;;  %v6081_v61 = vand.u32 127, %v725_v1  ;;  %v6087_v21 = vld [vmem:[#allocation3 + $0xc] sm:$0xf] }
 0x13d   : > { %1255 = vrot.lane.b32.xlu0 %v5823_v24, %s5451_s19  ;;  %1081 = vrot.lane.b32.xlu1 %v5789_v18, %s5455_s29  ;;  %v6099_v55 = vperm.slane %v6087_v21, 1 }
 0x13e   : > { %1343 = vrot.lane.b32.xlu2 %v5798_v20, %s5456_s10  ;;  %vm997_vm1 = vcmp.lt.s32.totalorder %v6081_v61, 1  ;;  %vm1283_vm2 = vcmp.lt.s32.totalorder %v6081_v61, 112  ;;  %vm907_vm3 = vcmp.lt.s32.totalorder %v6081_v61, 15  ;;  %vm1193_vm4 = vcmp.lt.s32.totalorder %v6081_v61, 113 }
 0x13f   : > { %10351 = vst [vmem:[#allocation82_spill] sm:$0xff] %v6099_v55  ;;  %vm817_vm5 = vcmp.lt.s32.totalorder %v6081_v61, 16  ;;  %vm1103_vm6 = vcmp.lt.s32.totalorder %v6081_v61, 127  ;;  %vm727_vm7 = vcmp.lt.s32.totalorder %v6081_v61, 17  ;;  %vm1373_vm8 = vcmp.lt.s32.totalorder %v6081_v61, 111 }
 0x145   : > { %879 = vrot.lane.b32.xlu0 %v5823_v24, %s5453_s26  ;;  %901 = vrot.lane.b32.xlu1 %v5838_v26, %s5453_s26 }
 0x146   : > { %991 = vrot.lane.b32.xlu2 %v5838_v26, %s5450_s18 }
 0x14d   : > { %1173 = vrot.lane.b32.xlu0 %v5847_v28, %s5452_s20  ;;  %811 = vrot.lane.b32.xlu1 %v5838_v26, %s5454_s28 }
 0x14e   : > { %1165 = vrot.lane.b32.xlu2 %v5823_v24, %s5452_s20 }
 0x150   : > { %v5855_v29 = vpop.permute.xlu2 %965 }
 0x151   : > { %10313 = vst [vmem:[#allocation44_spill] sm:$0xff] %v5855_v29 }
 0x155   : > { %797 = vrot.lane.b32.xlu0 %v5847_v28, %s5454_s28  ;;  %977 = vrot.lane.b32.xlu1 %v5847_v28, %s5450_s18 }
 0x156   : > { %789 = vrot.lane.b32.xlu2 %v5823_v24, %s5454_s28 }
 0x158   : > { %v5865_v31 = vpop.permute.xlu2 %1259 }
 0x15d   : > { %1345 = vrot.lane.b32.xlu0 %v5823_v24, %s5456_s10  ;;  %1263 = vrot.lane.b32.xlu1 %v5847_v28, %s5451_s19 }
 0x15e   : > { %1083 = vrot.lane.b32.xlu2 %v5847_v28, %s5455_s29 }
 0x160   : > { %v5873_v32 = vpop.permute.xlu2 %883 }
 0x161   : > { %10315 = vst [vmem:[#allocation46_spill] sm:$0xff] %v5873_v32 }
 0x165   : > { %705 = vrot.lane.b32.xlu0 %v5847_v28, %s5457_s11  ;;  %887 = vrot.lane.b32.xlu1 %v5847_v28, %s5453_s26 }
 0x166   : > { %697 = vrot.lane.b32.xlu2 %v5823_v24, %s5457_s11 }
 0x167   : > { %v5883_v34 = vpop.permute.xlu0 %973  ;;  %v5885_v35 = vpop.permute.xlu1 %1251 }
 0x168   : > { %10317 = vst [vmem:[#allocation48_spill] sm:$0xff] %v5883_v34  ;;  %v5887_v36 = vpop.permute.xlu2 %1079 }
 0x169   : > { %10318 = vst [vmem:[#allocation49_spill] sm:$0xff] %v5885_v35 }
 0x16d   : > { %993 = vrot.lane.b32.xlu0 %v5890_v38, %s5450_s18  ;;  %1075 = vrot.lane.b32.xlu1 %v5823_v24, %s5455_s29 }
 0x16e   : > { %903 = vrot.lane.b32.xlu2 %v5890_v38, %s5453_s26 }
 0x16f   : > { %v5900_v40 = vpop.permute.xlu0 %1161  ;;  %v5902_v41 = vpop.permute.xlu1 %875 }
 0x170   : > { %10321 = vst [vmem:[#allocation52_spill] sm:$0xff] %v5900_v40  ;;  %v5904_v42 = vpop.permute.xlu2 %975 }
 0x171   : > { %10322 = vst [vmem:[#allocation53_spill] sm:$0xff] %v5904_v42 }
 0x175   : > { %813 = vrot.lane.b32.xlu0 %v5890_v38, %s5454_s28  ;;  %1353 = vrot.lane.b32.xlu1 %v5847_v28, %s5456_s10 }
 0x176   : > { %971 = vrot.lane.b32.xlu2 %v5907_v44, %s5450_s18 }
 0x177   : > { %v5917_v46 = vpop.permute.xlu0 %785  ;;  %v5919_v47 = vpop.permute.xlu1 %1169 }
 0x178   : > { %v5921_v9 = vpop.permute.xlu2 %1253 }
 0x179   : > { %10324 = vst [vmem:[#allocation55_spill] sm:$0xff] %v5921_v9 }
 0x17d   : > { %1265 = vrot.lane.b32.xlu0 %v5924_v10, %s5451_s19  ;;  %881 = vrot.lane.b32.xlu1 %v5907_v44, %s5453_s26 }
 0x17e   : > { %979 = vrot.lane.b32.xlu2 %v5924_v10, %s5450_s18 }
 0x17f   : > { %v5932_v15 = vpop.permute.xlu0 %899  ;;  %v5934_v17 = vpop.permute.xlu1 %793 }
 0x180   : > { %10326 = vst [vmem:[#allocation57_spill] sm:$0xff] %v5932_v15  ;;  %v5936_v19 = vpop.permute.xlu2 %877 }
 0x181   : > { %10327 = vst [vmem:[#allocation58_spill] sm:$0xff] %v5934_v17 }
 0x185   : > { %1167 = vrot.lane.b32.xlu0 %v5907_v44, %s5452_s20  ;;  %1175 = vrot.lane.b32.xlu1 %v5924_v10, %s5452_s20 }
 0x186   : > { %1257 = vrot.lane.b32.xlu2 %v5907_v44, %s5451_s19 }
 0x187   : > { %v5946_v25 = vpop.permute.xlu0 %1261  ;;  %v5948_v27 = vpop.permute.xlu1 %1071 }
 0x188   : > { %10329 = vst [vmem:[#allocation60_spill] sm:$0xff] %v5948_v27  ;;  %v5950_v37 = vpop.permute.xlu2 %1171 }
 0x18d   : > { %791 = vrot.lane.b32.xlu0 %v5907_v44, %s5454_s28  ;;  %799 = vrot.lane.b32.xlu1 %v5924_v10, %s5454_s28 }
 0x18e   : > { %889 = vrot.lane.b32.xlu2 %v5924_v10, %s5453_s26 }
 0x18f   : > { %v5960_v48 = vpop.permute.xlu0 %885  ;;  %v5962_v30 = vpop.permute.xlu1 %989 }
 0x190   : > { %10331 = vst [vmem:[#allocation62_spill] sm:$0xff] %v5960_v48  ;;  %v5964_v33 = vpop.permute.xlu2 %795 }
 0x191   : > { %10332 = vst [vmem:[#allocation63_spill] sm:$0xff] %v5962_v30 }
 0x192   : > { %10333 = vst [vmem:[#allocation64_spill] sm:$0xff] %v5964_v33 }
 0x195   : > { %1085 = vrot.lane.b32.xlu0 %v5924_v10, %s5455_s29  ;;  %699 = vrot.lane.b32.xlu1 %v5907_v44, %s5457_s11 }
 0x196   : > { %1077 = vrot.lane.b32.xlu2 %v5907_v44, %s5455_s29 }
 0x197   : > { %v5974_v51 = vpop.permute.xlu0 %1073  ;;  %v5976_v45 = vpop.permute.xlu1 %967 }
 0x198   : > { %10335 = vst [vmem:[#allocation66_spill] sm:$0xff] %v5974_v51  ;;  %v5978_v59 = vpop.permute.xlu2 %1343 }
 0x199   : > { %10336 = vst [vmem:[#allocation67_spill] sm:$0xff] %v5978_v59 }
 0x19d   : > { %1355 = vrot.lane.b32.xlu0 %v5924_v10, %s5456_s10  ;;  %995 = vrot.lane.b32.xlu1 %v5981_v62, %s5450_s18 }
 0x19e   : > { %1347 = vrot.lane.b32.xlu2 %v5907_v44, %s5456_s10 }
 0x19f   : > { %v5989_v50 = vpop.permute.xlu0 %1351  ;;  %v5991_v53 = vpop.permute.xlu1 %1163 }
 0x1a0   : > { %10338 = vst [vmem:[#allocation69_spill] sm:$0xff] %v5991_v53  ;;  %v5993_v56 = vpop.permute.xlu2 %991 }
 0x1a1   : > { %10339 = vst [vmem:[#allocation70_spill] sm:$0xff] %v5993_v56 }
 0x1a5   : > { %905 = vrot.lane.b32.xlu0 %v5981_v62, %s5453_s26  ;;  %695 = vrot.lane.b32.xlu1 %v5798_v20, %s5457_s11 }
 0x1a6   : > { %707 = vrot.lane.b32.xlu2 %v5924_v10, %s5457_s11 }
 0x1a7   : > { %v6003_v54 = vpop.permute.xlu0 %969  ;;  %v6005_v49 = vpop.permute.xlu1 %787 }
 0x1a8   : > { %v6007_v52 = vpop.permute.xlu2 %1165 }
 0x1a9   : > { %10341 = vst [vmem:[#allocation72_spill] sm:$0xff] %v6007_v52 }
 0x1ad   : > { %809 = vrot.lane.b32.xlu0 %v5780_v16, %s5454_s28  ;;  %1341 = vrot.lane.b32.xlu1 %v5752_v11, %s5456_s10 }
 0x1ae   : > { %703 = vrot.lane.b32.xlu2 %v5789_v18, %s5457_s11 }
 0x1af   : > { %v6015_v57 = vpop.permute.xlu0 %1255  ;;  %v6017_v14 = vpop.permute.xlu1 %1081 }
 0x1b0   : > { %10342 = vst [vmem:[#allocation73_spill] sm:$0xff] %v6015_v57  ;;  %v6019_v13 = vpop.permute.xlu2 %789 }
 0x1b5   : > { %693 = vrot.lane.b32.xlu0 %v5752_v11, %s5457_s11  ;;  %701 = vrot.lane.b32.xlu1 %v5755_v12, %s5457_s11 }
 0x1b6   : > { %1349 = vrot.lane.b32.xlu2 %v5755_v12, %s5456_s10 }
 0x1b7   : > { %v6027_v58 = vpop.permute.xlu0 %879  ;;  %v6029_v5 = vpop.permute.xlu1 %901 }
 0x1b8   : > { %10343 = vst [vmem:[#allocation74_spill] sm:$0xff] %v6029_v5  ;;  %v6031_v43 = vpop.permute.xlu2 %1083  ;;  %v1007_v5 = vsel %vm997_vm1, %v5976_v45, %v5904_v42 }
 0x1bd   : > { %721 = vrot.lane.b32.xlu0 %v5890_v38, %s5457_s11  ;;  %719 = vrot.lane.b32.xlu1 %v5838_v26, %s5457_s11 }
 0x1be   : > { %815 = vrot.lane.b32.xlu2 %v5981_v62, %s5454_s28 }
 0x1bf   : > { %v6039_v23 = vpop.permute.xlu0 %1173  ;;  %v6041_v3 = vpop.permute.xlu1 %811 }
 0x1c0   : > { %10344 = vst [vmem:[#allocation75_spill] sm:$0xff] %v6041_v3  ;;  %v6043_v7 = vpop.permute.xlu2 %697 }
 0x1c5   : > { %1279 = vrot.lane.b32.xlu0 %v5890_v38, %s5451_s19  ;;  %985 = vrot.lane.b32.xlu1 %v6046_v0, %s5450_s18 }
 0x1c6   : > { %723 = vrot.lane.b32.xlu2 %v5981_v62, %s5457_s11 }
 0x1c7   : > { %v6054_v6 = vpop.permute.xlu0 %797  ;;  %v6056_v2 = vpop.permute.xlu1 %977 }
 0x1c8   : > { %10345 = vst [vmem:[#allocation76_spill] sm:$0xff] %v6054_v6  ;;  %v6058_v60 = vpop.permute.xlu2 %903  ;;  %v1008_v1 = vsel %vm997_vm1, %v6003_v54, %v6056_v2 }
 0x1c9   : > { %10346 = vst [vmem:[#allocation77_spill] sm:$0xff] %v6056_v2  ;;  %v1032_v11 = vmul.f32 %v6099_v55, %v1008_v1  ;;  %v1006_v2 = vsel %vm997_vm1, %v5855_v29, %v5883_v34 }
 0x1ca   : > { %10347 = vst [vmem:[#allocation78_spill] sm:$0xff] %v6058_v60  ;;  %v6147_v60 = vld [vmem:[#allocation3 + $0x8] sm:$0xf] }
 0x1cb   : > { %10357 = vst [vmem:[#allocation88_spill] sm:$0xff] %v6147_v60 }
 0x1cd   : > { %987 = vrot.lane.b32.xlu0 %v6064_v22, %s5450_s18  ;;  %983 = vrot.lane.b32.xlu1 %v6061_v63, %s5450_s18 }
 0x1ce   : > { %717 = vrot.lane.b32.xlu2 %v5780_v16, %s5457_s11 }
 0x1cf   : > { %v6072_v39 = vpop.permute.xlu0 %1345  ;;  %v6074_v12 = vpop.permute.xlu1 %1263 }
 0x1d0   : > { %10348 = vst [vmem:[#allocation79_spill] sm:$0xff] %v6072_v39  ;;  %v6076_v18 = vpop.permute.xlu2 %971 }
 0x1d5   : > { %1281 = vrot.lane.b32.xlu0 %v5981_v62, %s5451_s19  ;;  %981 = vrot.lane.b32.xlu1 %v6079_v4, %s5450_s18 }
 0x1d6   : > { %1271 = vrot.lane.b32.xlu2 %v6046_v0, %s5451_s19 }
 0x1d7   : > { %v6091_v28 = vpop.permute.xlu0 %705  ;;  %v6093_v10 = vpop.permute.xlu1 %887 }
 0x1d8   : > { %10349 = vst [vmem:[#allocation80_spill] sm:$0xff] %v6093_v10  ;;  %v6095_v3 = vpop.permute.xlu2 %979  ;;  %v918_v59 = vsel %vm907_vm3, %v6027_v58, %v6093_v10 }
 0x1d9   : > { %10350 = vst [vmem:[#allocation81_spill] sm:$0xff] %v6095_v3  ;;  %v1009_v8 = vsel %vm997_vm1, %v6076_v18, %v6095_v3  ;;  %v1024_v3 = vmul.f32 %v6099_v55, %v1006_v2 }
 0x1da   : > { %v1036_v15 = vmul.f32 %v6099_v55, %v1009_v8  ;;  %v1028_v8 = vmul.f32 %v6099_v55, %v1007_v5 }
 0x1dc   : > { %2347 = vmatpush.msrb.mxu3 %v1036_v15 }
 0x1dd   : > { %1277 = vrot.lane.b32.xlu0 %v5838_v26, %s5451_s19  ;;  %897 = vrot.lane.b32.xlu1 %v6064_v22, %s5453_s26 }
 0x1de   : > { %1269 = vrot.lane.b32.xlu2 %v6061_v63, %s5451_s19  ;;  %2348 = vmatpush.msrb.mxu3 %v1032_v11 }
 0x1df   : > { %v6126_v15 = vpop.permute.xlu0 %993  ;;  %v6128_v1 = vpop.permute.xlu1 %1075 }
 0x1e0   : > { %10352 = vst [vmem:[#allocation83_spill] sm:$0xff] %v6128_v1  ;;  %2349 = vmatpush.msrb.mxu3 %v1028_v8  ;;  %v6130_v42 = vpop.permute.xlu2 %1257  ;;  %v6145_v8 = vld [vmem:[#allocation3 + $0x1c] sm:$0xf] }
 0x1e1   : > { %10353 = vst [vmem:[#allocation84_spill] sm:$0xff] %v6130_v42  ;;  %v6161_v55 = vperm.slane %v6145_v8, 0 }
 0x1e2   : > { %2350 = vmatpush.msrb.mxu3 %v1024_v3  ;;  %10356 = vst [vmem:[#allocation87_spill] sm:$0xff] %v6145_v8 }
 0x1e3   : > { %10358 = vst [vmem:[#allocation89_spill] sm:$0xff] %v6161_v55 }
 0x1e5   : > { %1275 = vrot.lane.b32.xlu0 %v5780_v16, %s5451_s19  ;;  %895 = vrot.lane.b32.xlu1 %v6046_v0, %s5453_s26 }
 0x1e6   : > { %1273 = vrot.lane.b32.xlu2 %v6064_v22, %s5451_s19 }
 0x1e7   : > { %v6139_v5 = vpop.permute.xlu0 %813  ;;  %v6141_v11 = vpop.permute.xlu1 %1353 }
 0x1e8   : > { %10354 = vst [vmem:[#allocation85_spill] sm:$0xff] %v6139_v5  ;;  %v6143_v34 = vpop.permute.xlu2 %889  ;;  %v6165_v5 = vperm.slane %v6147_v60, 1  ;;  %v1294_v60 = vsel %vm1283_vm2, %v6015_v57, %v6074_v12  ;;  %v6196_v57 = vld [vmem:[#allocation3 + $0x18] sm:$0xf] }
 0x1e9   : > { %10355 = vst [vmem:[#allocation86_spill] sm:$0xff] %v6143_v34 }
 0x1ea   : > { %10359 = vst [vmem:[#allocation90_spill] sm:$0xff] %v6165_v5 }
 0x1ed   : > { %1191 = vrot.lane.b32.xlu0 %v5981_v62, %s5452_s20  ;;  %893 = vrot.lane.b32.xlu1 %v6061_v63, %s5453_s26 }
 0x1ee   : > { %1267 = vrot.lane.b32.xlu2 %v6079_v4, %s5451_s19 }
 0x1ef   : > { %v6155_v2 = vpop.permute.xlu0 %1265  ;;  %v6157_v3 = vpop.permute.xlu1 %881 }
 0x1f0   : > { %v6167_v20 = vpop.permute.xlu2 %1077  ;;  %v1295_v24 = vsel %vm1283_vm2, %v6130_v42, %v6155_v2  ;;  %v919_v30 = vsel %vm907_vm3, %v6157_v3, %v6143_v34  ;;  %v1293_v42 = vsel %vm1283_vm2, %v5921_v9, %v5946_v25  ;;  %v916_v9 = vsel %vm907_vm3, %v5902_v41, %v5873_v32 }
 0x1f1   : > { %10360 = vst [vmem:[#allocation91_spill] sm:$0xff] %v6167_v20  ;;  %v1321_v8 = vmul.f32 %v6161_v55, %v1295_v24  ;;  %v946_v29 = vmul.f32 %v6165_v5, %v919_v30  ;;  %v1317_v24 = vmul.f32 %v6161_v55, %v1294_v60  ;;  %v917_v30 = vsel %vm907_vm3, %v5936_v19, %v5960_v48 }
 0x1f2   : > { %v1292_v60 = vsel %vm1283_vm2, %v5885_v35, %v5865_v31  ;;  %v938_v10 = vmul.f32 %v6165_v5, %v917_v30  ;;  %v6221_v35 = vperm.slane %v6196_v57, 0  ;;  %v934_v32 = vmul.f32 %v6165_v5, %v916_v9 }
 0x1f3   : > { %2097 = vmatpush.msrb.mxu1 %v1321_v8  ;;  %2351 = vmatpush.msrb.mxu3 %v946_v29  ;;  %v942_v29 = vmul.f32 %v6165_v5, %v918_v59  ;;  %v1313_v8 = vmul.f32 %v6161_v55, %v1293_v42  ;;  %v1309_v42 = vmul.f32 %v6161_v55, %v1292_v60 }
 0x1f4   : > { %10362 = vst [vmem:[#allocation93_spill] sm:$0xff] %v6221_v35  ;;  %v1204_v34 = vsel %vm1193_vm4, %v6007_v52, %v6039_v23  ;;  %v1203_v60 = vsel %vm1193_vm4, %v5991_v53, %v5950_v37  ;;  %v828_v5 = vsel %vm817_vm5, %v6019_v13, %v6054_v6 }
 0x1f5   : > { %1189 = vrot.lane.b32.xlu0 %v5890_v38, %s5452_s20  ;;  %891 = vrot.lane.b32.xlu1 %v6079_v4, %s5453_s26  ;;  %v1223_v9 = vmul.f32 %v6221_v35, %v1203_v60 }
 0x1f6   : > { %1183 = vrot.lane.b32.xlu2 %v6064_v22, %s5452_s20  ;;  %2098 = vmatpush.msrb.mxu1 %v1317_v24 }
 0x1f7   : > { %2352 = vmatpush.msrb.mxu3 %v942_v29  ;;  %v6214_v48 = vpop.permute.xlu0 %1167  ;;  %v6216_v59 = vpop.permute.xlu1 %1175 }
 0x1f8   : > { %10361 = vst [vmem:[#allocation92_spill] sm:$0xff] %v6214_v48  ;;  %2099 = vmatpush.msrb.mxu1 %v1313_v8  ;;  %v6223_v24 = vpop.permute.xlu2 %1347  ;;  %v1205_v29 = vsel %vm1193_vm4, %v6214_v48, %v6216_v59  ;;  %v1227_v8 = vmul.f32 %v6221_v35, %v1204_v34 }
 0x1f9   : > { %2353 = vmatpush.msrb.mxu3 %v938_v10  ;;  %v1231_v30 = vmul.f32 %v6221_v35, %v1205_v29  ;;  %v6241_v10 = vld [vmem:[#allocation3 + $0x4] sm:$0xf] }
 0x1fa   : > { %2100 = vmatpush.msrb.mxu1 %v1309_v42  ;;  %v6260_v29 = vperm.slane %v6241_v10, 1 }
 0x1fb   : > { %2354 = vmatpush.msrb.mxu3 %v934_v32  ;;  %v1202_v32 = vsel %vm1193_vm4, %v5900_v40, %v5919_v47  ;;  %v6281_v40 = vld [vmem:[#allocation3] sm:$0xf] }
 0x1fc   : > { %2101 = vmatpush.msrb.mxu1 %v1231_v30  ;;  %10363 = vst [vmem:[#allocation94_spill] sm:$0xff] %v6260_v29  ;;  %v1219_v55 = vmul.f32 %v6221_v35, %v1202_v32  ;;  %v852_v32 = vmul.f32 %v6260_v29, %v828_v5  ;;  %v6279_v35 = vld [vmem:[#allocation3 + $0x14] sm:$0xf]  ;;  %v6304_v52 = vperm.slane %v6281_v40, 1 }
 0x1fd   : > { %1187 = vrot.lane.b32.xlu0 %v5838_v26, %s5452_s20  ;;  %807 = vrot.lane.b32.xlu1 %v6064_v22, %s5454_s28  ;;  %v6300_v53 = vperm.slane %v6279_v35, 0 }
 0x1fe   : > { %1181 = vrot.lane.b32.xlu2 %v6046_v0, %s5452_s20  ;;  %2102 = vmatpush.msrb.mxu1 %v1227_v8  ;;  %10365 = vst [vmem:[#allocation96_spill] sm:$0xff] %v6304_v52 }
 0x1ff   : > { %v6254_v34 = vpop.permute.xlu0 %791  ;;  %v6256_v42 = vpop.permute.xlu1 %799  ;;  %10364 = vst [vmem:[#allocation95_spill] sm:$0xff] %v6300_v53 }
 0x200   : > { %2103 = vmatpush.msrb.mxu1 %v1223_v9  ;;  %v6262_v30 = vpop.permute.xlu2 %707  ;;  %v829_v8 = vsel %vm817_vm5, %v6254_v34, %v6256_v42  ;;  %v827_v9 = vsel %vm817_vm5, %v6005_v49, %v5964_v33 }
 0x201   : > { %v856_v60 = vmul.f32 %v6260_v29, %v829_v8  ;;  %v848_v5 = vmul.f32 %v6260_v29, %v827_v9 }
 0x202   : > { %2104 = vmatpush.msrb.mxu1 %v1219_v55  ;;  %v826_v55 = vsel %vm817_vm5, %v5917_v46, %v5934_v17 }
 0x203   : > { %2355 = vmatpush.msrb.mxu3 %v856_v60 }
 0x205   : > { %1185 = vrot.lane.b32.xlu0 %v5780_v16, %s5452_s20  ;;  %805 = vrot.lane.b32.xlu1 %v6046_v0, %s5454_s28 }
 0x206   : > { %1179 = vrot.lane.b32.xlu2 %v6061_v63, %s5452_s20  ;;  %2356 = vmatpush.msrb.mxu3 %v852_v32  ;;  %v844_v32 = vmul.f32 %v6260_v29, %v826_v55  ;;  %v738_v55 = vsel %vm727_vm7, %v6043_v7, %v6091_v28  ;;  %v1113_v29 = vsel %vm1103_vm6, %v5974_v51, %v6017_v14 }
 0x207   : > { %v6294_v8 = vpop.permute.xlu0 %1085  ;;  %v6296_v60 = vpop.permute.xlu1 %699 }
 0x208   : > { %2357 = vmatpush.msrb.mxu3 %v848_v5  ;;  %v6306_v48 = vpop.permute.xlu2 %703  ;;  %v1115_v9 = vsel %vm1103_vm6, %v6167_v20, %v6294_v8  ;;  %v739_v17 = vsel %vm727_vm7, %v6296_v60, %v6262_v30  ;;  %v1114_v5 = vsel %vm1103_vm6, %v6128_v1, %v6031_v43  ;;  %v6351_v1 = vperm.slane %v6087_v21, 0 }
 0x209   : > { %v1141_v33 = vmul.f32 %v6300_v53, %v1115_v9  ;;  %v766_v6 = vmul.f32 %v6304_v52, %v739_v17  ;;  %v1137_v17 = vmul.f32 %v6300_v53, %v1114_v5  ;;  %v6332_v9 = vld [vmem:[#allocation3 + $0x20] sm:$0xf] }
 0x20a   : > { %2358 = vmatpush.msrb.mxu3 %v844_v32  ;;  %10366 = vst [vmem:[#allocation97_spill] sm:$0xff] %v6332_v9  ;;  %v762_v32 = vmul.f32 %v6304_v52, %v738_v55  ;;  %v6355_v55 = vperm.slane %v6332_v9, 0 }
 0x20b   : > { %2105 = vmatpush.msrb.mxu1 %v1141_v33  ;;  %v1112_v33 = vsel %vm1103_vm6, %v5948_v27, %v5887_v36  ;;  %10367 = vst [vmem:[#allocation98_spill] sm:$0xff] %v6351_v1 }
 0x20c   : > { %2359 = vmatpush.msrb.mxu3 %v766_v6  ;;  %v1133_v6 = vmul.f32 %v6300_v53, %v1113_v29  ;;  %10368 = vst [vmem:[#allocation99_spill] sm:$0xff] %v6355_v55 }
 0x20d   : > { %1101 = vrot.lane.b32.xlu0 %v5981_v62, %s5455_s29  ;;  %803 = vrot.lane.b32.xlu1 %v6061_v63, %s5454_s28 }
 0x20e   : > { %1177 = vrot.lane.b32.xlu2 %v6079_v4, %s5452_s20  ;;  %2106 = vmatpush.msrb.mxu1 %v1137_v17  ;;  %v1129_v17 = vmul.f32 %v6300_v53, %v1112_v33  ;;  %v1011_v33 = vsel %vm997_vm1, %v5993_v56, %v5976_v45 }
 0x20f   : > { %2360 = vmatpush.msrb.mxu3 %v762_v32  ;;  %v6346_v5 = vpop.permute.xlu0 %1355  ;;  %v6348_v51 = vpop.permute.xlu1 %995  ;;  %v1027_v45 = vmul.f32 %v6351_v1, %v1011_v33 }
 0x210   : > { %2107 = vmatpush.msrb.mxu1 %v1133_v6  ;;  %v6357_v27 = vpop.permute.xlu2 %1349  ;;  %v1013_v29 = vsel %vm997_vm1, %v6348_v51, %v6076_v18  ;;  %v1385_v32 = vsel %vm1373_vm8, %v6223_v24, %v6346_v5  ;;  %v1012_v6 = vsel %vm997_vm1, %v6126_v15, %v6003_v54  ;;  %v1384_v18 = vsel %vm1373_vm8, %v6072_v39, %v6141_v11  ;;  %v10374_v39 = vld [vmem:[#allocation88_spill] sm:$0xff] }
 0x211   : > { %v1035_v20 = vmul.f32 %v6351_v1, %v1013_v29  ;;  %v1411_v9 = vmul.f32 %v6355_v55, %v1385_v32  ;;  %v1031_v29 = vmul.f32 %v6351_v1, %v1012_v6  ;;  %v10369_v32 = vld [vmem:[#allocation67_spill] sm:$0xff]  ;;  %v10372_v6 = vld [vmem:[#allocation41_spill] sm:$0xff]  ;;  %v6407_v56 = vperm.slane %v10374_v39, 0 }
 0x212   : > { %2108 = vmatpush.msrb.mxu1 %v1129_v17  ;;  %v1383_v54 = vsel %vm1373_vm8, %v10369_v32, %v5989_v50  ;;  %v10371_v17 = vld [vmem:[#allocation63_spill] sm:$0xff] }
 0x213   : > { %1972 = vmatpush.msrb.mxu0 %v1035_v20  ;;  %2234 = vmatpush.msrb.mxu2 %v1411_v9  ;;  %v1407_v20 = vmul.f32 %v6355_v55, %v1384_v18  ;;  %v10370_v9 = vld [vmem:[#allocation44_spill] sm:$0xff]  ;;  %v1403_v18 = vmul.f32 %v6355_v55, %v1383_v54  ;;  %10375 = vst [vmem:[#allocation41_spill] sm:$0xff] %v6407_v56  ;;  %v1432_v54 = vld [vmem:[#allocation6 + $0x8] sm:$0xff] }
 0x214   : > { %2109 = vmatpush.msrb.mxu1 %v5907_v44  ;;  %v1010_v44 = vsel %vm997_vm1, %v10371_v17, %v10370_v9 }
 0x215   : > { %1099 = vrot.lane.b32.xlu0 %v5890_v38, %s5455_s29  ;;  %801 = vrot.lane.b32.xlu1 %v6079_v4, %s5454_s28  ;;  %v1023_v17 = vmul.f32 %v6351_v1, %v1010_v44  ;;  %v10378_v44 = vld [vmem:[#allocation78_spill] sm:$0xff] }
 0x216   : > { %1093 = vrot.lane.b32.xlu2 %v6064_v22, %s5455_s29  ;;  %1973 = vmatpush.msrb.mxu0 %v1031_v29  ;;  %v922_v1 = vsel %vm907_vm3, %v10378_v44, %v6027_v58  ;;  %v10381_v58 = vld [vmem:[#allocation57_spill] sm:$0xff] }
 0x217   : > { %2110 = vmatpush.msrb.mxu1 %v10372_v6  ;;  %2235 = vmatpush.msrb.mxu2 %v1407_v20  ;;  %v6401_v53 = vpop.permute.xlu0 %905  ;;  %v6403_v32 = vpop.permute.xlu1 %695  ;;  %v10377_v20 = vld [vmem:[#allocation40_spill] sm:$0xff] }
 0x218   : > { %10373 = vst [vmem:[#allocation44_spill] sm:$0xff] %v6401_v53  ;;  %1974 = vmatpush.msrb.mxu0 %v1027_v45  ;;  %v6409_v9 = vpop.permute.xlu2 %815  ;;  %v923_v33 = vsel %vm907_vm3, %v6401_v53, %v6157_v3  ;;  %v737_v29 = vsel %vm727_vm7, %v6403_v32, %v6306_v48  ;;  %v10379_v3 = vld [vmem:[#allocation34_spill] sm:$0xff] }
 0x219   : > { %10376 = vst [vmem:[#allocation88_spill] sm:$0xff] %v6409_v9  ;;  %2111 = vmatpush.msrb.mxu1 %v10377_v20  ;;  %2236 = vmatpush.msrb.mxu2 %v1403_v18  ;;  %v945_v45 = vmul.f32 %v6407_v56, %v923_v33  ;;  %v758_v6 = vmul.f32 %v6304_v52, %v737_v29  ;;  %v10380_v53 = vld [vmem:[#allocation74_spill] sm:$0xff] }
 0x21a   : > { %1975 = vmatpush.msrb.mxu0 %v1023_v17  ;;  %v921_v20 = vsel %vm907_vm3, %v10380_v53, %v5936_v19  ;;  %v941_v18 = vmul.f32 %v6407_v56, %v922_v1  ;;  %v920_v17 = vsel %vm907_vm3, %v10381_v58, %v5902_v41  ;;  %v833_v29 = vsel %vm817_vm5, %v6409_v9, %v6254_v34  ;;  %v1433_v34 = vld [vmem:[#allocation6 + $0x10] sm:$0xff] }
 0x21b   : > { %2112 = vmatpush.msrb.mxu1 %v10379_v3  ;;  %2361 = vmatpush.msrb.mxu3 %v758_v6  ;;  %v937_v19 = vmul.f32 %v6407_v56, %v921_v20  ;;  %v933_v41 = vmul.f32 %v6407_v56, %v920_v17  ;;  %v1435_v3 = vld [vmem:[#allocation6 + $0x20] sm:$0xff]  ;;  %v10386_v56 = vld [vmem:[#allocation75_spill] sm:$0xff] }
 0x21c   : > { %2113 = vmatmul.f32.vlgmr.msrb.gmra.mxu1 %v1432_v54  ;;  %1976 = vmatpush.msrb.mxu0 %v945_v45  ;;  %v6456_v45 = vperm.slane %v6241_v10, 0  ;;  %v831_v9 = vsel %vm817_vm5, %v10386_v56, %v6005_v49 }
 0x21d   : > { %1097 = vrot.lane.b32.xlu0 %v5838_v26, %s5455_s29  ;;  %715 = vrot.lane.b32.xlu1 %v6064_v22, %s5457_s11 }
 0x21e   : > { %1091 = vrot.lane.b32.xlu2 %v6046_v0, %s5455_s29  ;;  %1977 = vmatpush.msrb.mxu0 %v941_v18  ;;  %10384 = vst [vmem:[#allocation34_spill] sm:$0xff] %v6456_v45  ;;  %v855_v18 = vmul.f32 %v6456_v45, %v833_v29 }
 0x21f   : > { %v6444_v33 = vpop.permute.xlu0 %809  ;;  %v6446_v1 = vpop.permute.xlu1 %1341 }
 0x220   : > { %10382 = vst [vmem:[#allocation40_spill] sm:$0xff] %v6444_v33  ;;  %1978 = vmatpush.msrb.mxu0 %v937_v19  ;;  %v6452_v54 = vpop.permute.xlu2 %723  ;;  %v1382_v6 = vsel %vm1373_vm8, %v6446_v1, %v6357_v27  ;;  %v10385_v19 = vld [vmem:[#allocation85_spill] sm:$0xff] }
 0x221   : > { %10383 = vst [vmem:[#allocation78_spill] sm:$0xff] %v6452_v54  ;;  %v1399_v20 = vmul.f32 %v6355_v55, %v1382_v6  ;;  %v832_v17 = vsel %vm817_vm5, %v10385_v19, %v6019_v13  ;;  %v830_v13 = vsel %vm817_vm5, %v6444_v33, %v5917_v46  ;;  %v847_v6 = vmul.f32 %v6456_v45, %v831_v9  ;;  %v1436_v55 = vld [vmem:[#allocation6 + $0x28] sm:$0xff] }
 0x222   : > { %1979 = vmatpush.msrb.mxu0 %v933_v41  ;;  %v851_v29 = vmul.f32 %v6456_v45, %v832_v17  ;;  %v1438_v17 = vld [vmem:[#allocation6 + $0x38] sm:$0xff] }
 0x223   : > { %2237 = vmatpush.msrb.mxu2 %v1399_v20 }
 0x224   : > { %2116 = vmatmul.f32.gmra.mxu1 %v1435_v3  ;;  %1980 = vmatpush.msrb.mxu0 %v855_v18  ;;  %v6488_v3 = vperm.slane %v6281_v40, 0  ;;  %v743_v18 = vsel %vm727_vm7, %v6452_v54, %v6296_v60  ;;  %v10395_v54 = vld [vmem:[#allocation77_spill] sm:$0xff] }
 0x225   : > { %4787 = vmatmul.msk.f32.vlgmr.msrb.gmra.mxu2 %vm1863_vm9, %v1433_v34  ;;  %1095 = vrot.lane.b32.xlu0 %v5780_v16, %s5455_s29  ;;  %v843_v34 = vmul.f32 %v6456_v45, %v830_v13 }
 0x226   : > { %713 = vrot.lane.b32.xlu1 %v6046_v0, %s5457_s11  ;;  %1089 = vrot.lane.b32.xlu2 %v6061_v63, %s5455_s29  ;;  %10387 = vst [vmem:[#allocation74_spill] sm:$0xff] %v6488_v3  ;;  %v765_v33 = vmul.f32 %v6488_v3, %v743_v18  ;;  %v1441_v18 = vld [vmem:[#allocation6 + $0x50] sm:$0xff] }
 0x227   : > { %1981 = vmatpush.msrb.mxu0 %v851_v29  ;;  %v694_v49 = vpop.permute.xlu0 %693  ;;  %v6484_v41 = vpop.permute.xlu1 %701  ;;  %v1431_v29 = vld [vmem:[#allocation6] sm:$0xff] }
 0x228   : > { %v6490_v20 = vpop.permute.xlu2 %717  ;;  %v736_v46 = vsel %vm727_vm7, %v694_v49, %v6484_v41 }
 0x229   : > { %10388 = vst [vmem:[#allocation57_spill] sm:$0xff] %v6490_v20  ;;  %1982 = vmatpush.msrb.mxu0 %v847_v6  ;;  %v754_v9 = vmul.f32 %v6304_v52, %v736_v46 }
 0x22b   : > { %1983 = vmatpush.msrb.mxu0 %v843_v34  ;;  %2362 = vmatpush.msrb.mxu3 %v754_v9  ;;  %v1434_v34 = vld [vmem:[#allocation6 + $0x18] sm:$0xff]  ;;  %v740_v9 = vsel %vm727_vm7, %v6490_v20, %v694_v49  ;;  %v1447_v20 = vld [vmem:[#allocation6 + $0x80] sm:$0xff] }
 0x22c   : > { %2119 = vmatmul.f32.gmra.mxu1 %v1438_v17  ;;  %2363 = vmatmul.f32.vlgmr.msrb.gmra.mxu3 %v1431_v29  ;;  %v1439_v17 = vld [vmem:[#allocation6 + $0x40] sm:$0xff] }
 0x22d   : > { %1984 = vmatpush.msrb.mxu0 %v765_v33  ;;  %4788 = vmatmul.msk.f32.gmra.mxu2 %vm1863_vm9, %v1436_v55 }
 0x22e   : > { %1363 = vrot.lane.b32.xlu0 %v6064_v22, %s5456_s10  ;;  %709 = vrot.lane.b32.xlu1 %v6079_v4, %s5457_s11 }
 0x22f   : > { %1087 = vrot.lane.b32.xlu2 %v6079_v4, %s5455_s29  ;;  %v6509_v60 = vpop.permute.xlu0 %721  ;;  %v6511_v13 = vpop.permute.xlu1 %719 }
 0x230   : > { %10389 = vst [vmem:[#allocation85_spill] sm:$0xff] %v6509_v60  ;;  %v6513_v6 = vpop.permute.xlu2 %1271  ;;  %v742_v55 = vsel %vm727_vm7, %v6509_v60, %v6043_v7  ;;  %v741_v33 = vsel %vm727_vm7, %v6511_v13, %v6403_v32  ;;  %v753_v7 = vmul.f32 %v6488_v3, %v740_v9  ;;  %v10392_v9 = vld [vmem:[#allocation81_spill] sm:$0xff] }
 0x231   : > { %10390 = vst [vmem:[#allocation75_spill] sm:$0xff] %v6511_v13  ;;  %v761_v46 = vmul.f32 %v6488_v3, %v742_v55  ;;  %v757_v52 = vmul.f32 %v6488_v3, %v741_v33  ;;  %v1437_v33 = vld [vmem:[#allocation6 + $0x30] sm:$0xff]  ;;  %v1290_v13 = vsel %vm1283_vm2, %v6074_v12, %v6513_v6 }
 0x233   : > { %1985 = vmatpush.msrb.mxu0 %v761_v46  ;;  %v6550_v46 = vperm.slane %v6087_v21, 2 }
 0x234   : > { %2122 = vmatmul.f32.gmra.mxu1 %v1441_v18  ;;  %2366 = vmatmul.f32.gmra.mxu3 %v1434_v34  ;;  %v1442_v18 = vld [vmem:[#allocation6 + $0x58] sm:$0xff] }
 0x235   : > { %4789 = vmatmul.msk.f32.gmra.mxu2 %vm1863_vm9, %v1439_v17  ;;  %1986 = vmatpush.msrb.mxu0 %v757_v52  ;;  %v1444_v52 = vld [vmem:[#allocation6 + $0x68] sm:$0xff]  ;;  %10391 = vst [vmem:[#allocation100_spill] sm:$0xff] %v6550_v46 }
 0x236   : > { %1359 = vrot.lane.b32.xlu0 %v6061_v63, %s5456_s10  ;;  %1357 = vrot.lane.b32.xlu1 %v6079_v4, %s5456_s10 }
 0x237   : > { %711 = vrot.lane.b32.xlu2 %v6061_v63, %s5457_s11  ;;  %v6536_v32 = vpop.permute.xlu0 %1279  ;;  %v6538_v49 = vpop.permute.xlu1 %985  ;;  %1987 = vmatpush.msrb.mxu0 %v753_v7 }
 0x238   : > { %v6540_v55 = vpop.permute.xlu2 %1269  ;;  %1988 = vmatmul.f32.vlgmr.msrb.gmra.mxu0 %v1431_v29 }
 0x239   : > { %v1289_v12 = vsel %vm1283_vm2, %v5946_v25, %v6540_v55 }
 0x23c   : > { %2125 = vmatmul.f32.gmra.mxu1 %v1444_v52  ;;  %2369 = vmatmul.f32.gmra.mxu3 %v1437_v33  ;;  %v10393_v52 = vld [vmem:[#allocation87_spill] sm:$0xff] }
 0x23d   : > { %4790 = vmatmul.msk.f32.gmra.mxu2 %vm1863_vm9, %v1442_v18  ;;  %v6561_v18 = vperm.slane %v10393_v52, 1  ;;  %v6596_v25 = vperm.slane %v10393_v52, 2 }
 0x23e   : > { %1369 = vrot.lane.b32.xlu0 %v5890_v38, %s5456_s10  ;;  %1367 = vrot.lane.b32.xlu1 %v5838_v26, %s5456_s10  ;;  %v1440_v26 = vld [vmem:[#allocation6 + $0x48] sm:$0xff] }
 0x23f   : > { %1361 = vrot.lane.b32.xlu2 %v6046_v0, %s5456_s10  ;;  %v6552_v29 = vpop.permute.xlu0 %987  ;;  %v6554_v17 = vpop.permute.xlu1 %983  ;;  %10394 = vst [vmem:[#allocation81_spill] sm:$0xff] %v6561_v18 }
 0x240   : > { %v1005_v7 = vsel %vm997_vm1, %v10392_v9, %v6552_v29  ;;  %v1274_v45 = vpop.permute.xlu2 %1273  ;;  %1991 = vmatmul.f32.gmra.mxu0 %v1434_v34  ;;  %v1445_v9 = vld [vmem:[#allocation6 + $0x70] sm:$0xff]  ;;  %v1004_v34 = vsel %vm997_vm1, %v10395_v54, %v6538_v49  ;;  %10397 = vst [vmem:[#allocation87_spill] sm:$0xff] %v6596_v25 }
 0x241   : > { %v1037_v3 = vmul.f32 %v6550_v46, %v1005_v7  ;;  %v1291_v21 = vsel %vm1283_vm2, %v6155_v2, %v1274_v45  ;;  %v324_v2 = vld [vmem:[%s9978_s5] sm:$0xff]  ;;  %v325_v7 = vld [vmem:[%s9978_s5 + $0x8] sm:$0xff]  ;;  %v1033_v38 = vmul.f32 %v6550_v46, %v1004_v34 }
 0x242   : > { %v1322_v60 = vmul.f32 %v6561_v18, %v1291_v21  ;;  %v10396_v21 = vld [vmem:[#allocation53_spill] sm:$0xff]  ;;  %v10398_v34 = vld [vmem:[#allocation48_spill] sm:$0xff] }
 0x243   : > { %2722 = vmatpush.msra.mxu2 %v1037_v3  ;;  %v1003_v54 = vsel %vm997_vm1, %v10396_v21, %v6554_v17  ;;  %v1318_v3 = vmul.f32 %v6561_v18, %v1290_v13 }
 0x244   : > { %2128 = vmatmul.f32.gmra.mxu1 %v1447_v20  ;;  %2472 = vmatpush.msra.mxu0 %v1322_v60 }
 0x245   : > { %4791 = vmatmul.msk.f32.gmra.mxu2 %vm1863_vm9, %v1445_v9  ;;  %2372 = vmatmul.f32.gmra.mxu3 %v1440_v26  ;;  %v1314_v9 = vmul.f32 %v6561_v18, %v1289_v12 }
 0x246   : > { %386 = vperm.xlu0 %5029, %v324_v2   ;;  %391 = vperm.xlu1 %5030, %v325_v7   ;;  %v1029_v7 = vmul.f32 %v6550_v46, %v1003_v54  ;;  %v1286_v54 = vsel %vm1283_vm2, %v6513_v6, %v6536_v32 }
 0x247   : > { %1371 = vrot.lane.b32.xlu2 %v5981_v62, %s5456_s10  ;;  %2473 = vmatpush.msra.mxu0 %v1318_v3  ;;  %v6598_v20 = vpop.permute.xlu0 %1281  ;;  %v6600_v60 = vpop.permute.xlu1 %981  ;;  %v1443_v62 = vld [vmem:[#allocation6 + $0x60] sm:$0xff]  ;;  %v1319_v6 = vmul.f32 %v6596_v25, %v1286_v54 }
 0x248   : > { %2723 = vmatpush.msra.mxu2 %v1033_v38  ;;  %v1287_v13 = vsel %vm1283_vm2, %v1274_v45, %v6598_v20  ;;  %v1002_v2 = vsel %vm997_vm1, %v10398_v34, %v6600_v60  ;;  %v1268_v52 = vpop.permute.xlu2 %1267  ;;  %v1450_v38 = vld [vmem:[#allocation6 + $0x98] sm:$0xff]  ;;  %1994 = vmatmul.f32.gmra.mxu0 %v1437_v33  ;;  %v6628_v33 = vperm.slane %v10374_v39, 2  ;;  %v6633_v34 = vperm.slane %v6196_v57, 1 }
 0x249   : > { %v1323_v21 = vmul.f32 %v6596_v25, %v1287_v13  ;;  %2474 = vmatpush.msra.mxu0 %v1314_v9  ;;  %v1288_v12 = vsel %vm1283_vm2, %v5865_v31, %v1268_v52  ;;  %v1025_v3 = vmul.f32 %v6550_v46, %v1002_v2  ;;  %v1448_v13 = vld [vmem:[#allocation6 + $0x88] sm:$0xff]  ;;  %v327_v9 = vld [vmem:[%s9978_s5 + $0x18] sm:$0xff]  ;;  %v328_v31 = vld [vmem:[%s9978_s5 + $0x20] sm:$0xff] }
 0x24a   : > { %2724 = vmatpush.msra.mxu2 %v1029_v7  ;;  %v1310_v45 = vmul.f32 %v6561_v18, %v1288_v12  ;;  %10399 = vst [vmem:[#allocation77_spill] sm:$0xff] %v6628_v33  ;;  %v1455_v46 = vld [vmem:[#allocation6 + $0xc0] sm:$0xff]  ;;  %v1461_v18 = vld [vmem:[#allocation6 + $0xf0] sm:$0xff] }
 0x24b   : > { %2847 = vmatpush.msra.mxu3 %v1323_v21  ;;  %10400 = vst [vmem:[#allocation53_spill] sm:$0xff] %v6633_v34  ;;  %v10401_v21 = vld [vmem:[#allocation86_spill] sm:$0xff] }
 0x24c   : > { %2131 = vmatmul.f32.gmra.mxu1 %v1450_v38  ;;  %2475 = vmatpush.msra.mxu0 %v1310_v45  ;;  %v1453_v45 = vld [vmem:[#allocation6 + $0xb0] sm:$0xff] }
 0x24d   : > { %2725 = vmatpush.msra.mxu2 %v1025_v3  ;;  %2375 = vmatmul.f32.gmra.mxu3 %v1443_v62 }
 0x24e   : > { %4792 = vmatmul.msk.f32.gmra.mxu2 %vm1863_vm9, %v1448_v13  ;;  %401 = vperm.xlu0 %5029, %v327_v9  }
 0x24f   : > { %406 = vperm.xlu1 %5030, %v328_v31   ;;  %1365 = vrot.lane.b32.xlu2 %v5780_v16, %s5456_s10  ;;  %v6637_v2 = vpop.permute.xlu0 %1277  ;;  %v6639_v7 = vpop.permute.xlu1 %897  ;;  %v1446_v31 = vld [vmem:[#allocation6 + $0x78] sm:$0xff] }
 0x250   : > { %2848 = vmatpush.msra.mxu3 %v1319_v6  ;;  %v1285_v39 = vsel %vm1283_vm2, %v6540_v55, %v6637_v2  ;;  %v915_v12 = vsel %vm907_vm3, %v10401_v21, %v6639_v7  ;;  %v1184_v38 = vpop.permute.xlu2 %1183  ;;  %1997 = vmatmul.f32.gmra.mxu0 %v1440_v26  ;;  %v1451_v55 = vld [vmem:[#allocation6 + $0xa0] sm:$0xff]  ;;  %v330_v6 = vld [vmem:[%s9978_s5 + $0x30] sm:$0xff] }
 0x251   : > { %v1201_v3 = vsel %vm1193_vm4, %v6216_v59, %v1184_v38  ;;  %v947_v54 = vmul.f32 %v6628_v33, %v915_v12  ;;  %v1315_v13 = vmul.f32 %v6596_v25, %v1285_v39  ;;  %v331_v59 = vld [vmem:[%s9978_s5 + $0x38] sm:$0xff]  ;;  %v326_v26 = vld [vmem:[%s9978_s5 + $0x10] sm:$0xff] }
 0x252   : > { %v1232_v9 = vmul.f32 %v6633_v34, %v1201_v3  ;;  %v10402_v3 = vld [vmem:[#allocation80_spill] sm:$0xff] }
 0x253   : > { %2726 = vmatpush.msra.mxu2 %v947_v54  ;;  %2849 = vmatpush.msra.mxu3 %v1315_v13 }
 0x254   : > { %2134 = vmatmul.f32.gmra.mxu1 %v1453_v45  ;;  %2476 = vmatpush.msra.mxu0 %v1232_v9  ;;  %v1456_v9 = vld [vmem:[#allocation6 + $0xc8] sm:$0xff] }
 0x255   : > { %2378 = vmatmul.f32.gmra.mxu3 %v1446_v31 }
 0x256   : > { %4793 = vmatmul.msk.f32.gmra.mxu2 %vm1863_vm9, %v1451_v55  ;;  %416 = vperm.xlu0 %5029, %v330_v6  }
 0x257   : > { %421 = vperm.xlu1 %5030, %v331_v59   ;;  %396 = vperm.xlu2 %5031, %v326_v26   ;;  %v6665_v39 = vpop.permute.xlu0 %1275  ;;  %v6667_v21 = vpop.permute.xlu1 %895  ;;  %v1449_v26 = vld [vmem:[#allocation6 + $0x90] sm:$0xff] }
 0x258   : > { %v1284_v12 = vsel %vm1283_vm2, %v1268_v52, %v6665_v39  ;;  %v914_v45 = vsel %vm907_vm3, %v10402_v3, %v6667_v21  ;;  %v1182_v54 = vpop.permute.xlu2 %1181  ;;  %2000 = vmatmul.f32.gmra.mxu0 %v1443_v62  ;;  %v1454_v52 = vld [vmem:[#allocation6 + $0xb8] sm:$0xff]  ;;  %v337_v3 = vld [vmem:[%s9978_s5 + $0x68] sm:$0xff] }
 0x259   : > { %v1200_v13 = vsel %vm1193_vm4, %v6039_v23, %v1182_v54  ;;  %v943_v55 = vmul.f32 %v6628_v33, %v914_v45  ;;  %v1311_v6 = vmul.f32 %v6596_v25, %v1284_v12  ;;  %v338_v23 = vld [vmem:[%s9978_s5 + $0x70] sm:$0xff]  ;;  %v329_v62 = vld [vmem:[%s9978_s5 + $0x28] sm:$0xff]  ;;  %v6692_v12 = vperm.slane %v6196_v57, 2 }
 0x25a   : > { %v1228_v59 = vmul.f32 %v6633_v34, %v1200_v13  ;;  %v1452_v25 = vld [vmem:[#allocation6 + $0xa8] sm:$0xff] }
 0x25b   : > { %2727 = vmatpush.msra.mxu2 %v943_v55  ;;  %2850 = vmatpush.msra.mxu3 %v1311_v6  ;;  %10403 = vst [vmem:[#allocation48_spill] sm:$0xff] %v6692_v12  ;;  %v10404_v55 = vld [vmem:[#allocation62_spill] sm:$0xff] }
 0x25c   : > { %2137 = vmatmul.f32.gmra.mxu1 %v1456_v9  ;;  %2477 = vmatpush.msra.mxu0 %v1228_v59 }
 0x25d   : > { %2381 = vmatmul.f32.gmra.mxu3 %v1449_v26 }
 0x25e   : > { %4794 = vmatmul.msk.f32.gmra.mxu2 %vm1863_vm9, %v1454_v52  ;;  %1690 = vperm.xlu0 %5029, %v337_v3   ;;  %v1459_v52 = vld [vmem:[#allocation6 + $0xe0] sm:$0xff] }
 0x25f   : > { %1695 = vperm.xlu1 %5030, %v338_v23   ;;  %411 = vperm.xlu2 %5031, %v329_v62   ;;  %v6695_v45 = vpop.permute.xlu0 %1191  ;;  %v6697_v13 = vpop.permute.xlu1 %893 }
 0x260   : > { %v1197_v9 = vsel %vm1193_vm4, %v1184_v38, %v6695_v45  ;;  %v913_v6 = vsel %vm907_vm3, %v10404_v55, %v6697_v13  ;;  %v1180_v57 = vpop.permute.xlu2 %1179  ;;  %2003 = vmatmul.f32.gmra.mxu0 %v1446_v31  ;;  %v1457_v38 = vld [vmem:[#allocation6 + $0xd0] sm:$0xff]  ;;  %v340_v55 = vld [vmem:[%s9978_s5 + $0x80] sm:$0xff] }
 0x261   : > { %v1199_v59 = vsel %vm1193_vm4, %v5950_v37, %v1180_v57  ;;  %v939_v3 = vmul.f32 %v6628_v33, %v913_v6  ;;  %v1233_v23 = vmul.f32 %v6692_v12, %v1197_v9  ;;  %v341_v37 = vld [vmem:[%s9978_s5 + $0x88] sm:$0xff]  ;;  %v336_v31 = vld [vmem:[%s9978_s5 + $0x60] sm:$0xff] }
 0x262   : > { %v1224_v62 = vmul.f32 %v6633_v34, %v1199_v59 }
 0x263   : > { %2728 = vmatpush.msra.mxu2 %v939_v3  ;;  %2851 = vmatpush.msra.mxu3 %v1233_v23 }
 0x264   : > { %2140 = vmatmul.f32.gmra.mxu1 %v1459_v52  ;;  %2478 = vmatpush.msra.mxu0 %v1224_v62  ;;  %v10405_v52 = vld [vmem:[#allocation46_spill] sm:$0xff] }
 0x265   : > { %2384 = vmatmul.f32.gmra.mxu3 %v1452_v25 }
 0x266   : > { %4795 = vmatmul.msk.f32.gmra.mxu2 %vm1863_vm9, %v1457_v38  ;;  %1705 = vperm.xlu0 %5029, %v340_v55   ;;  %v1462_v38 = vld [vmem:[#allocation6 + $0xf8] sm:$0xff] }
 0x267   : > { %1710 = vperm.xlu1 %5030, %v341_v37   ;;  %1685 = vperm.xlu2 %5031, %v336_v31   ;;  %v6722_v9 = vpop.permute.xlu0 %1189  ;;  %v6724_v6 = vpop.permute.xlu1 %891 }
 0x268   : > { %v1196_v59 = vsel %vm1193_vm4, %v1182_v54, %v6722_v9  ;;  %v912_v3 = vsel %vm907_vm3, %v10405_v52, %v6724_v6  ;;  %v1178_v23 = vpop.permute.xlu2 %1177  ;;  %2006 = vmatmul.f32.gmra.mxu0 %v1449_v26  ;;  %v1460_v54 = vld [vmem:[#allocation6 + $0xe8] sm:$0xff]  ;;  %v343_v52 = vld [vmem:[%s9978_s5 + $0x98] sm:$0xff] }
 0x269   : > { %v1198_v62 = vsel %vm1193_vm4, %v5919_v47, %v1178_v23  ;;  %v935_v55 = vmul.f32 %v6628_v33, %v912_v3  ;;  %v1229_v37 = vmul.f32 %v6692_v12, %v1196_v59  ;;  %v344_v47 = vld [vmem:[%s9978_s5 + $0xa0] sm:$0xff]  ;;  %v339_v26 = vld [vmem:[%s9978_s5 + $0x78] sm:$0xff]  ;;  %v6749_v59 = vperm.slane %v6241_v10, 2 }
 0x26a   : > { %v1220_v31 = vmul.f32 %v6633_v34, %v1198_v62  ;;  %v6753_v3 = vperm.slane %v6279_v35, 1  ;;  %v1458_v33 = vld [vmem:[#allocation6 + $0xd8] sm:$0xff] }
 0x26b   : > { %2729 = vmatpush.msra.mxu2 %v935_v55  ;;  %2852 = vmatpush.msra.mxu3 %v1229_v37  ;;  %10406 = vst [vmem:[#allocation86_spill] sm:$0xff] %v6749_v59 }
 0x26c   : > { %2143 = vmatmul.f32.gmra.mxu1 %v1462_v38  ;;  %2479 = vmatpush.msra.mxu0 %v1220_v31  ;;  %10407 = vst [vmem:[#allocation80_spill] sm:$0xff] %v6753_v3 }
 0x26d   : > { %2387 = vmatmul.f32.gmra.mxu3 %v1455_v46 }
 0x26e   : > { %4796 = vmatmul.msk.f32.gmra.mxu2 %vm1863_vm9, %v1460_v54  ;;  %1720 = vperm.xlu0 %5029, %v343_v52   ;;  %v1465_v54 = vld [vmem:[#allocation6 + $0x110] sm:$0xff] }
 0x26f   : > { %1725 = vperm.xlu1 %5030, %v344_v47   ;;  %1700 = vperm.xlu2 %5031, %v339_v26   ;;  %v6755_v62 = vpop.permute.xlu0 %1187  ;;  %v6757_v38 = vpop.permute.xlu1 %807 }
 0x270   : > { %v1195_v55 = vsel %vm1193_vm4, %v1180_v57, %v6755_v62  ;;  %v825_v10 = vsel %vm817_vm5, %v6256_v42, %v6757_v38  ;;  %v1094_v37 = vpop.permute.xlu2 %1093  ;;  %2009 = vmatmul.f32.gmra.mxu0 %v1452_v25  ;;  %v1463_v57 = vld [vmem:[#allocation6 + $0x100] sm:$0xff]  ;;  %v346_v42 = vld [vmem:[%s9978_s5 + $0xb0] sm:$0xff] }
 0x271   : > { %v1111_v31 = vsel %vm1103_vm6, %v6294_v8, %v1094_v37  ;;  %v857_v52 = vmul.f32 %v6749_v59, %v825_v10  ;;  %v1225_v47 = vmul.f32 %v6692_v12, %v1195_v55  ;;  %v347_v8 = vld [vmem:[%s9978_s5 + $0xb8] sm:$0xff]  ;;  %v342_v25 = vld [vmem:[%s9978_s5 + $0x90] sm:$0xff] }
 0x272   : > { %v1142_v26 = vmul.f32 %v6753_v3, %v1111_v31 }
 0x273   : > { %2730 = vmatpush.msra.mxu2 %v857_v52  ;;  %2853 = vmatpush.msra.mxu3 %v1225_v47 }
 0x274   : > { %2146 = vmatmul.f32.gmra.mxu1 %v1465_v54  ;;  %2480 = vmatpush.msra.mxu0 %v1142_v26  ;;  %v10408_v54 = vld [vmem:[#allocation76_spill] sm:$0xff] }
 0x275   : > { %2390 = vmatmul.f32.gmra.mxu3 %v1458_v33 }
 0x276   : > { %4797 = vmatmul.msk.f32.gmra.mxu2 %vm1863_vm9, %v1463_v57  ;;  %1735 = vperm.xlu0 %5029, %v346_v42   ;;  %v1468_v57 = vld [vmem:[#allocation6 + $0x128] sm:$0xff] }
 0x277   : > { %1740 = vperm.xlu1 %5030, %v347_v8   ;;  %1715 = vperm.xlu2 %5031, %v342_v25   ;;  %v6782_v55 = vpop.permute.xlu0 %1185  ;;  %v6784_v10 = vpop.permute.xlu1 %805 }
 0x278   : > { %v1194_v31 = vsel %vm1193_vm4, %v1178_v23, %v6782_v55  ;;  %v824_v52 = vsel %vm817_vm5, %v10408_v54, %v6784_v10  ;;  %v1092_v47 = vpop.permute.xlu2 %1091  ;;  %2012 = vmatmul.f32.gmra.mxu0 %v1455_v46  ;;  %v1466_v23 = vld [vmem:[#allocation6 + $0x118] sm:$0xff]  ;;  %v349_v54 = vld [vmem:[%s9978_s5 + $0xc8] sm:$0xff] }
 0x279   : > { %v1110_v26 = vsel %vm1103_vm6, %v6031_v43, %v1092_v47  ;;  %v853_v42 = vmul.f32 %v6749_v59, %v824_v52  ;;  %v1221_v8 = vmul.f32 %v6692_v12, %v1194_v31  ;;  %v350_v43 = vld [vmem:[%s9978_s5 + $0xd0] sm:$0xff]  ;;  %v345_v46 = vld [vmem:[%s9978_s5 + $0xa8] sm:$0xff]  ;;  %v6809_v31 = vperm.slane %v6279_v35, 2 }
 0x27a   : > { %v1138_v25 = vmul.f32 %v6753_v3, %v1110_v26  ;;  %v1464_v12 = vld [vmem:[#allocation6 + $0x108] sm:$0xff] }
 0x27b   : > { %2731 = vmatpush.msra.mxu2 %v853_v42  ;;  %2854 = vmatpush.msra.mxu3 %v1221_v8  ;;  %10409 = vst [vmem:[#allocation62_spill] sm:$0xff] %v6809_v31  ;;  %v10410_v42 = vld [vmem:[#allocation64_spill] sm:$0xff] }
 0x27c   : > { %2149 = vmatmul.f32.gmra.mxu1 %v1468_v57  ;;  %2481 = vmatpush.msra.mxu0 %v1138_v25 }
 0x27d   : > { %2393 = vmatmul.f32.gmra.mxu3 %v1461_v18 }
 0x27e   : > { %4798 = vmatmul.msk.f32.gmra.mxu2 %vm1863_vm9, %v1466_v23  ;;  %1750 = vperm.xlu0 %5029, %v349_v54   ;;  %v1471_v23 = vld [vmem:[#allocation6 + $0x140] sm:$0xff] }
 0x27f   : > { %1755 = vperm.xlu1 %5030, %v350_v43   ;;  %1730 = vperm.xlu2 %5031, %v345_v46   ;;  %v6812_v52 = vpop.permute.xlu0 %1101  ;;  %v6814_v26 = vpop.permute.xlu1 %803 }
 0x280   : > { %v1107_v57 = vsel %vm1103_vm6, %v1094_v37, %v6812_v52  ;;  %v823_v8 = vsel %vm817_vm5, %v10410_v42, %v6814_v26  ;;  %v1090_v35 = vpop.permute.xlu2 %1089  ;;  %2015 = vmatmul.f32.gmra.mxu0 %v1458_v33  ;;  %v1469_v37 = vld [vmem:[#allocation6 + $0x130] sm:$0xff]  ;;  %v352_v42 = vld [vmem:[%s9978_s5 + $0xe0] sm:$0xff] }
 0x281   : > { %v1109_v25 = vsel %vm1103_vm6, %v6017_v14, %v1090_v35  ;;  %v849_v54 = vmul.f32 %v6749_v59, %v823_v8  ;;  %v1143_v43 = vmul.f32 %v6809_v31, %v1107_v57  ;;  %v353_v14 = vld [vmem:[%s9978_s5 + $0xe8] sm:$0xff]  ;;  %v348_v33 = vld [vmem:[%s9978_s5 + $0xc0] sm:$0xff] }
 0x282   : > { %v1134_v46 = vmul.f32 %v6753_v3, %v1109_v25 }
 0x283   : > { %2732 = vmatpush.msra.mxu2 %v849_v54  ;;  %2855 = vmatpush.msra.mxu3 %v1143_v43 }
 0x284   : > { %2152 = vmatmul.f32.gmra.mxu1 %v1471_v23  ;;  %2482 = vmatpush.msra.mxu0 %v1134_v46  ;;  %v10411_v23 = vld [vmem:[#allocation58_spill] sm:$0xff]  ;;  %v1474_v46 = vld [vmem:[#allocation6 + $0x158] sm:$0xff] }
 0x285   : > { %2396 = vmatmul.f32.gmra.mxu3 %v1464_v12 }
 0x286   : > { %4799 = vmatmul.msk.f32.gmra.mxu2 %vm1863_vm9, %v1469_v37  ;;  %1765 = vperm.xlu0 %5029, %v352_v42  }
 0x287   : > { %1770 = vperm.xlu1 %5030, %v353_v14   ;;  %1745 = vperm.xlu2 %5031, %v348_v33   ;;  %v6839_v57 = vpop.permute.xlu0 %1099  ;;  %v6841_v8 = vpop.permute.xlu1 %801  ;;  %v1467_v33 = vld [vmem:[#allocation6 + $0x120] sm:$0xff] }
 0x288   : > { %v1106_v25 = vsel %vm1103_vm6, %v1092_v47, %v6839_v57  ;;  %v822_v54 = vsel %vm817_vm5, %v10411_v23, %v6841_v8  ;;  %2018 = vmatmul.f32.gmra.mxu0 %v1461_v18  ;;  %v1472_v47 = vld [vmem:[#allocation6 + $0x148] sm:$0xff]  ;;  %v355_v23 = vld [vmem:[%s9978_s5 + $0xf8] sm:$0xff]  ;;  %v6866_v18 = vperm.slane %v6281_v40, 2 }
 0x289   : > { %v1088_v43 = vpop.permute.xlu2 %1087  ;;  %v845_v37 = vmul.f32 %v6749_v59, %v822_v54  ;;  %v1139_v42 = vmul.f32 %v6809_v31, %v1106_v25  ;;  %v356_v25 = vld [vmem:[%s9978_s5 + $0x100] sm:$0xff]  ;;  %v361_v59 = vld [vmem:[%s9978_s5 + $0x128] sm:$0xff] }
 0x28a   : > { %v1108_v14 = vsel %vm1103_vm6, %v5887_v36, %v1088_v43  ;;  %v351_v36 = vld [vmem:[%s9978_s5 + $0xd8] sm:$0xff]  ;;  %10412 = vst [vmem:[#allocation46_spill] sm:$0xff] %v6866_v18 }
 0x28b   : > { %v1130_v34 = vmul.f32 %v6753_v3, %v1108_v14  ;;  %2733 = vmatpush.msra.mxu2 %v845_v37  ;;  %2856 = vmatpush.msra.mxu3 %v1139_v42  ;;  %v10413_v37 = vld [vmem:[#allocation56_spill] sm:$0xff]  ;;  %v1477_v14 = vld [vmem:[#allocation6 + $0x170] sm:$0xff] }
 0x28c   : > { %2155 = vmatmul.f32.gmra.mxu1 %v1474_v46  ;;  %v1483_v3 = vld [vmem:[#allocation6 + $0x1a0] sm:$0xff] }
 0x28d   : > { %2483 = vmatpush.msra.mxu0 %v1130_v34  ;;  %2399 = vmatmul.f32.gmra.mxu3 %v1467_v33 }
 0x28e   : > { %4800 = vmatmul.msk.f32.gmra.mxu2 %vm1863_vm9, %v1472_v47  ;;  %1780 = vperm.xlu0 %5029, %v355_v23  }
 0x28f   : > { %1785 = vperm.xlu1 %5030, %v356_v25   ;;  %1760 = vperm.xlu2 %5031, %v351_v36   ;;  %v6869_v54 = vpop.permute.xlu0 %1097  ;;  %v6871_v46 = vpop.permute.xlu1 %715  ;;  %v10415_v25 = vld [vmem:[#allocation43_spill] sm:$0xff]  ;;  %v1475_v36 = vld [vmem:[#allocation6 + $0x160] sm:$0xff] }
 0x290   : > { %2484 = vmatpush.msra.mxu0 %v10413_v37  ;;  %v1105_v42 = vsel %vm1103_vm6, %v1090_v35, %v6869_v54  ;;  %v735_v40 = vsel %vm727_vm7, %v6262_v30, %v6871_v46  ;;  %v10416_v37 = vld [vmem:[#allocation39_spill] sm:$0xff]  ;;  %v358_v30 = vld [vmem:[%s9978_s5 + $0x110] sm:$0xff] }
 0x291   : > { %v6881_v34 = vpop.permute.xlu2 %711  ;;  %v767_v47 = vmul.f32 %v6866_v18, %v735_v40  ;;  %v1135_v23 = vmul.f32 %v6809_v31, %v1105_v42  ;;  %2021 = vmatmul.f32.gmra.mxu0 %v1464_v12  ;;  %v1470_v35 = vld [vmem:[#allocation6 + $0x138] sm:$0xff]  ;;  %v354_v42 = vld [vmem:[%s9978_s5 + $0xf0] sm:$0xff] }
 0x292   : > { %10414 = vst [vmem:[#allocation76_spill] sm:$0xff] %v6881_v34  ;;  %2485 = vmatpush.msra.mxu0 %v10415_v25  ;;  %v359_v40 = vld [vmem:[%s9978_s5 + $0x118] sm:$0xff] }
 0x293   : > { %2734 = vmatpush.msra.mxu2 %v767_v47  ;;  %2857 = vmatpush.msra.mxu3 %v1135_v23  ;;  %v10417_v12 = vld [vmem:[#allocation35_spill] sm:$0xff] }
 0x294   : > { %2486 = vmatpush.msra.mxu0 %v10416_v37  ;;  %2158 = vmatmul.f32.gmra.mxu1 %v1477_v14 }
 0x295   : > { %2402 = vmatmul.f32.gmra.mxu3 %v1470_v35 }
 0x296   : > { %2487 = vmatpush.msra.mxu0 %v10417_v12  ;;  %4801 = vmatmul.msk.f32.gmra.mxu2 %vm1863_vm9, %v1475_v36 }
 0x297   : > { %1795 = vperm.xlu0 %5029, %v358_v30   ;;  %v6898_v14 = vpop.permute.xlu0 %1095  ;;  %1800 = vperm.xlu1 %5030, %v359_v40   ;;  %v1480_v30 = vld [vmem:[#allocation6 + $0x188] sm:$0xff] }
 0x298   : > { %1775 = vperm.xlu2 %5031, %v354_v42   ;;  %v1104_v47 = vsel %vm1103_vm6, %v1088_v43, %v6898_v14  ;;  %v6903_v23 = vpop.permute.xlu1 %713  ;;  %v1478_v42 = vld [vmem:[#allocation6 + $0x178] sm:$0xff]  ;;  %v733_v43 = vsel %vm727_vm7, %v6306_v48, %v6881_v34 }
 0x299   : > { %v734_v25 = vsel %vm727_vm7, %v6091_v28, %v6903_v23  ;;  %v6909_v37 = vpop.f32.mrf.mxu1  ;;  %v6911_v36 = vpop.permute.xlu2 %1361  ;;  %v1131_v12 = vmul.f32 %v6809_v31, %v1104_v47  ;;  %2024 = vmatmul.f32.gmra.mxu0 %v1467_v33  ;;  %v6919_v28 = vld [vmem:[#allocation6 + $0x150] sm:$0xff]  ;;  %v357_v33 = vld [vmem:[%s9978_s5 + $0x108] sm:$0xff]  ;;  %v759_v48 = vmul.f32 %v6866_v18, %v733_v43 }
 0x29a   : > { %v763_v40 = vmul.f32 %v6866_v18, %v734_v25  ;;  %v362_v47 = vld [vmem:[%s9978_s5 + $0x130] sm:$0xff] }
 0x29b   : > { %2858 = vmatpush.msra.mxu3 %v1131_v12  ;;  %v10418_v25 = vld [vmem:[#allocation97_spill] sm:$0xff] }
 0x29c   : > { %2161 = vmatmul.f32.gmra.mxu1 %v1480_v30  ;;  %2735 = vmatpush.msra.mxu2 %v763_v40  ;;  %v6935_v30 = vperm.slane %v10418_v25, 2  ;;  %v6938_v12 = vperm.slane %v10418_v25, 1 }
 0x29d   : > { %2859 = vmatpush.msra.mxu3 %v6064_v22  ;;  %v6943_v22 = vperm.slane %v10418_v25, 3 }
 0x29e   : > { %4802 = vmatmul.msk.f32.gmra.mxu2 %vm1863_vm9, %v1478_v42  ;;  %2405 = vmatmul.f32.gmra.mxu3 %v6919_v28  ;;  %10419 = vst [vmem:[#allocation64_spill] sm:$0xff] %v6935_v30  ;;  %v10422_v42 = vld [vmem:[#allocation84_spill] sm:$0xff] }
 0x29f   : > { %1810 = vperm.xlu0 %5029, %v361_v59   ;;  %1815 = vperm.xlu1 %5030, %v362_v47   ;;  %10420 = vst [vmem:[#allocation58_spill] sm:$0xff] %v6938_v12  ;;  %v1299_v59 = vsel %vm1283_vm2, %v6598_v20, %v10422_v42  ;;  %v5072_v42 = vld [vmem:[#allocation3 + $0x1c] sm:$0xf] }
 0x2a0   : > { %1790 = vperm.xlu2 %5031, %v357_v33   ;;  %v1364_v40 = vpop.permute.xlu0 %1363  ;;  %v6940_v31 = vpop.permute.xlu1 %709  ;;  %10421 = vst [vmem:[#allocation56_spill] sm:$0xff] %v6943_v22  ;;  %2736 = vmatpush.msra.mxu2 %v759_v48  ;;  %v6966_v16 = vperm.slane %v5072_v42, 3 }
 0x2a1   : > { %v1381_v43 = vsel %vm1373_vm8, %v6346_v5, %v1364_v40  ;;  %v732_v47 = vsel %vm727_vm7, %v6484_v41, %v6940_v31  ;;  %v6956_v33 = vpop.f32.mrf.mxu1  ;;  %2860 = vmatpush.msra.mxu3 %v6046_v0  ;;  %v1372_v25 = vpop.permute.xlu2 %1371  ;;  %2027 = vmatmul.f32.gmra.mxu0 %v1470_v35  ;;  %v1481_v0 = vld [vmem:[#allocation6 + $0x190] sm:$0xff]  ;;  %v1380_v35 = vsel %vm1373_vm8, %v6141_v11, %v6911_v36 }
 0x2a2   : > { %10423 = vst [vmem:[#allocation43_spill] sm:$0xff] %v6956_v33  ;;  %v1412_v34 = vmul.f32 %v6938_v12, %v1381_v43  ;;  %v1377_v20 = vsel %vm1373_vm8, %v1364_v40, %v1372_v25  ;;  %v1389_v5 = vsel %vm1373_vm8, %v1372_v25, %v6223_v24  ;;  %v755_v48 = vmul.f32 %v6866_v18, %v732_v47  ;;  %v6971_v40 = vld [vmem:[#allocation6 + $0x168] sm:$0xff] }
 0x2a3   : > { %10424 = vst [vmem:[#allocation39_spill] sm:$0xff] %v6966_v16  ;;  %v1413_v41 = vmul.f32 %v6935_v30, %v1377_v20  ;;  %2861 = vmatpush.msra.mxu3 %v6061_v63  ;;  %v1414_v43 = vmul.f32 %v6943_v22, %v1389_v5  ;;  %v10425_v33 = vld [vmem:[#allocation73_spill] sm:$0xff]  ;;  %v1324_v47 = vmul.f32 %v6966_v16, %v1299_v59  ;;  %v364_v63 = vld [vmem:[%s9978_s5 + $0x140] sm:$0xff] }
 0x2a4   : > { %2164 = vmatmul.f32.gmra.mxu1 %v1483_v3  ;;  %2737 = vmatpush.msra.mxu2 %v755_v48  ;;  %v1298_v24 = vsel %vm1283_vm2, %v6536_v32, %v10425_v33  ;;  %v365_v32 = vld [vmem:[%s9978_s5 + $0x148] sm:$0xff]  ;;  %v360_v3 = vld [vmem:[%s9978_s5 + $0x120] sm:$0xff]  ;;  %v1408_v11 = vmul.f32 %v6938_v12, %v1380_v35 }
 0x2a5   : > { %2609 = vmatpush.msra.mxu1 %v1412_v34  ;;  %2862 = vmatpush.msra.mxu3 %v6079_v4  ;;  %v10426_v59 = vld [vmem:[#allocation55_spill] sm:$0xff]  ;;  %v1320_v34 = vmul.f32 %v6966_v16, %v1298_v24  ;;  %v10427_v20 = vld [vmem:[#allocation49_spill] sm:$0xff]  ;;  %v5073_v24 = vld [vmem:[#allocation3 + $0x18] sm:$0xf] }
 0x2a6   : > { %2984 = vmatpush.msrb.mxu0 %v1413_v41  ;;  %4803 = vmatmul.msk.f32.gmra.mxu2 %vm1863_vm9, %v1481_v0  ;;  %v1297_v4 = vsel %vm1283_vm2, %v6637_v2, %v10426_v59  ;;  %v1296_v5 = vsel %vm1283_vm2, %v6665_v39, %v10427_v20  ;;  %v1486_v41 = vld [vmem:[#allocation6 + $0x1b8] sm:$0xff]  ;;  %v10429_v35 = vld [vmem:[#allocation92_spill] sm:$0xff]  ;;  %v1001_v59 = vsel %vm997_vm1, %v6552_v29, %v6348_v51 }
 0x2a7   : > { %2408 = vmatmul.f32.gmra.mxu3 %v6971_v40  ;;  %3222 = vmatpush.msrb.mxu2 %v1324_v47  ;;  %v7020_v47 = vperm.slane %v5073_v24, 3  ;;  %v368_v29 = vld [vmem:[%s9978_s5 + $0x160] sm:$0xff] }
 0x2a8   : > { %3359 = vmatpush.msrb.mxu3 %v1414_v43  ;;  %1825 = vperm.xlu0 %5029, %v364_v63   ;;  %v7000_v33 = vpop.permute.xlu0 %1359  ;;  %v7002_v25 = vpop.permute.xlu1 %1357  ;;  %v1316_v43 = vmul.f32 %v6966_v16, %v1297_v4  ;;  %v1312_v63 = vmul.f32 %v6966_v16, %v1296_v5  ;;  %v10430_v4 = vld [vmem:[#allocation72_spill] sm:$0xff]  ;;  %v10432_v5 = vld [vmem:[#allocation70_spill] sm:$0xff] }
 0x2a9   : > { %1830 = vperm.xlu1 %5030, %v365_v32   ;;  %1805 = vperm.xlu2 %5031, %v360_v3   ;;  %v1379_v2 = vsel %vm1373_vm8, %v5989_v50, %v7000_v33  ;;  %v7012_v48 = vpop.f32.mrf.mxu1  ;;  %v7014_v42 = vpop.f32.mrf.mxu2  ;;  %10428 = vst [vmem:[#allocation35_spill] sm:$0xff] %v7020_v47  ;;  %v1209_v50 = vsel %vm1193_vm4, %v6695_v45, %v10429_v35  ;;  %v1484_v32 = vld [vmem:[#allocation6 + $0x1a8] sm:$0xff]  ;;  %v7028_v3 = vld [vmem:[#allocation6 + $0x180] sm:$0xff] }
 0x2aa   : > { %2610 = vmatpush.msra.mxu1 %v1408_v11  ;;  %3223 = vmatpush.msrb.mxu2 %v1320_v34  ;;  %v7016_v0 = vpop.permute.xlu2 %1365  ;;  %v1404_v39 = vmul.f32 %v6938_v12, %v1379_v2  ;;  %v1208_v11 = vsel %vm1193_vm4, %v6722_v9, %v10430_v4  ;;  %v1378_v45 = vsel %vm1373_vm8, %v6357_v27, %v7002_v25  ;;  %v5074_v34 = vld [vmem:[#allocation3 + $0xc] sm:$0xf]  ;;  %v363_v9 = vld [vmem:[%s9978_s5 + $0x138] sm:$0xff] }
 0x2ab   : > { %2030 = vmatmul.f32.gmra.mxu0 %v6919_v28  ;;  %v367_v28 = vld [vmem:[%s9978_s5 + $0x158] sm:$0xff]  ;;  %v7045_v20 = vperm.slane %v5074_v34, 3  ;;  %v1234_v51 = vmul.f32 %v7020_v47, %v1209_v50  ;;  %v1000_v27 = vsel %vm997_vm1, %v6538_v49, %v6126_v15  ;;  %v999_v2 = vsel %vm997_vm1, %v6554_v17, %v10432_v5  ;;  %v10435_v50 = vld [vmem:[#allocation52_spill] sm:$0xff] }
 0x2ac   : > { %3224 = vmatpush.msrb.mxu2 %v1316_v43  ;;  %2167 = vmatmul.f32.gmra.mxu1 %v1486_v41  ;;  %v10433_v41 = vld [vmem:[#allocation69_spill] sm:$0xff]  ;;  %v1400_v15 = vmul.f32 %v6938_v12, %v1378_v45  ;;  %v1230_v49 = vmul.f32 %v7020_v47, %v1208_v11  ;;  %v1489_v45 = vld [vmem:[#allocation6 + $0x1d0] sm:$0xff] }
 0x2ad   : > { %2611 = vmatpush.msra.mxu1 %v1404_v39  ;;  %10431 = vst [vmem:[#allocation97_spill] sm:$0xff] %v7045_v20  ;;  %v1207_v43 = vsel %vm1193_vm4, %v6755_v62, %v10433_v41  ;;  %v1038_v24 = vmul.f32 %v7045_v20, %v1001_v59  ;;  %v1206_v62 = vsel %vm1193_vm4, %v6782_v55, %v10435_v50 }
 0x2ae   : > { %3225 = vmatpush.msrb.mxu2 %v1312_v63  ;;  %v1226_v55 = vmul.f32 %v7020_v47, %v1207_v43  ;;  %v1034_v41 = vmul.f32 %v7045_v20, %v1000_v27  ;;  %v1030_v50 = vmul.f32 %v7045_v20, %v999_v2  ;;  %v10441_v27 = vld [vmem:[#allocation67_spill] sm:$0xff]  ;;  %v370_v2 = vld [vmem:[%s9978_s5 + $0x170] sm:$0xff] }
 0x2af   : > { %4804 = vmatmul.msk.f32.gmra.mxu2 %vm1863_vm9, %v1484_v32  ;;  %2411 = vmatmul.f32.gmra.mxu3 %v7028_v3  ;;  %v7068_v39 = vpop.f32.mrf.mxu3  ;;  %v10436_v32 = vld [vmem:[#allocation79_spill] sm:$0xff] }
 0x2b0   : > { %10434 = vst [vmem:[#allocation84_spill] sm:$0xff] %v7068_v39  ;;  %3226 = vmatpush.msrb.mxu2 %v1234_v51  ;;  %1840 = vperm.xlu0 %5029, %v367_v28   ;;  %v1370_v17 = vpop.permute.xlu0 %1369  ;;  %v1368_v35 = vpop.permute.xlu1 %1367 }
 0x2b1   : > { %1845 = vperm.xlu1 %5030, %v368_v29   ;;  %1820 = vperm.xlu2 %5031, %v363_v9   ;;  %v1376_v63 = vsel %vm1373_vm8, %v6911_v36, %v1370_v17  ;;  %v1388_v59 = vsel %vm1373_vm8, %v1370_v17, %v10436_v32  ;;  %v7083_v4 = vpop.f32.mrf.mxu1  ;;  %v7085_v11 = vpop.f32.mrf.mxu2  ;;  %v5075_v36 = vld [vmem:[#allocation3 + $0x14] sm:$0xf]  ;;  %v10439_v9 = vld [vmem:[#allocation91_spill] sm:$0xff]  ;;  %v1487_v17 = vld [vmem:[#allocation6 + $0x1c0] sm:$0xff] }
 0x2b2   : > { %2612 = vmatpush.msra.mxu1 %v1400_v15  ;;  %3227 = vmatpush.msrb.mxu2 %v1230_v49  ;;  %v7087_v28 = vpop.permute.xlu2 %396  ;;  %v1409_v34 = vmul.f32 %v6935_v30, %v1376_v63  ;;  %v1410_v51 = vmul.f32 %v6943_v22, %v1388_v59  ;;  %v7092_v29 = vperm.slane %v5075_v36, 3  ;;  %v1119_v5 = vsel %vm1103_vm6, %v6812_v52, %v10439_v9  ;;  %v10440_v15 = vld [vmem:[#allocation63_spill] sm:$0xff]  ;;  %v5076_v63 = vld [vmem:[#allocation3 + $0x8] sm:$0xf] }
 0x2b3   : > { %10437 = vst [vmem:[#allocation73_spill] sm:$0xff] %v7087_v28  ;;  %2033 = vmatmul.f32.gmra.mxu0 %v6971_v40  ;;  %v998_v43 = vsel %vm997_vm1, %v6600_v60, %v10440_v15  ;;  %v1222_v49 = vmul.f32 %v7020_v47, %v1206_v62  ;;  %v7106_v52 = vld [vmem:[#allocation6 + $0x198] sm:$0xff]  ;;  %v1375_v40 = vsel %vm1373_vm8, %v7000_v33, %v1368_v35  ;;  %v7120_v32 = vperm.slane %v5076_v63, 3  ;;  %v10443_v59 = vld [vmem:[#allocation44_spill] sm:$0xff] }
 0x2b4   : > { %10438 = vst [vmem:[#allocation55_spill] sm:$0xff] %v7092_v29  ;;  %3097 = vmatpush.msrb.mxu1 %v1038_v24  ;;  %3228 = vmatpush.msrb.mxu2 %v1226_v55  ;;  %v1387_v60 = vsel %vm1373_vm8, %v1368_v35, %v10441_v27  ;;  %v1144_v62 = vmul.f32 %v7092_v29, %v1119_v5  ;;  %v1490_v63 = vld [vmem:[#allocation6 + $0x1d8] sm:$0xff] }
 0x2b5   : > { %2170 = vmatmul.f32.gmra.mxu1 %v1489_v45  ;;  %2985 = vmatpush.msrb.mxu0 %v1409_v34  ;;  %v7108_v24 = vpop.f32.mrf.mxu0  ;;  %10442 = vst [vmem:[#allocation49_spill] sm:$0xff] %v7120_v32  ;;  %v911_v33 = vsel %vm907_vm3, %v6639_v7, %v10443_v59  ;;  %v10444_v45 = vld [vmem:[#allocation83_spill] sm:$0xff]  ;;  %v1026_v55 = vmul.f32 %v7045_v20, %v998_v43 }
 0x2b6   : > { %3098 = vmatpush.msrb.mxu1 %v1034_v41  ;;  %3229 = vmatpush.msrb.mxu2 %v1222_v49  ;;  %v1118_v35 = vsel %vm1103_vm6, %v6839_v57, %v10444_v45  ;;  %v371_v34 = vld [vmem:[%s9978_s5 + $0x178] sm:$0xff]  ;;  %v1374_v7 = vsel %vm1373_vm8, %v7002_v25, %v7016_v0  ;;  %v1386_v57 = vsel %vm1373_vm8, %v7016_v0, %v6446_v1  ;;  %v5077_v45 = vld [vmem:[#allocation3 + $0x4] sm:$0xf] }
 0x2b7   : > { %3360 = vmatpush.msrb.mxu3 %v1410_v51  ;;  %4805 = vmatmul.msk.f32.gmra.mxu2 %vm1863_vm9, %v1487_v17  ;;  %v366_v51 = vld [vmem:[%s9978_s5 + $0x150] sm:$0xff]  ;;  %v7138_v36 = vpop.f32.mrf.mxu3  ;;  %v910_v41 = vsel %vm907_vm3, %v6667_v21, %v10378_v44  ;;  %v1405_v25 = vmul.f32 %v6935_v30, %v1375_v40  ;;  %v1406_v15 = vmul.f32 %v6943_v22, %v1387_v60 }
 0x2b8   : > { %3099 = vmatpush.msrb.mxu1 %v1030_v50  ;;  %10445 = vst [vmem:[#allocation92_spill] sm:$0xff] %v7138_v36  ;;  %2414 = vmatmul.f32.gmra.mxu3 %v7106_v52  ;;  %v7149_v9 = vpop.permute.xlu0 %386  ;;  %v7151_v5 = vpop.permute.xlu1 %391  ;;  %v10448_v0 = vld [vmem:[#allocation66_spill] sm:$0xff]  ;;  %v948_v17 = vmul.f32 %v7120_v32, %v911_v33  ;;  %v1140_v44 = vmul.f32 %v7092_v29, %v1118_v35  ;;  %v7193_v35 = vperm.slane %v5077_v45, 3 }
 0x2b9   : > { %3230 = vmatpush.msrb.mxu2 %v1144_v62  ;;  %10446 = vst [vmem:[#allocation72_spill] sm:$0xff] %v7149_v9  ;;  %1855 = vperm.xlu0 %5029, %v370_v2   ;;  %v7159_v43 = vpop.f32.mrf.mxu1  ;;  %v7161_v1 = vpop.f32.mrf.mxu2  ;;  %v1117_v49 = vsel %vm1103_vm6, %v6869_v54, %v10448_v0  ;;  %v909_v50 = vsel %vm907_vm3, %v6697_v13, %v10380_v53  ;;  %v10449_v54 = vld [vmem:[#allocation60_spill] sm:$0xff]  ;;  %v1492_v2 = vld [vmem:[#allocation6 + $0x1e8] sm:$0xff]  ;;  %v7191_v33 = vld [vmem:[#allocation6 + $0x1b0] sm:$0xff] }
 0x2ba   : > { %10447 = vst [vmem:[#allocation70_spill] sm:$0xff] %v7151_v5  ;;  %3100 = vmatpush.msrb.mxu1 %v1026_v55  ;;  %1860 = vperm.xlu1 %5030, %v371_v34   ;;  %v7169_v21 = vpop.permute.xlu2 %411  ;;  %v1401_v40 = vmul.f32 %v6935_v30, %v1374_v7  ;;  %v1402_v27 = vmul.f32 %v6943_v22, %v1386_v57  ;;  %v10451_v55 = vld [vmem:[#allocation88_spill] sm:$0xff]  ;;  %v10454_v57 = vld [vmem:[#allocation26_spill] sm:$0xff]  ;;  %v10491_v22 = vld [vmem:[#allocation61_spill] sm:$0xff] }
 0x2bb   : > { %1835 = vperm.xlu2 %5031, %v366_v51   ;;  %2986 = vmatpush.msrb.mxu0 %v1405_v25  ;;  %v1116_v60 = vsel %vm1103_vm6, %v6898_v14, %v10449_v54  ;;  %v944_v62 = vmul.f32 %v7120_v32, %v910_v41  ;;  %v908_v53 = vsel %vm907_vm3, %v6724_v6, %v10381_v58  ;;  %v1503_v9 = vld [vmem:[#allocation6 + $0x240] sm:$0xff] }
 0x2bc   : > { %3361 = vmatpush.msrb.mxu3 %v1406_v15  ;;  %3101 = vmatpush.msrb.mxu1 %v948_v17  ;;  %v1136_v13 = vmul.f32 %v7092_v29, %v1117_v49  ;;  %v940_v14 = vmul.f32 %v7120_v32, %v909_v50  ;;  %10450 = vst [vmem:[#allocation69_spill] sm:$0xff] %v7193_v35 }
 0x2bd   : > { %3231 = vmatpush.msrb.mxu2 %v1140_v44  ;;  %2987 = vmatpush.msrb.mxu0 %v1401_v40  ;;  %v7187_v59 = vpop.f32.mrf.mxu0  ;;  %v821_v58 = vsel %vm817_vm5, %v6757_v38, %v10451_v55  ;;  %v1132_v6 = vmul.f32 %v7092_v29, %v1116_v60  ;;  %v936_v51 = vmul.f32 %v7120_v32, %v908_v53  ;;  %v1495_v40 = vld [vmem:[#allocation6 + $0x200] sm:$0xff]  ;;  %v10458_v60 = vld [vmem:[#allocation50_spill] sm:$0xff]  ;;  %v1500_v32 = vld [vmem:[#allocation6 + $0x228] sm:$0xff] }
 0x2be   : > { %3362 = vmatpush.msrb.mxu3 %v1402_v27  ;;  %2036 = vmatmul.f32.gmra.mxu0 %v7028_v3  ;;  %v369_v3 = vld [vmem:[%s9978_s5 + $0x168] sm:$0xff]  ;;  %v820_v38 = vsel %vm817_vm5, %v6784_v10, %v10385_v19  ;;  %v7215_v41 = vadd.f32 %v10454_v57, %v7169_v21  ;;  %v858_v0 = vmul.f32 %v7193_v35, %v821_v58 }
 0x2bf   : > { %3102 = vmatpush.msrb.mxu1 %v944_v62  ;;  %3232 = vmatpush.msrb.mxu2 %v1136_v13  ;;  %v7203_v34 = vpop.f32.mrf.mxu3  ;;  %v819_v19 = vsel %vm817_vm5, %v6814_v26, %v10386_v56  ;;  %v10456_v10 = vld [vmem:[#allocation68_spill] sm:$0xff]  ;;  %v854_v50 = vmul.f32 %v7193_v35, %v820_v38  ;;  %v1493_v56 = vld [vmem:[#allocation6 + $0x1f0] sm:$0xff]  ;;  %v10468_v57 = vld [vmem:[#allocation29_spill] sm:$0xff]  ;;  %v7390_v16 = vadd.f32 %v10491_v22, %v7169_v21 }
 0x2c0   : > { %2173 = vmatmul.f32.gmra.mxu1 %v1492_v2  ;;  %10452 = vst [vmem:[#allocation52_spill] sm:$0xff] %v7203_v34  ;;  %4806 = vmatmul.msk.f32.gmra.mxu2 %vm1863_vm9, %v1490_v63  ;;  %v7207_v7 = vpop.permute.xlu0 %401  ;;  %v10457_v27 = vld [vmem:[#allocation40_spill] sm:$0xff]  ;;  %v850_v62 = vmul.f32 %v7193_v35, %v819_v19  ;;  %v5078_v2 = vld [vmem:[#allocation3] sm:$0xf]  ;;  %v10460_v13 = vld [vmem:[#allocation78_spill] sm:$0xff] }
 0x2c1   : > { %3103 = vmatpush.msrb.mxu1 %v940_v14  ;;  %10453 = vst [vmem:[#allocation79_spill] sm:$0xff] %v7207_v7  ;;  %3233 = vmatpush.msrb.mxu2 %v1132_v6  ;;  %v7218_v25 = vpop.permute.xlu1 %406  ;;  %v7220_v15 = vpop.f32.mrf.mxu1  ;;  %v818_v54 = vsel %vm817_vm5, %v6841_v8, %v10457_v27  ;;  %v7247_v53 = vperm.slane %v5078_v2, 3  ;;  %v731_v8 = vsel %vm727_vm7, %v6871_v46, %v10460_v13  ;;  %v10461_v63 = vld [vmem:[#allocation42_spill] sm:$0xff]  ;;  %v10464_v46 = vld [vmem:[#allocation85_spill] sm:$0xff]  ;;  %v10471_v27 = vld [vmem:[#allocation76_spill] sm:$0xff] }
 0x2c2   : > { %2417 = vmatmul.f32.gmra.mxu3 %v7191_v33  ;;  %v7223_v49 = vpop.f32.mrf.mxu2  ;;  %v7225_v17 = vpop.permute.xlu2 %1685  ;;  %3490 = vrot.lane.b32.xlu0 %v7215_v41, %s5457_s11  ;;  %v846_v55 = vmul.f32 %v7193_v35, %v818_v54  ;;  %v10467_v38 = vld [vmem:[#allocation38_spill] sm:$0xff]  ;;  %v1496_v2 = vld [vmem:[#allocation6 + $0x208] sm:$0xff] }
 0x2c3   : > { %3104 = vmatpush.msrb.mxu1 %v936_v51  ;;  %1850 = vperm.xlu2 %5031, %v369_v3   ;;  %10455 = vst [vmem:[#allocation91_spill] sm:$0xff] %v7225_v17  ;;  %v1990_v44 = vadd.f32 %v7108_v24, %v7225_v17  ;;  %v7245_v24 = vld [vmem:[#allocation6 + $0x1c8] sm:$0xff]  ;;  %v730_v3 = vsel %vm727_vm7, %v6903_v23, %v10464_v46 }
 0x2c4   : > { %3234 = vmatpush.msrb.mxu2 %v10456_v10  ;;  %10459 = vst [vmem:[#allocation63_spill] sm:$0xff] %v7247_v53  ;;  %v768_v23 = vmul.f32 %v7247_v53, %v731_v8  ;;  %v1491_v8 = vld [vmem:[#allocation6 + $0x1e0] sm:$0xff] }
 0x2c5   : > { %3105 = vmatpush.msrb.mxu1 %v858_v0  ;;  %v2115_v26 = vadd.f32 %v6909_v37, %v1990_v44  ;;  %v1995_v14 = vpop.f32.mrf.mxu0 }
 0x2c6   : > { %3235 = vmatpush.msrb.mxu2 %v10458_v60  ;;  %2039 = vmatmul.f32.gmra.mxu0 %v7106_v52  ;;  %v10462_v52 = vld [vmem:[#allocation23_spill] sm:$0xff]  ;;  %v764_v60 = vmul.f32 %v7247_v53, %v730_v3 }
 0x2c7   : > { %3106 = vmatpush.msrb.mxu1 %v854_v50  ;;  %v7255_v37 = vadd.f32 %v7014_v42, %v2115_v26  ;;  %v7259_v45 = vadd.f32 %v10462_v52, %v7218_v25  ;;  %v10465_v42 = vld [vmem:[#allocation24_spill] sm:$0xff]  ;;  %v10472_v26 = vld [vmem:[#allocation57_spill] sm:$0xff] }
 0x2c8   : > { %3236 = vmatpush.msrb.mxu2 %v10461_v63  ;;  %2176 = vmatmul.f32.gmra.mxu1 %v1495_v40  ;;  %v7263_v58 = vpop.permute.xlu0 %416  ;;  %v7265_v6 = vpop.f32.mrf.mxu3  ;;  %v7273_v51 = vadd.f32 %v10465_v42, %v7218_v25  ;;  %v10470_v40 = vld [vmem:[#allocation75_spill] sm:$0xff]  ;;  %v10473_v52 = vld [vmem:[#allocation32_spill] sm:$0xff]  ;;  %10492 = vst [vmem:[#allocation24_spill] sm:$0xff] %v7390_v16 }
 0x2c9   : > { %3107 = vmatpush.msrb.mxu1 %v850_v62  ;;  %4807 = vmatmul.msk.f32.gmra.mxu2 %vm1863_vm9, %v1493_v56  ;;  %10463 = vst [vmem:[#allocation67_spill] sm:$0xff] %v7265_v6  ;;  %v7279_v0 = vadd.f32 %v10468_v57, %v7263_v58  ;;  %v7281_v19 = vpop.permute.xlu1 %421  ;;  %v7283_v10 = vpop.f32.mrf.mxu1  ;;  %v729_v54 = vsel %vm727_vm7, %v10471_v27, %v10470_v40  ;;  %v1498_v56 = vld [vmem:[#allocation6 + $0x218] sm:$0xff]  ;;  %v10478_v57 = vld [vmem:[#allocation33_spill] sm:$0xff] }
 0x2ca   : > { %10466 = vst [vmem:[#allocation44_spill] sm:$0xff] %v7273_v51  ;;  %3237 = vmatpush.msrb.mxu2 %v10467_v38  ;;  %2420 = vmatmul.f32.gmra.mxu3 %v7245_v24  ;;  %v7288_v44 = vpop.f32.mrf.mxu2  ;;  %v7290_v50 = vpop.permute.xlu2 %1700  ;;  %v728_v62 = vsel %vm727_vm7, %v6940_v31, %v10472_v26  ;;  %v760_v13 = vmul.f32 %v7247_v53, %v729_v54  ;;  %v10476_v42 = vld [vmem:[#allocation27_spill] sm:$0xff] }
 0x2cb   : > { %3108 = vmatpush.msrb.mxu1 %v846_v55  ;;  %3488 = vrot.lane.b32.xlu2 %v7259_v45, %s5457_s11  ;;  %10469 = vst [vmem:[#allocation83_spill] sm:$0xff] %v7290_v50  ;;  %v7309_v55 = vadd.f32 %v10473_v52, %v7281_v19  ;;  %v756_v46 = vmul.f32 %v7247_v53, %v728_v62 }
 0x2cc   : > { %3496 = vrot.lane.b32.xlu0 %v7273_v51, %s5457_s11  ;;  %3492 = vrot.lane.b32.xlu1 %v7279_v0, %s5457_s11  ;;  %v7320_v38 = vadd.f32 %v10476_v42, %v7169_v21 }
 0x2cd   : > { %3109 = vmatpush.msrb.mxu1 %v768_v23  ;;  %v1998_v63 = vpop.f32.mrf.mxu0  ;;  %v7324_v23 = vadd.f32 %v10478_v57, %v7281_v19  ;;  %v10482_v57 = vld [vmem:[#allocation30_spill] sm:$0xff] }
 0x2ce   : > { %2042 = vmatmul.f32.gmra.mxu0 %v7191_v33  ;;  %v1999_v31 = vadd.f32 %v1998_v63, %v7290_v50  ;;  %10477 = vst [vmem:[#allocation88_spill] sm:$0xff] %v7320_v38  ;;  %v1501_v63 = vld [vmem:[#allocation6 + $0x230] sm:$0xff] }
 0x2cf   : > { %3110 = vmatpush.msrb.mxu1 %v764_v60 }
 0x2d0   : > { %2179 = vmatmul.f32.gmra.mxu1 %v1498_v56  ;;  %v7314_v3 = vpop.permute.xlu0 %1690  ;;  %v7316_v33 = vpop.f32.mrf.mxu3  ;;  %v2124_v60 = vadd.f32 %v7083_v4, %v1999_v31  ;;  %v1499_v4 = vld [vmem:[#allocation6 + $0x220] sm:$0xff] }
 0x2d1   : > { %3111 = vmatpush.msrb.mxu1 %v760_v13  ;;  %4808 = vmatmul.msk.f32.gmra.mxu2 %vm1863_vm9, %v1496_v2  ;;  %10474 = vst [vmem:[#allocation66_spill] sm:$0xff] %v7314_v3  ;;  %v1993_v40 = vadd.f32 %v7187_v59, %v7314_v3  ;;  %v7328_v27 = vpop.permute.xlu1 %1695  ;;  %v7330_v54 = vpop.f32.mrf.mxu1  ;;  %v10481_v59 = vld [vmem:[#allocation43_spill] sm:$0xff] }
 0x2d2   : > { %10475 = vst [vmem:[#allocation60_spill] sm:$0xff] %v7316_v33  ;;  %2423 = vmatmul.f32.gmra.mxu3 %v1491_v8  ;;  %v1996_v56 = vadd.f32 %v1995_v14, %v7328_v27  ;;  %v2254_v26 = vpop.f32.mrf.mxu2  ;;  %v7336_v62 = vpop.permute.xlu2 %1715  ;;  %v7344_v13 = vadd.f32 %v7223_v49, %v2124_v60 }
 0x2d3   : > { %10479 = vst [vmem:[#allocation26_spill] sm:$0xff] %v7328_v27  ;;  %3112 = vmatpush.msrb.mxu1 %v756_v46  ;;  %3494 = vrot.lane.b32.xlu2 %v7309_v55, %s5457_s11  ;;  %v2118_v2 = vadd.f32 %v10481_v59, %v1993_v40  ;;  %v1494_v46 = vld [vmem:[#allocation6 + $0x1f8] sm:$0xff]  ;;  %v7356_v40 = vadd.f32 %v10482_v57, %v7263_v58  ;;  %v1504_v57 = vld [vmem:[#allocation6 + $0x248] sm:$0xff] }
 0x2d4   : > { %10480 = vst [vmem:[#allocation68_spill] sm:$0xff] %v7336_v62  ;;  %3502 = vrot.lane.b32.xlu0 %v7324_v23, %s5457_s11  ;;  %3498 = vrot.lane.b32.xlu1 %v7320_v38, %s5457_s11  ;;  %v2121_v52 = vadd.f32 %v7012_v48, %v1996_v56 }
 0x2d5   : > { %v7348_v14 = vadd.f32 %v7085_v11, %v2118_v2  ;;  %v2001_v42 = vpop.f32.mrf.mxu0  ;;  %v10485_v11 = vld [vmem:[#allocation59_spill] sm:$0xff] }
 0x2d6   : > { %2045 = vmatmul.f32.gmra.mxu0 %v7245_v24  ;;  %v7352_v31 = vadd.f32 %v7161_v1, %v2121_v52  ;;  %v7365_v60 = vadd.f32 %v10485_v11, %v7218_v25  ;;  %v10487_v24 = vld [vmem:[#allocation65_spill] sm:$0xff] }
 0x2d7   : > { %v7369_v1 = vadd.f32 %v10487_v24, %v7263_v58  ;;  %v1497_v24 = vld [vmem:[#allocation6 + $0x210] sm:$0xff] }
 0x2d8   : > { %2182 = vmatmul.f32.gmra.mxu1 %v1501_v63  ;;  %v7359_v49 = vpop.permute.xlu0 %1705  ;;  %v7361_v48 = vpop.f32.mrf.mxu3  ;;  %10486 = vst [vmem:[#allocation78_spill] sm:$0xff] %v7365_v60 }
 0x2d9   : > { %4809 = vmatmul.msk.f32.gmra.mxu2 %vm1863_vm9, %v1499_v4  ;;  %10483 = vst [vmem:[#allocation40_spill] sm:$0xff] %v7359_v49  ;;  %v2002_v56 = vadd.f32 %v2001_v42, %v7359_v49  ;;  %v7372_v59 = vpop.permute.xlu1 %1710  ;;  %v7374_v2 = vpop.f32.mrf.mxu1  ;;  %v1502_v42 = vld [vmem:[#allocation6 + $0x238] sm:$0xff] }
 0x2da   : > { %10484 = vst [vmem:[#allocation50_spill] sm:$0xff] %v7361_v48  ;;  %2426 = vmatmul.f32.gmra.mxu3 %v1494_v46  ;;  %v2257_v63 = vpop.f32.mrf.mxu2  ;;  %v7378_v52 = vpop.permute.xlu2 %1730 }
 0x2db   : > { %10488 = vst [vmem:[#allocation42_spill] sm:$0xff] %v7369_v1  ;;  %3500 = vrot.lane.b32.xlu2 %v7356_v40, %s5457_s11  ;;  %v2127_v4 = vadd.f32 %v7159_v43, %v2002_v56  ;;  %v10495_v56 = vld [vmem:[#allocation31_spill] sm:$0xff] }
 0x2dc   : > { %10489 = vst [vmem:[#allocation23_spill] sm:$0xff] %v7372_v59  ;;  %3508 = vrot.lane.b32.xlu0 %v7369_v1, %s5457_s11  ;;  %3504 = vrot.lane.b32.xlu1 %v7365_v60, %s5457_s11 }
 0x2dd   : > { %10490 = vst [vmem:[#allocation85_spill] sm:$0xff] %v7378_v52  ;;  %v7386_v11 = vadd.f32 %v7288_v44, %v2127_v4  ;;  %v2004_v30 = vpop.f32.mrf.mxu0  ;;  %v7400_v44 = vadd.f32 %v10495_v56, %v7169_v21  ;;  %v1507_v56 = vld [vmem:[#allocation6 + $0x260] sm:$0xff] }
 0x2de   : > { %2048 = vmatmul.f32.gmra.mxu0 %v1491_v8  ;;  %v2005_v47 = vadd.f32 %v2004_v30, %v7372_v59  ;;  %v10497_v8 = vld [vmem:[#allocation71_spill] sm:$0xff] }
 0x2df   : > { %10496 = vst [vmem:[#allocation75_spill] sm:$0xff] %v7400_v44  ;;  %v7404_v4 = vadd.f32 %v10497_v8, %v7281_v19  ;;  %v1505_v8 = vld [vmem:[#allocation6 + $0x250] sm:$0xff] }
 0x2e0   : > { %2185 = vmatmul.f32.gmra.mxu1 %v1504_v57  ;;  %v7394_v29 = vpop.permute.xlu0 %1720  ;;  %v7396_v43 = vpop.f32.mrf.mxu3 }
 0x2e1   : > { %4810 = vmatmul.msk.f32.gmra.mxu2 %vm1863_vm9, %v1502_v42  ;;  %10493 = vst [vmem:[#allocation38_spill] sm:$0xff] %v7394_v29  ;;  %v7406_v57 = vpop.permute.xlu1 %1725  ;;  %v7408_v22 = vpop.f32.mrf.mxu1  ;;  %v2130_v42 = vadd.f32 %v7220_v15, %v2005_v47  ;;  %v10501_v15 = vld [vmem:[#allocation28_spill] sm:$0xff] }
 0x2e2   : > { %10494 = vst [vmem:[#allocation29_spill] sm:$0xff] %v7396_v43  ;;  %2429 = vmatmul.f32.gmra.mxu3 %v1497_v24  ;;  %v2260_v30 = vpop.f32.mrf.mxu2  ;;  %v7413_v20 = vpop.permute.xlu2 %1745  ;;  %v7423_v35 = vadd.f32 %v10501_v15, %v7218_v25  ;;  %v1510_v15 = vld [vmem:[#allocation6 + $0x278] sm:$0xff] }
 0x2e3   : > { %10498 = vst [vmem:[#allocation76_spill] sm:$0xff] %v7404_v4  ;;  %3506 = vrot.lane.b32.xlu2 %v7390_v16, %s5457_s11  ;;  %v7419_v21 = vadd.f32 %v2254_v26, %v2130_v42  ;;  %v10505_v26 = vld [vmem:[#allocation36_spill] sm:$0xff] }
 0x2e4   : > { %10499 = vst [vmem:[#allocation57_spill] sm:$0xff] %v7406_v57  ;;  %3514 = vrot.lane.b32.xlu0 %v7400_v44, %s5457_s11  ;;  %3510 = vrot.lane.b32.xlu1 %v7404_v4, %s5457_s11  ;;  %v7433_v42 = vadd.f32 %v10505_v26, %v7263_v58  ;;  %v1508_v26 = vld [vmem:[#allocation6 + $0x268] sm:$0xff] }
 0x2e5   : > { %10500 = vst [vmem:[#allocation32_spill] sm:$0xff] %v7413_v20  ;;  %v2007_v47 = vpop.f32.mrf.mxu0 }
 0x2e6   : > { %2051 = vmatmul.f32.gmra.mxu0 %v1494_v46  ;;  %10502 = vst [vmem:[#allocation27_spill] sm:$0xff] %v7423_v35  ;;  %v2008_v18 = vadd.f32 %v2007_v47, %v7336_v62 }
 0x2e7   : > { %10506 = vst [vmem:[#allocation30_spill] sm:$0xff] %v7433_v42 }
 0x2e8   : > { %2188 = vmatmul.f32.gmra.mxu1 %v1507_v56  ;;  %v7427_v53 = vpop.permute.xlu0 %1735  ;;  %v7429_v12 = vpop.f32.mrf.mxu3  ;;  %v2133_v25 = vadd.f32 %v7283_v10, %v2008_v18  ;;  %v10509_v10 = vld [vmem:[#allocation37_spill] sm:$0xff] }
 0x2e9   : > { %4811 = vmatmul.msk.f32.gmra.mxu2 %vm1863_vm9, %v1505_v8  ;;  %10503 = vst [vmem:[#allocation33_spill] sm:$0xff] %v7427_v53  ;;  %v7435_v46 = vpop.permute.xlu1 %1740  ;;  %v7437_v56 = vpop.f32.mrf.mxu1  ;;  %v7452_v5 = vadd.f32 %v10509_v10, %v7281_v19  ;;  %v1511_v10 = vld [vmem:[#allocation6 + $0x280] sm:$0xff] }
 0x2ea   : > { %10504 = vst [vmem:[#allocation43_spill] sm:$0xff] %v7429_v12  ;;  %2432 = vmatmul.f32.gmra.mxu3 %v1500_v32  ;;  %v2263_v8 = vpop.f32.mrf.mxu2  ;;  %v7442_v47 = vpop.permute.xlu2 %1760  ;;  %v7448_v58 = vadd.f32 %v2257_v63, %v2133_v25 }
 0x2eb   : > { %10507 = vst [vmem:[#allocation59_spill] sm:$0xff] %v7435_v46  ;;  %3512 = vrot.lane.b32.xlu2 %v7423_v35, %s5457_s11 }
 0x2ec   : > { %10508 = vst [vmem:[#allocation65_spill] sm:$0xff] %v7442_v47  ;;  %3584 = vrot.lane.b32.xlu0 %v7259_v45, %s5454_s28  ;;  %3516 = vrot.lane.b32.xlu1 %v7433_v42, %s5457_s11 }
 0x2ed   : > { %v2010_v18 = vpop.f32.mrf.mxu0  ;;  %10510 = vst [vmem:[#allocation61_spill] sm:$0xff] %v7452_v5 }
 0x2ee   : > { %2054 = vmatmul.f32.gmra.mxu0 %v1497_v24  ;;  %v2011_v28 = vadd.f32 %v2010_v18, %v7394_v29  ;;  %v1513_v18 = vld [vmem:[#allocation6 + $0x290] sm:$0xff] }
 0x2f0   : > { %2191 = vmatmul.f32.gmra.mxu1 %v1510_v15  ;;  %v7456_v7 = vpop.permute.xlu0 %1750  ;;  %v7458_v12 = vpop.f32.mrf.mxu3  ;;  %v2136_v24 = vadd.f32 %v7330_v54, %v2011_v28 }
 0x2f1   : > { %4812 = vmatmul.msk.f32.gmra.mxu2 %vm1863_vm9, %v1508_v26  ;;  %10511 = vst [vmem:[#allocation31_spill] sm:$0xff] %v7456_v7  ;;  %v7460_v63 = vpop.permute.xlu1 %1755  ;;  %v7462_v25 = vpop.f32.mrf.mxu1 }
 0x2f2   : > { %10512 = vst [vmem:[#allocation71_spill] sm:$0xff] %v7458_v12  ;;  %2435 = vmatmul.f32.gmra.mxu3 %v1503_v9  ;;  %v2266_v19 = vpop.f32.mrf.mxu2  ;;  %v7467_v15 = vpop.permute.xlu2 %1775  ;;  %v7473_v26 = vadd.f32 %v2260_v30, %v2136_v24  ;;  %v1506_v12 = vld [vmem:[#allocation6 + $0x258] sm:$0xff] }
 0x2f3   : > { %10513 = vst [vmem:[#allocation28_spill] sm:$0xff] %v7460_v63  ;;  %3518 = vrot.lane.b32.xlu2 %v7452_v5, %s5457_s11  ;;  %s5391_s11 = scalar_lea.hbm %s9979_s6, 256 }
 0x2f4   : > { %10514 = vst [vmem:[#allocation36_spill] sm:$0xff] %v7467_v15  ;;  %3590 = vrot.lane.b32.xlu0 %v7309_v55, %s5454_s28  ;;  %3586 = vrot.lane.b32.xlu1 %v7215_v41, %s5454_s28 }
 0x2f5   : > { %v2013_v28 = vpop.f32.mrf.mxu0 }
 0x2f6   : > { %2057 = vmatmul.f32.gmra.mxu0 %v1500_v32  ;;  %v2014_v54 = vadd.f32 %v2013_v28, %v7406_v57  ;;  %v1514_v28 = vld [vmem:[#allocation6 + $0x298] sm:$0xff] }
 0x2f8   : > { %2194 = vmatmul.f32.gmra.mxu1 %v1513_v18  ;;  %v7477_v29 = vpop.permute.xlu0 %1765  ;;  %v7479_v43 = vpop.f32.mrf.mxu3  ;;  %v2139_v30 = vadd.f32 %v7374_v2, %v2014_v54 }
 0x2f9   : > { %4813 = vmatmul.msk.f32.gmra.mxu2 %vm1863_vm9, %v1511_v10  ;;  %10515 = vst [vmem:[#allocation37_spill] sm:$0xff] %v7477_v29  ;;  %v7481_v48 = vpop.permute.xlu1 %1770  ;;  %v7483_v62 = vpop.f32.mrf.mxu1  ;;  %v1516_v10 = vld [vmem:[#allocation6 + $0x2a8] sm:$0xff] }
 0x2fa   : > { %10516 = vst [vmem:[#allocation101_spill] sm:$0xff] %v7479_v43  ;;  %2438 = vmatmul.f32.gmra.mxu3 %v1506_v12  ;;  %v2269_v32 = vpop.f32.mrf.mxu2  ;;  %v7488_v24 = vpop.permute.xlu2 %1790  ;;  %v7494_v18 = vadd.f32 %v2263_v8, %v2139_v30  ;;  %v1509_v43 = vld [vmem:[#allocation6 + $0x270] sm:$0xff] }
 0x2fb   : > { %10517 = vst [vmem:[#allocation102_spill] sm:$0xff] %v7481_v48  ;;  %3588 = vrot.lane.b32.xlu2 %v7279_v0, %s5454_s28 }
 0x2fc   : > { %10518 = vst [vmem:[#allocation103_spill] sm:$0xff] %v7488_v24  ;;  %3596 = vrot.lane.b32.xlu0 %v7356_v40, %s5454_s28  ;;  %3592 = vrot.lane.b32.xlu1 %v7273_v51, %s5454_s28 }
 0x2fd   : > { %10519 = vst [vmem:[#allocation104_spill] sm:$0xff] %v7494_v18  ;;  %v2016_v2 = vpop.f32.mrf.mxu0 }
 0x2fe   : > { %2060 = vmatmul.f32.gmra.mxu0 %v1503_v9  ;;  %v2017_v54 = vadd.f32 %v2016_v2, %v7378_v52  ;;  %v1519_v2 = vld [vmem:[#allocation6 + $0x2c0] sm:$0xff] }
 0x300   : > { %2197 = vmatmul.f32.gmra.mxu1 %v1516_v10  ;;  %v7498_v57 = vpop.permute.xlu0 %1780  ;;  %v7500_v59 = vpop.f32.mrf.mxu3  ;;  %v2142_v8 = vadd.f32 %v7408_v22, %v2017_v54  ;;  %v1512_v22 = vld [vmem:[#allocation6 + $0x288] sm:$0xff] }
 0x301   : > { %4814 = vmatmul.msk.f32.gmra.mxu2 %vm1863_vm9, %v1514_v28  ;;  %10520 = vst [vmem:[#allocation105_spill] sm:$0xff] %v7498_v57  ;;  %v7502_v33 = vpop.f32.mrf.mxu1  ;;  %v7507_v9 = vpop.permute.xlu1 %1785 }
 0x302   : > { %10521 = vst [vmem:[#allocation106_spill] sm:$0xff] %v7500_v59  ;;  %2441 = vmatmul.f32.gmra.mxu3 %v1509_v43  ;;  %v2272_v30 = vpop.f32.mrf.mxu2  ;;  %v7515_v28 = vadd.f32 %v2266_v19, %v2142_v8  ;;  %v1517_v59 = vld [vmem:[#allocation6 + $0x2b0] sm:$0xff] }
 0x303   : > { %3594 = vrot.lane.b32.xlu2 %v7320_v38, %s5454_s28  ;;  %10522 = vst [vmem:[#allocation107_spill] sm:$0xff] %v7507_v9  ;;  %v7511_v10 = vpop.permute.xlu2 %1805 }
 0x304   : > { %3602 = vrot.lane.b32.xlu0 %v7390_v16, %s5454_s28  ;;  %10523 = vst [vmem:[#allocation108_spill] sm:$0xff] %v7511_v10  ;;  %3598 = vrot.lane.b32.xlu1 %v7324_v23, %s5454_s28 }
 0x305   : > { %10524 = vst [vmem:[#allocation109_spill] sm:$0xff] %v7515_v28  ;;  %v2019_v54 = vpop.f32.mrf.mxu0 }
 0x306   : > { %2063 = vmatmul.f32.gmra.mxu0 %v1506_v12  ;;  %v2020_v52 = vadd.f32 %v2019_v54, %v7427_v53  ;;  %v1522_v54 = vld [vmem:[#allocation6 + $0x2d8] sm:$0xff] }
 0x308   : > { %2200 = vmatmul.f32.gmra.mxu1 %v1519_v2  ;;  %v7519_v49 = vpop.f32.mrf.mxu3  ;;  %v2145_v19 = vadd.f32 %v7437_v56, %v2020_v52  ;;  %v1515_v52 = vld [vmem:[#allocation6 + $0x2a0] sm:$0xff] }
 0x309   : > { %4815 = vmatmul.msk.f32.gmra.mxu2 %vm1863_vm9, %v1517_v59  ;;  %10525 = vst [vmem:[#allocation110_spill] sm:$0xff] %v7519_v49  ;;  %v7521_v6 = vpop.permute.xlu0 %1795  ;;  %v7523_v34 = vpop.f32.mrf.mxu1  ;;  %v1520_v49 = vld [vmem:[#allocation6 + $0x2c8] sm:$0xff] }
 0x30a   : > { %2444 = vmatmul.f32.gmra.mxu3 %v1512_v22  ;;  %10526 = vst [vmem:[#allocation111_spill] sm:$0xff] %v7521_v6  ;;  %v2275_v12 = vpop.f32.mrf.mxu2  ;;  %v7534_v59 = vadd.f32 %v2269_v32, %v2145_v19  ;;  %v7536_v2 = vpop.permute.xlu1 %1800  ;;  %v1525_v19 = vld [vmem:[#allocation6 + $0x2f0] sm:$0xff] }
 0x30b   : > { %3600 = vrot.lane.b32.xlu2 %v7365_v60, %s5454_s28  ;;  %v7530_v8 = vpop.permute.xlu2 %1820  ;;  %10529 = vst [vmem:[#allocation114_spill] sm:$0xff] %v7536_v2 }
 0x30c   : > { %3608 = vrot.lane.b32.xlu0 %v7423_v35, %s5454_s28  ;;  %10527 = vst [vmem:[#allocation112_spill] sm:$0xff] %v7530_v8  ;;  %3604 = vrot.lane.b32.xlu1 %v7369_v1, %s5454_s28 }
 0x30d   : > { %10528 = vst [vmem:[#allocation113_spill] sm:$0xff] %v7534_v59 }
 0x30e   : > { %2066 = vmatmul.f32.gmra.mxu0 %v1509_v43  ;;  %v2022_v56 = vpop.f32.mrf.mxu0 }
 0x30f   : > { %v2023_v50 = vadd.f32 %v2022_v56, %v7435_v46  ;;  %v1523_v56 = vld [vmem:[#allocation6 + $0x2e0] sm:$0xff]  ;;  %v1518_v46 = vld [vmem:[#allocation6 + $0x2b8] sm:$0xff] }
 0x310   : > { %2203 = vmatmul.f32.gmra.mxu1 %v1522_v54  ;;  %v7539_v53 = vpop.f32.mrf.mxu3 }
 0x311   : > { %4816 = vmatmul.msk.f32.gmra.mxu2 %vm1863_vm9, %v1520_v49  ;;  %10530 = vst [vmem:[#allocation115_spill] sm:$0xff] %v7539_v53  ;;  %v7542_v27 = vpop.permute.xlu0 %1810  ;;  %v7544_v36 = vpop.f32.mrf.mxu1  ;;  %v2148_v43 = vadd.f32 %v7462_v25, %v2023_v50 }
 0x312   : > { %2447 = vmatmul.f32.gmra.mxu3 %v1515_v52  ;;  %10531 = vst [vmem:[#allocation116_spill] sm:$0xff] %v7542_v27  ;;  %v2278_v32 = vpop.f32.mrf.mxu2  ;;  %v7557_v53 = vpop.permute.xlu1 %1815 }
 0x313   : > { %3606 = vrot.lane.b32.xlu2 %v7404_v4, %s5454_s28  ;;  %v7555_v54 = vadd.f32 %v2272_v30, %v2148_v43  ;;  %10534 = vst [vmem:[#allocation119_spill] sm:$0xff] %v7557_v53 }
 0x314   : > { %3614 = vrot.lane.b32.xlu0 %v7452_v5, %s5454_s28  ;;  %3610 = vrot.lane.b32.xlu1 %v7400_v44, %s5454_s28 }
 0x315   : > { %v7553_v49 = vpop.permute.xlu2 %1835  ;;  %10533 = vst [vmem:[#allocation118_spill] sm:$0xff] %v7555_v54  ;;  %v1521_v54 = vld [vmem:[#allocation6 + $0x2d0] sm:$0xff] }
 0x316   : > { %10532 = vst [vmem:[#allocation117_spill] sm:$0xff] %v7553_v49  ;;  %2069 = vmatmul.f32.gmra.mxu0 %v1512_v22  ;;  %v2025_v50 = vpop.f32.mrf.mxu0  ;;  %v5080_v49 = vld [vmem:[#allocation6 + $0x28] sm:$0xff] }
 0x317   : > { %v2026_v25 = vadd.f32 %v2025_v50, %v7413_v20  ;;  %v1526_v20 = vld [vmem:[#allocation6 + $0x2f8] sm:$0xff] }
 0x318   : > { %2206 = vmatmul.f32.gmra.mxu1 %v1525_v19  ;;  %v7570_v22 = vpop.f32.mrf.mxu3 }
 0x319   : > { %4817 = vmatmul.msk.f32.gmra.mxu2 %vm1863_vm9, %v1523_v56  ;;  %v7561_v59 = vpop.f32.mrf.mxu1  ;;  %v2151_v43 = vadd.f32 %v7483_v62, %v2026_v25  ;;  %10536 = vst [vmem:[#allocation121_spill] sm:$0xff] %v7570_v22  ;;  %v1528_v56 = vld [vmem:[#allocation6 + $0x308] sm:$0xff] }
 0x31a   : > { %2450 = vmatmul.f32.gmra.mxu3 %v1518_v46  ;;  %v7565_v3 = vpop.permute.xlu0 %1825  ;;  %v2281_v30 = vpop.f32.mrf.mxu2 }
 0x31b   : > { %3612 = vrot.lane.b32.xlu2 %v7433_v42, %s5454_s28  ;;  %10535 = vst [vmem:[#allocation120_spill] sm:$0xff] %v7565_v3  ;;  %v7576_v50 = vadd.f32 %v2275_v12, %v2151_v43  ;;  %v7578_v39 = vpop.permute.xlu1 %1830 }
 0x31c   : > { %3696 = vrot.lane.b32.xlu0 %v7365_v60, %s5453_s26  ;;  %3688 = vrot.lane.b32.xlu1 %v7273_v51, %s5453_s26  ;;  %10539 = vst [vmem:[#allocation124_spill] sm:$0xff] %v7578_v39 }
 0x31d   : > { %v7574_v19 = vpop.permute.xlu2 %1850  ;;  %10538 = vst [vmem:[#allocation123_spill] sm:$0xff] %v7576_v50  ;;  %v1524_v50 = vld [vmem:[#allocation6 + $0x2e8] sm:$0xff] }
 0x31e   : > { %10537 = vst [vmem:[#allocation122_spill] sm:$0xff] %v7574_v19  ;;  %2072 = vmatmul.f32.gmra.mxu0 %v1515_v52  ;;  %v2028_v62 = vpop.f32.mrf.mxu0 }
 0x31f   : > { %v2029_v25 = vadd.f32 %v2028_v62, %v7456_v7  ;;  %v1529_v7 = vld [vmem:[#allocation6 + $0x310] sm:$0xff] }
 0x320   : > { %2209 = vmatmul.f32.gmra.mxu1 %v1528_v56  ;;  %v1531_v56 = vld [vmem:[#allocation6 + $0x320] sm:$0xff] }
 0x321   : > { %4818 = vmatmul.msk.f32.gmra.mxu2 %vm1863_vm9, %v1526_v20  ;;  %v7582_v22 = vpop.f32.mrf.mxu1  ;;  %v2154_v52 = vadd.f32 %v7502_v33, %v2029_v25  ;;  %v7591_v43 = vpop.f32.mrf.mxu3 }
 0x322   : > { %2453 = vmatmul.f32.gmra.mxu3 %v1521_v54  ;;  %v7586_v18 = vpop.permute.xlu0 %1840  ;;  %v2284_v12 = vpop.f32.mrf.mxu2  ;;  %10541 = vst [vmem:[#allocation126_spill] sm:$0xff] %v7591_v43 }
 0x323   : > { %3690 = vrot.lane.b32.xlu2 %v7320_v38, %s5453_s26  ;;  %10540 = vst [vmem:[#allocation125_spill] sm:$0xff] %v7586_v18  ;;  %v7597_v62 = vadd.f32 %v2278_v32, %v2154_v52  ;;  %v7603_v43 = vpop.permute.xlu1 %1845 }
 0x324   : > { %3706 = vrot.lane.b32.xlu0 %v7400_v44, %s5453_s26  ;;  %3698 = vrot.lane.b32.xlu1 %v7390_v16, %s5453_s26  ;;  %10543 = vst [vmem:[#allocation128_spill] sm:$0xff] %v7603_v43 }
 0x325   : > { %v7595_v20 = vpop.permute.xlu2 %3488  ;;  %10542 = vst [vmem:[#allocation127_spill] sm:$0xff] %v7597_v62  ;;  %v1527_v62 = vld [vmem:[#allocation6 + $0x300] sm:$0xff] }
 0x326   : > { %2075 = vmatmul.f32.gmra.mxu0 %v1518_v46 }
 0x328   : > { %2212 = vmatmul.f32.gmra.mxu1 %v1531_v56  ;;  %v2031_v33 = vpop.f32.mrf.mxu0  ;;  %v1534_v56 = vld [vmem:[#allocation6 + $0x338] sm:$0xff] }
 0x329   : > { %4819 = vmatmul.msk.f32.gmra.mxu2 %vm1863_vm9, %v1529_v7  ;;  %v2032_v25 = vadd.f32 %v2031_v33, %v7460_v63  ;;  %v7601_v17 = vpop.f32.mrf.mxu1  ;;  %v1532_v63 = vld [vmem:[#allocation6 + $0x328] sm:$0xff] }
 0x32a   : > { %2456 = vmatmul.f32.gmra.mxu3 %v1524_v50  ;;  %v2287_v28 = vpop.f32.mrf.mxu2  ;;  %v7612_v7 = vpop.f32.mrf.mxu3 }
 0x32b   : > { %3704 = vrot.lane.b32.xlu2 %v7423_v35, %s5453_s26  ;;  %v2157_v32 = vadd.f32 %v7523_v34, %v2032_v25  ;;  %v7610_v46 = vpop.permute.xlu0 %1855  ;;  %10545 = vst [vmem:[#allocation130_spill] sm:$0xff] %v7612_v7 }
 0x32c   : > { %3708 = vrot.lane.b32.xlu0 %v7433_v42, %s5453_s26  ;;  %10544 = vst [vmem:[#allocation129_spill] sm:$0xff] %v7610_v46  ;;  %3692 = vrot.lane.b32.xlu1 %v7356_v40, %s5453_s26 }
 0x32d   : > { %v7616_v52 = vpop.permute.xlu2 %3494  ;;  %v7618_v33 = vadd.f32 %v2281_v30, %v2157_v32  ;;  %v1537_v30 = vld [vmem:[#allocation6 + $0x350] sm:$0xff]  ;;  %v7635_v32 = vpop.permute.xlu1 %1860 }
 0x32e   : > { %2078 = vmatmul.f32.gmra.mxu0 %v1521_v54  ;;  %10548 = vst [vmem:[#allocation133_spill] sm:$0xff] %v7635_v32 }
 0x32f   : > { %10546 = vst [vmem:[#allocation131_spill] sm:$0xff] %v7618_v33  ;;  %v1538_v33 = vld [vmem:[#allocation6 + $0x358] sm:$0xff] }
 0x330   : > { %2215 = vmatmul.f32.gmra.mxu1 %v1534_v56  ;;  %v2034_v34 = vpop.f32.mrf.mxu0 }
 0x331   : > { %4820 = vmatmul.msk.f32.gmra.mxu2 %vm1863_vm9, %v1532_v63  ;;  %v2035_v25 = vadd.f32 %v2034_v34, %v7442_v47  ;;  %v1535_v47 = vld [vmem:[#allocation6 + $0x340] sm:$0xff] }
 0x332   : > { %2459 = vmatmul.f32.gmra.mxu3 %v1527_v62  ;;  %v7624_v7 = vpop.f32.mrf.mxu1  ;;  %v2290_v46 = vpop.f32.mrf.mxu2 }
 0x333   : > { %3700 = vrot.lane.b32.xlu2 %v7369_v1, %s5453_s26  ;;  %v2160_v19 = vadd.f32 %v7544_v36, %v2035_v25  ;;  %v7629_v54 = vpop.f32.mrf.mxu3  ;;  %v1530_v36 = vld [vmem:[#allocation6 + $0x318] sm:$0xff] }
 0x334   : > { %3792 = vrot.lane.b32.xlu0 %v7365_v60, %s5450_s18  ;;  %10547 = vst [vmem:[#allocation132_spill] sm:$0xff] %v7629_v54  ;;  %3784 = vrot.lane.b32.xlu1 %v7273_v51, %s5450_s18  ;;  %v7639_v34 = vpop.permute.xlu0 %3490 }
 0x335   : > { %v7633_v63 = vpop.permute.xlu2 %3500  ;;  %v7637_v56 = vadd.f32 %v2284_v12, %v2160_v19 }
 0x336   : > { %2081 = vmatmul.f32.gmra.mxu0 %v1524_v50 }
 0x337   : > { %10549 = vst [vmem:[#allocation134_spill] sm:$0xff] %v7637_v56 }
 0x338   : > { %2218 = vmatmul.f32.gmra.mxu1 %v1537_v30 }
 0x339   : > { %4821 = vmatmul.msk.f32.gmra.mxu2 %vm1863_vm9, %v1535_v47 }
 0x33a   : > { %2462 = vmatmul.f32.gmra.mxu3 %v1530_v36  ;;  %v7644_v25 = vpop.f32.mrf.mxu2 }
 0x33b   : > { %3786 = vrot.lane.b32.xlu2 %v7320_v38, %s5450_s18  ;;  %v2037_v54 = vpop.f32.mrf.mxu0  ;;  %v7648_v19 = vpop.f32.mrf.mxu3  ;;  %v10555_v38 = vld [vmem:[#allocation74_spill] sm:$0xff] }
 0x33c   : > { %3802 = vrot.lane.b32.xlu0 %v7400_v44, %s5450_s18  ;;  %10550 = vst [vmem:[#allocation135_spill] sm:$0xff] %v7648_v19  ;;  %3794 = vrot.lane.b32.xlu1 %v7390_v16, %s5450_s18  ;;  %v2038_v50 = vadd.f32 %v2037_v54, %v7477_v29  ;;  %v1533_v19 = vld [vmem:[#allocation6 + $0x330] sm:$0xff] }
 0x33d   : > { %v7653_v12 = vpop.f32.mrf.mxu1  ;;  %v7655_v47 = vpop.permute.xlu2 %3506  ;;  %v5079_v29 = vld [vmem:[#allocation6 + $0x10] sm:$0xff] }
 0x33e   : > { %v3497_v30 = vpop.permute.xlu0 %3496  ;;  %v7657_v56 = vpop.permute.xlu1 %3492  ;;  %v2163_v32 = vadd.f32 %v7561_v59, %v2038_v50  ;;  %2084 = vmatmul.f32.gmra.mxu0 %v1527_v62 }
 0x33f   : > { %v7663_v43 = vsel %vm727_vm7, %v7595_v20, %v3497_v30  ;;  %v7669_v54 = vsel %vm727_vm7, %v7657_v56, %v7633_v63 }
 0x340   : > { %10551 = vst [vmem:[#allocation136_spill] sm:$0xff] %v7663_v43  ;;  %4823 = vmatmul.msk.f32.vlgmr.msra.gmra.mxu1 %vm1863_vm9, %v5079_v29  ;;  %v2288_v51 = vadd.f32 %v2287_v28, %v2163_v32 }
 0x341   : > { %10552 = vst [vmem:[#allocation137_spill] sm:$0xff] %v7669_v54  ;;  %4822 = vmatmul.msk.f32.gmra.mxu2 %vm1863_vm9, %v1538_v33 }
 0x342   : > { %2465 = vmatmul.f32.gmra.mxu3 %v1533_v19 }
 0x343   : > { %3800 = vrot.lane.b32.xlu2 %v7423_v35, %s5450_s18  ;;  %v2040_v59 = vpop.f32.mrf.mxu0  ;;  %v7677_v62 = vpop.f32.mrf.mxu2 }
 0x344   : > { %3710 = vrot.lane.b32.xlu0 %v7452_v5, %s5453_s26  ;;  %3694 = vrot.lane.b32.xlu1 %v7324_v23, %s5453_s26  ;;  %v2041_v50 = vadd.f32 %v2040_v59, %v7481_v48  ;;  %v1536_v59 = vld [vmem:[#allocation6 + $0x348] sm:$0xff] }
 0x345   : > { %v7682_v54 = vpop.f32.mrf.mxu1  ;;  %v7684_v29 = vpop.f32.mrf.mxu3 }
 0x346   : > { %10553 = vst [vmem:[#allocation138_spill] sm:$0xff] %v7684_v29  ;;  %v7686_v28 = vpop.permute.xlu0 %3502  ;;  %v3513_v33 = vpop.permute.xlu2 %3512  ;;  %v2166_v32 = vadd.f32 %v7582_v22, %v2041_v50  ;;  %2087 = vmatmul.f32.gmra.mxu0 %v1530_v36  ;;  %v3472_v36 = vmul.f32 %v2288_v51, %v7259_v45 }
 0x347   : > { %v7693_v43 = vsel %vm727_vm7, %v7616_v52, %v7686_v28  ;;  %v3532_v18 = vsel %vm727_vm7, %v3513_v33, %v7595_v20  ;;  %v3499_v48 = vpop.permute.xlu1 %3498  ;;  %v5081_v20 = vld [vmem:[#allocation6] sm:$0xff] }
 0x348   : > { %10554 = vst [vmem:[#allocation139_spill] sm:$0xff] %v7693_v43  ;;  %v3536_v29 = vmul.f32 %v3532_v18, %v10555_v38  ;;  %4824 = vmatmul.msk.f32.gmra.mxu1 %vm1863_vm9, %v5080_v49  ;;  %v7703_v22 = vsel %vm727_vm7, %v3499_v48, %v7655_v47  ;;  %v7708_v50 = vsel %vm727_vm7, %v7639_v34, %v3499_v48 }
 0x349   : > { %10556 = vst [vmem:[#allocation74_spill] sm:$0xff] %v7703_v22  ;;  %v2291_v43 = vadd.f32 %v2290_v46, %v2166_v32  ;;  %2738 = vmatmul.f32.vlgmr.msra.gmra.mxu2 %v5081_v20 }
 0x34a   : > { %v3552_v18 = vmul.f32 %v3536_v29, %v7255_v37  ;;  %2468 = vmatmul.f32.gmra.mxu3 %v1536_v59 }
 0x34b   : > { %3702 = vrot.lane.b32.xlu2 %v7404_v4, %s5453_s26  ;;  %v2043_v39 = vpop.f32.mrf.mxu0 }
 0x34c   : > { %v7714_v49 = vadd.f32 %v3552_v18, %v3472_v36  ;;  %3804 = vrot.lane.b32.xlu0 %v7433_v42, %s5450_s18  ;;  %v7718_v22 = vpop.f32.mrf.mxu2  ;;  %3788 = vrot.lane.b32.xlu1 %v7356_v40, %s5450_s18  ;;  %v2044_v48 = vadd.f32 %v2043_v39, %v7467_v15  ;;  %v5100_v15 = vld [vmem:[#allocation6 + $0xd0] sm:$0xff] }
 0x34d   : > { %v7723_v51 = vpop.f32.mrf.mxu1  ;;  %v7725_v37 = vpop.f32.mrf.mxu3 }
 0x34e   : > { %10557 = vst [vmem:[#allocation140_spill] sm:$0xff] %v7725_v37  ;;  %v7727_v46 = vpop.permute.xlu0 %3508  ;;  %v3519_v29 = vpop.permute.xlu2 %3518  ;;  %v2169_v32 = vadd.f32 %v7601_v17, %v2044_v48  ;;  %2090 = vmatmul.f32.gmra.mxu0 %v1533_v19  ;;  %v5082_v37 = vld [vmem:[#allocation6 + $0x40] sm:$0xff]  ;;  %v5084_v19 = vld [vmem:[#allocation6 + $0x8] sm:$0xff] }
 0x34f   : > { %v7734_v20 = vsel %vm727_vm7, %v7633_v63, %v7727_v46  ;;  %v3535_v36 = vsel %vm727_vm7, %v3519_v29, %v7616_v52  ;;  %v3505_v39 = vpop.permute.xlu1 %3504 }
 0x350   : > { %10558 = vst [vmem:[#allocation141_spill] sm:$0xff] %v7734_v20  ;;  %v3548_v18 = vmul.f32 %v3535_v36, %v10555_v38  ;;  %4825 = vmatmul.msk.f32.gmra.mxu1 %vm1863_vm9, %v5082_v37  ;;  %v7743_v17 = vsel %vm727_vm7, %v3505_v39, %v3513_v33  ;;  %v7747_v48 = vsel %vm727_vm7, %v3497_v30, %v3505_v39  ;;  %v5083_v20 = vld [vmem:[#allocation6 + $0x18] sm:$0xff] }
 0x351   : > { %10559 = vst [vmem:[#allocation142_spill] sm:$0xff] %v7743_v17  ;;  %v2294_v63 = vadd.f32 %v7644_v25, %v2169_v32  ;;  %2741 = vmatmul.f32.gmra.mxu2 %v5083_v20  ;;  %v5085_v17 = vld [vmem:[#allocation6 + $0x58] sm:$0xff] }
 0x352   : > { %10560 = vst [vmem:[#allocation143_spill] sm:$0xff] %v7747_v48  ;;  %v3564_v52 = vmul.f32 %v3548_v18, %v7344_v13  ;;  %2863 = vmatmul.f32.vlgmr.msra.gmra.mxu3 %v5084_v19 }
 0x353   : > { %3796 = vrot.lane.b32.xlu2 %v7369_v1, %s5450_s18  ;;  %v2046_v37 = vpop.f32.mrf.mxu0 }
 0x354   : > { %3888 = vrot.lane.b32.xlu0 %v7365_v60, %s5455_s29  ;;  %v7755_v33 = vpop.f32.mrf.mxu2  ;;  %3872 = vrot.lane.b32.xlu1 %v7259_v45, %s5455_s29  ;;  %v2047_v25 = vadd.f32 %v2046_v37, %v7498_v57 }
 0x355   : > { %v7760_v30 = vpop.f32.mrf.mxu1  ;;  %v7762_v32 = vpop.f32.mrf.mxu3 }
 0x356   : > { %10561 = vst [vmem:[#allocation144_spill] sm:$0xff] %v7762_v32  ;;  %v3515_v13 = vpop.permute.xlu0 %3514  ;;  %v7764_v20 = vpop.permute.xlu2 %3588  ;;  %v2172_v36 = vadd.f32 %v7624_v7, %v2047_v25  ;;  %2093 = vmatmul.f32.gmra.mxu0 %v1536_v59  ;;  %v5086_v25 = vld [vmem:[#allocation6 + $0x30] sm:$0xff] }
 0x357   : > { %v7770_v39 = vsel %vm727_vm7, %v7655_v47, %v3515_v13  ;;  %v3533_v18 = vsel %vm727_vm7, %v3515_v13, %v7639_v34  ;;  %v3511_v37 = vpop.permute.xlu1 %3510  ;;  %v3476_v34 = vmul.f32 %v2291_v43, %v7215_v41  ;;  %v5087_v13 = vld [vmem:[#allocation6 + $0x20] sm:$0xff] }
 0x358   : > { %10562 = vst [vmem:[#allocation145_spill] sm:$0xff] %v7770_v39  ;;  %v3540_v48 = vmul.f32 %v3533_v18, %v10555_v38  ;;  %4826 = vmatmul.msk.f32.gmra.mxu1 %vm1863_vm9, %v5085_v17  ;;  %v7779_v32 = vsel %vm727_vm7, %v3511_v37, %v3519_v29  ;;  %v7784_v7 = vsel %vm727_vm7, %v7686_v28, %v3511_v37 }
 0x359   : > { %10563 = vst [vmem:[#allocation146_spill] sm:$0xff] %v7779_v32  ;;  %v2297_v47 = vadd.f32 %v7677_v62, %v2172_v36  ;;  %2744 = vmatmul.f32.gmra.mxu2 %v5086_v25 }
 0x35a   : > { %10564 = vst [vmem:[#allocation147_spill] sm:$0xff] %v7784_v7  ;;  %v3556_v59 = vmul.f32 %v3540_v48, %v7348_v14  ;;  %2866 = vmatmul.f32.gmra.mxu3 %v5087_v13  ;;  %v5093_v7 = vld [vmem:[#allocation6 + $0x50] sm:$0xff] }
 0x35b   : > { %v3484_v17 = vmul.f32 %v2297_v47, %v7309_v55  ;;  %3874 = vrot.lane.b32.xlu2 %v7215_v41, %s5455_s29  ;;  %v2049_v18 = vpop.f32.mrf.mxu0 }
 0x35c   : > { %v7792_v29 = vadd.f32 %v3556_v59, %v3476_v34  ;;  %3898 = vrot.lane.b32.xlu0 %v7400_v44, %s5455_s29  ;;  %v7796_v62 = vpop.f32.mrf.mxu2  ;;  %3890 = vrot.lane.b32.xlu1 %v7390_v16, %s5455_s29  ;;  %v2050_v14 = vadd.f32 %v2049_v18, %v7507_v9  ;;  %v5088_v34 = vld [vmem:[#allocation6 + $0x70] sm:$0xff]  ;;  %v5089_v18 = vld [vmem:[#allocation6 + $0x48] sm:$0xff] }
 0x35d   : > { %v7801_v43 = vpop.f32.mrf.mxu1  ;;  %v7803_v28 = vpop.f32.mrf.mxu3  ;;  %v7805_v48 = vadd.f32 %v3564_v52, %v3484_v17 }
 0x35e   : > { %10565 = vst [vmem:[#allocation148_spill] sm:$0xff] %v7803_v28  ;;  %v7807_v36 = vpop.permute.xlu0 %3584  ;;  %v7809_v37 = vpop.permute.xlu2 %3594  ;;  %v2175_v47 = vadd.f32 %v7653_v12, %v2050_v14  ;;  %2488 = vmatmul.f32.vlgmr.msra.gmra.mxu0 %v5084_v19  ;;  %v5090_v19 = vld [vmem:[#allocation6 + $0x38] sm:$0xff]  ;;  %v3480_v14 = vmul.f32 %v2294_v63, %v7279_v0 }
 0x35f   : > { %v3517_v25 = vpop.permute.xlu1 %3516 }
 0x360   : > { %4827 = vmatmul.msk.f32.gmra.mxu1 %vm1863_vm9, %v5088_v34  ;;  %v7816_v59 = vsel %vm727_vm7, %v7727_v46, %v3517_v25  ;;  %v3534_v52 = vsel %vm727_vm7, %v3517_v25, %v7657_v56  ;;  %v7822_v17 = vadd.f32 %v7718_v22, %v2175_v47 }
 0x361   : > { %10566 = vst [vmem:[#allocation149_spill] sm:$0xff] %v7816_v59  ;;  %2747 = vmatmul.f32.gmra.mxu2 %v5089_v18  ;;  %v3544_v12 = vmul.f32 %v3534_v52, %v10555_v38 }
 0x362   : > { %2869 = vmatmul.f32.gmra.mxu3 %v5090_v19 }
 0x363   : > { %v3560_v34 = vmul.f32 %v3544_v12, %v7352_v31  ;;  %3896 = vrot.lane.b32.xlu2 %v7423_v35, %s5455_s29  ;;  %v2052_v46 = vpop.f32.mrf.mxu0  ;;  %v5091_v12 = vld [vmem:[#allocation6 + $0x88] sm:$0xff] }
 0x364   : > { %3790 = vrot.lane.b32.xlu0 %v7324_v23, %s5450_s18  ;;  %v7831_v56 = vpop.f32.mrf.mxu2  ;;  %3680 = vrot.lane.b32.xlu1 %v7259_v45, %s5453_s26  ;;  %v2053_v38 = vadd.f32 %v2052_v46, %v7488_v24  ;;  %v5092_v46 = vld [vmem:[#allocation6 + $0x60] sm:$0xff] }
 0x365   : > { %v7835_v22 = vadd.f32 %v3560_v34, %v3480_v14  ;;  %v7838_v47 = vpop.f32.mrf.mxu1  ;;  %v7840_v63 = vpop.f32.mrf.mxu3 }
 0x366   : > { %10567 = vst [vmem:[#allocation150_spill] sm:$0xff] %v7840_v63  ;;  %v7842_v31 = vpop.permute.xlu0 %3590  ;;  %v7844_v25 = vpop.permute.xlu2 %3600  ;;  %v2178_v52 = vadd.f32 %v7682_v54, %v2053_v38  ;;  %2491 = vmatmul.f32.gmra.mxu0 %v5087_v13  ;;  %v5094_v63 = vld [vmem:[#allocation6 + $0xa0] sm:$0xff] }
 0x367   : > { %v7847_v18 = vpop.permute.xlu1 %3586 }
 0x368   : > { %4828 = vmatmul.msk.f32.gmra.mxu1 %vm1863_vm9, %v5091_v12  ;;  %v7854_v14 = vsel %vm817_vm5, %v7847_v18, %v7809_v37  ;;  %v7857_v34 = vadd.f32 %v7755_v33, %v2178_v52 }
 0x369   : > { %2750 = vmatmul.f32.gmra.mxu2 %v5092_v46 }
 0x36a   : > { %2872 = vmatmul.f32.gmra.mxu3 %v5093_v7 }
 0x36b   : > { %3682 = vrot.lane.b32.xlu2 %v7215_v41, %s5453_s26  ;;  %v2055_v54 = vpop.f32.mrf.mxu0 }
 0x36c   : > { %3876 = vrot.lane.b32.xlu0 %v7279_v0, %s5455_s29  ;;  %v7863_v13 = vpop.f32.mrf.mxu2  ;;  %3798 = vrot.lane.b32.xlu1 %v7404_v4, %s5450_s18  ;;  %v2056_v38 = vadd.f32 %v2055_v54, %v7521_v6 }
 0x36d   : > { %v7868_v33 = vpop.f32.mrf.mxu1  ;;  %v7870_v52 = vpop.f32.mrf.mxu3 }
 0x36e   : > { %10568 = vst [vmem:[#allocation151_spill] sm:$0xff] %v7870_v52  ;;  %v3597_v12 = vpop.permute.xlu0 %3596  ;;  %v7872_v46 = vpop.permute.xlu2 %3606  ;;  %v2181_v32 = vadd.f32 %v7723_v51, %v2056_v38  ;;  %2494 = vmatmul.f32.gmra.mxu0 %v5090_v19  ;;  %v5095_v38 = vld [vmem:[#allocation6 + $0x78] sm:$0xff]  ;;  %v5096_v19 = vld [vmem:[#allocation6 + $0x68] sm:$0xff] }
 0x36f   : > { %v7878_v59 = vsel %vm817_vm5, %v7764_v20, %v3597_v12  ;;  %v3593_v39 = vpop.permute.xlu1 %3592 }
 0x370   : > { %4829 = vmatmul.msk.f32.gmra.mxu1 %vm1863_vm9, %v5094_v63  ;;  %v7884_v54 = vsel %vm817_vm5, %v3593_v39, %v7844_v25  ;;  %v7889_v52 = vsel %vm817_vm5, %v7807_v36, %v3593_v39  ;;  %v7892_v51 = vadd.f32 %v7796_v62, %v2181_v32 }
 0x371   : > { %10569 = vst [vmem:[#allocation152_spill] sm:$0xff] %v7884_v54  ;;  %2753 = vmatmul.f32.gmra.mxu2 %v5095_v38 }
 0x372   : > { %2875 = vmatmul.f32.gmra.mxu3 %v5096_v19 }
 0x373   : > { %3806 = vrot.lane.b32.xlu2 %v7452_v5, %s5450_s18  ;;  %v2058_v63 = vpop.f32.mrf.mxu0 }
 0x374   : > { %3968 = vrot.lane.b32.xlu0 %v7259_v45, %s5452_s20  ;;  %v7898_v54 = vpop.f32.mrf.mxu2  ;;  %3892 = vrot.lane.b32.xlu1 %v7369_v1, %s5455_s29  ;;  %v2059_v39 = vadd.f32 %v2058_v63, %v7536_v2  ;;  %v10572_v2 = vld [vmem:[#allocation34_spill] sm:$0xff] }
 0x375   : > { %v7903_v32 = vpop.f32.mrf.mxu1  ;;  %v7905_v62 = vpop.f32.mrf.mxu3 }
 0x376   : > { %10570 = vst [vmem:[#allocation153_spill] sm:$0xff] %v7905_v62  ;;  %v7907_v38 = vpop.permute.xlu0 %3602  ;;  %v3613_v6 = vpop.permute.xlu2 %3612  ;;  %v2184_v28 = vadd.f32 %v7760_v30, %v2059_v39  ;;  %2497 = vmatmul.f32.gmra.mxu0 %v5093_v7  ;;  %v5097_v62 = vld [vmem:[#allocation6 + $0xb8] sm:$0xff]  ;;  %v5099_v7 = vld [vmem:[#allocation6 + $0x80] sm:$0xff] }
 0x377   : > { %v7914_v24 = vsel %vm817_vm5, %v7809_v37, %v7907_v38  ;;  %v3630_v9 = vsel %vm817_vm5, %v3613_v6, %v7764_v20  ;;  %v3599_v63 = vpop.permute.xlu1 %3598  ;;  %v5098_v20 = vld [vmem:[#allocation6 + $0x90] sm:$0xff] }
 0x378   : > { %10571 = vst [vmem:[#allocation154_spill] sm:$0xff] %v7914_v24  ;;  %v3640_v57 = vmul.f32 %v3630_v9, %v10572_v2  ;;  %4830 = vmatmul.msk.f32.gmra.mxu1 %vm1863_vm9, %v5097_v62  ;;  %v7924_v30 = vsel %vm817_vm5, %v3599_v63, %v7872_v46  ;;  %v7929_v37 = vsel %vm817_vm5, %v7842_v31, %v3599_v63 }
 0x379   : > { %10573 = vst [vmem:[#allocation34_spill] sm:$0xff] %v7924_v30  ;;  %v7932_v39 = vadd.f32 %v7831_v56, %v2184_v28  ;;  %2756 = vmatmul.f32.gmra.mxu2 %v5098_v20 }
 0x37a   : > { %v3656_v9 = vmul.f32 %v3640_v57, %v7448_v58  ;;  %2878 = vmatmul.f32.gmra.mxu3 %v5099_v7 }
 0x37b   : > { %10574 = vst [vmem:[#allocation155_spill] sm:$0xff] %v7932_v39  ;;  %3900 = vrot.lane.b32.xlu2 %v7433_v42, %s5455_s29  ;;  %v2061_v30 = vpop.f32.mrf.mxu0  ;;  %v5125_v39 = vld [vmem:[#allocation6 + $0x168] sm:$0xff] }
 0x37c   : > { %v7938_v62 = vadd.f32 %v3656_v9, %v7835_v22  ;;  %3986 = vrot.lane.b32.xlu0 %v7390_v16, %s5452_s20  ;;  %v7942_v63 = vpop.f32.mrf.mxu2  ;;  %3970 = vrot.lane.b32.xlu1 %v7215_v41, %s5452_s20  ;;  %v2062_v28 = vadd.f32 %v2061_v30, %v7511_v10 }
 0x37d   : > { %v7947_v57 = vpop.f32.mrf.mxu1  ;;  %v7949_v58 = vpop.f32.mrf.mxu3 }
 0x37e   : > { %10575 = vst [vmem:[#allocation156_spill] sm:$0xff] %v7949_v58  ;;  %v3609_v56 = vpop.permute.xlu0 %3608  ;;  %v7951_v20 = vpop.permute.xlu2 %3690  ;;  %v2187_v22 = vadd.f32 %v7801_v43, %v2062_v28  ;;  %2500 = vmatmul.f32.gmra.mxu0 %v5096_v19  ;;  %v5101_v28 = vld [vmem:[#allocation6 + $0xa8] sm:$0xff]  ;;  %v5102_v19 = vld [vmem:[#allocation6 + $0x98] sm:$0xff] }
 0x37f   : > { %10576 = vst [vmem:[#allocation157_spill] sm:$0xff] %v7951_v20  ;;  %v7957_v9 = vsel %vm817_vm5, %v7844_v25, %v3609_v56  ;;  %v3628_v24 = vsel %vm817_vm5, %v3609_v56, %v7807_v36  ;;  %v3605_v30 = vpop.permute.xlu1 %3604 }
 0x380   : > { %10577 = vst [vmem:[#allocation158_spill] sm:$0xff] %v7957_v9  ;;  %v3632_v10 = vmul.f32 %v3628_v24, %v10572_v2  ;;  %4831 = vmatmul.msk.f32.gmra.mxu1 %vm1863_vm9, %v5100_v15  ;;  %v7966_v58 = vsel %vm817_vm5, %v3605_v30, %v3613_v6  ;;  %v7970_v43 = vsel %vm817_vm5, %v3597_v12, %v3605_v30  ;;  %v5113_v9 = vld [vmem:[#allocation6 + $0x108] sm:$0xff] }
 0x381   : > { %10578 = vst [vmem:[#allocation159_spill] sm:$0xff] %v7966_v58  ;;  %v7973_v25 = vadd.f32 %v7863_v13, %v2187_v22  ;;  %2759 = vmatmul.f32.gmra.mxu2 %v5101_v28  ;;  %v5112_v58 = vld [vmem:[#allocation6 + $0x130] sm:$0xff] }
 0x382   : > { %10579 = vst [vmem:[#allocation160_spill] sm:$0xff] %v7970_v43  ;;  %v3648_v36 = vmul.f32 %v3632_v10, %v7386_v11  ;;  %2881 = vmatmul.f32.gmra.mxu3 %v5102_v19  ;;  %v5111_v43 = vld [vmem:[#allocation6 + $0xe0] sm:$0xff] }
 0x383   : > { %10580 = vst [vmem:[#allocation161_spill] sm:$0xff] %v7973_v25  ;;  %3984 = vrot.lane.b32.xlu2 %v7365_v60, %s5452_s20  ;;  %v2064_v6 = vpop.f32.mrf.mxu0  ;;  %v10631_v25 = vld [vmem:[#allocation41_spill] sm:$0xff] }
 0x384   : > { %v7979_v15 = vadd.f32 %v3648_v36, %v7714_v49  ;;  %3684 = vrot.lane.b32.xlu0 %v7279_v0, %s5453_s26  ;;  %v7983_v24 = vpop.f32.mrf.mxu2  ;;  %3992 = vrot.lane.b32.xlu1 %v7423_v35, %s5452_s20  ;;  %v2065_v13 = vadd.f32 %v2064_v6, %v7542_v27  ;;  %v5103_v6 = vld [vmem:[#allocation6 + $0xe8] sm:$0xff] }
 0x385   : > { %v7988_v11 = vpop.f32.mrf.mxu1  ;;  %v7990_v10 = vpop.f32.mrf.mxu3 }
 0x386   : > { %10581 = vst [vmem:[#allocation162_spill] sm:$0xff] %v7990_v10  ;;  %v3615_v12 = vpop.permute.xlu0 %3614  ;;  %v7992_v56 = vpop.permute.xlu2 %3704  ;;  %v2190_v49 = vadd.f32 %v7838_v47, %v2065_v13  ;;  %2503 = vmatmul.f32.gmra.mxu0 %v5099_v7  ;;  %v5116_v10 = vld [vmem:[#allocation6 + $0x120] sm:$0xff] }
 0x387   : > { %10582 = vst [vmem:[#allocation163_spill] sm:$0xff] %v7992_v56  ;;  %v7998_v22 = vsel %vm817_vm5, %v7872_v46, %v3615_v12  ;;  %v3631_v30 = vsel %vm817_vm5, %v3615_v12, %v7842_v31  ;;  %v3611_v28 = vpop.permute.xlu1 %3610  ;;  %v5104_v31 = vld [vmem:[#allocation6 + $0xc0] sm:$0xff] }
 0x388   : > { %10583 = vst [vmem:[#allocation164_spill] sm:$0xff] %v7998_v22  ;;  %v3644_v36 = vmul.f32 %v3631_v30, %v10572_v2  ;;  %4832 = vmatmul.msk.f32.gmra.mxu1 %vm1863_vm9, %v5103_v6  ;;  %v8008_v47 = vsel %vm817_vm5, %v7907_v38, %v3611_v28  ;;  %v3629_v46 = vsel %vm817_vm5, %v3611_v28, %v7847_v18  ;;  %v5105_v30 = vld [vmem:[#allocation6 + $0xb0] sm:$0xff] }
 0x389   : > { %10584 = vst [vmem:[#allocation165_spill] sm:$0xff] %v8008_v47  ;;  %v8014_v13 = vadd.f32 %v7898_v54, %v2190_v49  ;;  %2762 = vmatmul.f32.gmra.mxu2 %v5104_v31  ;;  %v3636_v7 = vmul.f32 %v3629_v46, %v10572_v2  ;;  %v5106_v31 = vld [vmem:[#allocation6 + $0x100] sm:$0xff]  ;;  %v5110_v22 = vld [vmem:[#allocation6 + $0xf0] sm:$0xff] }
 0x38a   : > { %v3660_v12 = vmul.f32 %v3644_v36, %v7473_v26  ;;  %2884 = vmatmul.f32.gmra.mxu3 %v5105_v30 }
 0x38b   : > { %10585 = vst [vmem:[#allocation166_spill] sm:$0xff] %v8014_v13  ;;  %v3652_v6 = vmul.f32 %v3636_v7, %v7419_v21  ;;  %3994 = vrot.lane.b32.xlu2 %v7400_v44, %s5452_s20  ;;  %v2067_v18 = vpop.f32.mrf.mxu0  ;;  %v5107_v7 = vld [vmem:[#allocation6 + $0xd8] sm:$0xff] }
 0x38c   : > { %v8022_v38 = vadd.f32 %v3660_v12, %v7805_v48  ;;  %3878 = vrot.lane.b32.xlu0 %v7309_v55, %s5455_s29  ;;  %v2323_v54 = vpop.f32.mrf.mxu2  ;;  %3776 = vrot.lane.b32.xlu1 %v7259_v45, %s5450_s18  ;;  %v2068_v2 = vadd.f32 %v2067_v18, %v7557_v53  ;;  %v5108_v12 = vld [vmem:[#allocation6 + $0xc8] sm:$0xff] }
 0x38d   : > { %v8029_v26 = vadd.f32 %v3652_v6, %v7792_v29  ;;  %v8032_v21 = vpop.f32.mrf.mxu1  ;;  %v8034_v49 = vpop.f32.mrf.mxu3  ;;  %v5120_v53 = vld [vmem:[#allocation6 + $0x128] sm:$0xff] }
 0x38e   : > { %10586 = vst [vmem:[#allocation167_spill] sm:$0xff] %v8034_v49  ;;  %v8036_v28 = vpop.permute.xlu0 %3696  ;;  %v8038_v48 = vpop.permute.xlu2 %3700  ;;  %v2193_v36 = vadd.f32 %v7868_v33, %v2068_v2  ;;  %2506 = vmatmul.f32.gmra.mxu0 %v5102_v19  ;;  %v5115_v49 = vld [vmem:[#allocation6 + $0x148] sm:$0xff] }
 0x38f   : > { %10587 = vst [vmem:[#allocation168_spill] sm:$0xff] %v8036_v28  ;;  %v8041_v46 = vpop.permute.xlu1 %3688 }
 0x390   : > { %10588 = vst [vmem:[#allocation169_spill] sm:$0xff] %v8038_v48  ;;  %4833 = vmatmul.msk.f32.gmra.mxu1 %vm1863_vm9, %v5106_v31  ;;  %v8045_v29 = vadd.f32 %v7942_v63, %v2193_v36  ;;  %v5109_v48 = vld [vmem:[#allocation6 + $0x118] sm:$0xff] }
 0x391   : > { %10589 = vst [vmem:[#allocation170_spill] sm:$0xff] %v8041_v46  ;;  %2765 = vmatmul.f32.gmra.mxu2 %v5107_v7 }
 0x392   : > { %10590 = vst [vmem:[#allocation171_spill] sm:$0xff] %v8045_v29  ;;  %2887 = vmatmul.f32.gmra.mxu3 %v5108_v12 }
 0x393   : > { %3778 = vrot.lane.b32.xlu2 %v7215_v41, %s5450_s18  ;;  %v2070_v6 = vpop.f32.mrf.mxu0 }
 0x394   : > { %3972 = vrot.lane.b32.xlu0 %v7279_v0, %s5452_s20  ;;  %v2326_v33 = vpop.f32.mrf.mxu2  ;;  %3894 = vrot.lane.b32.xlu1 %v7404_v4, %s5455_s29  ;;  %v2071_v19 = vadd.f32 %v2070_v6, %v7530_v8 }
 0x395   : > { %v8054_v18 = vpop.f32.mrf.mxu1  ;;  %v8056_v63 = vpop.f32.mrf.mxu3 }
 0x396   : > { %10591 = vst [vmem:[#allocation172_spill] sm:$0xff] %v8056_v63  ;;  %v8058_v2 = vpop.permute.xlu0 %3706  ;;  %v8060_v36 = vpop.permute.xlu2 %3786  ;;  %v2196_v31 = vadd.f32 %v7903_v32, %v2071_v19  ;;  %2509 = vmatmul.f32.gmra.mxu0 %v5105_v30 }
 0x397   : > { %10592 = vst [vmem:[#allocation173_spill] sm:$0xff] %v8060_v36  ;;  %v8063_v7 = vpop.permute.xlu1 %3698 }
 0x398   : > { %10593 = vst [vmem:[#allocation174_spill] sm:$0xff] %v8063_v7  ;;  %4834 = vmatmul.msk.f32.gmra.mxu1 %vm1863_vm9, %v5109_v48  ;;  %v8070_v6 = vsel %vm907_vm3, %v8063_v7, %v8058_v2  ;;  %v8073_v28 = vadd.f32 %v7983_v24, %v2196_v31 }
 0x399   : > { %10594 = vst [vmem:[#allocation175_spill] sm:$0xff] %v8070_v6  ;;  %2768 = vmatmul.f32.gmra.mxu2 %v5110_v22 }
 0x39a   : > { %10595 = vst [vmem:[#allocation176_spill] sm:$0xff] %v8073_v28  ;;  %2890 = vmatmul.f32.gmra.mxu3 %v5111_v43 }
 0x39b   : > { %3902 = vrot.lane.b32.xlu2 %v7452_v5, %s5455_s29  ;;  %v2073_v32 = vpop.f32.mrf.mxu0 }
 0x39c   : > { %4064 = vrot.lane.b32.xlu0 %v7259_v45, %s5451_s19  ;;  %v2329_v30 = vpop.f32.mrf.mxu2  ;;  %3988 = vrot.lane.b32.xlu1 %v7369_v1, %s5452_s20  ;;  %v2074_v48 = vadd.f32 %v2073_v32, %v7565_v3  ;;  %v5114_v32 = vld [vmem:[#allocation6 + $0xf8] sm:$0xff] }
 0x39d   : > { %v8082_v19 = vpop.f32.mrf.mxu1  ;;  %v8084_v24 = vpop.f32.mrf.mxu3 }
 0x39e   : > { %10596 = vst [vmem:[#allocation177_spill] sm:$0xff] %v8084_v24  ;;  %v8086_v22 = vpop.permute.xlu0 %3708  ;;  %v8088_v31 = vpop.permute.xlu2 %3800  ;;  %v2199_v7 = vadd.f32 %v7947_v57, %v2074_v48  ;;  %2512 = vmatmul.f32.gmra.mxu0 %v5108_v12  ;;  %v10601_v12 = vld [vmem:[#allocation124_spill] sm:$0xff] }
 0x39f   : > { %10597 = vst [vmem:[#allocation178_spill] sm:$0xff] %v8086_v22  ;;  %v8091_v6 = vpop.permute.xlu1 %3692 }
 0x3a0   : > { %10598 = vst [vmem:[#allocation179_spill] sm:$0xff] %v8088_v31  ;;  %4835 = vmatmul.msk.f32.gmra.mxu1 %vm1863_vm9, %v5112_v58  ;;  %v8094_v47 = vadd.f32 %v2323_v54, %v2199_v7 }
 0x3a1   : > { %10599 = vst [vmem:[#allocation180_spill] sm:$0xff] %v8091_v6  ;;  %2771 = vmatmul.f32.gmra.mxu2 %v5113_v9 }
 0x3a2   : > { %10600 = vst [vmem:[#allocation181_spill] sm:$0xff] %v8094_v47  ;;  %2893 = vmatmul.f32.gmra.mxu3 %v5114_v32  ;;  %v5122_v47 = vld [vmem:[#allocation6 + $0x150] sm:$0xff] }
 0x3a3   : > { %3996 = vrot.lane.b32.xlu2 %v7433_v42, %s5452_s20  ;;  %v2076_v24 = vpop.f32.mrf.mxu0 }
 0x3a4   : > { %4082 = vrot.lane.b32.xlu0 %v7390_v16, %s5451_s19  ;;  %v2332_v57 = vpop.f32.mrf.mxu2  ;;  %4066 = vrot.lane.b32.xlu1 %v7215_v41, %s5451_s19  ;;  %v2077_v48 = vadd.f32 %v2076_v24, %v10601_v12  ;;  %v5117_v24 = vld [vmem:[#allocation6 + $0x110] sm:$0xff]  ;;  %v5118_v12 = vld [vmem:[#allocation6 + $0x160] sm:$0xff] }
 0x3a5   : > { %v8103_v58 = vpop.f32.mrf.mxu1  ;;  %v8105_v54 = vpop.f32.mrf.mxu3 }
 0x3a6   : > { %10602 = vst [vmem:[#allocation182_spill] sm:$0xff] %v8105_v54  ;;  %v8107_v9 = vpop.permute.xlu0 %3792  ;;  %v8109_v7 = vpop.permute.xlu2 %3702  ;;  %v2202_v63 = vadd.f32 %v7988_v11, %v2077_v48  ;;  %2515 = vmatmul.f32.gmra.mxu0 %v5111_v43  ;;  %v10607_v43 = vld [vmem:[#allocation117_spill] sm:$0xff] }
 0x3a7   : > { %10603 = vst [vmem:[#allocation183_spill] sm:$0xff] %v8107_v9  ;;  %v8112_v3 = vpop.permute.xlu1 %3784 }
 0x3a8   : > { %10604 = vst [vmem:[#allocation184_spill] sm:$0xff] %v8109_v7  ;;  %4836 = vmatmul.msk.f32.gmra.mxu1 %vm1863_vm9, %v5115_v49  ;;  %v8115_v8 = vadd.f32 %v2326_v33, %v2202_v63 }
 0x3a9   : > { %10605 = vst [vmem:[#allocation185_spill] sm:$0xff] %v8112_v3  ;;  %2774 = vmatmul.f32.gmra.mxu2 %v5116_v10 }
 0x3aa   : > { %10606 = vst [vmem:[#allocation186_spill] sm:$0xff] %v8115_v8  ;;  %2896 = vmatmul.f32.gmra.mxu3 %v5117_v24  ;;  %v5124_v8 = vld [vmem:[#allocation6 + $0x190] sm:$0xff] }
 0x3ab   : > { %4080 = vrot.lane.b32.xlu2 %v7365_v60, %s5451_s19  ;;  %v2079_v9 = vpop.f32.mrf.mxu0 }
 0x3ac   : > { %3686 = vrot.lane.b32.xlu0 %v7309_v55, %s5453_s26  ;;  %v2335_v11 = vpop.f32.mrf.mxu2  ;;  %4088 = vrot.lane.b32.xlu1 %v7423_v35, %s5451_s19  ;;  %v2080_v48 = vadd.f32 %v2079_v9, %v10607_v43 }
 0x3ad   : > { %v8124_v49 = vpop.f32.mrf.mxu1  ;;  %v8126_v33 = vpop.f32.mrf.mxu3 }
 0x3ae   : > { %10608 = vst [vmem:[#allocation187_spill] sm:$0xff] %v8126_v33  ;;  %v8128_v10 = vpop.permute.xlu0 %3802  ;;  %v8130_v63 = vpop.permute.xlu2 %3796  ;;  %v2205_v7 = vadd.f32 %v8032_v21, %v2080_v48  ;;  %2518 = vmatmul.f32.gmra.mxu0 %v5114_v32  ;;  %v5119_v33 = vld [vmem:[#allocation6 + $0x138] sm:$0xff]  ;;  %v10613_v32 = vld [vmem:[#allocation88_spill] sm:$0xff]  ;;  %v10614_v48 = vld [vmem:[#allocation125_spill] sm:$0xff] }
 0x3af   : > { %10609 = vst [vmem:[#allocation188_spill] sm:$0xff] %v8130_v63  ;;  %v8133_v54 = vpop.permute.xlu1 %3794 }
 0x3b0   : > { %10610 = vst [vmem:[#allocation189_spill] sm:$0xff] %v8133_v54  ;;  %4837 = vmatmul.msk.f32.gmra.mxu1 %vm1863_vm9, %v5118_v12  ;;  %v8140_v9 = vsel %vm997_vm1, %v8133_v54, %v8128_v10  ;;  %v8142_v43 = vadd.f32 %v2329_v30, %v2205_v7 }
 0x3b1   : > { %10611 = vst [vmem:[#allocation190_spill] sm:$0xff] %v8140_v9  ;;  %2777 = vmatmul.f32.gmra.mxu2 %v5119_v33 }
 0x3b2   : > { %10612 = vst [vmem:[#allocation191_spill] sm:$0xff] %v8142_v43  ;;  %2899 = vmatmul.f32.gmra.mxu3 %v5120_v53  ;;  %v5121_v43 = vld [vmem:[#allocation6 + $0x178] sm:$0xff] }
 0x3b3   : > { %4090 = vrot.lane.b32.xlu2 %v7400_v44, %s5451_s19  ;;  %v2082_v21 = vpop.f32.mrf.mxu0 }
 0x3b4   : > { %3882 = vrot.lane.b32.xlu0 %v10613_v32, %s5455_s29  ;;  %v2338_v12 = vpop.f32.mrf.mxu2  ;;  %3780 = vrot.lane.b32.xlu1 %v7279_v0, %s5450_s18  ;;  %v2083_v63 = vadd.f32 %v2082_v21, %v10614_v48  ;;  %v5123_v21 = vld [vmem:[#allocation6 + $0x140] sm:$0xff] }
 0x3b5   : > { %v8151_v9 = vpop.f32.mrf.mxu1  ;;  %v8153_v30 = vpop.f32.mrf.mxu3 }
 0x3b6   : > { %10615 = vst [vmem:[#allocation88_spill] sm:$0xff] %v8153_v30  ;;  %v8155_v7 = vpop.permute.xlu0 %3710  ;;  %v8157_v33 = vpop.permute.xlu2 %3874  ;;  %v2208_v54 = vadd.f32 %v8054_v18, %v2083_v63  ;;  %2521 = vmatmul.f32.gmra.mxu0 %v5117_v24  ;;  %v10620_v30 = vld [vmem:[#allocation44_spill] sm:$0xff] }
 0x3b7   : > { %10616 = vst [vmem:[#allocation192_spill] sm:$0xff] %v8155_v7  ;;  %v8160_v27 = vpop.permute.xlu1 %3694  ;;  %v10621_v24 = vld [vmem:[#allocation128_spill] sm:$0xff] }
 0x3b8   : > { %10617 = vst [vmem:[#allocation193_spill] sm:$0xff] %v8157_v33  ;;  %4838 = vmatmul.msk.f32.gmra.mxu1 %vm1863_vm9, %v5121_v43  ;;  %v8163_v28 = vadd.f32 %v2332_v57, %v2208_v54 }
 0x3b9   : > { %10618 = vst [vmem:[#allocation194_spill] sm:$0xff] %v8160_v27  ;;  %2780 = vmatmul.f32.gmra.mxu2 %v5122_v47 }
 0x3ba   : > { %10619 = vst [vmem:[#allocation195_spill] sm:$0xff] %v8163_v28  ;;  %2902 = vmatmul.f32.gmra.mxu3 %v5123_v21 }
 0x3bb   : > { %3880 = vrot.lane.b32.xlu2 %v10620_v30, %s5455_s29  ;;  %v2085_v48 = vpop.f32.mrf.mxu0 }
 0x3bc   : > { %3998 = vrot.lane.b32.xlu0 %v7452_v5, %s5452_s20  ;;  %v2341_v18 = vpop.f32.mrf.mxu2  ;;  %3974 = vrot.lane.b32.xlu1 %v7309_v55, %s5452_s20  ;;  %v2086_v63 = vadd.f32 %v2085_v48, %v10621_v24  ;;  %v5126_v48 = vld [vmem:[#allocation6 + $0x158] sm:$0xff] }
 0x3bd   : > { %v8172_v43 = vpop.f32.mrf.mxu3  ;;  %v8174_v57 = vpop.f32.mrf.mxu1 }
 0x3be   : > { %10622 = vst [vmem:[#allocation44_spill] sm:$0xff] %v8172_v43  ;;  %v8176_v47 = vpop.permute.xlu0 %3804  ;;  %v8178_v54 = vpop.permute.xlu2 %3896  ;;  %v2211_v28 = vadd.f32 %v8082_v19, %v2086_v63  ;;  %2524 = vmatmul.f32.gmra.mxu0 %v5120_v53  ;;  %v10627_v53 = vld [vmem:[#allocation122_spill] sm:$0xff] }
 0x3bf   : > { %10623 = vst [vmem:[#allocation196_spill] sm:$0xff] %v8176_v47  ;;  %v8181_v29 = vpop.permute.xlu1 %3788 }
 0x3c0   : > { %10624 = vst [vmem:[#allocation197_spill] sm:$0xff] %v8178_v54  ;;  %4839 = vmatmul.msk.f32.gmra.mxu1 %vm1863_vm9, %v5124_v8  ;;  %v8184_v13 = vadd.f32 %v2335_v11, %v2211_v28 }
 0x3c1   : > { %10625 = vst [vmem:[#allocation198_spill] sm:$0xff] %v8181_v29  ;;  %2783 = vmatmul.f32.gmra.mxu2 %v5125_v39  ;;  %v10633_v29 = vld [vmem:[#allocation109_spill] sm:$0xff] }
 0x3c2   : > { %10626 = vst [vmem:[#allocation199_spill] sm:$0xff] %v8184_v13  ;;  %2905 = vmatmul.f32.gmra.mxu3 %v5126_v48 }
 0x3c3   : > { %3990 = vrot.lane.b32.xlu2 %v7404_v4, %s5452_s20  ;;  %v2088_v43 = vpop.f32.mrf.mxu0 }
 0x3c4   : > { %4092 = vrot.lane.b32.xlu0 %v7433_v42, %s5451_s19  ;;  %v2344_v19 = vpop.f32.mrf.mxu2  ;;  %4068 = vrot.lane.b32.xlu1 %v7279_v0, %s5451_s19  ;;  %v2089_v63 = vadd.f32 %v2088_v43, %v10627_v53  ;;  %v5127_v53 = vld [vmem:[#allocation6 + $0x1a8] sm:$0xff] }
 0x3c5   : > { %v8193_v8 = vpop.f32.mrf.mxu3  ;;  %v8195_v28 = vpop.f32.mrf.mxu1 }
 0x3c6   : > { %10628 = vst [vmem:[#allocation200_spill] sm:$0xff] %v8193_v8  ;;  %v8197_v39 = vpop.permute.xlu0 %3888  ;;  %v8199_v11 = vpop.permute.xlu2 %3682  ;;  %v2214_v54 = vadd.f32 %v8103_v58, %v2089_v63  ;;  %2527 = vmatmul.f32.gmra.mxu0 %v5123_v21  ;;  %v5129_v58 = vld [vmem:[#allocation6 + $0x170] sm:$0xff] }
 0x3c7   : > { %10629 = vst [vmem:[#allocation201_spill] sm:$0xff] %v8197_v39  ;;  %v3725_v24 = vsel %vm907_vm3, %v8058_v2, %v8199_v11  ;;  %v8206_v13 = vpop.permute.xlu1 %3872  ;;  %v5128_v39 = vld [vmem:[#allocation6 + $0x180] sm:$0xff] }
 0x3c8   : > { %10630 = vst [vmem:[#allocation202_spill] sm:$0xff] %v8206_v13  ;;  %v3732_v43 = vmul.f32 %v3725_v24, %v10631_v25  ;;  %4840 = vmatmul.msk.f32.gmra.mxu1 %vm1863_vm9, %v5127_v53  ;;  %v8210_v8 = vadd.f32 %v2338_v12, %v2214_v54  ;;  %v10634_v12 = vld [vmem:[#allocation129_spill] sm:$0xff] }
 0x3c9   : > { %2786 = vmatmul.f32.gmra.mxu2 %v5128_v39 }
 0x3ca   : > { %10632 = vst [vmem:[#allocation41_spill] sm:$0xff] %v8210_v8  ;;  %v3748_v36 = vmul.f32 %v3732_v43, %v10633_v29  ;;  %2908 = vmatmul.f32.gmra.mxu3 %v5129_v58  ;;  %v5130_v43 = vld [vmem:[#allocation6 + $0x1c0] sm:$0xff] }
 0x3cb   : > { %4084 = vrot.lane.b32.xlu2 %v7369_v1, %s5451_s19  ;;  %v2091_v21 = vpop.f32.mrf.mxu0 }
 0x3cc   : > { %v8216_v2 = vadd.f32 %v3748_v36, %v8029_v26  ;;  %4176 = vrot.lane.b32.xlu0 %v7365_v60, %s5456_s10  ;;  %v2739_v24 = vpop.f32.mrf.mxu2  ;;  %4160 = vrot.lane.b32.xlu1 %v7259_v45, %s5456_s10  ;;  %v2092_v54 = vadd.f32 %v2091_v21, %v10634_v12  ;;  %v5131_v45 = vld [vmem:[#allocation6 + $0x198] sm:$0xff]  ;;  %v5132_v12 = vld [vmem:[#allocation6 + $0x188] sm:$0xff] }
 0x3cd   : > { %v8223_v53 = vpop.f32.mrf.mxu3  ;;  %v8225_v29 = vpop.f32.mrf.mxu1  ;;  %v10640_v21 = vld [vmem:[#allocation91_spill] sm:$0xff] }
 0x3ce   : > { %10635 = vst [vmem:[#allocation109_spill] sm:$0xff] %v8223_v53  ;;  %v8227_v63 = vpop.permute.xlu0 %3898  ;;  %v8229_v39 = vpop.permute.xlu2 %3806  ;;  %v2217_v26 = vadd.f32 %v8124_v49, %v2092_v54  ;;  %2530 = vmatmul.f32.gmra.mxu0 %v5126_v48  ;;  %v2740_v53 = vadd.f32 %v2739_v24, %v10640_v21  ;;  %v10641_v48 = vld [vmem:[#allocation133_spill] sm:$0xff] }
 0x3cf   : > { %10636 = vst [vmem:[#allocation203_spill] sm:$0xff] %v8227_v63  ;;  %v8232_v36 = vpop.permute.xlu1 %3890 }
 0x3d0   : > { %10637 = vst [vmem:[#allocation204_spill] sm:$0xff] %v8229_v39  ;;  %4841 = vmatmul.msk.f32.gmra.mxu1 %vm1863_vm9, %v5130_v43  ;;  %v8235_v60 = vadd.f32 %v2341_v18, %v2217_v26 }
 0x3d1   : > { %10638 = vst [vmem:[#allocation205_spill] sm:$0xff] %v8232_v36  ;;  %2789 = vmatmul.f32.gmra.mxu2 %v5131_v45 }
 0x3d2   : > { %10639 = vst [vmem:[#allocation206_spill] sm:$0xff] %v8235_v60  ;;  %2911 = vmatmul.f32.gmra.mxu3 %v5132_v12 }
 0x3d3   : > { %4162 = vrot.lane.b32.xlu2 %v7215_v41, %s5456_s10  ;;  %v2094_v63 = vpop.f32.mrf.mxu0 }
 0x3d4   : > { %4186 = vrot.lane.b32.xlu0 %v7400_v44, %s5456_s10  ;;  %v2742_v49 = vpop.f32.mrf.mxu2  ;;  %4178 = vrot.lane.b32.xlu1 %v7390_v16, %s5456_s10  ;;  %v2095_v18 = vadd.f32 %v2094_v63, %v10641_v48  ;;  %v5133_v44 = vld [vmem:[#allocation6 + $0x1d8] sm:$0xff] }
 0x3d5   : > { %v8245_v54 = vpop.f32.mrf.mxu1  ;;  %v2864_v26 = vpop.f32.mrf.mxu3 }
 0x3d6   : > { %v8247_v43 = vadd.f32 %v2864_v26, %v2740_v53  ;;  %v8249_v24 = vpop.permute.xlu0 %3790  ;;  %v8251_v45 = vpop.permute.xlu2 %3900  ;;  %v2220_v41 = vadd.f32 %v8151_v9, %v2095_v18  ;;  %2533 = vmatmul.f32.gmra.mxu0 %v5129_v58  ;;  %v5134_v53 = vld [vmem:[#allocation6 + $0x1b0] sm:$0xff]  ;;  %v10646_v9 = vld [vmem:[#allocation104_spill] sm:$0xff] }
 0x3d7   : > { %10643 = vst [vmem:[#allocation208_spill] sm:$0xff] %v8249_v24  ;;  %v8254_v60 = vpop.permute.xlu1 %3680  ;;  %v10647_v18 = vld [vmem:[#allocation84_spill] sm:$0xff] }
 0x3d8   : > { %10642 = vst [vmem:[#allocation207_spill] sm:$0xff] %v8247_v43  ;;  %4842 = vmatmul.msk.f32.gmra.mxu1 %vm1863_vm9, %v5133_v44  ;;  %v3724_v63 = vsel %vm907_vm3, %v7992_v56, %v8254_v60  ;;  %v8261_v16 = vadd.f32 %v2344_v19, %v2220_v41  ;;  %v2365_v43 = vadd.f32 %v10647_v18, %v10640_v21  ;;  %v10648_v44 = vld [vmem:[#allocation66_spill] sm:$0xff]  ;;  %v10653_v56 = vld [vmem:[#allocation136_spill] sm:$0xff] }
 0x3d9   : > { %10644 = vst [vmem:[#allocation209_spill] sm:$0xff] %v8251_v45  ;;  %2792 = vmatmul.f32.gmra.mxu2 %v5134_v53  ;;  %v3728_v26 = vmul.f32 %v3724_v63, %v10631_v25  ;;  %v5135_v45 = vld [vmem:[#allocation6 + $0x1a0] sm:$0xff]  ;;  %v2743_v48 = vadd.f32 %v2742_v49, %v10648_v44 }
 0x3da   : > { %10645 = vst [vmem:[#allocation210_spill] sm:$0xff] %v8261_v16  ;;  %2914 = vmatmul.f32.gmra.mxu3 %v5135_v45 }
 0x3db   : > { %v3744_v58 = vmul.f32 %v3728_v26, %v10646_v9  ;;  %4184 = vrot.lane.b32.xlu2 %v7423_v35, %s5456_s10  ;;  %v2489_v36 = vpop.f32.mrf.mxu0  ;;  %v10652_v35 = vld [vmem:[#allocation96_spill] sm:$0xff] }
 0x3dc   : > { %3976 = vrot.lane.b32.xlu0 %v10620_v30, %s5452_s20  ;;  %v2745_v19 = vpop.f32.mrf.mxu2  ;;  %3782 = vrot.lane.b32.xlu1 %v7309_v55, %s5450_s18  ;;  %v2490_v63 = vadd.f32 %v2489_v36, %v2365_v43  ;;  %v3537_v21 = vmul.f32 %v10653_v56, %v10652_v35  ;;  %v5137_v43 = vld [vmem:[#allocation6 + $0x1c8] sm:$0xff]  ;;  %v10657_v56 = vld [vmem:[#allocation26_spill] sm:$0xff]  ;;  %s4640_s18 = scalar_lea.hbm %s9979_s6, %s4953_s9 }
 0x3dd   : > { %v8275_v41 = vadd.f32 %v3744_v58, %v7979_v15  ;;  %v8277_v53 = vpop.f32.mrf.mxu1  ;;  %v2867_v26 = vpop.f32.mrf.mxu3  ;;  %v5136_v15 = vld [vmem:[#allocation6 + $0x1f0] sm:$0xff]  ;;  %v10656_v58 = vld [vmem:[#allocation92_spill] sm:$0xff] }
 0x3de   : > { %v8279_v9 = vadd.f32 %v2867_v26, %v2743_v48  ;;  %v8281_v18 = vpop.permute.xlu0 %3876  ;;  %v8283_v49 = vpop.permute.xlu2 %3984  ;;  %v2615_v16 = vadd.f32 %v8174_v57, %v2490_v63  ;;  %2536 = vmatmul.f32.gmra.mxu0 %v5132_v12  ;;  %v5138_v48 = vld [vmem:[#allocation6 + $0x1b8] sm:$0xff]  ;;  %v2368_v26 = vadd.f32 %v10656_v58, %v10648_v44  ;;  %v2746_v57 = vadd.f32 %v2745_v19, %v10657_v56 }
 0x3df   : > { %10650 = vst [vmem:[#allocation84_spill] sm:$0xff] %v8281_v18  ;;  %v8288_v8 = vpop.permute.xlu1 %3798  ;;  %v3541_v19 = vmul.f32 %v7708_v50, %v10652_v35 }
 0x3e0   : > { %10649 = vst [vmem:[#allocation104_spill] sm:$0xff] %v8279_v9  ;;  %4843 = vmatmul.msk.f32.gmra.mxu1 %vm1863_vm9, %v5136_v15  ;;  %v8291_v36 = vmul.f32 %v3537_v21, %v2615_v16 }
 0x3e1   : > { %10651 = vst [vmem:[#allocation211_spill] sm:$0xff] %v8283_v49  ;;  %2795 = vmatmul.f32.gmra.mxu2 %v5137_v43  ;;  %v5139_v49 = vld [vmem:[#allocation6 + $0x208] sm:$0xff] }
 0x3e2   : > { %10654 = vst [vmem:[#allocation96_spill] sm:$0xff] %v8288_v8  ;;  %2917 = vmatmul.f32.gmra.mxu3 %v5138_v48 }
 0x3e3   : > { %10655 = vst [vmem:[#allocation136_spill] sm:$0xff] %v8291_v36  ;;  %3884 = vrot.lane.b32.xlu2 %v7356_v40, %s5455_s29  ;;  %v2492_v12 = vpop.f32.mrf.mxu0 }
 0x3e4   : > { %4086 = vrot.lane.b32.xlu0 %v7404_v4, %s5451_s19  ;;  %v2748_v63 = vpop.f32.mrf.mxu2  ;;  %3978 = vrot.lane.b32.xlu1 %v10613_v32, %s5452_s20  ;;  %v2493_v16 = vadd.f32 %v2492_v12, %v2368_v26  ;;  %v5140_v12 = vld [vmem:[#allocation6 + $0x1e0] sm:$0xff] }
 0x3e5   : > { %v8302_v21 = vpop.f32.mrf.mxu1  ;;  %v2870_v15 = vpop.f32.mrf.mxu3 }
 0x3e6   : > { %v8304_v43 = vadd.f32 %v2870_v15, %v2746_v57  ;;  %v8306_v58 = vpop.permute.xlu0 %3968  ;;  %v8308_v8 = vpop.permute.xlu2 %3994  ;;  %v2618_v9 = vadd.f32 %v8195_v28, %v2493_v16  ;;  %2539 = vmatmul.f32.gmra.mxu0 %v5135_v45  ;;  %v10663_v57 = vld [vmem:[#allocation83_spill] sm:$0xff] }
 0x3e7   : > { %10659 = vst [vmem:[#allocation212_spill] sm:$0xff] %v8306_v58  ;;  %v8313_v44 = vpop.permute.xlu1 %3892  ;;  %v2749_v15 = vadd.f32 %v2748_v63, %v10663_v57 }
 0x3e8   : > { %10658 = vst [vmem:[#allocation92_spill] sm:$0xff] %v8304_v43  ;;  %4844 = vmatmul.msk.f32.gmra.mxu1 %vm1863_vm9, %v5139_v49  ;;  %v8316_v26 = vmul.f32 %v3541_v19, %v2618_v9  ;;  %v5141_v43 = vld [vmem:[#allocation6 + $0x1d0] sm:$0xff]  ;;  %v10667_v19 = vld [vmem:[#allocation137_spill] sm:$0xff] }
 0x3e9   : > { %10660 = vst [vmem:[#allocation213_spill] sm:$0xff] %v8308_v8  ;;  %2798 = vmatmul.f32.gmra.mxu2 %v5140_v12  ;;  %v10664_v8 = vld [vmem:[#allocation52_spill] sm:$0xff]  ;;  %v3545_v12 = vmul.f32 %v10667_v19, %v10652_v35  ;;  %v10670_v19 = vld [vmem:[#allocation127_spill] sm:$0xff] }
 0x3ea   : > { %10661 = vst [vmem:[#allocation214_spill] sm:$0xff] %v8313_v44  ;;  %2920 = vmatmul.f32.gmra.mxu3 %v5141_v43  ;;  %v2371_v36 = vadd.f32 %v10664_v8, %v10657_v56 }
 0x3eb   : > { %10662 = vst [vmem:[#allocation215_spill] sm:$0xff] %v8316_v26  ;;  %4070 = vrot.lane.b32.xlu2 %v7309_v55, %s5451_s19  ;;  %v2495_v50 = vpop.f32.mrf.mxu0 }
 0x3ec   : > { %4180 = vrot.lane.b32.xlu0 %v7369_v1, %s5456_s10  ;;  %v2751_v28 = vpop.f32.mrf.mxu2  ;;  %4094 = vrot.lane.b32.xlu1 %v7452_v5, %s5451_s19  ;;  %v2496_v45 = vadd.f32 %v2495_v50, %v2371_v36  ;;  %v10669_v50 = vld [vmem:[#allocation98_spill] sm:$0xff] }
 0x3ed   : > { %v8327_v9 = vpop.f32.mrf.mxu1  ;;  %v2873_v49 = vpop.f32.mrf.mxu3 }
 0x3ee   : > { %v8329_v63 = vadd.f32 %v2873_v49, %v2749_v15  ;;  %v8331_v16 = vpop.permute.xlu0 %3986  ;;  %v8333_v8 = vpop.permute.xlu2 %3778  ;;  %v2621_v56 = vadd.f32 %v8225_v29, %v2496_v45  ;;  %2542 = vmatmul.f32.gmra.mxu0 %v5138_v48  ;;  %v5142_v49 = vld [vmem:[#allocation6 + $0x220] sm:$0xff]  ;;  %v5144_v29 = vld [vmem:[#allocation6 + $0x1e8] sm:$0xff]  ;;  %v10671_v45 = vld [vmem:[#allocation67_spill] sm:$0xff] }
 0x3ef   : > { %10666 = vst [vmem:[#allocation216_spill] sm:$0xff] %v8331_v16  ;;  %v3821_v1 = vsel %vm997_vm1, %v8128_v10, %v8333_v8  ;;  %v8342_v36 = vpop.permute.xlu1 %3970  ;;  %v5143_v16 = vld [vmem:[#allocation6 + $0x1f8] sm:$0xff]  ;;  %v2374_v26 = vadd.f32 %v10671_v45, %v10663_v57  ;;  %v10672_v10 = vld [vmem:[#allocation40_spill] sm:$0xff] }
 0x3f0   : > { %10665 = vst [vmem:[#allocation52_spill] sm:$0xff] %v8329_v63  ;;  %v3828_v15 = vmul.f32 %v3821_v1, %v10669_v50  ;;  %4845 = vmatmul.msk.f32.gmra.mxu1 %vm1863_vm9, %v5142_v49  ;;  %v8346_v63 = vmul.f32 %v3545_v12, %v2621_v56  ;;  %v2752_v48 = vadd.f32 %v2751_v28, %v10672_v10 }
 0x3f1   : > { %10668 = vst [vmem:[#allocation137_spill] sm:$0xff] %v8342_v36  ;;  %2801 = vmatmul.f32.gmra.mxu2 %v5143_v16 }
 0x3f2   : > { %v3844_v44 = vmul.f32 %v3828_v15, %v10670_v19  ;;  %2923 = vmatmul.f32.gmra.mxu3 %v5144_v29 }
 0x3f3   : > { %4164 = vrot.lane.b32.xlu2 %v7279_v0, %s5456_s10  ;;  %v2498_v49 = vpop.f32.mrf.mxu0 }
 0x3f4   : > { %v8355_v1 = vadd.f32 %v3844_v44, %v8216_v2  ;;  %3980 = vrot.lane.b32.xlu0 %v7356_v40, %s5452_s20  ;;  %v2754_v56 = vpop.f32.mrf.mxu2  ;;  %4188 = vrot.lane.b32.xlu1 %v7433_v42, %s5456_s10  ;;  %v2499_v16 = vadd.f32 %v2498_v49, %v2374_v26  ;;  %v10675_v2 = vld [vmem:[#allocation139_spill] sm:$0xff] }
 0x3f5   : > { %v8361_v12 = vpop.f32.mrf.mxu1  ;;  %v2876_v15 = vpop.f32.mrf.mxu3  ;;  %v3549_v44 = vmul.f32 %v10675_v2, %v10652_v35  ;;  %v5145_v49 = vld [vmem:[#allocation6 + $0x238] sm:$0xff]  ;;  %v10678_v35 = vld [vmem:[#allocation113_spill] sm:$0xff] }
 0x3f6   : > { %v8363_v19 = vadd.f32 %v2876_v15, %v2752_v48  ;;  %v8365_v0 = vpop.permute.xlu0 %3684  ;;  %v8367_v28 = vpop.permute.xlu2 %3902  ;;  %v2624_v45 = vadd.f32 %v8245_v54, %v2499_v16  ;;  %2545 = vmatmul.f32.gmra.mxu0 %v5141_v43  ;;  %v5147_v54 = vld [vmem:[#allocation6 + $0x200] sm:$0xff]  ;;  %v10680_v43 = vld [vmem:[#allocation23_spill] sm:$0xff] }
 0x3f7   : > { %10674 = vst [vmem:[#allocation127_spill] sm:$0xff] %v8367_v28  ;;  %v3726_v42 = vsel %vm907_vm3, %v8086_v22, %v8365_v0  ;;  %v8376_v26 = vpop.permute.xlu1 %3992  ;;  %v5146_v28 = vld [vmem:[#allocation6 + $0x210] sm:$0xff]  ;;  %v10679_v16 = vld [vmem:[#allocation60_spill] sm:$0xff] }
 0x3f8   : > { %10673 = vst [vmem:[#allocation98_spill] sm:$0xff] %v8363_v19  ;;  %v3736_v48 = vmul.f32 %v3726_v42, %v10631_v25  ;;  %4846 = vmatmul.msk.f32.gmra.mxu1 %vm1863_vm9, %v5145_v49  ;;  %v8380_v15 = vmul.f32 %v3549_v44, %v2624_v45  ;;  %v2377_v19 = vadd.f32 %v10679_v16, %v10672_v10  ;;  %v5148_v10 = vld [vmem:[#allocation6 + $0x250] sm:$0xff] }
 0x3f9   : > { %10676 = vst [vmem:[#allocation67_spill] sm:$0xff] %v8376_v26  ;;  %2804 = vmatmul.f32.gmra.mxu2 %v5146_v28  ;;  %v2755_v26 = vadd.f32 %v2754_v56, %v10680_v43 }
 0x3fa   : > { %10677 = vst [vmem:[#allocation139_spill] sm:$0xff] %v8380_v15  ;;  %v3752_v2 = vmul.f32 %v3736_v48, %v10678_v35  ;;  %2926 = vmatmul.f32.gmra.mxu3 %v5147_v54 }
 0x3fb   : > { %3886 = vrot.lane.b32.xlu2 %v7324_v23, %s5455_s29  ;;  %v2501_v49 = vpop.f32.mrf.mxu0 }
 0x3fc   : > { %v8389_v42 = vadd.f32 %v3752_v2, %v7938_v62  ;;  %4166 = vrot.lane.b32.xlu0 %v7309_v55, %s5456_s10  ;;  %v2757_v28 = vpop.f32.mrf.mxu2  ;;  %4072 = vrot.lane.b32.xlu1 %v10620_v30, %s5451_s19  ;;  %v2502_v44 = vadd.f32 %v2501_v49, %v2377_v19  ;;  %v10684_v62 = vld [vmem:[#allocation94_spill] sm:$0xff]  ;;  %v5149_v49 = vld [vmem:[#allocation6 + $0x228] sm:$0xff] }
 0x3fd   : > { %v8395_v45 = vpop.f32.mrf.mxu1  ;;  %v2879_v48 = vpop.f32.mrf.mxu3  ;;  %v3633_v2 = vmul.f32 %v7889_v52, %v10684_v62  ;;  %v10685_v52 = vld [vmem:[#allocation68_spill] sm:$0xff] }
 0x3fe   : > { %v8397_v35 = vadd.f32 %v2879_v48, %v2755_v26  ;;  %v8399_v16 = vpop.permute.xlu0 %3878  ;;  %v8401_v56 = vpop.permute.xlu2 %3996  ;;  %v2627_v22 = vadd.f32 %v8277_v53, %v2502_v44  ;;  %2548 = vmatmul.f32.gmra.mxu0 %v5144_v29  ;;  %v5150_v53 = vld [vmem:[#allocation6 + $0x218] sm:$0xff]  ;;  %v10686_v29 = vld [vmem:[#allocation50_spill] sm:$0xff] }
 0x3ff   : > { %10682 = vst [vmem:[#allocation60_spill] sm:$0xff] %v8399_v16  ;;  %v8406_v55 = vpop.permute.xlu1 %3776  ;;  %v2380_v44 = vadd.f32 %v10686_v29, %v10680_v43 }
 0x400   : > { %10681 = vst [vmem:[#allocation113_spill] sm:$0xff] %v8397_v35  ;;  %4847 = vmatmul.msk.f32.gmra.mxu1 %vm1863_vm9, %v5148_v10  ;;  %v3820_v19 = vsel %vm997_vm1, %v8088_v31, %v8406_v55  ;;  %v8413_v26 = vmul.f32 %v3633_v2, %v2627_v22  ;;  %v10687_v35 = vld [vmem:[#allocation123_spill] sm:$0xff]  ;;  %v3637_v31 = vmul.f32 %v7854_v14, %v10684_v62  ;;  %v10693_v14 = vld [vmem:[#allocation38_spill] sm:$0xff] }
 0x401   : > { %10683 = vst [vmem:[#allocation217_spill] sm:$0xff] %v8401_v56  ;;  %2807 = vmatmul.f32.gmra.mxu2 %v5149_v49  ;;  %v3824_v48 = vmul.f32 %v3820_v19, %v10669_v50  ;;  %v2758_v56 = vadd.f32 %v2757_v28, %v10685_v52 }
 0x402   : > { %2929 = vmatmul.f32.gmra.mxu3 %v5150_v53 }
 0x403   : > { %v3840_v10 = vmul.f32 %v3824_v48, %v10687_v35  ;;  %4074 = vrot.lane.b32.xlu2 %v10613_v32, %s5451_s19  ;;  %v2504_v57 = vpop.f32.mrf.mxu0 }
 0x404   : > { %3982 = vrot.lane.b32.xlu0 %v7324_v23, %s5452_s20  ;;  %v2760_v22 = vpop.f32.mrf.mxu2  ;;  %4182 = vrot.lane.b32.xlu1 %v7404_v4, %s5456_s10  ;;  %v2505_v2 = vadd.f32 %v2504_v57, %v2380_v44  ;;  %v5152_v44 = vld [vmem:[#allocation6 + $0x240] sm:$0xff]  ;;  %s4643_s20 = sshll.u32 %s4640_s18, 4  ;;  %s4644_s20 = int_to_ptr.hbm [resolvable:$true] %s4643_s20 }
 0x405   : > { %v8427_v28 = vadd.f32 %v3840_v10, %v8275_v41  ;;  %v8429_v19 = vpop.f32.mrf.mxu1  ;;  %v2882_v49 = vpop.f32.mrf.mxu3  ;;  %v5151_v41 = vld [vmem:[#allocation6 + $0x268] sm:$0xff]  ;;  %s5385_s26 = sshra.s32 %s4644_s20, 4  ;;  %s5386_s26 = int_to_ptr.hbm [resolvable:$true] %s5385_s26 }
 0x406   : > { %v8431_v29 = vadd.f32 %v2882_v49, %v2758_v56  ;;  %v8433_v35 = vpop.permute.xlu0 %3972  ;;  %v8435_v48 = vpop.permute.xlu2 %4080  ;;  %v2630_v43 = vadd.f32 %v8302_v21, %v2505_v2  ;;  %2551 = vmatmul.f32.gmra.mxu0 %v5147_v54  ;;  %v5153_v56 = vld [vmem:[#allocation6 + $0x230] sm:$0xff]  ;;  %v10692_v10 = vld [vmem:[#allocation29_spill] sm:$0xff]  ;;  %v2761_v21 = vadd.f32 %v2760_v22, %v10693_v14  ;;  %v3641_v22 = vmul.f32 %v7878_v59, %v10684_v62  ;;  %s5387_s28 = scalar_lea.hbm %s5386_s26, 128  ;;  %p5392_p3 = scmp.lt.s32.totalorder %s5386_s26, %s9979_s6 }
 0x407   : > { %10689 = vst [vmem:[#allocation50_spill] sm:$0xff] %v8433_v35  ;;  %v8440_v4 = vpop.permute.xlu1 %3894  ;;  %v2383_v49 = vadd.f32 %v10692_v10, %v10685_v52  ;;  %v10699_v59 = vld [vmem:[#allocation57_spill] sm:$0xff]  ;;  %p5388_p0 = scmp.ne.s32.totalorder %s5386_s26, %s5387_s28  ;;  %p5393_p4 = scmp.lt.s32.totalorder %s5391_s11, %s5387_s28 }
 0x408   : > { %10688 = vst [vmem:[#allocation94_spill] sm:$0xff] %v8431_v29  ;;  %4848 = vmatmul.msk.f32.gmra.mxu1 %vm1863_vm9, %v5151_v41  ;;  %v8443_v57 = vmul.f32 %v3637_v31, %v2630_v43 }
 0x409   : > { %10690 = vst [vmem:[#allocation123_spill] sm:$0xff] %v8435_v48  ;;  %2810 = vmatmul.f32.gmra.mxu2 %v5152_v44  ;;  %v5154_v48 = vld [vmem:[#allocation6 + $0x280] sm:$0xff]  ;;  %p5389_p1 = pnand %p5388_p0, %p5533_p5  ;;  %p5394_p7 = por %p5393_p4, %p5392_p3 }
 0x40a   : > { %10691 = vst [vmem:[#allocation218_spill] sm:$0xff] %v8440_v4  ;;  %2932 = vmatmul.f32.gmra.mxu3 %v5153_v56  ;;  %v10709_v4 = vld [vmem:[#allocation90_spill] sm:$0xff] }
 0x40b   : > { %4190 = vrot.lane.b32.xlu2 %v7452_v5, %s5456_s10  ;;  %v2507_v54 = vpop.f32.mrf.mxu0  ;;  %p5390_p2 = pneg %p5389_p1 }
 0x40c   : > { %4170 = vrot.lane.b32.xlu0 %v10613_v32, %s5456_s10  ;;  %v2763_v2 = vpop.f32.mrf.mxu2  ;;  %4076 = vrot.lane.b32.xlu1 %v7356_v40, %s5451_s19  ;;  %v2508_v31 = vadd.f32 %v2507_v54, %v2383_v49  ;;  %v5155_v54 = vld [vmem:[#allocation6 + $0x258] sm:$0xff] }
 0x40d   : > { %v8454_v43 = vpop.f32.mrf.mxu1  ;;  %v2885_v41 = vpop.f32.mrf.mxu3  ;;  %p5395_p8 = pnand %p5394_p7, %p5390_p2 }
 0x40e   : > { %v8456_v44 = vadd.f32 %v2885_v41, %v2761_v21  ;;  %v8458_v10 = vpop.permute.xlu0 %4064  ;;  %v8460_v29 = vpop.permute.xlu2 %4090  ;;  %v2633_v5 = vadd.f32 %v8327_v9, %v2508_v31  ;;  %2554 = vmatmul.f32.gmra.mxu0 %v5150_v53  ;;  %v5156_v21 = vld [vmem:[#allocation6 + $0x248] sm:$0xff]  ;;  %v10698_v41 = vld [vmem:[#allocation43_spill] sm:$0xff]  ;;  %v2764_v9 = vadd.f32 %v2763_v2, %v10699_v59  ;;  %v3645_v2 = vmul.f32 %v7929_v37, %v10684_v62 }
 0x40f   : > { %10695 = vst [vmem:[#allocation219_spill] sm:$0xff] %v8458_v10  ;;  %v8465_v52 = vpop.permute.xlu1 %3988  ;;  %v10705_v37 = vld [vmem:[#allocation85_spill] sm:$0xff] }
 0x410   : > { %10694 = vst [vmem:[#allocation29_spill] sm:$0xff] %v8456_v44  ;;  %4849 = vmatmul.msk.f32.gmra.mxu1 %vm1863_vm9, %v5154_v48  ;;  %v8468_v49 = vmul.f32 %v3641_v22, %v2633_v5 }
 0x411   : > { %10696 = vst [vmem:[#allocation220_spill] sm:$0xff] %v8460_v29  ;;  %2813 = vmatmul.f32.gmra.mxu2 %v5155_v54  ;;  %v2386_v29 = vadd.f32 %v10698_v41, %v10693_v14 }
 0x412   : > { %10697 = vst [vmem:[#allocation221_spill] sm:$0xff] %v8465_v52  ;;  %2935 = vmatmul.f32.gmra.mxu3 %v5156_v21 }
 0x413   : > { %4168 = vrot.lane.b32.xlu2 %v10620_v30, %s5456_s10  ;;  %v2510_v53 = vpop.f32.mrf.mxu0 }
 0x414   : > { %4174 = vrot.lane.b32.xlu0 %v7324_v23, %s5456_s10  ;;  %v2766_v31 = vpop.f32.mrf.mxu2  ;;  %4078 = vrot.lane.b32.xlu1 %v7324_v23, %s5451_s19  ;;  %v2511_v5 = vadd.f32 %v2510_v53, %v2386_v29  ;;  %v10703_v53 = vld [vmem:[#allocation95_spill] sm:$0xff]  ;;  %s4641_s19 = sshll.u32 %s9907_s12, 4  ;;  %s4642_s19 = int_to_ptr.vmem [resolvable:$true] %s4641_s19 }
 0x415   : > { %v8479_v48 = vpop.f32.mrf.mxu1  ;;  %v2888_v22 = vpop.f32.mrf.mxu3  ;;  %v2767_v62 = vadd.f32 %v2766_v31, %v10705_v37 }
 0x416   : > { %v8481_v54 = vadd.f32 %v2888_v22, %v2764_v9  ;;  %v8483_v41 = vpop.permute.xlu0 %4082  ;;  %v8485_v44 = vpop.permute.xlu2 %3880  ;;  %v2636_v14 = vadd.f32 %v8361_v12, %v2511_v5  ;;  %2557 = vmatmul.f32.gmra.mxu0 %v5153_v56  ;;  %v5157_v22 = vld [vmem:[#allocation6 + $0x298] sm:$0xff]  ;;  %v5159_v5 = vld [vmem:[#allocation6 + $0x260] sm:$0xff] }
 0x417   : > { %10701 = vst [vmem:[#allocation222_spill] sm:$0xff] %v8483_v41  ;;  %v3912_v52 = vsel %vm1103_vm6, %v8206_v13, %v8485_v44  ;;  %v8494_v29 = vpop.permute.xlu1 %4066  ;;  %v5158_v41 = vld [vmem:[#allocation6 + $0x270] sm:$0xff]  ;;  %v10706_v13 = vld [vmem:[#allocation71_spill] sm:$0xff] }
 0x418   : > { %10700 = vst [vmem:[#allocation43_spill] sm:$0xff] %v8481_v54  ;;  %v3920_v9 = vmul.f32 %v3912_v52, %v10703_v53  ;;  %4850 = vmatmul.msk.f32.gmra.mxu1 %vm1863_vm9, %v5157_v22  ;;  %v8498_v54 = vmul.f32 %v3645_v2, %v2636_v14  ;;  %v2389_v56 = vadd.f32 %v10706_v13, %v10699_v59 }
 0x419   : > { %10702 = vst [vmem:[#allocation223_spill] sm:$0xff] %v8494_v29  ;;  %2816 = vmatmul.f32.gmra.mxu2 %v5158_v41  ;;  %v3720_v52 = vsel %vm907_vm3, %v8254_v60, %v8041_v46 }
 0x41a   : > { %10704 = vst [vmem:[#allocation95_spill] sm:$0xff] %v8498_v54  ;;  %v3936_v12 = vmul.f32 %v3920_v9, %v7822_v17  ;;  %2938 = vmatmul.f32.gmra.mxu3 %v5159_v5  ;;  %v3729_v54 = vmul.f32 %v3720_v52, %v10709_v4  ;;  %v10711_v52 = vld [vmem:[#allocation118_spill] sm:$0xff] }
 0x41b   : > { %4172 = vrot.lane.b32.xlu2 %v7356_v40, %s5456_s10  ;;  %v2513_v41 = vpop.f32.mrf.mxu0 }
 0x41c   : > { %v8511_v14 = vadd.f32 %v3936_v12, %v8427_v28  ;;  %v2769_v31 = vpop.f32.mrf.mxu2  ;;  %v2514_v2 = vadd.f32 %v2513_v41, %v2389_v56  ;;  %v5161_v41 = vld [vmem:[#allocation6 + $0x288] sm:$0xff] }
 0x41d   : > { %v8513_v17 = vpop.f32.mrf.mxu1  ;;  %v2891_v9 = vpop.f32.mrf.mxu3 }
 0x41e   : > { %v8515_v22 = vadd.f32 %v2891_v9, %v2767_v62  ;;  %v8517_v13 = vpop.permute.xlu0 %3686  ;;  %v8519_v59 = vpop.permute.xlu2 %3990  ;;  %v2639_v15 = vadd.f32 %v8395_v45, %v2514_v2  ;;  %2560 = vmatmul.f32.gmra.mxu0 %v5156_v21  ;;  %v5160_v62 = vld [vmem:[#allocation6 + $0x2b0] sm:$0xff]  ;;  %v5162_v45 = vld [vmem:[#allocation6 + $0x278] sm:$0xff]  ;;  %v10712_v2 = vld [vmem:[#allocation101_spill] sm:$0xff]  ;;  %v3721_v21 = vsel %vm907_vm3, %v8199_v11, %v7951_v20 }
 0x41f   : > { %10708 = vst [vmem:[#allocation224_spill] sm:$0xff] %v8519_v59  ;;  %v3727_v60 = vsel %vm907_vm3, %v8155_v7, %v8517_v13  ;;  %v8527_v28 = vpop.permute.xlu1 %4088  ;;  %v10750_v59 = vld [vmem:[#allocation134_spill] sm:$0xff] }
 0x420   : > { %10707 = vst [vmem:[#allocation71_spill] sm:$0xff] %v8515_v22  ;;  %v3740_v12 = vmul.f32 %v3727_v60, %v10631_v25  ;;  %4851 = vmatmul.msk.f32.gmra.mxu1 %vm1863_vm9, %v5160_v62  ;;  %v8531_v56 = vmul.f32 %v3729_v54, %v2639_v15  ;;  %v2392_v22 = vadd.f32 %v10712_v2, %v10705_v37  ;;  %v10713_v25 = vld [vmem:[#allocation33_spill] sm:$0xff] }
 0x421   : > { %10710 = vst [vmem:[#allocation90_spill] sm:$0xff] %v8527_v28  ;;  %2819 = vmatmul.f32.gmra.mxu2 %v5161_v41  ;;  %v2770_v60 = vadd.f32 %v2769_v31, %v10713_v25  ;;  %v3733_v37 = vmul.f32 %v3721_v21, %v10709_v4 }
 0x422   : > { %v3756_v9 = vmul.f32 %v3740_v12, %v10711_v52  ;;  %2941 = vmatmul.f32.gmra.mxu3 %v5162_v45 }
 0x423   : > { %v2516_v15 = vpop.f32.mrf.mxu0 }
 0x424   : > { %v8542_v62 = vadd.f32 %v3756_v9, %v8022_v38  ;;  %v2772_v54 = vpop.f32.mrf.mxu2  ;;  %v2517_v41 = vadd.f32 %v2516_v15, %v2392_v22  ;;  %v5163_v9 = vld [vmem:[#allocation6 + $0x2c8] sm:$0xff] }
 0x425   : > { %v8544_v28 = vpop.f32.mrf.mxu1  ;;  %v2894_v12 = vpop.f32.mrf.mxu3 }
 0x426   : > { %v8546_v52 = vadd.f32 %v2894_v12, %v2770_v60  ;;  %v8548_v7 = vpop.permute.xlu0 %3882  ;;  %v8550_v2 = vpop.permute.xlu2 %4084  ;;  %v2642_v11 = vadd.f32 %v8429_v19, %v2517_v41  ;;  %2563 = vmatmul.f32.gmra.mxu0 %v5159_v5  ;;  %v5164_v19 = vld [vmem:[#allocation6 + $0x2a0] sm:$0xff]  ;;  %v5165_v41 = vld [vmem:[#allocation6 + $0x290] sm:$0xff] }
 0x427   : > { %10715 = vst [vmem:[#allocation101_spill] sm:$0xff] %v8548_v7  ;;  %v3913_v38 = vsel %vm1103_vm6, %v8157_v33, %v8548_v7  ;;  %v8558_v31 = vpop.permute.xlu1 %3780  ;;  %v10717_v12 = vld [vmem:[#allocation106_spill] sm:$0xff]  ;;  %v10718_v33 = vld [vmem:[#allocation131_spill] sm:$0xff] }
 0x428   : > { %10714 = vst [vmem:[#allocation118_spill] sm:$0xff] %v8546_v52  ;;  %v3924_v22 = vmul.f32 %v3913_v38, %v10703_v53  ;;  %4852 = vmatmul.msk.f32.gmra.mxu1 %vm1863_vm9, %v5163_v9  ;;  %v3822_v21 = vsel %vm997_vm1, %v8176_v47, %v8558_v31  ;;  %v8566_v60 = vmul.f32 %v3733_v37, %v2642_v11  ;;  %v10719_v37 = vld [vmem:[#allocation59_spill] sm:$0xff] }
 0x429   : > { %10716 = vst [vmem:[#allocation225_spill] sm:$0xff] %v8550_v2  ;;  %2822 = vmatmul.f32.gmra.mxu2 %v5164_v19  ;;  %v3832_v15 = vmul.f32 %v3822_v21, %v10669_v50  ;;  %v2395_v38 = vadd.f32 %v10717_v12, %v10713_v25  ;;  %v3722_v47 = vsel %vm907_vm3, %v8365_v0, %v8091_v6  ;;  %v5169_v6 = vld [vmem:[#allocation6 + $0x2f8] sm:$0xff] }
 0x42a   : > { %v3940_v5 = vmul.f32 %v3924_v22, %v7857_v34  ;;  %2944 = vmatmul.f32.gmra.mxu3 %v5165_v41  ;;  %v2773_v11 = vadd.f32 %v2772_v54, %v10719_v37  ;;  %v3737_v0 = vmul.f32 %v3722_v47, %v10709_v4  ;;  %v3723_v47 = vsel %vm907_vm3, %v8517_v13, %v8160_v27 }
 0x42b   : > { %v3848_v9 = vmul.f32 %v3832_v15, %v10718_v33  ;;  %v2519_v21 = vpop.f32.mrf.mxu0 }
 0x42c   : > { %v8579_v19 = vadd.f32 %v3940_v5, %v8355_v1  ;;  %v2775_v52 = vpop.f32.mrf.mxu2  ;;  %v2520_v22 = vadd.f32 %v2519_v21, %v2395_v38  ;;  %v5166_v5 = vld [vmem:[#allocation6 + $0x2e0] sm:$0xff]  ;;  %v5167_v38 = vld [vmem:[#allocation6 + $0x2b8] sm:$0xff]  ;;  %v5168_v21 = vld [vmem:[#allocation6 + $0x2a8] sm:$0xff] }
 0x42d   : > { %v8582_v34 = vadd.f32 %v3848_v9, %v8389_v42  ;;  %v8584_v20 = vpop.f32.mrf.mxu1  ;;  %v2897_v12 = vpop.f32.mrf.mxu3  ;;  %v10724_v9 = vld [vmem:[#allocation32_spill] sm:$0xff] }
 0x42e   : > { %v8586_v33 = vadd.f32 %v2897_v12, %v2773_v11  ;;  %v8588_v15 = vpop.permute.xlu0 %3998  ;;  %v8590_v25 = vpop.permute.xlu2 %4162  ;;  %v2645_v1 = vadd.f32 %v8454_v43, %v2520_v22  ;;  %2566 = vmatmul.f32.gmra.mxu0 %v5162_v45  ;;  %v2776_v11 = vadd.f32 %v2775_v52, %v10724_v9  ;;  %v10725_v12 = vld [vmem:[#allocation110_spill] sm:$0xff] }
 0x42f   : > { %10721 = vst [vmem:[#allocation131_spill] sm:$0xff] %v8588_v15  ;;  %v8594_v54 = vpop.permute.xlu1 %3974  ;;  %v2398_v15 = vadd.f32 %v10725_v12, %v10719_v37 }
 0x430   : > { %10720 = vst [vmem:[#allocation106_spill] sm:$0xff] %v8586_v33  ;;  %4853 = vmatmul.msk.f32.gmra.mxu1 %vm1863_vm9, %v5166_v5  ;;  %v8597_v42 = vmul.f32 %v3737_v0, %v2645_v1  ;;  %v3741_v33 = vmul.f32 %v3723_v47, %v10709_v4  ;;  %v3816_v4 = vsel %vm997_vm1, %v8406_v55, %v8112_v3 }
 0x431   : > { %10722 = vst [vmem:[#allocation226_spill] sm:$0xff] %v8590_v25  ;;  %2825 = vmatmul.f32.gmra.mxu2 %v5167_v38 }
 0x432   : > { %10723 = vst [vmem:[#allocation227_spill] sm:$0xff] %v8594_v54  ;;  %2947 = vmatmul.f32.gmra.mxu3 %v5168_v21 }
 0x433   : > { %v2522_v43 = vpop.f32.mrf.mxu0 }
 0x434   : > { %v2778_v45 = vpop.f32.mrf.mxu2  ;;  %v2523_v22 = vadd.f32 %v2522_v43, %v2398_v15  ;;  %v5170_v15 = vld [vmem:[#allocation6 + $0x2d0] sm:$0xff]  ;;  %v5171_v43 = vld [vmem:[#allocation6 + $0x2c0] sm:$0xff] }
 0x435   : > { %v8606_v5 = vpop.f32.mrf.mxu1  ;;  %v2900_v0 = vpop.f32.mrf.mxu3 }
 0x436   : > { %v8608_v1 = vadd.f32 %v2900_v0, %v2776_v11  ;;  %v8610_v38 = vpop.permute.xlu0 %4092  ;;  %v4185_v52 = vpop.permute.xlu2 %4184  ;;  %v2648_v12 = vadd.f32 %v8479_v48, %v2523_v22  ;;  %2569 = vmatmul.f32.gmra.mxu0 %v5165_v41  ;;  %v10729_v11 = vld [vmem:[#allocation115_spill] sm:$0xff] }
 0x437   : > { %10727 = vst [vmem:[#allocation228_spill] sm:$0xff] %v8610_v38  ;;  %v8614_v37 = vpop.permute.xlu1 %4068  ;;  %v2401_v0 = vadd.f32 %v10729_v11, %v10724_v9  ;;  %v10730_v48 = vld [vmem:[#allocation31_spill] sm:$0xff]  ;;  %v10733_v11 = vld [vmem:[#allocation82_spill] sm:$0xff] }
 0x438   : > { %10726 = vst [vmem:[#allocation110_spill] sm:$0xff] %v8608_v1  ;;  %4854 = vmatmul.msk.f32.gmra.mxu1 %vm1863_vm9, %v5169_v6  ;;  %v8617_v13 = vmul.f32 %v3741_v33, %v2648_v12  ;;  %v2779_v41 = vadd.f32 %v2778_v45, %v10730_v48  ;;  %v3825_v9 = vmul.f32 %v3816_v4, %v10733_v11  ;;  %v5173_v4 = vld [vmem:[#allocation6 + $0x2e8] sm:$0xff] }
 0x439   : > { %10728 = vst [vmem:[#allocation229_spill] sm:$0xff] %v8614_v37  ;;  %2828 = vmatmul.f32.gmra.mxu2 %v5170_v15 }
 0x43a   : > { %2950 = vmatmul.f32.gmra.mxu3 %v5171_v43 }
 0x43b   : > { %v2525_v47 = vpop.f32.mrf.mxu0 }
 0x43c   : > { %v2781_v22 = vpop.f32.mrf.mxu2  ;;  %v2526_v38 = vadd.f32 %v2525_v47, %v2401_v0  ;;  %v5172_v47 = vld [vmem:[#allocation6 + $0x310] sm:$0xff] }
 0x43d   : > { %v8626_v6 = vpop.f32.mrf.mxu1  ;;  %v2903_v33 = vpop.f32.mrf.mxu3 }
 0x43e   : > { %v8628_v12 = vadd.f32 %v2903_v33, %v2779_v41  ;;  %v8630_v15 = vpop.permute.xlu0 %4176  ;;  %v8632_v1 = vpop.permute.xlu2 %3884  ;;  %v2651_v27 = vadd.f32 %v8513_v17, %v2526_v38  ;;  %2572 = vmatmul.f32.gmra.mxu0 %v5168_v21  ;;  %v10736_v21 = vld [vmem:[#allocation121_spill] sm:$0xff] }
 0x43f   : > { %10732 = vst [vmem:[#allocation230_spill] sm:$0xff] %v8632_v1  ;;  %v8639_v55 = vsel %vm1373_vm8, %v8630_v15, %v4185_v52  ;;  %v3914_v45 = vsel %vm1103_vm6, %v8281_v18, %v8632_v1  ;;  %v8645_v0 = vpop.permute.xlu1 %4160  ;;  %v2404_v18 = vadd.f32 %v10736_v21, %v10730_v48 }
 0x440   : > { %10731 = vst [vmem:[#allocation115_spill] sm:$0xff] %v8628_v12  ;;  %v3928_v41 = vmul.f32 %v3914_v45, %v10703_v53  ;;  %4855 = vmatmul.msk.f32.gmra.mxu1 %vm1863_vm9, %v5172_v47  ;;  %v8652_v17 = vsel %vm1373_vm8, %v4185_v52, %v8645_v0  ;;  %v8654_v38 = vmul.f32 %v3825_v9, %v2651_v27  ;;  %v10737_v45 = vld [vmem:[#allocation173_spill] sm:$0xff]  ;;  %v10738_v12 = vld [vmem:[#allocation28_spill] sm:$0xff] }
 0x441   : > { %10734 = vst [vmem:[#allocation82_spill] sm:$0xff] %v8639_v55  ;;  %2831 = vmatmul.f32.gmra.mxu2 %v5173_v4  ;;  %v5174_v55 = vld [vmem:[#allocation6 + $0x2d8] sm:$0xff]  ;;  %v3817_v47 = vsel %vm997_vm1, %v8333_v8, %v10737_v45  ;;  %v2782_v3 = vadd.f32 %v2781_v22, %v10738_v12 }
 0x442   : > { %10735 = vst [vmem:[#allocation231_spill] sm:$0xff] %v8652_v17  ;;  %v3944_v33 = vmul.f32 %v3928_v41, %v7892_v51  ;;  %2953 = vmatmul.f32.gmra.mxu3 %v5174_v55  ;;  %v3829_v48 = vmul.f32 %v3817_v47, %v10733_v11 }
 0x443   : > { %v2528_v27 = vpop.f32.mrf.mxu0 }
 0x444   : > { %v8665_v52 = vadd.f32 %v3944_v33, %v8582_v34  ;;  %v2784_v9 = vpop.f32.mrf.mxu2  ;;  %v2529_v4 = vadd.f32 %v2528_v27, %v2404_v18  ;;  %v5175_v34 = vld [vmem:[#allocation6 + $0x328] sm:$0xff]  ;;  %v5176_v33 = vld [vmem:[#allocation6 + $0x300] sm:$0xff] }
 0x445   : > { %v8667_v17 = vpop.f32.mrf.mxu1  ;;  %v2906_v51 = vpop.f32.mrf.mxu3  ;;  %v10742_v27 = vld [vmem:[#allocation65_spill] sm:$0xff] }
 0x446   : > { %v8669_v41 = vadd.f32 %v2906_v51, %v2782_v3  ;;  %v8671_v46 = vpop.permute.xlu0 %4186  ;;  %v8673_v21 = vpop.permute.xlu2 %4070  ;;  %v2654_v8 = vadd.f32 %v8544_v28, %v2529_v4  ;;  %2575 = vmatmul.f32.gmra.mxu0 %v5171_v43  ;;  %v2785_v47 = vadd.f32 %v2784_v9, %v10742_v27  ;;  %v5177_v51 = vld [vmem:[#allocation6 + $0x2f0] sm:$0xff] }
 0x447   : > { %10740 = vst [vmem:[#allocation232_spill] sm:$0xff] %v8671_v46  ;;  %v8677_v22 = vpop.permute.xlu1 %4178  ;;  %v10743_v28 = vld [vmem:[#allocation126_spill] sm:$0xff] }
 0x448   : > { %10739 = vst [vmem:[#allocation121_spill] sm:$0xff] %v8669_v41  ;;  %4856 = vmatmul.msk.f32.gmra.mxu1 %vm1863_vm9, %v5175_v34  ;;  %v8684_v3 = vsel %vm1373_vm8, %v8677_v22, %v8671_v46  ;;  %v8686_v18 = vmul.f32 %v3829_v48, %v2654_v8  ;;  %v2407_v43 = vadd.f32 %v10743_v28, %v10738_v12  ;;  %v10744_v4 = vld [vmem:[#allocation198_spill] sm:$0xff] }
 0x449   : > { %10741 = vst [vmem:[#allocation233_spill] sm:$0xff] %v8684_v3  ;;  %2834 = vmatmul.f32.gmra.mxu2 %v5176_v33  ;;  %v3818_v34 = vsel %vm997_vm1, %v8558_v31, %v10744_v4  ;;  %v5178_v4 = vld [vmem:[#allocation6 + $0x340] sm:$0xff] }
 0x44a   : > { %2956 = vmatmul.f32.gmra.mxu3 %v5177_v51  ;;  %v3833_v2 = vmul.f32 %v3818_v34, %v10733_v11  ;;  %v5179_v34 = vld [vmem:[#allocation6 + $0x318] sm:$0xff] }
 0x44b   : > { %v2531_v41 = vpop.f32.mrf.mxu0 }
 0x44c   : > { %v2787_v45 = vpop.f32.mrf.mxu2  ;;  %v2532_v46 = vadd.f32 %v2531_v41, %v2407_v43  ;;  %v10747_v43 = vld [vmem:[#allocation93_spill] sm:$0xff] }
 0x44d   : > { %v8695_v3 = vpop.f32.mrf.mxu1  ;;  %v2909_v48 = vpop.f32.mrf.mxu3 }
 0x44e   : > { %v8697_v8 = vadd.f32 %v2909_v48, %v2785_v47  ;;  %v8699_v33 = vpop.permute.xlu0 %3976  ;;  %v8701_v9 = vpop.permute.xlu2 %4164  ;;  %v2657_v28 = vadd.f32 %v8584_v20, %v2532_v46  ;;  %2578 = vmatmul.f32.gmra.mxu0 %v5174_v55  ;;  %v10748_v46 = vld [vmem:[#allocation161_spill] sm:$0xff]  ;;  %v10749_v55 = vld [vmem:[#allocation130_spill] sm:$0xff] }
 0x44f   : > { %10746 = vst [vmem:[#allocation234_spill] sm:$0xff] %v8699_v33  ;;  %v4008_v31 = vsel %vm1193_vm4, %v8306_v58, %v8699_v33  ;;  %v3783_v41 = vpop.permute.xlu1 %3782  ;;  %v5180_v58 = vld [vmem:[#allocation6 + $0x308] sm:$0xff] }
 0x450   : > { %10745 = vst [vmem:[#allocation126_spill] sm:$0xff] %v8697_v8  ;;  %v4016_v12 = vmul.f32 %v4008_v31, %v10747_v43  ;;  %4857 = vmatmul.msk.f32.gmra.mxu1 %vm1863_vm9, %v5178_v4  ;;  %v3823_v47 = vsel %vm997_vm1, %v8229_v39, %v3783_v41  ;;  %v8714_v48 = vmul.f32 %v3833_v2, %v2657_v28  ;;  %v10751_v4 = vld [vmem:[#allocation37_spill] sm:$0xff] }
 0x451   : > { %2837 = vmatmul.f32.gmra.mxu2 %v5179_v34  ;;  %v3836_v20 = vmul.f32 %v3823_v47, %v10669_v50  ;;  %v2410_v31 = vadd.f32 %v10749_v55, %v10742_v27  ;;  %v2788_v1 = vadd.f32 %v2787_v45, %v10751_v4  ;;  %v3819_v2 = vsel %vm997_vm1, %v3783_v41, %v8249_v24 }
 0x452   : > { %v4032_v8 = vmul.f32 %v4016_v12, %v10748_v46  ;;  %2959 = vmatmul.f32.gmra.mxu3 %v5180_v58 }
 0x453   : > { %v3852_v33 = vmul.f32 %v3836_v20, %v10750_v59  ;;  %v2534_v28 = vpop.f32.mrf.mxu0 }
 0x454   : > { %v8723_v7 = vadd.f32 %v4032_v8, %v8511_v14  ;;  %v2790_v50 = vpop.f32.mrf.mxu2  ;;  %v2535_v47 = vadd.f32 %v2534_v28, %v2410_v31  ;;  %v3837_v14 = vmul.f32 %v3819_v2, %v10733_v11  ;;  %v10753_v2 = vld [vmem:[#allocation155_spill] sm:$0xff]  ;;  %v5183_v28 = vld [vmem:[#allocation6 + $0x320] sm:$0xff] }
 0x455   : > { %v3868_v12 = vadd.f32 %v3852_v33, %v8542_v62  ;;  %v8729_v34 = vpop.f32.mrf.mxu1  ;;  %v2912_v46 = vpop.f32.mrf.mxu3 }
 0x456   : > { %v8731_v55 = vadd.f32 %v2912_v46, %v2788_v1  ;;  %v8733_v59 = vpop.permute.xlu0 %4086  ;;  %v8735_v45 = vpop.permute.xlu2 %3886  ;;  %v2660_v8 = vadd.f32 %v8606_v5, %v2535_v47  ;;  %2581 = vmatmul.f32.gmra.mxu0 %v5177_v51  ;;  %v5181_v1 = vld [vmem:[#allocation6 + $0x358] sm:$0xff]  ;;  %v5182_v5 = vld [vmem:[#allocation6 + $0x330] sm:$0xff] }
 0x457   : > { %v3915_v41 = vsel %vm1103_vm6, %v8399_v16, %v8735_v45  ;;  %v8743_v62 = vpop.permute.xlu1 %3978  ;;  %v10755_v46 = vld [vmem:[#allocation166_spill] sm:$0xff] }
 0x458   : > { %10752 = vst [vmem:[#allocation93_spill] sm:$0xff] %v8731_v55  ;;  %v3932_v33 = vmul.f32 %v3915_v41, %v10703_v53  ;;  %4858 = vmatmul.msk.f32.gmra.mxu1 %vm1863_vm9, %v5181_v1  ;;  %v4009_v11 = vsel %vm1193_vm4, %v8342_v36, %v8743_v62  ;;  %v8751_v20 = vmul.f32 %v3837_v14, %v2660_v8  ;;  %v10754_v53 = vld [vmem:[#allocation132_spill] sm:$0xff]  ;;  %v10756_v1 = vld [vmem:[#allocation102_spill] sm:$0xff] }
 0x459   : > { %2840 = vmatmul.f32.gmra.mxu2 %v5182_v5  ;;  %v4020_v31 = vmul.f32 %v4009_v11, %v10747_v43  ;;  %v2413_v47 = vadd.f32 %v10754_v53, %v10751_v4  ;;  %v2791_v16 = vadd.f32 %v2790_v50, %v10756_v1 }
 0x45a   : > { %v3948_v51 = vmul.f32 %v3932_v33, %v10753_v2  ;;  %2962 = vmatmul.f32.gmra.mxu3 %v5183_v28 }
 0x45b   : > { %v4036_v41 = vmul.f32 %v4020_v31, %v10755_v46  ;;  %v2537_v36 = vpop.f32.mrf.mxu0 }
 0x45c   : > { %v8759_v39 = vadd.f32 %v3948_v51, %v3868_v12  ;;  %v2793_v14 = vpop.f32.mrf.mxu2  ;;  %v2538_v5 = vadd.f32 %v2537_v36, %v2413_v47  ;;  %v5184_v51 = vld [vmem:[#allocation6] sm:$0xff]  ;;  %v5185_v47 = vld [vmem:[#allocation6 + $0x348] sm:$0xff] }
 0x45d   : > { %v4052_v8 = vadd.f32 %v4036_v41, %v8579_v19  ;;  %v8762_v27 = vpop.f32.mrf.mxu1  ;;  %v2915_v11 = vpop.f32.mrf.mxu3  ;;  %v10758_v19 = vld [vmem:[#allocation89_spill] sm:$0xff]  ;;  %v5186_v41 = vld [vmem:[#allocation6 + $0x338] sm:$0xff] }
 0x45e   : > { %v8764_v33 = vadd.f32 %v2915_v11, %v2791_v16  ;;  %v8766_v2 = vpop.permute.xlu0 %4180  ;;  %v8768_v55 = vpop.permute.xlu2 %4074  ;;  %v2663_v31 = vadd.f32 %v8626_v6, %v2538_v5  ;;  %2584 = vmatmul.f32.gmra.mxu0 %v5180_v58  ;;  %v10761_v58 = vld [vmem:[#allocation186_spill] sm:$0xff]  ;;  %v10762_v5 = vld [vmem:[#allocation135_spill] sm:$0xff] }
 0x45f   : > { %v4105_v50 = vsel %vm1283_vm2, %v8494_v29, %v8768_v55  ;;  %v4095_v12 = vpop.permute.xlu1 %4094  ;;  %v2416_v11 = vadd.f32 %v10762_v5, %v10756_v1  ;;  %v10764_v29 = vld [vmem:[#allocation36_spill] sm:$0xff] }
 0x460   : > { %10757 = vst [vmem:[#allocation161_spill] sm:$0xff] %v8764_v33  ;;  %v4116_v36 = vmul.f32 %v4105_v50, %v10758_v19  ;;  %3113 = vmatmul.f32.vlgmr.msrb.gmra.mxu1 %v5184_v51  ;;  %v8779_v16 = vsel %vm1283_vm2, %v8733_v59, %v4095_v12  ;;  %v8784_v6 = vsel %vm1283_vm2, %v4095_v12, %v8673_v21  ;;  %v10763_v50 = vld [vmem:[#allocation136_spill] sm:$0xff] }
 0x461   : > { %10759 = vst [vmem:[#allocation130_spill] sm:$0xff] %v8779_v16  ;;  %v3473_v53 = vmul.f32 %v2663_v31, %v10620_v30  ;;  %2843 = vmatmul.f32.gmra.mxu2 %v5185_v47  ;;  %v2794_v16 = vadd.f32 %v2793_v14, %v10764_v29 }
 0x462   : > { %10760 = vst [vmem:[#allocation134_spill] sm:$0xff] %v8784_v6  ;;  %v4132_v46 = vmul.f32 %v4116_v36, %v10761_v58  ;;  %2965 = vmatmul.f32.gmra.mxu3 %v5186_v41 }
 0x463   : > { %v3569_v51 = vadd.f32 %v10763_v50, %v3473_v53  ;;  %v2540_v24 = vpop.f32.mrf.mxu0  ;;  %v5189_v50 = vld [vmem:[#allocation6 + $0x350] sm:$0xff] }
 0x464   : > { %v8792_v33 = vadd.f32 %v4132_v46, %v4052_v8  ;;  %v2796_v12 = vpop.f32.mrf.mxu2  ;;  %v2541_v30 = vadd.f32 %v2540_v24, %v2416_v11  ;;  %v5187_v46 = vld [vmem:[#allocation6 + $0x18] sm:$0xff] }
 0x465   : > { %v3665_v6 = vadd.f32 %v8413_v26, %v3569_v51  ;;  %v8795_v31 = vpop.f32.mrf.mxu1  ;;  %v2918_v47 = vpop.f32.mrf.mxu3  ;;  %v10768_v51 = vld [vmem:[#allocation138_spill] sm:$0xff] }
 0x466   : > { %v8797_v36 = vadd.f32 %v2918_v47, %v2794_v16  ;;  %v8799_v58 = vpop.permute.xlu0 %3980  ;;  %v8801_v4 = vpop.permute.xlu2 %4190  ;;  %v2666_v53 = vadd.f32 %v8667_v17, %v2541_v30  ;;  %2587 = vmatmul.f32.gmra.mxu0 %v5183_v28  ;;  %v5188_v28 = vld [vmem:[#allocation6 + $0x8] sm:$0xff]  ;;  %v2419_v30 = vadd.f32 %v10768_v51, %v10764_v29  ;;  %v10769_v47 = vld [vmem:[#allocation215_spill] sm:$0xff] }
 0x467   : > { %v4010_v14 = vsel %vm1193_vm4, %v8433_v35, %v8799_v58  ;;  %v4189_v8 = vpop.permute.xlu1 %4188  ;;  %v3761_v24 = vadd.f32 %v8531_v56, %v3665_v6  ;;  %v10767_v6 = vld [vmem:[#allocation171_spill] sm:$0xff] }
 0x468   : > { %v4024_v26 = vmul.f32 %v4010_v14, %v10747_v43  ;;  %3116 = vmatmul.f32.gmra.mxu1 %v5187_v46  ;;  %v8813_v16 = vsel %vm1373_vm8, %v8766_v2, %v4189_v8  ;;  %v8818_v17 = vsel %vm1373_vm8, %v4189_v8, %v8701_v9  ;;  %v3477_v5 = vmul.f32 %v2666_v53, %v10613_v32  ;;  %v10770_v46 = vld [vmem:[#allocation105_spill] sm:$0xff] }
 0x469   : > { %10765 = vst [vmem:[#allocation155_spill] sm:$0xff] %v8813_v16  ;;  %3238 = vmatmul.f32.vlgmr.msrb.gmra.mxu2 %v5188_v28  ;;  %v8822_v56 = vadd.f32 %v8654_v38, %v3761_v24  ;;  %v2797_v16 = vadd.f32 %v2796_v12, %v10770_v46 }
 0x46a   : > { %10766 = vst [vmem:[#allocation132_spill] sm:$0xff] %v8818_v17  ;;  %v4040_v11 = vmul.f32 %v4024_v26, %v10767_v6  ;;  %2968 = vmatmul.f32.gmra.mxu3 %v5189_v50  ;;  %v3573_v14 = vadd.f32 %v10769_v47, %v3477_v5 }
 0x46b   : > { %v2543_v32 = vpop.f32.mrf.mxu0 }
 0x46c   : > { %v8830_v8 = vadd.f32 %v4040_v11, %v8665_v52  ;;  %v2799_v53 = vpop.f32.mrf.mxu2  ;;  %v3669_v28 = vadd.f32 %v8443_v57, %v3573_v14  ;;  %v2544_v38 = vadd.f32 %v2543_v32, %v2419_v30  ;;  %v10773_v11 = vld [vmem:[#allocation99_spill] sm:$0xff]  ;;  %v5190_v30 = vld [vmem:[#allocation6 + $0x30] sm:$0xff]  ;;  %v5191_v14 = vld [vmem:[#allocation6 + $0x20] sm:$0xff] }
 0x46d   : > { %v8833_v24 = vpop.f32.mrf.mxu1  ;;  %v2921_v26 = vpop.f32.mrf.mxu3 }
 0x46e   : > { %v8835_v6 = vadd.f32 %v2921_v26, %v2797_v16  ;;  %v8837_v17 = vpop.permute.xlu0 %4166  ;;  %v4169_v51 = vpop.permute.xlu2 %4168  ;;  %v2669_v5 = vadd.f32 %v8695_v3, %v2544_v38  ;;  %2590 = vmatmul.f32.gmra.mxu0 %v5186_v41  ;;  %v3765_v32 = vadd.f32 %v8566_v60, %v3669_v28  ;;  %v10774_v38 = vld [vmem:[#allocation199_spill] sm:$0xff]  ;;  %v5192_v41 = vld [vmem:[#allocation6 + $0x10] sm:$0xff] }
 0x46f   : > { %v8844_v52 = vsel %vm1373_vm8, %v8801_v4, %v8837_v17  ;;  %v8849_v57 = vsel %vm1373_vm8, %v4169_v51, %v8630_v15  ;;  %v4200_v12 = vsel %vm1373_vm8, %v8645_v0, %v4169_v51  ;;  %v8854_v16 = vpop.permute.xlu1 %4072  ;;  %v10775_v51 = vld [vmem:[#allocation140_spill] sm:$0xff] }
 0x470   : > { %10771 = vst [vmem:[#allocation166_spill] sm:$0xff] %v8835_v6  ;;  %v4208_v3 = vmul.f32 %v4200_v12, %v10773_v11  ;;  %3119 = vmatmul.f32.gmra.mxu1 %v5190_v30  ;;  %v3481_v47 = vmul.f32 %v2669_v5, %v7356_v40  ;;  %v4104_v15 = vsel %vm1283_vm2, %v8458_v10, %v8854_v16  ;;  %v10776_v30 = vld [vmem:[#allocation107_spill] sm:$0xff] }
 0x471   : > { %10772 = vst [vmem:[#allocation102_spill] sm:$0xff] %v8844_v52  ;;  %3241 = vmatmul.f32.gmra.mxu2 %v5191_v14  ;;  %v4112_v26 = vmul.f32 %v4104_v15, %v10758_v19  ;;  %v2422_v12 = vadd.f32 %v10775_v51, %v10770_v46  ;;  %v8870_v5 = vadd.f32 %v8686_v18, %v3765_v32  ;;  %v10777_v52 = vld [vmem:[#allocation181_spill] sm:$0xff] }
 0x472   : > { %v4224_v0 = vmul.f32 %v4208_v3, %v10774_v38  ;;  %4895 = vmatmul.msk.f32.vlgmr.msrb.gmra.mxu3 %vm1863_vm9, %v5192_v41  ;;  %v3577_v40 = vadd.f32 %v8346_v63, %v3481_v47  ;;  %v2800_v14 = vadd.f32 %v2799_v53, %v10776_v30  ;;  %v5193_v32 = vld [vmem:[#allocation6 + $0x48] sm:$0xff] }
 0x473   : > { %v4128_v10 = vmul.f32 %v4112_v26, %v10777_v52  ;;  %v2546_v60 = vpop.f32.mrf.mxu0  ;;  %v5194_v26 = vld [vmem:[#allocation6 + $0x38] sm:$0xff] }
 0x474   : > { %v2802_v28 = vpop.f32.mrf.mxu2  ;;  %v3673_v3 = vadd.f32 %v8468_v49, %v3577_v40  ;;  %v2547_v38 = vadd.f32 %v2546_v60, %v2422_v12  ;;  %v5195_v40 = vld [vmem:[#allocation6 + $0x28] sm:$0xff]  ;;  %v10783_v60 = vld [vmem:[#allocation139_spill] sm:$0xff] }
 0x475   : > { %v8875_v35 = vpop.f32.mrf.mxu1  ;;  %v2924_v15 = vpop.f32.mrf.mxu3  ;;  %v4144_v6 = vadd.f32 %v4128_v10, %v8723_v7 }
 0x476   : > { %v8878_v51 = vadd.f32 %v2924_v15, %v2800_v14  ;;  %v8880_v63 = vpop.permute.xlu0 %3982  ;;  %v4173_v18 = vpop.permute.xlu2 %4172  ;;  %v2672_v47 = vadd.f32 %v8729_v34, %v2547_v38  ;;  %2593 = vmatmul.f32.gmra.mxu0 %v5189_v50  ;;  %v10782_v14 = vld [vmem:[#allocation201_spill] sm:$0xff]  ;;  %v10784_v15 = vld [vmem:[#allocation103_spill] sm:$0xff] }
 0x477   : > { %v4011_v53 = vsel %vm1193_vm4, %v8594_v54, %v8880_v63  ;;  %v8890_v49 = vsel %vm1373_vm8, %v4173_v18, %v8766_v2  ;;  %v8892_v52 = vpop.permute.xlu1 %4182  ;;  %v8894_v7 = vadd.f32 %v4224_v0, %v4144_v6  ;;  %v10780_v2 = vld [vmem:[#allocation176_spill] sm:$0xff]  ;;  %v3769_v6 = vadd.f32 %v8597_v42, %v3673_v3  ;;  %v10785_v42 = vld [vmem:[#allocation95_spill] sm:$0xff]  ;;  %v10812_v54 = vld [vmem:[#allocation53_spill] sm:$0xff] }
 0x478   : > { %10778 = vst [vmem:[#allocation89_spill] sm:$0xff] %v8878_v51  ;;  %v4028_v10 = vmul.f32 %v4011_v53, %v10747_v43  ;;  %3122 = vmatmul.f32.gmra.mxu1 %v5193_v32  ;;  %v3485_v34 = vmul.f32 %v2672_v47, %v7324_v23  ;;  %v8902_v12 = vsel %vm1373_vm8, %v8892_v52, %v8801_v4  ;;  %v10781_v43 = vld [vmem:[#allocation144_spill] sm:$0xff] }
 0x479   : > { %3244 = vmatmul.f32.gmra.mxu2 %v5194_v26  ;;  %10779 = vst [vmem:[#allocation186_spill] sm:$0xff] %v8902_v12  ;;  %v2425_v0 = vadd.f32 %v10781_v43, %v10776_v30  ;;  %v3908_v23 = vsel %vm1103_vm6, %v8485_v44, %v10782_v14  ;;  %v2803_v4 = vadd.f32 %v2802_v28, %v10784_v15  ;;  %v10786_v12 = vld [vmem:[#allocation80_spill] sm:$0xff] }
 0x47a   : > { %v4044_v50 = vmul.f32 %v4028_v10, %v10780_v2  ;;  %4896 = vmatmul.msk.f32.gmra.mxu3 %vm1863_vm9, %v5195_v40  ;;  %v3581_v38 = vadd.f32 %v10783_v60, %v3485_v34  ;;  %v8919_v32 = vadd.f32 %v8714_v48, %v3769_v6  ;;  %v3921_v44 = vmul.f32 %v3908_v23, %v10786_v12  ;;  %v5196_v23 = vld [vmem:[#allocation6 + $0x60] sm:$0xff] }
 0x47b   : > { %v2549_v53 = vpop.f32.mrf.mxu0  ;;  %v4202_v28 = vsel %vm1373_vm8, %v8701_v9, %v4173_v18  ;;  %v10940_v14 = vld [vmem:[#allocation96_spill] sm:$0xff] }
 0x47c   : > { %v8916_v47 = vadd.f32 %v4044_v50, %v8759_v39  ;;  %v2805_v10 = vpop.f32.mrf.mxu2  ;;  %v3677_v3 = vadd.f32 %v10785_v42, %v3581_v38  ;;  %v2550_v26 = vadd.f32 %v2549_v53, %v2425_v0  ;;  %v5197_v38 = vld [vmem:[#allocation6 + $0x50] sm:$0xff]  ;;  %v5198_v42 = vld [vmem:[#allocation6 + $0x40] sm:$0xff] }
 0x47d   : > { %v8922_v2 = vpop.f32.mrf.mxu1  ;;  %v2927_v43 = vpop.f32.mrf.mxu3 }
 0x47e   : > { %v8928_v34 = vadd.f32 %v2927_v43, %v2803_v4  ;;  %v4171_v39 = vpop.permute.xlu0 %4170  ;;  %v2675_v50 = vadd.f32 %v8762_v27, %v2550_v26  ;;  %4859 = vmatmul.msk.f32.vlgmr.msrb.gmra.mxu0 %vm1863_vm9, %v5192_v41  ;;  %v3773_v9 = vadd.f32 %v8617_v13, %v3677_v3  ;;  %v4216_v27 = vmul.f32 %v4202_v28, %v10773_v11  ;;  %v10788_v13 = vld [vmem:[#allocation41_spill] sm:$0xff]  ;;  %v10789_v3 = vld [vmem:[#allocation148_spill] sm:$0xff] }
 0x47f   : > { %v8934_v48 = vsel %vm1373_vm8, %v4171_v39, %v8677_v22  ;;  %v4201_v6 = vsel %vm1373_vm8, %v8590_v25, %v4171_v39  ;;  %v8940_v0 = vpop.permute.xlu1 %4076  ;;  %v2428_v26 = vadd.f32 %v10789_v3, %v10784_v15  ;;  %v10790_v43 = vld [vmem:[#allocation205_spill] sm:$0xff] }
 0x480   : > { %10787 = vst [vmem:[#allocation135_spill] sm:$0xff] %v8928_v34  ;;  %v4212_v18 = vmul.f32 %v4201_v6, %v10773_v11  ;;  %3125 = vmatmul.f32.gmra.mxu1 %v5196_v23  ;;  %v4106_v22 = vsel %vm1283_vm2, %v8614_v37, %v8940_v0  ;;  %v3937_v60 = vmul.f32 %v3921_v44, %v2675_v50  ;;  %v10791_v39 = vld [vmem:[#allocation101_spill] sm:$0xff]  ;;  %v10792_v50 = vld [vmem:[#allocation191_spill] sm:$0xff] }
 0x481   : > { %3247 = vmatmul.f32.gmra.mxu2 %v5197_v38  ;;  %v4120_v41 = vmul.f32 %v4106_v22, %v10758_v19  ;;  %v8951_v4 = vadd.f32 %v8751_v20, %v3773_v9  ;;  %v3909_v44 = vsel %vm1103_vm6, %v10791_v39, %v10790_v43  ;;  %v10793_v20 = vld [vmem:[#allocation111_spill] sm:$0xff]  ;;  %v10794_v38 = vld [vmem:[#allocation206_spill] sm:$0xff] }
 0x482   : > { %v4228_v53 = vmul.f32 %v4212_v18, %v10788_v13  ;;  %4897 = vmatmul.msk.f32.gmra.mxu3 %vm1863_vm9, %v5198_v42  ;;  %v8962_v28 = vadd.f32 %v3937_v60, %v8822_v56  ;;  %v2806_v9 = vadd.f32 %v2805_v10, %v10793_v20  ;;  %v4232_v13 = vmul.f32 %v4216_v27, %v10794_v38  ;;  %v5285_v43 = vld [vmem:[#allocation6 + $0x2f8] sm:$0xff] }
 0x483   : > { %v4136_v6 = vmul.f32 %v4120_v41, %v10792_v50  ;;  %v2552_v23 = vpop.f32.mrf.mxu0  ;;  %v3925_v56 = vmul.f32 %v3909_v44, %v10786_v12  ;;  %v5199_v44 = vld [vmem:[#allocation6 + $0x78] sm:$0xff] }
 0x484   : > { %v8967_v18 = vadd.f32 %v4228_v53, %v8792_v33  ;;  %v2808_v22 = vpop.f32.mrf.mxu2  ;;  %v2553_v25 = vadd.f32 %v2552_v23, %v2428_v26  ;;  %v10796_v23 = vld [vmem:[#allocation150_spill] sm:$0xff] }
 0x485   : > { %v4152_v3 = vadd.f32 %v4136_v6, %v8830_v8  ;;  %v8971_v37 = vpop.f32.mrf.mxu1  ;;  %v2930_v39 = vpop.f32.mrf.mxu3 }
 0x486   : > { %v4256_v60 = vmax.f32 %v8894_v7, %v8967_v18  ;;  %v8976_v41 = vadd.f32 %v2930_v39, %v2806_v9  ;;  %v4175_v10 = vpop.permute.xlu0 %4174  ;;  %v2678_v53 = vadd.f32 %v8795_v31, %v2553_v25  ;;  %4860 = vmatmul.msk.f32.gmra.mxu0 %vm1863_vm9, %v5195_v40  ;;  %v5201_v9 = vld [vmem:[#allocation6 + $0x58] sm:$0xff]  ;;  %v10799_v39 = vld [vmem:[#allocation230_spill] sm:$0xff] }
 0x487   : > { %v8978_v33 = vadd.f32 %v4232_v13, %v4152_v3  ;;  %v8984_v8 = vsel %vm1373_vm8, %v4175_v10, %v8892_v52  ;;  %v4203_v27 = vsel %vm1373_vm8, %v8837_v17, %v4175_v10  ;;  %v4079_v26 = vpop.permute.xlu1 %4078  ;;  %v5200_v17 = vld [vmem:[#allocation6 + $0x68] sm:$0xff]  ;;  %v10797_v13 = vld [vmem:[#allocation195_spill] sm:$0xff]  ;;  %v10798_v3 = vld [vmem:[#allocation214_spill] sm:$0xff] }
 0x488   : > { %10795 = vst [vmem:[#allocation136_spill] sm:$0xff] %v8976_v41  ;;  %3128 = vmatmul.f32.gmra.mxu1 %v5199_v44  ;;  %v8993_v50 = vsel %vm1283_vm2, %v4079_v26, %v8733_v59  ;;  %v4107_v25 = vsel %vm1283_vm2, %v8673_v21, %v4079_v26  ;;  %v3941_v52 = vmul.f32 %v3925_v56, %v2678_v53  ;;  %v10800_v56 = vld [vmem:[#allocation114_spill] sm:$0xff]  ;;  %v10901_v41 = vld [vmem:[#allocation49_spill] sm:$0xff] }
 0x489   : > { %v4257_v31 = vmax.f32 %v4256_v60, %v8978_v33  ;;  %v4220_v6 = vmul.f32 %v4203_v27, %v10773_v11  ;;  %3250 = vmatmul.f32.gmra.mxu2 %v5200_v17  ;;  %v4124_v40 = vmul.f32 %v4107_v25, %v10758_v19  ;;  %v2431_v59 = vadd.f32 %v10796_v23, %v10793_v20  ;;  %v10801_v53 = vld [vmem:[#allocation210_spill] sm:$0xff]  ;;  %v5287_v20 = vld [vmem:[#allocation6 + $0x320] sm:$0xff] }
 0x48a   : > { %4898 = vmatmul.msk.f32.gmra.mxu3 %vm1863_vm9, %v5201_v9  ;;  %v9005_v38 = vadd.f32 %v3941_v52, %v8870_v5  ;;  %v3910_v11 = vsel %vm1103_vm6, %v10799_v39, %v10798_v3  ;;  %v2809_v60 = vadd.f32 %v2808_v22, %v10800_v56  ;;  %v5202_v22 = vld [vmem:[#allocation6 + $0x90] sm:$0xff] }
 0x48b   : > { %v4140_v21 = vmul.f32 %v4124_v40, %v10797_v13  ;;  %v2555_v10 = vpop.f32.mrf.mxu0  ;;  %v4236_v27 = vmul.f32 %v4220_v6, %v10801_v53  ;;  %v3929_v17 = vmul.f32 %v3910_v11, %v10786_v12 }
 0x48c   : > { %v2811_v19 = vpop.f32.mrf.mxu2  ;;  %v2556_v44 = vadd.f32 %v2555_v10, %v2431_v59  ;;  %v5204_v59 = vld [vmem:[#allocation6 + $0x70] sm:$0xff]  ;;  %v10805_v10 = vld [vmem:[#allocation108_spill] sm:$0xff] }
 0x48d   : > { %v4156_v26 = vadd.f32 %v4140_v21, %v8916_v47  ;;  %v9015_v25 = vpop.f32.mrf.mxu1  ;;  %v2933_v5 = vpop.f32.mrf.mxu3  ;;  %v5203_v47 = vld [vmem:[#allocation6 + $0x80] sm:$0xff]  ;;  %v10803_v21 = vld [vmem:[#allocation151_spill] sm:$0xff] }
 0x48e   : > { %v9017_v52 = vadd.f32 %v2933_v5, %v2809_v60  ;;  %v2681_v23 = vadd.f32 %v8833_v24, %v2556_v44  ;;  %4861 = vmatmul.msk.f32.gmra.mxu0 %vm1863_vm9, %v5198_v42  ;;  %v2434_v39 = vadd.f32 %v10803_v21, %v10800_v56  ;;  %v10804_v24 = vld [vmem:[#allocation218_spill] sm:$0xff]  ;;  %v5206_v21 = vld [vmem:[#allocation6 + $0x98] sm:$0xff] }
 0x48f   : > { %v9020_v40 = vadd.f32 %v4236_v27, %v4156_v26  ;;  %v3911_v42 = vsel %vm1103_vm6, %v8735_v45, %v10804_v24 }
 0x490   : > { %10802 = vst [vmem:[#allocation36_spill] sm:$0xff] %v9017_v52  ;;  %3131 = vmatmul.f32.gmra.mxu1 %v5202_v22  ;;  %v3945_v13 = vmul.f32 %v3929_v17, %v2681_v23  ;;  %v3933_v22 = vmul.f32 %v3911_v42, %v10786_v12  ;;  %v10808_v42 = vld [vmem:[#allocation116_spill] sm:$0xff]  ;;  %v5264_v52 = vld [vmem:[#allocation6 + $0x250] sm:$0xff] }
 0x491   : > { %v4258_v6 = vmax.f32 %v4257_v31, %v9020_v40  ;;  %3253 = vmatmul.f32.gmra.mxu2 %v5203_v47  ;;  %v2812_v31 = vadd.f32 %v2811_v19, %v10805_v10  ;;  %v5205_v47 = vld [vmem:[#allocation6 + $0xa8] sm:$0xff] }
 0x492   : > { %4899 = vmatmul.msk.f32.gmra.mxu3 %vm1863_vm9, %v5204_v59  ;;  %v9029_v60 = vadd.f32 %v3945_v13, %v8919_v32 }
 0x493   : > { %v4259_v11 = vrot.slane %v4258_v6, 4  ;;  %v2558_v53 = vpop.f32.mrf.mxu0 }
 0x494   : > { %v2814_v27 = vpop.f32.mrf.mxu2  ;;  %v2559_v44 = vadd.f32 %v2558_v53, %v2434_v39  ;;  %v10807_v39 = vld [vmem:[#allocation153_spill] sm:$0xff] }
 0x495   : > { %v4260_v26 = vmax.f32 %v4258_v6, %v4259_v11  ;;  %v9036_v5 = vpop.f32.mrf.mxu1  ;;  %v2936_v17 = vpop.f32.mrf.mxu3  ;;  %v5207_v6 = vld [vmem:[#allocation6 + $0x88] sm:$0xff]  ;;  %v2437_v11 = vadd.f32 %v10807_v39, %v10805_v10 }
 0x496   : > { %v9038_v23 = vadd.f32 %v2936_v17, %v2812_v31  ;;  %v2684_v13 = vadd.f32 %v8875_v35, %v2559_v44  ;;  %4862 = vmatmul.msk.f32.gmra.mxu0 %vm1863_vm9, %v5201_v9  ;;  %v2815_v35 = vadd.f32 %v2814_v27, %v10808_v42  ;;  %v10809_v44 = vld [vmem:[#allocation211_spill] sm:$0xff]  ;;  %v10810_v17 = vld [vmem:[#allocation234_spill] sm:$0xff] }
 0x497   : > { %v4261_v32 = vrot.slane %v4260_v26, 2 }
 0x498   : > { %10806 = vst [vmem:[#allocation171_spill] sm:$0xff] %v9038_v23  ;;  %3134 = vmatmul.f32.gmra.mxu1 %v5205_v47  ;;  %v3949_v19 = vmul.f32 %v3933_v22, %v2684_v13 }
 0x499   : > { %v4262_v45 = vmax.f32 %v4260_v26, %v4261_v32  ;;  %3256 = vmatmul.f32.gmra.mxu2 %v5206_v21  ;;  %v4004_v26 = vsel %vm1193_vm4, %v10810_v17, %v10809_v44 }
 0x49a   : > { %4900 = vmatmul.msk.f32.gmra.mxu3 %vm1863_vm9, %v5207_v6  ;;  %v9047_v12 = vadd.f32 %v3949_v19, %v8951_v4  ;;  %v4017_v23 = vmul.f32 %v4004_v26, %v10812_v54 }
 0x49b   : > { %v4263_v31 = vrot.slane %v4262_v45, 1  ;;  %v2561_v53 = vpop.f32.mrf.mxu0 }
 0x49c   : > { %v2817_v9 = vpop.f32.mrf.mxu2  ;;  %v2562_v32 = vadd.f32 %v2561_v53, %v2437_v11  ;;  %v5208_v11 = vld [vmem:[#allocation6 + $0xc0] sm:$0xff] }
 0x49d   : > { %v4264_v22 = vmax.f32 %v4262_v45, %v4263_v31  ;;  %v9054_v13 = vpop.f32.mrf.mxu1  ;;  %v2939_v47 = vpop.f32.mrf.mxu3 }
 0x49e   : > { %v9056_v21 = vadd.f32 %v2939_v47, %v2815_v35  ;;  %4863 = vmatmul.msk.f32.gmra.mxu0 %vm1863_vm9, %v5204_v59  ;;  %v2687_v45 = vadd.f32 %v8922_v2, %v2562_v32  ;;  %v5209_v35 = vld [vmem:[#allocation6 + $0xb0] sm:$0xff]  ;;  %v5210_v47 = vld [vmem:[#allocation6 + $0xa0] sm:$0xff] }
 0x49f   : > { %v4292_v39 = vsub.f32 %v8894_v7, %v4264_v22  ;;  %v4296_v4 = vsub.f32 %v8967_v18, %v4264_v22  ;;  %v4300_v27 = vsub.f32 %v8978_v33, %v4264_v22  ;;  %v4304_v19 = vsub.f32 %v9020_v40, %v4264_v22  ;;  %v10813_v18 = vld [vmem:[#allocation156_spill] sm:$0xff]  ;;  %v10815_v22 = vld [vmem:[#allocation119_spill] sm:$0xff] }
 0x4a0   : > { %10811 = vst [vmem:[#allocation138_spill] sm:$0xff] %v9056_v21  ;;  %3137 = vmatmul.f32.gmra.mxu1 %v5208_v11  ;;  %v4033_v7 = vmul.f32 %v4017_v23, %v2687_v45  ;;  %v2440_v33 = vadd.f32 %v10813_v18, %v10808_v42  ;;  %v10814_v40 = vld [vmem:[#allocation216_spill] sm:$0xff]  ;;  %v2818_v32 = vadd.f32 %v2817_v9, %v10815_v22 }
 0x4a1   : > { %v4308_v31 = vmul.f32 1.442695, %v4292_v39  ;;  %v4316_v53 = vmul.f32 1.442695, %v4296_v4  ;;  %3259 = vmatmul.f32.gmra.mxu2 %v5209_v35  ;;  %v4324_v17 = vmul.f32 1.442695, %v4300_v27  ;;  %v4005_v59 = vsel %vm1193_vm4, %v8743_v62, %v10814_v40 }
 0x4a2   : > { %4901 = vmatmul.msk.f32.gmra.mxu3 %vm1863_vm9, %v5210_v47  ;;  %v4332_v2 = vmul.f32 1.442695, %v4304_v19  ;;  %v9073_v26 = vadd.f32 %v4033_v7, %v8962_v28  ;;  %v4021_v35 = vmul.f32 %v4005_v59, %v10812_v54  ;;  %v5211_v28 = vld [vmem:[#allocation6 + $0xd8] sm:$0xff]  ;;  %v10818_v59 = vld [vmem:[#allocation221_spill] sm:$0xff] }
 0x4a3   : > { %5032 = vpow2.f32 %v4308_v31  ;;  %v2564_v23 = vpop.f32.mrf.mxu0  ;;  %v5212_v31 = vld [vmem:[#allocation6 + $0xc8] sm:$0xff]  ;;  %v5213_v7 = vld [vmem:[#allocation6 + $0xb8] sm:$0xff] }
 0x4a4   : > { %5034 = vpow2.f32 %v4316_v53  ;;  %v2820_v39 = vpop.f32.mrf.mxu2  ;;  %v2565_v4 = vadd.f32 %v2564_v23, %v2440_v33 }
 0x4a5   : > { %v9076_v27 = vpop.f32.mrf.mxu1  ;;  %v2942_v45 = vpop.f32.mrf.mxu3  ;;  %5036 = vpow2.f32 %v4324_v17  ;;  %v10817_v17 = vld [vmem:[#allocation162_spill] sm:$0xff] }
 0x4a6   : > { %v9078_v11 = vadd.f32 %v2942_v45, %v2818_v32  ;;  %v2690_v62 = vadd.f32 %v8971_v37, %v2565_v4  ;;  %4864 = vmatmul.msk.f32.gmra.mxu0 %vm1863_vm9, %v5207_v6  ;;  %5038 = vpow2.f32 %v4332_v2  ;;  %v2443_v18 = vadd.f32 %v10817_v17, %v10815_v22  ;;  %v10819_v32 = vld [vmem:[#allocation112_spill] sm:$0xff] }
 0x4a7   : > { %v4006_v2 = vsel %vm1193_vm4, %v8799_v58, %v10818_v59  ;;  %v2821_v23 = vadd.f32 %v2820_v39, %v10819_v32  ;;  %v5214_v39 = vld [vmem:[#allocation6 + $0xf0] sm:$0xff] }
 0x4a8   : > { %10816 = vst [vmem:[#allocation215_spill] sm:$0xff] %v9078_v11  ;;  %3140 = vmatmul.f32.gmra.mxu1 %v5211_v28  ;;  %v4037_v9 = vmul.f32 %v4021_v35, %v2690_v62 }
 0x4a9   : > { %v9083_v19 = vpop.eup %5032  ;;  %3262 = vmatmul.f32.gmra.mxu2 %v5212_v31 }
 0x4aa   : > { %v9085_v53 = vpop.eup %5034  ;;  %4902 = vmatmul.msk.f32.gmra.mxu3 %vm1863_vm9, %v5213_v7  ;;  %v9093_v6 = vadd.f32 %v4037_v9, %v9005_v38  ;;  %v4025_v9 = vmul.f32 %v4006_v2, %v10812_v54 }
 0x4ab   : > { %v4340_v37 = vadd.f32 %v9085_v53, %v9083_v19  ;;  %v9095_v33 = vpop.eup %5036  ;;  %v2567_v4 = vpop.f32.mrf.mxu0 }
 0x4ac   : > { %v2823_v45 = vpop.f32.mrf.mxu2  ;;  %v2568_v62 = vadd.f32 %v2567_v4, %v2443_v18  ;;  %v9105_v17 = vpop.eup %5038  ;;  %v5215_v18 = vld [vmem:[#allocation6 + $0xe0] sm:$0xff]  ;;  %v5216_v4 = vld [vmem:[#allocation6 + $0xd0] sm:$0xff] }
 0x4ad   : > { %v4341_v35 = vadd.f32 %v9095_v33, %v4340_v37  ;;  %v9103_v28 = vpop.f32.mrf.mxu1  ;;  %v2945_v31 = vpop.f32.mrf.mxu3 }
 0x4ae   : > { %v9107_v38 = vadd.f32 %v2945_v31, %v2821_v23  ;;  %v2693_v58 = vadd.f32 %v9015_v25, %v2568_v62  ;;  %4865 = vmatmul.msk.f32.gmra.mxu0 %vm1863_vm9, %v5210_v47  ;;  %v10821_v23 = vld [vmem:[#allocation167_spill] sm:$0xff]  ;;  %v10823_v47 = vld [vmem:[#allocation120_spill] sm:$0xff] }
 0x4af   : > { %v4342_v11 = vadd.f32 %v9105_v17, %v4341_v35  ;;  %v2446_v31 = vadd.f32 %v10821_v23, %v10819_v32  ;;  %v10822_v35 = vld [vmem:[#allocation224_spill] sm:$0xff]  ;;  %v2824_v62 = vadd.f32 %v2823_v45, %v10823_v47  ;;  %v5218_v23 = vld [vmem:[#allocation6 + $0xf8] sm:$0xff] }
 0x4b0   : > { %10820 = vst [vmem:[#allocation105_spill] sm:$0xff] %v9107_v38  ;;  %3143 = vmatmul.f32.gmra.mxu1 %v5214_v39  ;;  %v4041_v37 = vmul.f32 %v4025_v9, %v2693_v58  ;;  %v4007_v25 = vsel %vm1193_vm4, %v8880_v63, %v10822_v35  ;;  %v5219_v35 = vld [vmem:[#allocation6 + $0xe8] sm:$0xff] }
 0x4b1   : > { %v4343_v59 = vrot.slane %v4342_v11, 4  ;;  %3265 = vmatmul.f32.gmra.mxu2 %v5215_v18 }
 0x4b2   : > { %4903 = vmatmul.msk.f32.gmra.mxu3 %vm1863_vm9, %v5216_v4  ;;  %v9117_v2 = vadd.f32 %v4041_v37, %v9029_v60  ;;  %v5217_v37 = vld [vmem:[#allocation6 + $0x108] sm:$0xff] }
 0x4b3   : > { %v4344_v38 = vadd.f32 %v4343_v59, %v4342_v11  ;;  %v2570_v9 = vpop.f32.mrf.mxu0  ;;  %v4029_v11 = vmul.f32 %v4007_v25, %v10812_v54 }
 0x4b4   : > { %v2826_v58 = vpop.f32.mrf.mxu2  ;;  %v2571_v18 = vadd.f32 %v2570_v9, %v2446_v31  ;;  %v10825_v31 = vld [vmem:[#allocation172_spill] sm:$0xff] }
 0x4b5   : > { %v4345_v39 = vrot.slane %v4344_v38, 2  ;;  %v9124_v21 = vpop.f32.mrf.mxu1  ;;  %v2948_v40 = vpop.f32.mrf.mxu3 }
 0x4b6   : > { %v9126_v22 = vadd.f32 %v2948_v40, %v2824_v62  ;;  %v2696_v59 = vadd.f32 %v9036_v5, %v2571_v18  ;;  %4866 = vmatmul.msk.f32.gmra.mxu0 %vm1863_vm9, %v5213_v7  ;;  %v2449_v40 = vadd.f32 %v10825_v31, %v10823_v47  ;;  %v10827_v7 = vld [vmem:[#allocation124_spill] sm:$0xff] }
 0x4b7   : > { %v4346_v60 = vadd.f32 %v4345_v39, %v4344_v38  ;;  %v10826_v38 = vld [vmem:[#allocation123_spill] sm:$0xff]  ;;  %v2827_v25 = vadd.f32 %v2826_v58, %v10827_v7  ;;  %v5222_v58 = vld [vmem:[#allocation6 + $0x100] sm:$0xff] }
 0x4b8   : > { %10824 = vst [vmem:[#allocation99_spill] sm:$0xff] %v9126_v22  ;;  %3146 = vmatmul.f32.gmra.mxu1 %v5217_v37  ;;  %v4045_v45 = vmul.f32 %v4029_v11, %v2696_v59  ;;  %v4100_v5 = vsel %vm1283_vm2, %v8854_v16, %v10826_v38 }
 0x4b9   : > { %v4347_v63 = vrot.slane %v4346_v60, 1  ;;  %3268 = vmatmul.f32.gmra.mxu2 %v5218_v23  ;;  %v5221_v23 = vld [vmem:[#allocation6 + $0x110] sm:$0xff] }
 0x4ba   : > { %4904 = vmatmul.msk.f32.gmra.mxu3 %vm1863_vm9, %v5219_v35  ;;  %v9135_v54 = vadd.f32 %v4045_v45, %v9047_v12  ;;  %v5220_v45 = vld [vmem:[#allocation6 + $0x120] sm:$0xff] }
 0x4bb   : > { %v4348_v62 = vadd.f32 %v4347_v63, %v4346_v60  ;;  %v2573_v9 = vpop.f32.mrf.mxu0  ;;  %v10829_v60 = vld [vmem:[#allocation81_spill] sm:$0xff] }
 0x4bc   : > { %v2829_v39 = vpop.f32.mrf.mxu2  ;;  %v2574_v18 = vadd.f32 %v2573_v9, %v2449_v40  ;;  %v4113_v63 = vmul.f32 %v4100_v5, %v10829_v60  ;;  %v10830_v40 = vld [vmem:[#allocation177_spill] sm:$0xff]  ;;  %v10831_v5 = vld [vmem:[#allocation222_spill] sm:$0xff] }
 0x4bd   : > { %5040 = vrcp.f32 %v4348_v62  ;;  %v9142_v11 = vpop.f32.mrf.mxu1  ;;  %v2951_v59 = vpop.f32.mrf.mxu3  ;;  %v2452_v9 = vadd.f32 %v10830_v40, %v10827_v7  ;;  %v4387_v7 = vand.u32 2147483648, %v4348_v62  ;;  %vm4381_vm11 = vweird.f32 %v4348_v62 }
 0x4be   : > { %v9144_v37 = vadd.f32 %v2951_v59, %v2827_v25  ;;  %v2699_v12 = vadd.f32 %v9054_v13, %v2574_v18  ;;  %4867 = vmatmul.msk.f32.gmra.mxu0 %vm1863_vm9, %v5216_v4  ;;  %v4101_v13 = vsel %vm1283_vm2, %v8768_v55, %v10831_v5  ;;  %v10832_v4 = vld [vmem:[#allocation117_spill] sm:$0xff]  ;;  %v5223_v55 = vld [vmem:[#allocation6 + $0x138] sm:$0xff]  ;;  %v4385_v5 = vand.u32 2147483647, %v4348_v62 }
 0x4bf   : > { %v2830_v18 = vadd.f32 %v2829_v39, %v10832_v4 }
 0x4c0   : > { %10828 = vst [vmem:[#allocation199_spill] sm:$0xff] %v9144_v37  ;;  %3149 = vmatmul.f32.gmra.mxu1 %v5220_v45  ;;  %v4129_v16 = vmul.f32 %v4113_v63, %v2699_v12  ;;  %vm4386_vm13 = vcmp.eq.f32.partialorder %v4385_v5, 8.507059e+37 }
 0x4c1   : > { %3271 = vmatmul.f32.gmra.mxu2 %v5221_v23 }
 0x4c2   : > { %4905 = vmatmul.msk.f32.gmra.mxu3 %vm1863_vm9, %v5222_v58  ;;  %v9153_v25 = vadd.f32 %v4129_v16, %v9073_v26  ;;  %v4117_v26 = vmul.f32 %v4101_v13, %v10829_v60  ;;  %v10834_v13 = vld [vmem:[#allocation182_spill] sm:$0xff] }
 0x4c3   : > { %v5041_v31 = vpop.eup %5040  ;;  %v2576_v59 = vpop.f32.mrf.mxu0 }
 0x4c4   : > { %v2832_v63 = vpop.f32.mrf.mxu2  ;;  %v4377_v12 = vmul.f32 %v5041_v31, %v4348_v62  ;;  %v2577_v45 = vadd.f32 %v2576_v59, %v2452_v9  ;;  %vm4382_vm10 = vweird.f32 %v5041_v31  ;;  %v5224_v9 = vld [vmem:[#allocation6 + $0x128] sm:$0xff]  ;;  %v5225_v59 = vld [vmem:[#allocation6 + $0x118] sm:$0xff] }
 0x4c5   : > { %v9160_v23 = vpop.f32.mrf.mxu1  ;;  %v2954_v37 = vpop.f32.mrf.mxu3  ;;  %vm4383_vm12 = vmor %vm4381_vm11, %vm4382_vm10  ;;  %v10837_v62 = vld [vmem:[#allocation79_spill] sm:$0xff] }
 0x4c6   : > { %v9162_v22 = vadd.f32 %v2954_v37, %v2830_v18  ;;  %v4378_v40 = vsub.f32 1.0, %v4377_v12  ;;  %v2702_v16 = vadd.f32 %v9076_v27, %v2577_v45  ;;  %4868 = vmatmul.msk.f32.gmra.mxu0 %vm1863_vm9, %v5219_v35  ;;  %v2455_v18 = vadd.f32 %v10834_v13, %v10832_v4  ;;  %v10835_v12 = vld [vmem:[#allocation225_spill] sm:$0xff] }
 0x4c7   : > { %v4388_v35 = vor.u32 1.1754944e-38, %v4387_v7  ;;  %v4102_v45 = vsel %vm1283_vm2, %v8940_v0, %v10835_v12 }
 0x4c8   : > { %10833 = vst [vmem:[#allocation140_spill] sm:$0xff] %v9162_v22  ;;  %3152 = vmatmul.f32.gmra.mxu1 %v5223_v55  ;;  %v4379_v39 = vmul.f32 %v5041_v31, %v4378_v40  ;;  %v4133_v38 = vmul.f32 %v4117_v26, %v2702_v16  ;;  %v10836_v40 = vld [vmem:[#allocation125_spill] sm:$0xff]  ;;  %v4121_v12 = vmul.f32 %v4102_v45, %v10829_v60  ;;  %v10842_v45 = vld [vmem:[#allocation70_spill] sm:$0xff] }
 0x4c9   : > { %3274 = vmatmul.f32.gmra.mxu2 %v5224_v9  ;;  %v2833_v26 = vadd.f32 %v2832_v63, %v10836_v40 }
 0x4ca   : > { %4906 = vmatmul.msk.f32.gmra.mxu3 %vm1863_vm9, %v5225_v59  ;;  %v4380_v37 = vadd.f32 %v5041_v31, %v4379_v39  ;;  %v9171_v27 = vadd.f32 %v4133_v38, %v9093_v6  ;;  %v10838_v39 = vld [vmem:[#allocation20_spill] sm:$0xff] }
 0x4cb   : > { %v2579_v16 = vpop.f32.mrf.mxu0  ;;  %v508_v22 = vadd.f32 %v10838_v39, %v10837_v62 }
 0x4cc   : > { %v2835_v55 = vpop.f32.mrf.mxu2  ;;  %v4384_v9 = vsel %vm4383_vm12, %v5041_v31, %v4380_v37  ;;  %v2580_v13 = vadd.f32 %v2579_v16, %v2455_v18  ;;  %v5226_v37 = vld [vmem:[#allocation6 + $0x150] sm:$0xff] }
 0x4cd   : > { %v9180_v4 = vpop.f32.mrf.mxu1  ;;  %v2957_v6 = vpop.f32.mrf.mxu3  ;;  %v4389_v38 = vsel %vm4386_vm13, %v4388_v35, %v4384_v9  ;;  %v10840_v35 = vld [vmem:[#allocation73_spill] sm:$0xff] }
 0x4ce   : > { %v9182_v7 = vadd.f32 %v2957_v6, %v2833_v26  ;;  %v4444_v47 = vmul.f32 %v9105_v17, %v4389_v38  ;;  %v4440_v0 = vmul.f32 %v9095_v33, %v4389_v38  ;;  %v4436_v63 = vmul.f32 %v9085_v53, %v4389_v38  ;;  %4869 = vmatmul.msk.f32.gmra.mxu0 %vm1863_vm9, %v5222_v58  ;;  %v10841_v26 = vld [vmem:[#allocation18_spill] sm:$0xff]  ;;  %v5227_v17 = vld [vmem:[#allocation6 + $0x140] sm:$0xff]  ;;  %v10844_v58 = vld [vmem:[#allocation187_spill] sm:$0xff] }
 0x4cf   : > { %v2705_v31 = vadd.f32 %v9103_v28, %v2580_v13  ;;  %v4432_v5 = vmul.f32 %v9083_v19, %v4389_v38  ;;  %v505_v16 = vadd.f32 %v10841_v26, %v10840_v35  ;;  %v5228_v33 = vld [vmem:[#allocation6 + $0x130] sm:$0xff]  ;;  %v10843_v28 = vld [vmem:[#allocation15_spill] sm:$0xff]  ;;  %v2458_v19 = vadd.f32 %v10844_v58, %v10836_v40  ;;  %v10849_v58 = vld [vmem:[#allocation88_spill] sm:$0xff] }
 0x4d0   : > { %10839 = vst [vmem:[#allocation107_spill] sm:$0xff] %v9182_v7  ;;  %3155 = vmatmul.f32.gmra.mxu1 %v5226_v37  ;;  %v4460_v18 = vmul.f32 %v4444_v47, %v508_v22  ;;  %v502_v39 = vadd.f32 %v10843_v28, %v10842_v45  ;;  %v10845_v22 = vld [vmem:[#allocation128_spill] sm:$0xff] }
 0x4d1   : > { %v4137_v9 = vmul.f32 %v4121_v12, %v2705_v31  ;;  %3277 = vmatmul.f32.gmra.mxu2 %v5227_v17  ;;  %v4456_v53 = vmul.f32 %v4440_v0, %v505_v16  ;;  %v2836_v47 = vadd.f32 %v2835_v55, %v10845_v22  ;;  %v10846_v31 = vld [vmem:[#allocation72_spill] sm:$0xff] }
 0x4d2   : > { %4907 = vmatmul.msk.f32.gmra.mxu3 %vm1863_vm9, %v5228_v33  ;;  %4492 = vmatpush.msra.mxu0 %v4460_v18  ;;  %v4452_v38 = vmul.f32 %v4436_v63, %v502_v39  ;;  %v10847_v37 = vld [vmem:[#allocation12_spill] sm:$0xff]  ;;  %v5231_v39 = vld [vmem:[#allocation6 + $0x148] sm:$0xff] }
 0x4d3   : > { %v9199_v13 = vadd.f32 %v4137_v9, %v9117_v2  ;;  %v2582_v6 = vpop.f32.mrf.mxu0  ;;  %v499_v26 = vadd.f32 %v10847_v37, %v10846_v31  ;;  %v4125_v2 = vmul.f32 %v8993_v50, %v10829_v60  ;;  %v5229_v9 = vld [vmem:[#allocation6 + $0x168] sm:$0xff]  ;;  %v10850_v50 = vld [vmem:[#allocation122_spill] sm:$0xff]  ;;  %v10887_v40 = vld [vmem:[#allocation68_spill] sm:$0xff] }
 0x4d4   : > { %v2838_v12 = vpop.f32.mrf.mxu2  ;;  %4493 = vmatpush.msra.mxu0 %v4456_v53  ;;  %v2583_v18 = vadd.f32 %v2582_v6, %v2458_v19  ;;  %v5230_v53 = vld [vmem:[#allocation6 + $0x158] sm:$0xff]  ;;  %v2461_v19 = vadd.f32 %v10849_v58, %v10845_v22 }
 0x4d5   : > { %v9204_v0 = vpop.f32.mrf.mxu1  ;;  %v2960_v16 = vpop.f32.mrf.mxu3  ;;  %v4448_v28 = vmul.f32 %v4432_v5, %v499_v26  ;;  %v2839_v60 = vadd.f32 %v2838_v12, %v10850_v50  ;;  %v10852_v26 = vld [vmem:[#allocation58_spill] sm:$0xff]  ;;  %v5234_v12 = vld [vmem:[#allocation6 + $0x160] sm:$0xff] }
 0x4d6   : > { %v9206_v17 = vadd.f32 %v2960_v16, %v2836_v47  ;;  %4494 = vmatpush.msra.mxu0 %v4452_v38  ;;  %v2708_v55 = vadd.f32 %v9124_v21, %v2583_v18  ;;  %v4209_v18 = vmul.f32 %v8849_v57, %v10852_v26 }
 0x4d7   : > { %4870 = vmatmul.msk.f32.gmra.mxu0 %vm1863_vm9, %v5225_v59 }
 0x4d8   : > { %10848 = vst [vmem:[#allocation181_spill] sm:$0xff] %v9206_v17  ;;  %3158 = vmatmul.f32.gmra.mxu1 %v5229_v9  ;;  %4495 = vmatpush.msra.mxu0 %v4448_v28  ;;  %v4141_v63 = vmul.f32 %v4125_v2, %v2708_v55  ;;  %v5232_v28 = vld [vmem:[#allocation6 + $0x180] sm:$0xff]  ;;  %v5233_v2 = vld [vmem:[#allocation6 + $0x170] sm:$0xff] }
 0x4d9   : > { %3280 = vmatmul.f32.gmra.mxu2 %v5230_v53  ;;  %v10853_v55 = vld [vmem:[#allocation44_spill] sm:$0xff]  ;;  %v10854_v53 = vld [vmem:[#allocation129_spill] sm:$0xff] }
 0x4da   : > { %4908 = vmatmul.msk.f32.gmra.mxu3 %vm1863_vm9, %v5231_v39  ;;  %v9216_v5 = vadd.f32 %v4141_v63, %v9135_v54  ;;  %v2464_v9 = vadd.f32 %v10853_v55, %v10850_v50  ;;  %v10857_v55 = vld [vmem:[#allocation133_spill] sm:$0xff] }
 0x4db   : > { %v2585_v21 = vpop.f32.mrf.mxu0  ;;  %v10886_v50 = vld [vmem:[#allocation165_spill] sm:$0xff] }
 0x4dc   : > { %v2841_v47 = vpop.f32.mrf.mxu2  ;;  %v2586_v59 = vadd.f32 %v2585_v21, %v2461_v19 }
 0x4dd   : > { %v2963_v6 = vpop.f32.mrf.mxu3  ;;  %v3114_v38 = vpop.f32.mrf.mxu1  ;;  %v2842_v57 = vadd.f32 %v2841_v47, %v10854_v53  ;;  %v5237_v47 = vld [vmem:[#allocation6 + $0x178] sm:$0xff] }
 0x4de   : > { %v9219_v37 = vadd.f32 %v2963_v6, %v2839_v60  ;;  %v2711_v16 = vadd.f32 %v9142_v11, %v2586_v59  ;;  %v4213_v59 = vmul.f32 %v8934_v48, %v10852_v26 }
 0x4df   : > { %4871 = vmatmul.msk.f32.gmra.mxu0 %vm1863_vm9, %v5228_v33 }
 0x4e0   : > { %10851 = vst [vmem:[#allocation176_spill] sm:$0xff] %v9219_v37  ;;  %3161 = vmatmul.f32.gmra.mxu1 %v5232_v28  ;;  %v4225_v54 = vmul.f32 %v4209_v18, %v2711_v16  ;;  %v5235_v18 = vld [vmem:[#allocation6 + $0x198] sm:$0xff]  ;;  %v5236_v16 = vld [vmem:[#allocation6 + $0x188] sm:$0xff]  ;;  %v10856_v28 = vld [vmem:[#allocation200_spill] sm:$0xff] }
 0x4e1   : > { %3283 = vmatmul.f32.gmra.mxu2 %v5233_v2 }
 0x4e2   : > { %4909 = vmatmul.msk.f32.gmra.mxu3 %vm1863_vm9, %v5234_v12  ;;  %v9229_v63 = vadd.f32 %v4225_v54, %v9153_v25  ;;  %v2467_v54 = vadd.f32 %v10856_v28, %v10854_v53  ;;  %v5240_v28 = vld [vmem:[#allocation6 + $0x190] sm:$0xff] }
 0x4e3   : > { %v2588_v58 = vpop.f32.mrf.mxu0 }
 0x4e4   : > { %v2844_v11 = vpop.f32.mrf.mxu2  ;;  %v2589_v19 = vadd.f32 %v2588_v58, %v2464_v9 }
 0x4e5   : > { %v2966_v33 = vpop.f32.mrf.mxu3  ;;  %v3117_v60 = vpop.f32.mrf.mxu1  ;;  %v2845_v48 = vadd.f32 %v2844_v11, %v10857_v55 }
 0x4e6   : > { %v9232_v21 = vadd.f32 %v2966_v33, %v2842_v57  ;;  %v2714_v6 = vadd.f32 %v9160_v23, %v2589_v19 }
 0x4e7   : > { %4872 = vmatmul.msk.f32.gmra.mxu0 %vm1863_vm9, %v5231_v39 }
 0x4e8   : > { %10855 = vst [vmem:[#allocation144_spill] sm:$0xff] %v9232_v21  ;;  %3164 = vmatmul.f32.gmra.mxu1 %v5235_v18  ;;  %v4229_v25 = vmul.f32 %v4213_v59, %v2714_v6  ;;  %v4217_v59 = vmul.f32 %v8890_v49, %v10852_v26  ;;  %v5239_v18 = vld [vmem:[#allocation6 + $0x1a0] sm:$0xff] }
 0x4e9   : > { %3286 = vmatmul.f32.gmra.mxu2 %v5236_v16 }
 0x4ea   : > { %4910 = vmatmul.msk.f32.gmra.mxu3 %vm1863_vm9, %v5237_v47  ;;  %v9242_v2 = vadd.f32 %v4229_v25, %v9171_v27  ;;  %v5238_v27 = vld [vmem:[#allocation6 + $0x1b0] sm:$0xff]  ;;  %v10859_v25 = vld [vmem:[#allocation91_spill] sm:$0xff] }
 0x4eb   : > { %v2591_v9 = vpop.f32.mrf.mxu0  ;;  %v3115_v16 = vadd.f32 %v3114_v38, %v10859_v25 }
 0x4ec   : > { %v3239_v23 = vpop.f32.mrf.mxu2  ;;  %v4265_v39 = vmax.f32 %v9229_v63, %v9242_v2  ;;  %v2592_v57 = vadd.f32 %v2591_v9, %v2467_v54  ;;  %v10860_v54 = vld [vmem:[#allocation109_spill] sm:$0xff] }
 0x4ed   : > { %v2969_v58 = vpop.f32.mrf.mxu3  ;;  %v3120_v19 = vpop.f32.mrf.mxu1  ;;  %v3240_v49 = vadd.f32 %v3239_v23, %v3115_v16  ;;  %v5241_v23 = vld [vmem:[#allocation6 + $0x1c8] sm:$0xff]  ;;  %v10863_v16 = vld [vmem:[#allocation66_spill] sm:$0xff] }
 0x4ee   : > { %v9247_v33 = vadd.f32 %v2969_v58, %v2845_v48  ;;  %v2717_v6 = vadd.f32 %v9180_v4, %v2592_v57  ;;  %v2470_v48 = vadd.f32 %v10860_v54, %v10857_v55 }
 0x4ef   : > { %4873 = vmatmul.msk.f32.gmra.mxu0 %vm1863_vm9, %v5234_v12 }
 0x4f0   : > { %10858 = vst [vmem:[#allocation139_spill] sm:$0xff] %v9247_v33  ;;  %3167 = vmatmul.f32.gmra.mxu1 %v5238_v27  ;;  %v4233_v11 = vmul.f32 %v4217_v59, %v2717_v6  ;;  %v10861_v27 = vld [vmem:[#allocation63_spill] sm:$0xff]  ;;  %v4221_v33 = vmul.f32 %v8984_v8, %v10852_v26 }
 0x4f1   : > { %3289 = vmatmul.f32.gmra.mxu2 %v5239_v18  ;;  %v10862_v18 = vld [vmem:[#allocation142_spill] sm:$0xff] }
 0x4f2   : > { %4911 = vmatmul.msk.f32.gmra.mxu3 %vm1863_vm9, %v5240_v28  ;;  %v9258_v9 = vadd.f32 %v4233_v11, %v9199_v13  ;;  %v3539_v38 = vmul.f32 %v10862_v18, %v10861_v27 }
 0x4f3   : > { %v2594_v4 = vpop.f32.mrf.mxu0 }
 0x4f4   : > { %v3242_v57 = vpop.f32.mrf.mxu2  ;;  %v4266_v12 = vmax.f32 %v4265_v39, %v9258_v9  ;;  %v2595_v58 = vadd.f32 %v2594_v4, %v2470_v48  ;;  %v5242_v39 = vld [vmem:[#allocation6 + $0x1b8] sm:$0xff]  ;;  %v3118_v48 = vadd.f32 %v3117_v60, %v10863_v16  ;;  %v5243_v4 = vld [vmem:[#allocation6 + $0x1a8] sm:$0xff] }
 0x4f5   : > { %v3123_v59 = vpop.f32.mrf.mxu1  ;;  %v3364_v6 = vpop.f32.mrf.mxu3  ;;  %v10867_v60 = vld [vmem:[#allocation145_spill] sm:$0xff] }
 0x4f6   : > { %v3365_v25 = vadd.f32 %v3364_v6, %v3240_v49  ;;  %v2720_v54 = vadd.f32 %v9204_v0, %v2595_v58  ;;  %v3243_v8 = vadd.f32 %v3242_v57, %v3118_v48  ;;  %v10864_v58 = vld [vmem:[#allocation46_spill] sm:$0xff] }
 0x4f7   : > { %4874 = vmatmul.msk.f32.gmra.mxu0 %vm1863_vm9, %v5237_v47  ;;  %v10865_v47 = vld [vmem:[#allocation143_spill] sm:$0xff] }
 0x4f8   : > { %v9267_v13 = vmul.f32 %v3539_v38, %v3365_v25  ;;  %3170 = vmatmul.f32.gmra.mxu1 %v5241_v23  ;;  %v4237_v11 = vmul.f32 %v4221_v33, %v2720_v54  ;;  %v3538_v6 = vmul.f32 %v10865_v47, %v10864_v58  ;;  %v10866_v38 = vld [vmem:[#allocation207_spill] sm:$0xff]  ;;  %v3543_v23 = vmul.f32 %v10867_v60, %v10861_v27 }
 0x4f9   : > { %3292 = vmatmul.f32.gmra.mxu2 %v5242_v39 }
 0x4fa   : > { %4912 = vmatmul.msk.f32.gmra.mxu3 %vm1863_vm9, %v5243_v4  ;;  %v9272_v49 = vadd.f32 %v4237_v11, %v9216_v5  ;;  %v5244_v11 = vld [vmem:[#allocation6 + $0x1e0] sm:$0xff] }
 0x4fb   : > { %v2989_v26 = vpop.f32.mrf.mxu0 }
 0x4fc   : > { %v3245_v0 = vpop.f32.mrf.mxu2  ;;  %v4267_v18 = vmax.f32 %v4266_v12, %v9272_v49  ;;  %v2990_v33 = vadd.f32 %v2989_v26, %v10866_v38  ;;  %v5245_v12 = vld [vmem:[#allocation6 + $0x1d0] sm:$0xff]  ;;  %v5246_v38 = vld [vmem:[#allocation6 + $0x1c0] sm:$0xff] }
 0x4fd   : > { %v9278_v25 = vpop.f32.mrf.mxu1  ;;  %v3367_v54 = vpop.f32.mrf.mxu3  ;;  %v10868_v26 = vld [vmem:[#allocation26_spill] sm:$0xff] }
 0x4fe   : > { %v3368_v39 = vadd.f32 %v3367_v54, %v3243_v8  ;;  %v4268_v16 = vrot.slane %v4267_v18, 4  ;;  %v9282_v5 = vmul.f32 %v3538_v6, %v2990_v33  ;;  %v3121_v47 = vadd.f32 %v3120_v19, %v10868_v26  ;;  %v10869_v6 = vld [vmem:[#allocation74_spill] sm:$0xff] }
 0x4ff   : > { %4875 = vmatmul.msk.f32.gmra.mxu0 %vm1863_vm9, %v5240_v28  ;;  %v3542_v33 = vmul.f32 %v10869_v6, %v10864_v58 }
 0x500   : > { %v9285_v57 = vmul.f32 %v3543_v23, %v3368_v39  ;;  %3173 = vmatmul.f32.gmra.mxu1 %v5244_v11  ;;  %v4269_v48 = vmax.f32 %v4267_v18, %v4268_v16  ;;  %v3246_v60 = vadd.f32 %v3245_v0, %v3121_v47  ;;  %v10870_v23 = vld [vmem:[#allocation104_spill] sm:$0xff]  ;;  %v10871_v16 = vld [vmem:[#allocation149_spill] sm:$0xff]  ;;  %v5247_v47 = vld [vmem:[#allocation6 + $0x1f8] sm:$0xff] }
 0x501   : > { %3295 = vmatmul.f32.gmra.mxu2 %v5245_v12  ;;  %v3547_v11 = vmul.f32 %v10871_v16, %v10861_v27 }
 0x502   : > { %4913 = vmatmul.msk.f32.gmra.mxu3 %vm1863_vm9, %v5246_v38  ;;  %v4270_v21 = vrot.slane %v4269_v48, 2 }
 0x503   : > { %v2992_v8 = vpop.f32.mrf.mxu0 }
 0x504   : > { %v3248_v54 = vpop.f32.mrf.mxu2  ;;  %v4271_v28 = vmax.f32 %v4269_v48, %v4270_v21  ;;  %v2993_v39 = vadd.f32 %v2992_v8, %v10870_v23  ;;  %v5248_v21 = vld [vmem:[#allocation6 + $0x1e8] sm:$0xff]  ;;  %v10872_v48 = vld [vmem:[#allocation83_spill] sm:$0xff] }
 0x505   : > { %v9292_v55 = vpop.f32.mrf.mxu1  ;;  %v3370_v18 = vpop.f32.mrf.mxu3  ;;  %v3124_v8 = vadd.f32 %v3123_v59, %v10872_v48  ;;  %v5249_v23 = vld [vmem:[#allocation6 + $0x1d8] sm:$0xff]  ;;  %v10874_v59 = vld [vmem:[#allocation92_spill] sm:$0xff] }
 0x506   : > { %v3371_v19 = vadd.f32 %v3370_v18, %v3246_v60  ;;  %v4272_v12 = vrot.slane %v4271_v28, 1  ;;  %v9296_v26 = vmul.f32 %v3542_v33, %v2993_v39 }
 0x507   : > { %4876 = vmatmul.msk.f32.gmra.mxu0 %vm1863_vm9, %v5243_v4  ;;  %v3249_v39 = vadd.f32 %v3248_v54, %v3124_v8  ;;  %v5250_v8 = vld [vmem:[#allocation6 + $0x210] sm:$0xff] }
 0x508   : > { %v9299_v0 = vmul.f32 %v3547_v11, %v3371_v19  ;;  %3176 = vmatmul.f32.gmra.mxu1 %v5247_v47  ;;  %v4273_v6 = vmax.f32 %v4271_v28, %v4272_v12  ;;  %v10873_v28 = vld [vmem:[#allocation141_spill] sm:$0xff] }
 0x509   : > { %3298 = vmatmul.f32.gmra.mxu2 %v5248_v21  ;;  %v3546_v19 = vmul.f32 %v10873_v28, %v10864_v58 }
 0x50a   : > { %4914 = vmatmul.msk.f32.gmra.mxu3 %vm1863_vm9, %v5249_v23  ;;  %v4293_v16 = vsub.f32 %v9229_v63, %v4273_v6  ;;  %v4297_v60 = vsub.f32 %v9242_v2, %v4273_v6  ;;  %v4301_v33 = vsub.f32 %v9258_v9, %v4273_v6  ;;  %v4305_v4 = vsub.f32 %v9272_v49, %v4273_v6  ;;  %v10875_v63 = vld [vmem:[#allocation146_spill] sm:$0xff] }
 0x50b   : > { %v2995_v18 = vpop.f32.mrf.mxu0  ;;  %v3551_v2 = vmul.f32 %v10875_v63, %v10861_v27  ;;  %v5252_v27 = vld [vmem:[#allocation6 + $0x1f0] sm:$0xff] }
 0x50c   : > { %v3251_v11 = vpop.f32.mrf.mxu2  ;;  %v4310_v12 = vmul.f32 1.442695, %v4293_v16  ;;  %v4318_v47 = vmul.f32 1.442695, %v4297_v60  ;;  %v2996_v21 = vadd.f32 %v2995_v18, %v10874_v59  ;;  %v4326_v53 = vmul.f32 1.442695, %v4301_v33 }
 0x50d   : > { %v9310_v48 = vpop.f32.mrf.mxu1  ;;  %v3373_v37 = vpop.f32.mrf.mxu3  ;;  %v4334_v54 = vmul.f32 1.442695, %v4305_v4  ;;  %v5251_v16 = vld [vmem:[#allocation6 + $0x200] sm:$0xff]  ;;  %v10877_v4 = vld [vmem:[#allocation147_spill] sm:$0xff] }
 0x50e   : > { %v3374_v9 = vadd.f32 %v3373_v37, %v3249_v39  ;;  %5042 = vpow2.f32 %v4310_v12  ;;  %v9314_v49 = vmul.f32 %v3546_v19, %v2996_v21  ;;  %v10876_v60 = vld [vmem:[#allocation40_spill] sm:$0xff]  ;;  %v3550_v28 = vmul.f32 %v10877_v4, %v10864_v58  ;;  %v10879_v21 = vld [vmem:[#allocation69_spill] sm:$0xff] }
 0x50f   : > { %4877 = vmatmul.msk.f32.gmra.mxu0 %vm1863_vm9, %v5246_v38  ;;  %5044 = vpow2.f32 %v4318_v47  ;;  %v3127_v18 = vadd.f32 %v9278_v25, %v10876_v60  ;;  %v10878_v19 = vld [vmem:[#allocation52_spill] sm:$0xff]  ;;  %v10880_v25 = vld [vmem:[#allocation158_spill] sm:$0xff]  ;;  %v5254_v60 = vld [vmem:[#allocation6 + $0x218] sm:$0xff]  ;;  %v3639_v7 = vmul.f32 %v10886_v50, %v10879_v21 }
 0x510   : > { %v9317_v6 = vmul.f32 %v3551_v2, %v3374_v9  ;;  %3179 = vmatmul.f32.gmra.mxu1 %v5250_v8  ;;  %5046 = vpow2.f32 %v4326_v53  ;;  %v3635_v63 = vmul.f32 %v10880_v25, %v10879_v21  ;;  %v5253_v8 = vld [vmem:[#allocation6 + $0x228] sm:$0xff]  ;;  %v10884_v25 = vld [vmem:[#allocation152_spill] sm:$0xff] }
 0x511   : > { %3301 = vmatmul.f32.gmra.mxu2 %v5251_v16  ;;  %5048 = vpow2.f32 %v4334_v54  ;;  %v3252_v37 = vadd.f32 %v3251_v11, %v3127_v18  ;;  %v5255_v4 = vld [vmem:[#allocation6 + $0x208] sm:$0xff] }
 0x512   : > { %4915 = vmatmul.msk.f32.gmra.mxu3 %vm1863_vm9, %v5252_v27 }
 0x513   : > { %v2998_v33 = vpop.f32.mrf.mxu0 }
 0x514   : > { %v3254_v39 = vpop.f32.mrf.mxu2  ;;  %v9322_v38 = vpop.eup %5042  ;;  %v2999_v12 = vadd.f32 %v2998_v33, %v10878_v19 }
 0x515   : > { %v3135_v47 = vpop.f32.mrf.mxu1  ;;  %v3376_v59 = vpop.f32.mrf.mxu3 }
 0x516   : > { %v9327_v53 = vpop.eup %5044  ;;  %v3377_v2 = vadd.f32 %v3376_v59, %v3252_v37  ;;  %v9333_v9 = vmul.f32 %v3550_v28, %v2999_v12  ;;  %v10882_v37 = vld [vmem:[#allocation23_spill] sm:$0xff]  ;;  %v10883_v59 = vld [vmem:[#allocation86_spill] sm:$0xff] }
 0x517   : > { %v4349_v11 = vadd.f32 %v9327_v53, %v9322_v38  ;;  %4878 = vmatmul.msk.f32.gmra.mxu0 %vm1863_vm9, %v5249_v23  ;;  %v9336_v54 = vpop.eup %5046  ;;  %v3130_v33 = vadd.f32 %v9292_v55, %v10882_v37 }
 0x518   : > { %10881 = vst [vmem:[#allocation103_spill] sm:$0xff] %v9333_v9  ;;  %v9338_v58 = vmul.f32 %v3635_v63, %v3377_v2  ;;  %3182 = vmatmul.f32.gmra.mxu1 %v5253_v8  ;;  %v9341_v18 = vpop.eup %5048  ;;  %v3634_v63 = vmul.f32 %v10884_v25, %v10883_v59  ;;  %v5257_v25 = vld [vmem:[#allocation6 + $0x230] sm:$0xff] }
 0x519   : > { %v4350_v16 = vadd.f32 %v9336_v54, %v4349_v11  ;;  %3304 = vmatmul.f32.gmra.mxu2 %v5254_v60  ;;  %v3255_v28 = vadd.f32 %v3254_v39, %v3130_v33  ;;  %v10885_v11 = vld [vmem:[#allocation98_spill] sm:$0xff] }
 0x51a   : > { %4916 = vmatmul.msk.f32.gmra.mxu3 %vm1863_vm9, %v5255_v4 }
 0x51b   : > { %v4351_v23 = vadd.f32 %v9341_v18, %v4350_v16  ;;  %v3001_v19 = vpop.f32.mrf.mxu0  ;;  %v5256_v16 = vld [vmem:[#allocation6 + $0x240] sm:$0xff] }
 0x51c   : > { %v3257_v12 = vpop.f32.mrf.mxu2  ;;  %v3002_v8 = vadd.f32 %v3001_v19, %v10885_v11  ;;  %v3133_v19 = vadd.f32 %v9310_v48, %v10887_v40  ;;  %v5258_v11 = vld [vmem:[#allocation6 + $0x220] sm:$0xff] }
 0x51d   : > { %v4352_v2 = vrot.slane %v4351_v23, 4  ;;  %v3138_v60 = vpop.f32.mrf.mxu1  ;;  %v3379_v17 = vpop.f32.mrf.mxu3 }
 0x51e   : > { %v3380_v55 = vadd.f32 %v3379_v17, %v3255_v28  ;;  %v9352_v22 = vmul.f32 %v3634_v63, %v3002_v8  ;;  %v3258_v17 = vadd.f32 %v3257_v12, %v3133_v19  ;;  %v10888_v63 = vld [vmem:[#allocation154_spill] sm:$0xff] }
 0x51f   : > { %v4353_v37 = vadd.f32 %v4352_v2, %v4351_v23  ;;  %4879 = vmatmul.msk.f32.gmra.mxu0 %vm1863_vm9, %v5252_v27  ;;  %v3638_v27 = vmul.f32 %v10888_v63, %v10883_v59  ;;  %v10889_v2 = vld [vmem:[#allocation113_spill] sm:$0xff]  ;;  %v10891_v19 = vld [vmem:[#allocation38_spill] sm:$0xff]  ;;  %v5261_v63 = vld [vmem:[#allocation6 + $0x238] sm:$0xff] }
 0x520   : > { %v9355_v39 = vmul.f32 %v3639_v7, %v3380_v55  ;;  %3185 = vmatmul.f32.gmra.mxu1 %v5256_v16 }
 0x521   : > { %v4354_v33 = vrot.slane %v4353_v37, 2  ;;  %3307 = vmatmul.f32.gmra.mxu2 %v5257_v25  ;;  %v10890_v25 = vld [vmem:[#allocation159_spill] sm:$0xff] }
 0x522   : > { %4917 = vmatmul.msk.f32.gmra.mxu3 %vm1863_vm9, %v5258_v11  ;;  %v3643_v32 = vmul.f32 %v10890_v25, %v10879_v21 }
 0x523   : > { %v4355_v50 = vadd.f32 %v4354_v33, %v4353_v37  ;;  %v3004_v23 = vpop.f32.mrf.mxu0  ;;  %v5259_v37 = vld [vmem:[#allocation6 + $0x258] sm:$0xff]  ;;  %v5260_v33 = vld [vmem:[#allocation6 + $0x248] sm:$0xff] }
 0x524   : > { %v3260_v28 = vpop.f32.mrf.mxu2  ;;  %v3005_v8 = vadd.f32 %v3004_v23, %v10889_v2  ;;  %v3136_v23 = vadd.f32 %v3135_v47, %v10891_v19  ;;  %v5262_v19 = vld [vmem:[#allocation6 + $0x270] sm:$0xff] }
 0x525   : > { %v4356_v7 = vrot.slane %v4355_v50, 1  ;;  %v9363_v55 = vpop.f32.mrf.mxu1  ;;  %v3382_v16 = vpop.f32.mrf.mxu3 }
 0x526   : > { %v3383_v40 = vadd.f32 %v3382_v16, %v3258_v17  ;;  %v9367_v44 = vmul.f32 %v3638_v27, %v3005_v8  ;;  %v3261_v2 = vadd.f32 %v3260_v28, %v3136_v23  ;;  %v10894_v16 = vld [vmem:[#allocation164_spill] sm:$0xff] }
 0x527   : > { %v4357_v48 = vadd.f32 %v4356_v7, %v4355_v50  ;;  %4880 = vmatmul.msk.f32.gmra.mxu0 %vm1863_vm9, %v5255_v4  ;;  %v10892_v50 = vld [vmem:[#allocation160_spill] sm:$0xff]  ;;  %v10893_v7 = vld [vmem:[#allocation94_spill] sm:$0xff] }
 0x528   : > { %v9370_v12 = vmul.f32 %v3643_v32, %v3383_v40  ;;  %3188 = vmatmul.f32.gmra.mxu1 %v5259_v37  ;;  %v3642_v27 = vmul.f32 %v10892_v50, %v10883_v59  ;;  %v3647_v40 = vmul.f32 %v10894_v16, %v10879_v21  ;;  %v5263_v50 = vld [vmem:[#allocation6 + $0x260] sm:$0xff]  ;;  %v10897_v21 = vld [vmem:[#allocation163_spill] sm:$0xff] }
 0x529   : > { %5050 = vrcp.f32 %v4357_v48  ;;  %3310 = vmatmul.f32.gmra.mxu2 %v5260_v33  ;;  %vm4395_vm15 = vweird.f32 %v4357_v48 }
 0x52a   : > { %4918 = vmatmul.msk.f32.gmra.mxu3 %vm1863_vm9, %v5261_v63 }
 0x52b   : > { %v3007_v25 = vpop.f32.mrf.mxu0 }
 0x52c   : > { %v3263_v17 = vpop.f32.mrf.mxu2  ;;  %v3008_v4 = vadd.f32 %v3007_v25, %v10893_v7  ;;  %v10896_v25 = vld [vmem:[#allocation57_spill] sm:$0xff] }
 0x52d   : > { %v9377_v32 = vpop.f32.mrf.mxu1  ;;  %v3385_v8 = vpop.f32.mrf.mxu3  ;;  %v3139_v7 = vadd.f32 %v3138_v60, %v10896_v25  ;;  %v10900_v60 = vld [vmem:[#allocation29_spill] sm:$0xff] }
 0x52e   : > { %v3386_v37 = vadd.f32 %v3385_v8, %v3261_v2  ;;  %v9381_v47 = vmul.f32 %v3642_v27, %v3008_v4  ;;  %v10898_v2 = vld [vmem:[#allocation168_spill] sm:$0xff]  ;;  %v4401_v4 = vand.u32 2147483648, %v4357_v48 }
 0x52f   : > { %v5051_v33 = vpop.eup %5050  ;;  %4881 = vmatmul.msk.f32.gmra.mxu0 %vm1863_vm9, %v5258_v11  ;;  %v3712_v27 = vsel %vm907_vm3, %v10898_v2, %v10897_v21  ;;  %v3264_v11 = vadd.f32 %v3263_v17, %v3139_v7  ;;  %v5265_v7 = vld [vmem:[#allocation6 + $0x288] sm:$0xff] }
 0x530   : > { %v9384_v28 = vmul.f32 %v3647_v40, %v3386_v37  ;;  %3191 = vmatmul.f32.gmra.mxu1 %v5262_v19  ;;  %v4391_v23 = vmul.f32 %v5051_v33, %v4357_v48  ;;  %vm4396_vm14 = vweird.f32 %v5051_v33  ;;  %v4399_v37 = vand.u32 2147483647, %v4357_v48  ;;  %v10899_v19 = vld [vmem:[#allocation34_spill] sm:$0xff] }
 0x531   : > { %3313 = vmatmul.f32.gmra.mxu2 %v5263_v50  ;;  %v3646_v50 = vmul.f32 %v10899_v19, %v10883_v59  ;;  %v3731_v10 = vmul.f32 %v3712_v27, %v10901_v41  ;;  %vm4397_vm0 = vmor %vm4395_vm15, %vm4396_vm14  ;;  %v10904_v27 = vld [vmem:[#allocation170_spill] sm:$0xff] }
 0x532   : > { %10895 = vst [vmem:[#allocation95_spill] sm:$0xff] %v9384_v28  ;;  %4919 = vmatmul.msk.f32.gmra.mxu3 %vm1863_vm9, %v5264_v52  ;;  %v4392_v42 = vsub.f32 1.0, %v4391_v23  ;;  %vm4400_vm5 = vcmp.eq.f32.partialorder %v4399_v37, 8.507059e+37  ;;  %v3716_v48 = vsel %vm907_vm3, %v10904_v27, %v10898_v2  ;;  %v10945_v28 = vld [vmem:[#allocation179_spill] sm:$0xff] }
 0x533   : > { %v3010_v8 = vpop.f32.mrf.mxu0 }
 0x534   : > { %v3266_v16 = vpop.f32.mrf.mxu2  ;;  %v4393_v40 = vmul.f32 %v5051_v33, %v4392_v42  ;;  %v3011_v25 = vadd.f32 %v3010_v8, %v10900_v60  ;;  %v4402_v42 = vor.u32 1.1754944e-38, %v4401_v4  ;;  %v10903_v8 = vld [vmem:[#allocation21_spill] sm:$0xff] }
 0x535   : > { %v9395_v24 = vpop.f32.mrf.mxu1  ;;  %v3388_v23 = vpop.f32.mrf.mxu3  ;;  %v561_v19 = vadd.f32 %v10903_v8, %v10837_v62  ;;  %v10936_v62 = vld [vmem:[#allocation198_spill] sm:$0xff] }
 0x536   : > { %v3389_v3 = vadd.f32 %v3388_v23, %v3264_v11  ;;  %v4394_v34 = vadd.f32 %v5051_v33, %v4393_v40  ;;  %v9398_v21 = vmul.f32 %v3646_v50, %v3011_v25  ;;  %v10905_v11 = vld [vmem:[#allocation85_spill] sm:$0xff] }
 0x537   : > { %4882 = vmatmul.msk.f32.gmra.mxu0 %vm1863_vm9, %v5261_v63  ;;  %v3142_v40 = vadd.f32 %v9363_v55, %v10905_v11  ;;  %v5266_v63 = vld [vmem:[#allocation6 + $0x278] sm:$0xff] }
 0x538   : > { %10902 = vst [vmem:[#allocation80_spill] sm:$0xff] %v9398_v21  ;;  %v9401_v17 = vmul.f32 %v3731_v10, %v3389_v3  ;;  %3194 = vmatmul.f32.gmra.mxu1 %v5265_v7  ;;  %v4398_v59 = vsel %vm4397_vm0, %v5051_v33, %v4394_v34  ;;  %v5267_v3 = vld [vmem:[#allocation6 + $0x268] sm:$0xff]  ;;  %v10906_v55 = vld [vmem:[#allocation19_spill] sm:$0xff] }
 0x539   : > { %3316 = vmatmul.f32.gmra.mxu2 %v5266_v63  ;;  %v4403_v4 = vsel %vm4400_vm5, %v4402_v42, %v4398_v59  ;;  %v3267_v50 = vadd.f32 %v3266_v16, %v3142_v40  ;;  %v558_v23 = vadd.f32 %v10906_v55, %v10840_v35  ;;  %v10907_v7 = vld [vmem:[#allocation77_spill] sm:$0xff]  ;;  %v10908_v59 = vld [vmem:[#allocation43_spill] sm:$0xff]  ;;  %v10910_v16 = vld [vmem:[#allocation16_spill] sm:$0xff] }
 0x53a   : > { %4920 = vmatmul.msk.f32.gmra.mxu3 %vm1863_vm9, %v5267_v3  ;;  %v4445_v34 = vmul.f32 %v9341_v18, %v4403_v4  ;;  %v4441_v10 = vmul.f32 %v9336_v54, %v4403_v4  ;;  %v4437_v33 = vmul.f32 %v9327_v53, %v4403_v4  ;;  %v4433_v37 = vmul.f32 %v9322_v38, %v4403_v4  ;;  %v10909_v54 = vld [vmem:[#allocation175_spill] sm:$0xff]  ;;  %v10911_v4 = vld [vmem:[#allocation13_spill] sm:$0xff]  ;;  %v5269_v55 = vld [vmem:[#allocation6 + $0x290] sm:$0xff] }
 0x53b   : > { %v3013_v60 = vpop.f32.mrf.mxu0  ;;  %v3730_v42 = vmul.f32 %v3716_v48, %v10907_v7  ;;  %v3735_v11 = vmul.f32 %v10909_v54, %v10901_v41 }
 0x53c   : > { %v4461_v2 = vmul.f32 %v4445_v34, %v561_v19  ;;  %v3269_v25 = vpop.f32.mrf.mxu2  ;;  %v3014_v8 = vadd.f32 %v3013_v60, %v10908_v59  ;;  %v4457_v38 = vmul.f32 %v4441_v10, %v558_v23  ;;  %v555_v19 = vadd.f32 %v10910_v16, %v10842_v45  ;;  %v5268_v60 = vld [vmem:[#allocation6 + $0x2a0] sm:$0xff]  ;;  %v10913_v10 = vld [vmem:[#allocation157_spill] sm:$0xff]  ;;  %v10915_v59 = vld [vmem:[#allocation178_spill] sm:$0xff] }
 0x53d   : > { %v9420_v27 = vpop.f32.mrf.mxu1  ;;  %v3391_v18 = vpop.f32.mrf.mxu3  ;;  %v552_v34 = vadd.f32 %v10911_v4, %v10846_v31  ;;  %v10914_v23 = vld [vmem:[#allocation33_spill] sm:$0xff]  ;;  %v10917_v16 = vld [vmem:[#allocation71_spill] sm:$0xff]  ;;  %v5282_v45 = vld [vmem:[#allocation6 + $0x2e0] sm:$0xff] }
 0x53e   : > { %4521 = vmatpush.msra.mxu1 %v4461_v2  ;;  %v3392_v53 = vadd.f32 %v3391_v18, %v3267_v50  ;;  %v9426_v40 = vmul.f32 %v3730_v42, %v3014_v8  ;;  %v4453_v48 = vmul.f32 %v4437_v33, %v555_v19  ;;  %v10912_v50 = vld [vmem:[#allocation174_spill] sm:$0xff]  ;;  %v3145_v42 = vadd.f32 %v9377_v32, %v10914_v23  ;;  %v10916_v8 = vld [vmem:[#allocation169_spill] sm:$0xff] }
 0x53f   : > { %4883 = vmatmul.msk.f32.gmra.mxu0 %vm1863_vm9, %v5264_v52  ;;  %v3717_v2 = vsel %vm907_vm3, %v10913_v10, %v10912_v50  ;;  %v5270_v52 = vld [vmem:[#allocation6 + $0x280] sm:$0xff]  ;;  %v4449_v33 = vmul.f32 %v4433_v37, %v552_v34  ;;  %v3714_v18 = vsel %vm907_vm3, %v10916_v8, %v10915_v59 }
 0x540   : > { %v9429_v63 = vmul.f32 %v3735_v11, %v3392_v53  ;;  %4522 = vmatpush.msra.mxu1 %v4457_v38  ;;  %v3270_v54 = vadd.f32 %v3269_v25, %v3145_v42  ;;  %v3734_v38 = vmul.f32 %v3717_v2, %v10907_v7  ;;  %v5271_v25 = vld [vmem:[#allocation6 + $0x2b8] sm:$0xff]  ;;  %v10918_v50 = vld [vmem:[#allocation180_spill] sm:$0xff] }
 0x541   : > { %3197 = vmatmul.f32.gmra.mxu1 %v5268_v60  ;;  %3319 = vmatmul.f32.gmra.mxu2 %v5269_v55  ;;  %v5272_v55 = vld [vmem:[#allocation6 + $0x2a8] sm:$0xff]  ;;  %v3718_v10 = vsel %vm907_vm3, %v10918_v50, %v10916_v8  ;;  %v10919_v2 = vld [vmem:[#allocation59_spill] sm:$0xff]  ;;  %v10921_v59 = vld [vmem:[#allocation184_spill] sm:$0xff] }
 0x542   : > { %4523 = vmatpush.msra.mxu1 %v4453_v48  ;;  %4921 = vmatmul.msk.f32.gmra.mxu3 %vm1863_vm9, %v5270_v52  ;;  %v3739_v48 = vmul.f32 %v3714_v18, %v10901_v41  ;;  %v3148_v23 = vadd.f32 %v9395_v24, %v10919_v2  ;;  %v5273_v42 = vld [vmem:[#allocation6 + $0x298] sm:$0xff]  ;;  %v10925_v50 = vld [vmem:[#allocation194_spill] sm:$0xff] }
 0x543   : > { %v3016_v11 = vpop.f32.mrf.mxu0  ;;  %v5276_v2 = vld [vmem:[#allocation6 + $0x2b0] sm:$0xff] }
 0x544   : > { %4524 = vmatpush.msra.mxu1 %v4449_v33  ;;  %v3272_v53 = vpop.f32.mrf.mxu2  ;;  %v3017_v19 = vadd.f32 %v3016_v11, %v10917_v16  ;;  %v10920_v33 = vld [vmem:[#allocation192_spill] sm:$0xff]  ;;  %v10922_v16 = vld [vmem:[#allocation118_spill] sm:$0xff] }
 0x545   : > { %v9446_v4 = vpop.f32.mrf.mxu1  ;;  %v3394_v32 = vpop.f32.mrf.mxu3  ;;  %v3273_v18 = vadd.f32 %v3272_v53, %v3148_v23  ;;  %v5274_v53 = vld [vmem:[#allocation6 + $0x2d0] sm:$0xff] }
 0x546   : > { %v3395_v60 = vadd.f32 %v3394_v32, %v3270_v54  ;;  %v9449_v37 = vmul.f32 %v3734_v38, %v3017_v19  ;;  %v3738_v38 = vmul.f32 %v3718_v10, %v10907_v7  ;;  %v3719_v10 = vsel %vm907_vm3, %v10925_v50, %v10921_v59 }
 0x547   : > { %4884 = vmatmul.msk.f32.gmra.mxu0 %vm1863_vm9, %v5267_v3  ;;  %v3715_v3 = vsel %vm907_vm3, %v10921_v59, %v10920_v33  ;;  %v3742_v33 = vmul.f32 %v3719_v10, %v10907_v7  ;;  %v5278_v59 = vld [vmem:[#allocation6 + $0x2d8] sm:$0xff]  ;;  %v5279_v7 = vld [vmem:[#allocation6 + $0x2c8] sm:$0xff]  ;;  %v10931_v10 = vld [vmem:[#allocation110_spill] sm:$0xff] }
 0x548   : > { %v9452_v34 = vmul.f32 %v3739_v48, %v3395_v60  ;;  %v3743_v24 = vmul.f32 %v3715_v3, %v10901_v41 }
 0x549   : > { %3200 = vmatmul.f32.gmra.mxu1 %v5271_v25  ;;  %3322 = vmatmul.f32.gmra.mxu2 %v5272_v55  ;;  %v5275_v55 = vld [vmem:[#allocation6 + $0x2c0] sm:$0xff] }
 0x54a   : > { %4922 = vmatmul.msk.f32.gmra.mxu3 %vm1863_vm9, %v5273_v42 }
 0x54b   : > { %v3019_v54 = vpop.f32.mrf.mxu0 }
 0x54c   : > { %v9465_v11 = vpop.f32.mrf.mxu2  ;;  %v3020_v19 = vadd.f32 %v3019_v54, %v10922_v16  ;;  %v5277_v16 = vld [vmem:[#allocation6 + $0x2e8] sm:$0xff] }
 0x54d   : > { %v9469_v8 = vpop.f32.mrf.mxu1  ;;  %v3397_v32 = vpop.f32.mrf.mxu3 }
 0x54e   : > { %v3398_v48 = vadd.f32 %v3397_v32, %v3273_v18  ;;  %v9472_v60 = vmul.f32 %v3738_v38, %v3020_v19  ;;  %v10928_v19 = vld [vmem:[#allocation183_spill] sm:$0xff]  ;;  %v10929_v32 = vld [vmem:[#allocation185_spill] sm:$0xff] }
 0x54f   : > { %4885 = vmatmul.msk.f32.gmra.mxu0 %vm1863_vm9, %v5270_v52  ;;  %v10926_v52 = vld [vmem:[#allocation106_spill] sm:$0xff] }
 0x550   : > { %10923 = vst [vmem:[#allocation41_spill] sm:$0xff] %v9472_v60  ;;  %v9475_v25 = vmul.f32 %v3743_v24, %v3398_v48  ;;  %v3812_v24 = vsel %vm997_vm1, %v10929_v32, %v10928_v19  ;;  %v10933_v32 = vld [vmem:[#allocation173_spill] sm:$0xff] }
 0x551   : > { %3203 = vmatmul.f32.gmra.mxu1 %v5274_v53  ;;  %3325 = vmatmul.f32.gmra.mxu2 %v5275_v55  ;;  %v10930_v55 = vld [vmem:[#allocation100_spill] sm:$0xff] }
 0x552   : > { %10924 = vst [vmem:[#allocation148_spill] sm:$0xff] %v9475_v25  ;;  %4923 = vmatmul.msk.f32.gmra.mxu3 %vm1863_vm9, %v5276_v2  ;;  %v3826_v50 = vmul.f32 %v3812_v24, %v10930_v55 }
 0x554   : > { %v3022_v41 = vpop.f32.mrf.mxu0  ;;  %v9482_v23 = vpop.f32.mrf.mxu2 }
 0x555   : > { %v3023_v3 = vadd.f32 %v3022_v41, %v10926_v52  ;;  %v9486_v18 = vpop.f32.mrf.mxu1  ;;  %v9488_v54 = vpop.f32.mrf.mxu3 }
 0x557   : > { %v9490_v38 = vmul.f32 %v3742_v33, %v3023_v3  ;;  %4886 = vmatmul.msk.f32.gmra.mxu0 %vm1863_vm9, %v5273_v42  ;;  %v5280_v3 = vld [vmem:[#allocation6 + $0x300] sm:$0xff] }
 0x559   : > { %10927 = vst [vmem:[#allocation101_spill] sm:$0xff] %v9490_v38  ;;  %3206 = vmatmul.f32.gmra.mxu1 %v5277_v16  ;;  %3328 = vmatmul.f32.gmra.mxu2 %v5278_v59  ;;  %v5281_v16 = vld [vmem:[#allocation6 + $0x2f0] sm:$0xff]  ;;  %v10932_v59 = vld [vmem:[#allocation189_spill] sm:$0xff] }
 0x55a   : > { %4924 = vmatmul.msk.f32.gmra.mxu3 %vm1863_vm9, %v5279_v7  ;;  %v3813_v31 = vsel %vm997_vm1, %v10933_v32, %v10932_v59  ;;  %v5284_v59 = vld [vmem:[#allocation6 + $0x308] sm:$0xff]  ;;  %v10935_v32 = vld [vmem:[#allocation188_spill] sm:$0xff] }
 0x55b   : > { %v3814_v56 = vsel %vm997_vm1, %v10936_v62, %v10935_v32  ;;  %v5286_v62 = vld [vmem:[#allocation6 + $0x330] sm:$0xff] }
 0x55c   : > { %v3025_v48 = vpop.f32.mrf.mxu0  ;;  %v9498_v53 = vpop.f32.mrf.mxu2 }
 0x55d   : > { %v3026_v41 = vadd.f32 %v3025_v48, %v10931_v10  ;;  %v3162_v42 = vpop.f32.mrf.mxu1  ;;  %v9502_v33 = vpop.f32.mrf.mxu3  ;;  %v10934_v10 = vld [vmem:[#allocation115_spill] sm:$0xff] }
 0x55f   : > { %v9504_v52 = vmul.f32 %v3826_v50, %v3026_v41  ;;  %4887 = vmatmul.msk.f32.gmra.mxu0 %vm1863_vm9, %v5276_v2  ;;  %v3830_v50 = vmul.f32 %v3813_v31, %v10930_v55  ;;  %v10937_v31 = vld [vmem:[#allocation37_spill] sm:$0xff] }
 0x561   : > { %3209 = vmatmul.f32.gmra.mxu1 %v5280_v3  ;;  %3331 = vmatmul.f32.gmra.mxu2 %v5281_v16  ;;  %v5283_v16 = vld [vmem:[#allocation6 + $0x318] sm:$0xff] }
 0x562   : > { %4925 = vmatmul.msk.f32.gmra.mxu3 %vm1863_vm9, %v5282_v45 }
 0x564   : > { %v3028_v24 = vpop.f32.mrf.mxu0  ;;  %v9512_v48 = vpop.f32.mrf.mxu2 }
 0x565   : > { %v3029_v41 = vadd.f32 %v3028_v24, %v10934_v10  ;;  %v3165_v2 = vpop.f32.mrf.mxu1  ;;  %v9516_v35 = vpop.f32.mrf.mxu3  ;;  %v3163_v24 = vadd.f32 %v3162_v42, %v10937_v31  ;;  %v10941_v42 = vld [vmem:[#allocation208_spill] sm:$0xff] }
 0x566   : > { %v3815_v31 = vsel %vm997_vm1, %v10941_v42, %v10940_v14 }
 0x567   : > { %v9518_v3 = vmul.f32 %v3830_v50, %v3029_v41  ;;  %4888 = vmatmul.msk.f32.gmra.mxu0 %vm1863_vm9, %v5279_v7  ;;  %v3834_v50 = vmul.f32 %v3814_v56, %v10930_v55  ;;  %v10938_v41 = vld [vmem:[#allocation121_spill] sm:$0xff]  ;;  %v5288_v56 = vld [vmem:[#allocation6 + $0x310] sm:$0xff] }
 0x569   : > { %3212 = vmatmul.f32.gmra.mxu1 %v5283_v16  ;;  %3334 = vmatmul.f32.gmra.mxu2 %v5284_v59 }
 0x56a   : > { %4926 = vmatmul.msk.f32.gmra.mxu3 %vm1863_vm9, %v5285_v43 }
 0x56c   : > { %v3031_v10 = vpop.f32.mrf.mxu0  ;;  %v3287_v38 = vpop.f32.mrf.mxu2 }
 0x56d   : > { %v3032_v7 = vadd.f32 %v3031_v10, %v10938_v41  ;;  %v3168_v51 = vpop.f32.mrf.mxu1  ;;  %v3288_v16 = vadd.f32 %v3287_v38, %v3163_v24  ;;  %v9529_v21 = vpop.f32.mrf.mxu3  ;;  %v3166_v38 = vadd.f32 %v3165_v2, %v10756_v1  ;;  %v10942_v41 = vld [vmem:[#allocation126_spill] sm:$0xff]  ;;  %v10944_v1 = vld [vmem:[#allocation27_spill] sm:$0xff] }
 0x56f   : > { %v9531_v59 = vmul.f32 %v3834_v50, %v3032_v7  ;;  %4889 = vmatmul.msk.f32.gmra.mxu0 %vm1863_vm9, %v5282_v45  ;;  %v3838_v50 = vmul.f32 %v3815_v31, %v10930_v55  ;;  %v3808_v55 = vsel %vm997_vm1, %v10928_v19, %v10945_v28  ;;  %v5289_v31 = vld [vmem:[#allocation6 + $0x348] sm:$0xff] }
 0x570   : > { %v10947_v28 = vld [vmem:[#allocation93_spill] sm:$0xff] }
 0x571   : > { %10939 = vst [vmem:[#allocation191_spill] sm:$0xff] %v9531_v59  ;;  %3215 = vmatmul.f32.gmra.mxu1 %v5286_v62  ;;  %3337 = vmatmul.f32.gmra.mxu2 %v5287_v20  ;;  %v10943_v20 = vld [vmem:[#allocation32_spill] sm:$0xff] }
 0x572   : > { %4927 = vmatmul.msk.f32.gmra.mxu3 %vm1863_vm9, %v5288_v56  ;;  %v3151_v59 = vadd.f32 %v9420_v27, %v10943_v20  ;;  %v10948_v20 = vld [vmem:[#allocation31_spill] sm:$0xff] }
 0x574   : > { %v3034_v24 = vpop.f32.mrf.mxu0  ;;  %v3290_v10 = vpop.f32.mrf.mxu2  ;;  %v3276_v42 = vadd.f32 %v9465_v11, %v3151_v59  ;;  %v10946_v11 = vld [vmem:[#allocation97_spill] sm:$0xff] }
 0x575   : > { %v3035_v45 = vadd.f32 %v3034_v24, %v10942_v41  ;;  %v3171_v7 = vpop.f32.mrf.mxu1  ;;  %v3291_v62 = vadd.f32 %v3290_v10, %v3166_v38  ;;  %v3412_v9 = vpop.f32.mrf.mxu3  ;;  %v5290_v38 = vld [vmem:[#allocation6 + $0x338] sm:$0xff] }
 0x576   : > { %v3413_v25 = vadd.f32 %v3412_v9, %v3288_v16  ;;  %v3401_v27 = vadd.f32 %v9488_v54, %v3276_v42  ;;  %v5291_v16 = vld [vmem:[#allocation6 + $0x328] sm:$0xff]  ;;  %v3154_v54 = vadd.f32 %v9446_v4, %v10948_v20 }
 0x577   : > { %v9544_v60 = vmul.f32 %v3838_v50, %v3035_v45  ;;  %4890 = vmatmul.msk.f32.gmra.mxu0 %vm1863_vm9, %v5285_v43  ;;  %v3169_v43 = vadd.f32 %v3168_v51, %v10764_v29 }
 0x578   : > { %v3475_v2 = vmul.f32 %v3413_v25, %v10944_v1  ;;  %v3827_v25 = vmul.f32 %v3808_v55, %v10946_v11  ;;  %v3279_v51 = vadd.f32 %v9482_v23, %v3154_v54  ;;  %v10951_v23 = vld [vmem:[#allocation190_spill] sm:$0xff]  ;;  %v10954_v54 = vld [vmem:[#allocation24_spill] sm:$0xff] }
 0x579   : > { %3218 = vmatmul.f32.gmra.mxu1 %v5289_v31  ;;  %3340 = vmatmul.f32.gmra.mxu2 %v5290_v38 }
 0x57a   : > { %v3571_v9 = vadd.f32 %v9267_v13, %v3475_v2  ;;  %4928 = vmatmul.msk.f32.gmra.mxu3 %vm1863_vm9, %v5291_v16  ;;  %v3843_v13 = vmul.f32 %v3827_v25, %v3401_v27  ;;  %v10949_v2 = vld [vmem:[#allocation78_spill] sm:$0xff]  ;;  %v3404_v4 = vadd.f32 %v9502_v33, %v3279_v51  ;;  %v5293_v27 = vld [vmem:[#allocation6 + $0x340] sm:$0xff]  ;;  %v5294_v51 = vld [vmem:[#allocation6 + $0x358] sm:$0xff] }
 0x57c   : > { %v3667_v59 = vadd.f32 %v9338_v58, %v3571_v9  ;;  %v3037_v24 = vpop.f32.mrf.mxu0  ;;  %v3293_v10 = vpop.f32.mrf.mxu2  ;;  %v10950_v58 = vld [vmem:[#allocation75_spill] sm:$0xff]  ;;  %v5292_v9 = vld [vmem:[#allocation6 + $0x350] sm:$0xff] }
 0x57d   : > { %v3038_v19 = vadd.f32 %v3037_v24, %v10947_v28  ;;  %v3174_v50 = vpop.f32.mrf.mxu1  ;;  %v3294_v41 = vadd.f32 %v3293_v10, %v3169_v43  ;;  %v3415_v45 = vpop.f32.mrf.mxu3  ;;  %v3831_v43 = vmul.f32 %v10951_v23, %v10946_v11  ;;  %v10952_v24 = vld [vmem:[#allocation161_spill] sm:$0xff] }
 0x57e   : > { %v3416_v42 = vadd.f32 %v3415_v45, %v3291_v62  ;;  %v3763_v1 = vadd.f32 %v9401_v17, %v3667_v59  ;;  %v3172_v17 = vadd.f32 %v3171_v7, %v10770_v46  ;;  %v10953_v45 = vld [vmem:[#allocation28_spill] sm:$0xff] }
 0x57f   : > { %v3474_v29 = vmul.f32 %v3038_v19, %v10949_v2  ;;  %4891 = vmatmul.msk.f32.gmra.mxu0 %vm1863_vm9, %v5288_v56  ;;  %v3157_v20 = vadd.f32 %v9469_v8, %v10953_v45  ;;  %v3847_v46 = vmul.f32 %v3831_v43, %v3404_v4  ;;  %v10959_v43 = vld [vmem:[#allocation61_spill] sm:$0xff] }
 0x580   : > { %v3479_v55 = vmul.f32 %v3416_v42, %v10950_v58  ;;  %v9567_v31 = vadd.f32 %v3843_v13, %v3763_v1  ;;  %v10955_v1 = vld [vmem:[#allocation30_spill] sm:$0xff] }
 0x581   : > { %v3570_v38 = vadd.f32 %v9282_v5, %v3474_v29  ;;  %3343 = vmatmul.f32.gmra.mxu2 %v5292_v9  ;;  %v3282_v42 = vadd.f32 %v9498_v53, %v3157_v20  ;;  %v3175_v53 = vadd.f32 %v3174_v50, %v10776_v30  ;;  %v10958_v50 = vld [vmem:[#allocation42_spill] sm:$0xff] }
 0x582   : > { %v3575_v62 = vadd.f32 %v9285_v57, %v3479_v55  ;;  %4929 = vmatmul.msk.f32.gmra.mxu3 %vm1863_vm9, %v5293_v27 }
 0x583   : > { %v3666_v56 = vadd.f32 %v9352_v22, %v3570_v38 }
 0x584   : > { %v3671_v25 = vadd.f32 %v9355_v39, %v3575_v62  ;;  %v3040_v59 = vpop.f32.mrf.mxu0  ;;  %v3296_v5 = vpop.f32.mrf.mxu2  ;;  %v10957_v62 = vld [vmem:[#allocation65_spill] sm:$0xff] }
 0x585   : > { %v3041_v10 = vadd.f32 %v3040_v59, %v10952_v24  ;;  %v3177_v28 = vpop.f32.mrf.mxu1  ;;  %v3297_v33 = vadd.f32 %v3296_v5, %v3172_v17  ;;  %v3418_v19 = vpop.f32.mrf.mxu3  ;;  %v3762_v57 = vadd.f32 %v9426_v40, %v3666_v56  ;;  %v10956_v40 = vld [vmem:[#allocation196_spill] sm:$0xff]  ;;  %v3160_v17 = vadd.f32 %v9486_v18, %v10957_v62  ;;  %v10961_v24 = vld [vmem:[#allocation202_spill] sm:$0xff] }
 0x586   : > { %v3419_v7 = vadd.f32 %v3418_v19, %v3294_v41  ;;  %v3767_v22 = vadd.f32 %v9429_v63, %v3671_v25  ;;  %v3810_v8 = vsel %vm997_vm1, %v10935_v32, %v10956_v40  ;;  %v3407_v41 = vadd.f32 %v9516_v35, %v3282_v42 }
 0x587   : > { %v3478_v13 = vmul.f32 %v3041_v10, %v10954_v54  ;;  %4892 = vmatmul.msk.f32.gmra.mxu0 %vm1863_vm9, %v5291_v16  ;;  %v9586_v39 = vadd.f32 %v9504_v52, %v3762_v57  ;;  %v3835_v58 = vmul.f32 %v3810_v8, %v10946_v11  ;;  %v3178_v10 = vadd.f32 %v3177_v28, %v10784_v15  ;;  %v10963_v57 = vld [vmem:[#allocation95_spill] sm:$0xff]  ;;  %v10967_v15 = vld [vmem:[#allocation148_spill] sm:$0xff] }
 0x588   : > { %v3483_v2 = vmul.f32 %v3419_v7, %v10955_v1  ;;  %v9590_v29 = vadd.f32 %v3847_v46, %v3767_v22  ;;  %v10965_v22 = vld [vmem:[#allocation41_spill] sm:$0xff] }
 0x589   : > { %v3574_v63 = vadd.f32 %v9296_v26, %v3478_v13  ;;  %v3851_v56 = vmul.f32 %v3835_v58, %v3407_v41  ;;  %v10966_v13 = vld [vmem:[#allocation55_spill] sm:$0xff] }
 0x58a   : > { %v3579_v16 = vadd.f32 %v9299_v0, %v3483_v2  ;;  %4930 = vmatmul.msk.f32.gmra.mxu3 %vm1863_vm9, %v5294_v51 }
 0x58b   : > { %v3670_v52 = vadd.f32 %v9367_v44, %v3574_v63 }
 0x58c   : > { %v3675_v55 = vadd.f32 %v9370_v12, %v3579_v16  ;;  %v3043_v38 = vpop.f32.mrf.mxu0  ;;  %v3299_v9 = vpop.f32.mrf.mxu2  ;;  %v10970_v16 = vld [vmem:[#allocation103_spill] sm:$0xff] }
 0x58d   : > { %v3044_v32 = vadd.f32 %v3043_v38, %v8797_v36  ;;  %v3180_v26 = vpop.f32.mrf.mxu1  ;;  %v3300_v4 = vadd.f32 %v3299_v9, %v3175_v53  ;;  %v3421_v35 = vpop.f32.mrf.mxu3  ;;  %v3766_v0 = vadd.f32 %v9449_v37, %v3670_v52  ;;  %v3285_v36 = vadd.f32 %v9512_v48, %v3160_v17  ;;  %v10960_v37 = vld [vmem:[#allocation204_spill] sm:$0xff]  ;;  %v10971_v52 = vld [vmem:[#allocation201_spill] sm:$0xff]  ;;  %v10973_v9 = vld [vmem:[#allocation203_spill] sm:$0xff] }
 0x58e   : > { %v3422_v30 = vadd.f32 %v3421_v35, %v3297_v33  ;;  %v3771_v44 = vadd.f32 %v9452_v34, %v3675_v55  ;;  %v3811_v18 = vsel %vm997_vm1, %v10940_v14, %v10960_v37  ;;  %v10972_v38 = vld [vmem:[#allocation193_spill] sm:$0xff]  ;;  %v10975_v35 = vld [vmem:[#allocation80_spill] sm:$0xff] }
 0x58f   : > { %v3482_v23 = vmul.f32 %v3044_v32, %v10958_v50  ;;  %4893 = vmatmul.msk.f32.gmra.mxu0 %vm1863_vm9, %v5293_v27  ;;  %v9612_v12 = vadd.f32 %v9518_v3, %v3766_v0  ;;  %v3410_v5 = vadd.f32 %v9529_v21, %v3285_v36  ;;  %v10962_v3 = vld [vmem:[#allocation197_spill] sm:$0xff]  ;;  %v3839_v19 = vmul.f32 %v3811_v18, %v10946_v11  ;;  %v10969_v11 = vld [vmem:[#allocation191_spill] sm:$0xff] }
 0x590   : > { %v3487_v25 = vmul.f32 %v3422_v30, %v10959_v43  ;;  %v9616_v59 = vadd.f32 %v3851_v56, %v3771_v44  ;;  %v3916_v48 = vsel %vm1103_vm6, %v10962_v3, %v10961_v24  ;;  %v3904_v58 = vsel %vm1103_vm6, %v10971_v52, %v10962_v3  ;;  %v10976_v56 = vld [vmem:[#allocation62_spill] sm:$0xff]  ;;  %v10977_v44 = vld [vmem:[#allocation89_spill] sm:$0xff] }
 0x591   : > { %v3578_v34 = vadd.f32 %v9314_v49, %v3482_v23  ;;  %v10964_v49 = vld [vmem:[#allocation166_spill] sm:$0xff]  ;;  %v3923_v42 = vmul.f32 %v3916_v48, %v10966_v13  ;;  %v3855_v1 = vmul.f32 %v3839_v19, %v3410_v5  ;;  %v3917_v32 = vsel %vm1103_vm6, %v10973_v9, %v10972_v38  ;;  %v10979_v24 = vld [vmem:[#allocation205_spill] sm:$0xff] }
 0x592   : > { %v3583_v27 = vadd.f32 %v9317_v6, %v3487_v25  ;;  %v3922_v30 = vmul.f32 %v3904_v58, %v10976_v56  ;;  %v3927_v37 = vmul.f32 %v3917_v32, %v10966_v13  ;;  %v3905_v3 = vsel %vm1103_vm6, %v10979_v24, %v10973_v9  ;;  %v10988_v58 = vld [vmem:[#allocation136_spill] sm:$0xff] }
 0x593   : > { %v3674_v33 = vadd.f32 %v9381_v47, %v3578_v34  ;;  %v10968_v47 = vld [vmem:[#allocation76_spill] sm:$0xff] }
 0x594   : > { %v3679_v45 = vadd.f32 %v10963_v57, %v3583_v27  ;;  %v3046_v14 = vpop.f32.mrf.mxu0  ;;  %v3302_v20 = vpop.f32.mrf.mxu2  ;;  %v10982_v57 = vld [vmem:[#allocation114_spill] sm:$0xff] }
 0x595   : > { %v3047_v46 = vadd.f32 %v3046_v14, %v10964_v49  ;;  %v3183_v21 = vpop.f32.mrf.mxu1  ;;  %v3303_v7 = vadd.f32 %v3302_v20, %v3178_v10  ;;  %v3424_v6 = vpop.f32.mrf.mxu3  ;;  %v3770_v54 = vadd.f32 %v10965_v22, %v3674_v33  ;;  %v10980_v10 = vld [vmem:[#allocation84_spill] sm:$0xff]  ;;  %v10981_v33 = vld [vmem:[#allocation209_spill] sm:$0xff]  ;;  %v10983_v20 = vld [vmem:[#allocation135_spill] sm:$0xff] }
 0x596   : > { %v3425_v2 = vadd.f32 %v3424_v6, %v3300_v4  ;;  %v3775_v28 = vadd.f32 %v10967_v15, %v3679_v45  ;;  %v3918_v19 = vsel %vm1103_vm6, %v10981_v33, %v10980_v10  ;;  %v3184_v45 = vadd.f32 %v3183_v21, %v10982_v57  ;;  %v10995_v57 = vld [vmem:[#allocation211_spill] sm:$0xff] }
 0x597   : > { %v3486_v40 = vmul.f32 %v3047_v46, %v10968_v47  ;;  %4894 = vmatmul.msk.f32.gmra.mxu0 %vm1863_vm9, %v5294_v51  ;;  %v3866_v8 = vadd.f32 %v10969_v11, %v3770_v54  ;;  %v10974_v51 = vld [vmem:[#allocation111_spill] sm:$0xff]  ;;  %v3931_v22 = vmul.f32 %v3918_v19, %v10966_v13  ;;  %v10987_v11 = vld [vmem:[#allocation108_spill] sm:$0xff] }
 0x598   : > { %v3939_v63 = vmul.f32 %v3923_v42, %v3425_v2  ;;  %v3871_v41 = vadd.f32 %v3855_v1, %v3775_v28  ;;  %v3181_v4 = vadd.f32 %v3180_v26, %v10974_v51  ;;  %v10984_v2 = vld [vmem:[#allocation214_spill] sm:$0xff]  ;;  %v10985_v28 = vld [vmem:[#allocation60_spill] sm:$0xff]  ;;  %v10986_v47 = vld [vmem:[#allocation127_spill] sm:$0xff] }
 0x599   : > { %v3582_v53 = vadd.f32 %v10970_v16, %v3486_v40  ;;  %v3906_v21 = vsel %vm1103_vm6, %v10984_v2, %v10981_v33  ;;  %v3919_v40 = vsel %vm1103_vm6, %v10986_v47, %v10985_v28 }
 0x59a   : > { %v9646_v55 = vadd.f32 %v3939_v63, %v9567_v31  ;;  %v10978_v31 = vld [vmem:[#allocation101_spill] sm:$0xff]  ;;  %v3930_v52 = vmul.f32 %v3906_v21, %v10976_v56  ;;  %v3935_v51 = vmul.f32 %v3919_v40, %v10966_v13 }
 0x59b   : > { %v3678_v0 = vadd.f32 %v10975_v35, %v3582_v53 }
 0x59c   : > { %v3049_v62 = vpop.f32.mrf.mxu0  ;;  %v3305_v17 = vpop.f32.mrf.mxu2 }
 0x59d   : > { %v3050_v50 = vadd.f32 %v3049_v62, %v10977_v44  ;;  %v3186_v23 = vpop.f32.mrf.mxu1  ;;  %v3306_v36 = vadd.f32 %v3305_v17, %v3181_v4  ;;  %v3427_v43 = vpop.f32.mrf.mxu3  ;;  %v3774_v25 = vadd.f32 %v10978_v31, %v3678_v0  ;;  %v10989_v62 = vld [vmem:[#allocation218_spill] sm:$0xff]  ;;  %v10990_v44 = vld [vmem:[#allocation212_spill] sm:$0xff] }
 0x59e   : > { %v3428_v18 = vadd.f32 %v3427_v43, %v3303_v7  ;;  %v3187_v63 = vadd.f32 %v3186_v23, %v10987_v11  ;;  %v3907_v17 = vsel %vm1103_vm6, %v10989_v62, %v10986_v47  ;;  %v11001_v11 = vld [vmem:[#allocation216_spill] sm:$0xff] }
 0x59f   : > { %v3938_v34 = vmul.f32 %v3922_v30, %v3050_v50  ;;  %v3870_v5 = vadd.f32 %v9544_v60, %v3774_v25  ;;  %v10991_v50 = vld [vmem:[#allocation67_spill] sm:$0xff]  ;;  %v3934_v13 = vmul.f32 %v3907_v17, %v10976_v56 }
 0x5a0   : > { %v3943_v26 = vmul.f32 %v3927_v37, %v3428_v18  ;;  %v4012_v23 = vsel %vm1193_vm4, %v10991_v50, %v10990_v44  ;;  %v10993_v37 = vld [vmem:[#allocation36_spill] sm:$0xff] }
 0x5a1   : > { %v9660_v27 = vadd.f32 %v3938_v34, %v9586_v39  ;;  %v3926_v39 = vmul.f32 %v3905_v3, %v10976_v56  ;;  %v10997_v56 = vld [vmem:[#allocation213_spill] sm:$0xff] }
 0x5a2   : > { %v9667_v48 = vadd.f32 %v3943_v26, %v9590_v29  ;;  %v10994_v26 = vld [vmem:[#allocation35_spill] sm:$0xff] }
 0x5a3   : > { %v4019_v24 = vmul.f32 %v4012_v23, %v10994_v26 }
 0x5a4   : > { %v3052_v60 = vpop.f32.mrf.mxu0  ;;  %v3308_v14 = vpop.f32.mrf.mxu2 }
 0x5a5   : > { %v3053_v49 = vadd.f32 %v3052_v60, %v10983_v20  ;;  %v3189_v46 = vpop.f32.mrf.mxu1  ;;  %v3309_v7 = vadd.f32 %v3308_v14, %v3184_v45  ;;  %v3430_v6 = vpop.f32.mrf.mxu3  ;;  %v4000_v45 = vsel %vm1193_vm4, %v10995_v57, %v10991_v50  ;;  %v10996_v14 = vld [vmem:[#allocation137_spill] sm:$0xff]  ;;  %v10998_v20 = vld [vmem:[#allocation119_spill] sm:$0xff]  ;;  %v11006_v50 = vld [vmem:[#allocation112_spill] sm:$0xff] }
 0x5a6   : > { %v3431_v29 = vadd.f32 %v3430_v6, %v3306_v36  ;;  %v10992_v36 = vld [vmem:[#allocation116_spill] sm:$0xff] }
 0x5a7   : > { %v3942_v54 = vmul.f32 %v3926_v39, %v3053_v49  ;;  %v3190_v43 = vadd.f32 %v3189_v46, %v10992_v36  ;;  %v4013_v39 = vsel %vm1193_vm4, %v10997_v56, %v10996_v14  ;;  %v10999_v6 = vld [vmem:[#allocation48_spill] sm:$0xff] }
 0x5a8   : > { %v3947_v42 = vmul.f32 %v3931_v22, %v3431_v29  ;;  %v4018_v22 = vmul.f32 %v4000_v45, %v10999_v6  ;;  %v11000_v29 = vld [vmem:[#allocation171_spill] sm:$0xff]  ;;  %v4023_v2 = vmul.f32 %v4013_v39, %v10994_v26  ;;  %v11010_v45 = vld [vmem:[#allocation224_spill] sm:$0xff] }
 0x5a9   : > { %v3958_v1 = vadd.f32 %v3942_v54, %v9612_v12 }
 0x5aa   : > { %v3963_v15 = vadd.f32 %v3947_v42, %v9616_v59 }
 0x5ac   : > { %v3055_v16 = vpop.f32.mrf.mxu0  ;;  %v3311_v53 = vpop.f32.mrf.mxu2 }
 0x5ad   : > { %v3056_v12 = vadd.f32 %v3055_v16, %v10988_v58  ;;  %v3192_v38 = vpop.f32.mrf.mxu1  ;;  %v3312_v9 = vadd.f32 %v3311_v53, %v3187_v63  ;;  %v3433_v32 = vpop.f32.mrf.mxu3  ;;  %v4001_v63 = vsel %vm1193_vm4, %v11001_v11, %v10997_v56  ;;  %v11002_v53 = vld [vmem:[#allocation50_spill] sm:$0xff]  ;;  %v11011_v56 = vld [vmem:[#allocation120_spill] sm:$0xff] }
 0x5ae   : > { %v3434_v4 = vadd.f32 %v3433_v32, %v3309_v7  ;;  %v3193_v49 = vadd.f32 %v3192_v38, %v10998_v20  ;;  %v11004_v32 = vld [vmem:[#allocation138_spill] sm:$0xff] }
 0x5af   : > { %v3946_v59 = vmul.f32 %v3930_v52, %v3056_v12  ;;  %v11003_v52 = vld [vmem:[#allocation217_spill] sm:$0xff] }
 0x5b0   : > { %v3951_v35 = vmul.f32 %v3935_v51, %v3434_v4  ;;  %v4014_v58 = vsel %vm1193_vm4, %v11003_v52, %v11002_v53 }
 0x5b1   : > { %v3962_v0 = vadd.f32 %v3946_v59, %v3866_v8  ;;  %v4027_v4 = vmul.f32 %v4014_v58, %v10994_v26 }
 0x5b2   : > { %v3967_v30 = vadd.f32 %v3951_v35, %v3871_v41 }
 0x5b4   : > { %v3058_v31 = vpop.f32.mrf.mxu0  ;;  %v3314_v25 = vpop.f32.mrf.mxu2 }
 0x5b5   : > { %v3059_v18 = vadd.f32 %v3058_v31, %v10993_v37  ;;  %v3315_v8 = vadd.f32 %v3314_v25, %v3190_v43  ;;  %v3436_v34 = vpop.f32.mrf.mxu3  ;;  %v3195_v41 = vpop.f32.mrf.mxu1  ;;  %v11007_v43 = vld [vmem:[#allocation227_spill] sm:$0xff] }
 0x5b6   : > { %v3437_v3 = vadd.f32 %v3436_v34, %v3312_v9  ;;  %v4022_v9 = vmul.f32 %v4001_v63, %v10999_v6  ;;  %v3196_v23 = vadd.f32 %v3195_v41, %v11006_v50  ;;  %v11008_v31 = vld [vmem:[#allocation131_spill] sm:$0xff] }
 0x5b7   : > { %v3950_v10 = vmul.f32 %v3934_v13, %v3059_v18  ;;  %v4015_v25 = vsel %vm1193_vm4, %v11008_v31, %v11007_v43  ;;  %v11009_v34 = vld [vmem:[#allocation215_spill] sm:$0xff]  ;;  %v4003_v14 = vsel %vm1193_vm4, %v11010_v45, %v11008_v31  ;;  %v11022_v31 = vld [vmem:[#allocation222_spill] sm:$0xff] }
 0x5b8   : > { %v4035_v33 = vmul.f32 %v4019_v24, %v3437_v3  ;;  %v11016_v63 = vld [vmem:[#allocation123_spill] sm:$0xff] }
 0x5b9   : > { %v3966_v19 = vadd.f32 %v3950_v10, %v3870_v5  ;;  %v4031_v10 = vmul.f32 %v4015_v25, %v10994_v26 }
 0x5ba   : > { %v4051_v60 = vadd.f32 %v4035_v33, %v9646_v55 }
 0x5bc   : > { %v3061_v46 = vpop.f32.mrf.mxu0  ;;  %v3317_v7 = vpop.f32.mrf.mxu2 }
 0x5bd   : > { %v3062_v5 = vadd.f32 %v3061_v46, %v11000_v29  ;;  %v3318_v54 = vadd.f32 %v3317_v7, %v3193_v49  ;;  %v3439_v42 = vpop.f32.mrf.mxu3  ;;  %v11012_v49 = vld [vmem:[#allocation219_spill] sm:$0xff]  ;;  %v11013_v46 = vld [vmem:[#allocation90_spill] sm:$0xff] }
 0x5be   : > { %v3440_v21 = vadd.f32 %v3439_v42, %v3315_v8  ;;  %v3198_v40 = vpop.f32.mrf.mxu1  ;;  %v4108_v7 = vsel %vm1283_vm2, %v11013_v46, %v11012_v49  ;;  %v4096_v53 = vsel %vm1283_vm2, %v11016_v63, %v11013_v46  ;;  %v11027_v46 = vld [vmem:[#allocation225_spill] sm:$0xff] }
 0x5bf   : > { %v4034_v28 = vmul.f32 %v4018_v22, %v3062_v5  ;;  %v3199_v39 = vadd.f32 %v3198_v40, %v11011_v56  ;;  %v4030_v5 = vmul.f32 %v4003_v14, %v10999_v6 }
 0x5c0   : > { %v4039_v55 = vmul.f32 %v4023_v2, %v3440_v21  ;;  %v11015_v21 = vld [vmem:[#allocation39_spill] sm:$0xff] }
 0x5c1   : > { %v4050_v47 = vadd.f32 %v4034_v28, %v9660_v27  ;;  %v4115_v28 = vmul.f32 %v4108_v7, %v11015_v21 }
 0x5c2   : > { %v4055_v16 = vadd.f32 %v4039_v55, %v9667_v48  ;;  %v11005_v48 = vld [vmem:[#allocation221_spill] sm:$0xff] }
 0x5c3   : > { %v4002_v44 = vsel %vm1193_vm4, %v11005_v48, %v11003_v52  ;;  %v11017_v52 = vld [vmem:[#allocation124_spill] sm:$0xff] }
 0x5c4   : > { %v3064_v12 = vpop.f32.mrf.mxu0  ;;  %v3320_v38 = vpop.f32.mrf.mxu2 }
 0x5c5   : > { %v3065_v51 = vadd.f32 %v3064_v12, %v11004_v32  ;;  %v3442_v27 = vpop.f32.mrf.mxu3  ;;  %v3321_v37 = vadd.f32 %v3320_v38, %v3196_v23  ;;  %v11018_v38 = vld [vmem:[#allocation223_spill] sm:$0xff] }
 0x5c6   : > { %v3443_v59 = vadd.f32 %v3442_v27, %v3318_v54  ;;  %v3201_v13 = vpop.f32.mrf.mxu1 }
 0x5c7   : > { %v4038_v35 = vmul.f32 %v4022_v9, %v3065_v51  ;;  %v3202_v58 = vadd.f32 %v3201_v13, %v11017_v52  ;;  %v11023_v13 = vld [vmem:[#allocation117_spill] sm:$0xff] }
 0x5c8   : > { %v4043_v62 = vmul.f32 %v4027_v4, %v3443_v59  ;;  %v11020_v4 = vld [vmem:[#allocation87_spill] sm:$0xff] }
 0x5c9   : > { %v9729_v17 = vadd.f32 %v4038_v35, %v3958_v1  ;;  %v4026_v1 = vmul.f32 %v4002_v44, %v10999_v6  ;;  %v11019_v6 = vld [vmem:[#allocation220_spill] sm:$0xff]  ;;  %v4114_v59 = vmul.f32 %v4096_v53, %v11020_v4  ;;  %v11021_v35 = vld [vmem:[#allocation99_spill] sm:$0xff] }
 0x5ca   : > { %v9736_v36 = vadd.f32 %v4043_v62, %v3963_v15  ;;  %v4109_v9 = vsel %vm1283_vm2, %v11019_v6, %v11018_v38  ;;  %v4097_v25 = vsel %vm1283_vm2, %v11022_v31, %v11019_v6  ;;  %v11036_v31 = vld [vmem:[#allocation122_spill] sm:$0xff] }
 0x5cb   : > { %v4119_v48 = vmul.f32 %v4109_v9, %v11015_v21 }
 0x5cc   : > { %v3067_v18 = vpop.f32.mrf.mxu0  ;;  %v3323_v8 = vpop.f32.mrf.mxu2 }
 0x5cd   : > { %v3068_v24 = vadd.f32 %v3067_v18, %v11009_v34  ;;  %v3445_v3 = vpop.f32.mrf.mxu3  ;;  %v3324_v22 = vadd.f32 %v3323_v8, %v3199_v39  ;;  %v11024_v8 = vld [vmem:[#allocation229_spill] sm:$0xff] }
 0x5ce   : > { %v3446_v33 = vadd.f32 %v3445_v3, %v3321_v37  ;;  %v3204_v54 = vpop.f32.mrf.mxu1 }
 0x5cf   : > { %v4042_v41 = vmul.f32 %v4026_v1, %v3068_v24  ;;  %v3205_v37 = vadd.f32 %v3204_v54, %v11023_v13  ;;  %v11025_v1 = vld [vmem:[#allocation228_spill] sm:$0xff]  ;;  %v11037_v13 = vld [vmem:[#allocation226_spill] sm:$0xff] }
 0x5d0   : > { %v4047_v15 = vmul.f32 %v4031_v10, %v3446_v33  ;;  %v4110_v34 = vsel %vm1283_vm2, %v11025_v1, %v11024_v8  ;;  %v4118_v33 = vmul.f32 %v4097_v25, %v11020_v4  ;;  %v4098_v7 = vsel %vm1283_vm2, %v11027_v46, %v11025_v1 }
 0x5d1   : > { %v4058_v57 = vadd.f32 %v4042_v41, %v3962_v0  ;;  %v11014_v0 = vld [vmem:[#allocation105_spill] sm:$0xff]  ;;  %v11026_v41 = vld [vmem:[#allocation199_spill] sm:$0xff]  ;;  %v4123_v45 = vmul.f32 %v4110_v34, %v11015_v21  ;;  %v11039_v34 = vld [vmem:[#allocation64_spill] sm:$0xff] }
 0x5d2   : > { %v4063_v20 = vadd.f32 %v4047_v15, %v3967_v30 }
 0x5d4   : > { %v3070_v29 = vpop.f32.mrf.mxu0  ;;  %v3326_v26 = vpop.f32.mrf.mxu2 }
 0x5d5   : > { %v3071_v42 = vadd.f32 %v3070_v29, %v11014_v0  ;;  %v3448_v2 = vpop.f32.mrf.mxu3  ;;  %v3327_v32 = vadd.f32 %v3326_v26, %v3202_v58  ;;  %v11031_v58 = vld [vmem:[#allocation128_spill] sm:$0xff] }
 0x5d6   : > { %v3449_v55 = vadd.f32 %v3448_v2, %v3324_v22  ;;  %v3207_v50 = vpop.f32.mrf.mxu1  ;;  %v11028_v22 = vld [vmem:[#allocation125_spill] sm:$0xff]  ;;  %v11029_v2 = vld [vmem:[#allocation140_spill] sm:$0xff] }
 0x5d7   : > { %v4046_v11 = vmul.f32 %v4030_v5, %v3071_v42  ;;  %v3208_v29 = vadd.f32 %v3207_v50, %v11028_v22  ;;  %v4122_v42 = vmul.f32 %v4098_v7, %v11020_v4 }
 0x5d8   : > { %v4131_v40 = vmul.f32 %v4115_v28, %v3449_v55 }
 0x5d9   : > { %v4062_v30 = vadd.f32 %v4046_v11, %v3966_v19  ;;  %v11030_v11 = vld [vmem:[#allocation134_spill] sm:$0xff] }
 0x5da   : > { %v4147_v12 = vadd.f32 %v4131_v40, %v4051_v60 }
 0x5dc   : > { %v3073_v51 = vpop.f32.mrf.mxu0  ;;  %v3329_v27 = vpop.f32.mrf.mxu2 }
 0x5dd   : > { %v3074_v19 = vadd.f32 %v3073_v51, %v11021_v35  ;;  %v3451_v62 = vpop.f32.mrf.mxu3  ;;  %v3330_v24 = vadd.f32 %v3329_v27, %v3205_v37  ;;  %v11032_v51 = vld [vmem:[#allocation130_spill] sm:$0xff]  ;;  %v11038_v37 = vld [vmem:[#allocation232_spill] sm:$0xff] }
 0x5de   : > { %v3452_v44 = vadd.f32 %v3451_v62, %v3327_v32  ;;  %v3210_v49 = vpop.f32.mrf.mxu1  ;;  %v4126_v27 = vmul.f32 %v11032_v51, %v11020_v4  ;;  %v4205_v4 = vsel %vm1373_vm8, %v11038_v37, %v11037_v13  ;;  %v11047_v51 = vld [vmem:[#allocation155_spill] sm:$0xff]  ;;  %v11050_v13 = vld [vmem:[#allocation186_spill] sm:$0xff] }
 0x5df   : > { %v4130_v23 = vmul.f32 %v4114_v59, %v3074_v19  ;;  %v3211_v38 = vadd.f32 %v3210_v49, %v11031_v58  ;;  %v11033_v59 = vld [vmem:[#allocation107_spill] sm:$0xff]  ;;  %v4222_v37 = vmul.f32 %v11050_v13, %v11039_v34 }
 0x5e0   : > { %v4135_v43 = vmul.f32 %v4119_v48, %v3452_v44  ;;  %v11034_v48 = vld [vmem:[#allocation56_spill] sm:$0xff]  ;;  %v11035_v44 = vld [vmem:[#allocation231_spill] sm:$0xff] }
 0x5e1   : > { %v4146_v60 = vadd.f32 %v4130_v23, %v4050_v47 }
 0x5e2   : > { %v4151_v18 = vadd.f32 %v4135_v43, %v4055_v16 }
 0x5e4   : > { %v3076_v3 = vpop.f32.mrf.mxu0  ;;  %v3332_v10 = vpop.f32.mrf.mxu2 }
 0x5e5   : > { %v3077_v47 = vadd.f32 %v3076_v3, %v11026_v41  ;;  %v3454_v15 = vpop.f32.mrf.mxu3  ;;  %v3333_v5 = vadd.f32 %v3332_v10, %v3208_v29  ;;  %v11043_v29 = vld [vmem:[#allocation233_spill] sm:$0xff] }
 0x5e6   : > { %v3455_v14 = vadd.f32 %v3454_v15, %v3330_v24  ;;  %v3213_v9 = vpop.f32.mrf.mxu1  ;;  %v11040_v24 = vld [vmem:[#allocation82_spill] sm:$0xff] }
 0x5e7   : > { %v4134_v56 = vmul.f32 %v4118_v33, %v3077_v47  ;;  %v3214_v25 = vadd.f32 %v3213_v9, %v11036_v31  ;;  %v4210_v3 = vmul.f32 %v11040_v24, %v11039_v34  ;;  %v11041_v33 = vld [vmem:[#allocation181_spill] sm:$0xff] }
 0x5e8   : > { %v4139_v39 = vmul.f32 %v4123_v45, %v3455_v14 }
 0x5e9   : > { %v4150_v16 = vadd.f32 %v4134_v56, %v9729_v17  ;;  %v4127_v17 = vmul.f32 %v11030_v11, %v11015_v21  ;;  %v4211_v21 = vmul.f32 %v11035_v44, %v11034_v48 }
 0x5ea   : > { %v4155_v26 = vadd.f32 %v4139_v39, %v9736_v36  ;;  %v11042_v39 = vld [vmem:[#allocation129_spill] sm:$0xff] }
 0x5ec   : > { %v3079_v54 = vpop.f32.mrf.mxu0  ;;  %v3335_v0 = vpop.f32.mrf.mxu2 }
 0x5ed   : > { %v3080_v28 = vadd.f32 %v3079_v54, %v11029_v2  ;;  %v3457_v55 = vpop.f32.mrf.mxu3  ;;  %v3336_v36 = vadd.f32 %v3335_v0, %v3211_v38  ;;  %v11044_v54 = vld [vmem:[#allocation176_spill] sm:$0xff] }
 0x5ee   : > { %v3458_v40 = vadd.f32 %v3457_v55, %v3333_v5  ;;  %v3216_v10 = vpop.f32.mrf.mxu1  ;;  %v4214_v5 = vmul.f32 %v11043_v29, %v11039_v34  ;;  %v11045_v2 = vld [vmem:[#allocation132_spill] sm:$0xff] }
 0x5ef   : > { %v4138_v63 = vmul.f32 %v4122_v42, %v3080_v28  ;;  %v3217_v61 = vadd.f32 %v3216_v10, %v11042_v39  ;;  %v4219_v28 = vmul.f32 %v11045_v2, %v11034_v48 }
 0x5f0   : > { %v4143_v53 = vmul.f32 %v4127_v17, %v3458_v40 }
 0x5f1   : > { %v4154_v52 = vadd.f32 %v4138_v63, %v4058_v57 }
 0x5f2   : > { %v4159_v6 = vadd.f32 %v4143_v53, %v4063_v20 }
 0x5f4   : > { %v3082_v32 = vpop.f32.mrf.mxu0  ;;  %v3338_v19 = vpop.f32.mrf.mxu2 }
 0x5f5   : > { %v3083_v35 = vadd.f32 %v3082_v32, %v11033_v59  ;;  %v3460_v62 = vpop.f32.mrf.mxu3  ;;  %v3339_v8 = vadd.f32 %v3338_v19, %v3214_v25  ;;  %v11048_v59 = vld [vmem:[#allocation144_spill] sm:$0xff] }
 0x5f6   : > { %v3461_v50 = vadd.f32 %v3460_v62, %v3336_v36  ;;  %v3219_v11 = vpop.f32.mrf.mxu1  ;;  %v11049_v62 = vld [vmem:[#allocation102_spill] sm:$0xff] }
 0x5f7   : > { %v4142_v23 = vmul.f32 %v4126_v27, %v3083_v35  ;;  %v4218_v27 = vmul.f32 %v11047_v51, %v11039_v34  ;;  %v4223_v44 = vmul.f32 %v11049_v62, %v11034_v48 }
 0x5f8   : > { %v4227_v43 = vmul.f32 %v4211_v21, %v3461_v50 }
 0x5f9   : > { %v4158_v57 = vadd.f32 %v4142_v23, %v4062_v30  ;;  %v4215_v30 = vmul.f32 %v4205_v4, %v11034_v48  ;;  %v11051_v4 = vld [vmem:[#allocation139_spill] sm:$0xff] }
 0x5fa   : > { %v9799_v20 = vadd.f32 %v4227_v43, %v4147_v12 }
 0x5fc   : > { %v3085_v1 = vpop.f32.mrf.mxu0  ;;  %v3341_v12 = vpop.f32.mrf.mxu2 }
 0x5fd   : > { %v3086_v41 = vadd.f32 %v3085_v1, %v11041_v33  ;;  %v3463_v47 = vpop.f32.mrf.mxu3  ;;  %v3342_v46 = vadd.f32 %v3341_v12, %v3217_v61 }
 0x5fe   : > { %v3464_v15 = vadd.f32 %v3463_v47, %v3339_v8 }
 0x5ff   : > { %v4226_v45 = vmul.f32 %v4210_v3, %v3086_v41 }
 0x600   : > { %v4231_v14 = vmul.f32 %v4215_v30, %v3464_v15 }
 0x601   : > { %v9809_v56 = vadd.f32 %v4226_v45, %v4146_v60 }
 0x602   : > { %v4247_v49 = vadd.f32 %v4231_v14, %v4151_v18  ;;  %v11046_v18 = vld [vmem:[#allocation133_spill] sm:$0xff] }
 0x603   : > { %v3220_v53 = vadd.f32 %v3219_v11, %v11046_v18 }
 0x604   : > { %v4283_v7 = vmax.f32 %v9799_v20, %v4247_v49  ;;  %v3088_v22 = vpop.f32.mrf.mxu0  ;;  %v3344_v63 = vpop.f32.mrf.mxu2 }
 0x605   : > { %v3089_v0 = vadd.f32 %v3088_v22, %v11044_v54  ;;  %v3466_v42 = vpop.f32.mrf.mxu3  ;;  %v3345_v9 = vadd.f32 %v3344_v63, %v3220_v53 }
 0x606   : > { %v3467_v55 = vadd.f32 %v3466_v42, %v3342_v46 }
 0x607   : > { %v4230_v60 = vmul.f32 %v4214_v5, %v3089_v0 }
 0x608   : > { %v4235_v17 = vmul.f32 %v4219_v28, %v3467_v55 }
 0x609   : > { %v4246_v40 = vadd.f32 %v4230_v60, %v4150_v16 }
 0x60a   : > { %v4251_v58 = vadd.f32 %v4235_v17, %v4155_v26 }
 0x60b   : > { %v4274_v38 = vmax.f32 %v9809_v56, %v4246_v40 }
 0x60c   : > { %v4284_v36 = vmax.f32 %v4283_v7, %v4251_v58  ;;  %v3091_v32 = vpop.f32.mrf.mxu0 }
 0x60d   : > { %v3092_v35 = vadd.f32 %v3091_v32, %v11048_v59  ;;  %v3469_v19 = vpop.f32.mrf.mxu3 }
 0x60e   : > { %v3470_v21 = vadd.f32 %v3469_v19, %v3345_v9 }
 0x60f   : > { %v4234_v16 = vmul.f32 %v4218_v27, %v3092_v35 }
 0x610   : > { %v4239_v50 = vmul.f32 %v4223_v44, %v3470_v21 }
 0x611   : > { %v4250_v23 = vadd.f32 %v4234_v16, %v4154_v52 }
 0x612   : > { %v4255_v43 = vadd.f32 %v4239_v50, %v4159_v6 }
 0x613   : > { %v4275_v26 = vmax.f32 %v4274_v38, %v4250_v23 }
 0x614   : > { %v4285_v31 = vmax.f32 %v4284_v36, %v4255_v43  ;;  %v3094_v25 = vpop.f32.mrf.mxu0 }
 0x615   : > { %v3095_v8 = vadd.f32 %v3094_v25, %v11051_v4  ;;  %v9854_v4 = vld [vmem:[%s9977_s4 + $0x8] sm:$0xff] }
 0x616   : > { %v4286_v1 = vrot.slane %v4285_v31, 4 }
 0x617   : > { %v4238_v24 = vmul.f32 %v4222_v37, %v3095_v8 }
 0x618   : > { %v4287_v3 = vmax.f32 %v4285_v31, %v4286_v1 }
 0x619   : > { %v4254_v10 = vadd.f32 %v4238_v24, %v4158_v57 }
 0x61a   : > { %v4288_v33 = vrot.slane %v4287_v3, 2 }
 0x61b   : > { %v4276_v41 = vmax.f32 %v4275_v26, %v4254_v10 }
 0x61c   : > { %v4289_v48 = vmax.f32 %v4287_v3, %v4288_v33 }
 0x61d   : > { %v4277_v47 = vrot.slane %v4276_v41, 4 }
 0x61e   : > { %v4290_v30 = vrot.slane %v4289_v48, 1 }
 0x61f   : > { %v4278_v15 = vmax.f32 %v4276_v41, %v4277_v47  ;;  %v11053_v47 = vld [vmem:[#allocation25_spill] sm:$0xff] }
 0x620   : > { %v4291_v52 = vmax.f32 %v4289_v48, %v4290_v30  ;;  %v11052_v48 = vld [vmem:[#allocation79_spill] sm:$0xff] }
 0x621   : > { %v4279_v6 = vrot.slane %v4278_v15, 2  ;;  %v667_v30 = vadd.f32 %v11053_v47, %v11052_v48 }
 0x622   : > { %v4295_v45 = vsub.f32 %v9799_v20, %v4291_v52  ;;  %v4299_v12 = vsub.f32 %v4247_v49, %v4291_v52  ;;  %v4303_v14 = vsub.f32 %v4251_v58, %v4291_v52  ;;  %v4307_v39 = vsub.f32 %v4255_v43, %v4291_v52 }
 0x623   : > { %v4280_v34 = vmax.f32 %v4278_v15, %v4279_v6 }
 0x624   : > { %v4314_v61 = vmul.f32 1.442695, %v4295_v45  ;;  %v4322_v46 = vmul.f32 1.442695, %v4299_v12  ;;  %v4330_v7 = vmul.f32 1.442695, %v4303_v14 }
 0x625   : > { %v4281_v22 = vrot.slane %v4280_v34, 1  ;;  %v4338_v57 = vmul.f32 1.442695, %v4307_v39 }
 0x626   : > { %5052 = vpow2.f32 %v4314_v61 }
 0x627   : > { %5054 = vpow2.f32 %v4322_v46  ;;  %v4282_v29 = vmax.f32 %v4280_v34, %v4281_v22  ;;  %v4466_v46 = vld [vmem:[%s9977_s4 + $0x10] sm:$0xff] }
 0x628   : > { %5056 = vpow2.f32 %v4330_v7  ;;  %v11054_v22 = vld [vmem:[#allocation73_spill] sm:$0xff] }
 0x629   : > { %v4294_v5 = vsub.f32 %v9809_v56, %v4282_v29  ;;  %v4298_v54 = vsub.f32 %v4246_v40, %v4282_v29  ;;  %v4302_v0 = vsub.f32 %v4250_v23, %v4282_v29  ;;  %v4306_v42 = vsub.f32 %v4254_v10, %v4282_v29  ;;  %v9845_v23 = vld [vmem:[%s9977_s4] sm:$0xff] }
 0x62a   : > { %5058 = vpow2.f32 %v4338_v57  ;;  %4931 = vmatmul.msk.f32.vlgmr.msra.gmra.mxu0 %vm1863_vm9, %v9845_v23  ;;  %4935 = vmatmul.msk.f32.vlgmr.msra.gmra.mxu1 %vm1863_vm9, %v9845_v23  ;;  %v11055_v57 = vld [vmem:[#allocation22_spill] sm:$0xff] }
 0x62b   : > { %v4312_v20 = vmul.f32 1.442695, %v4294_v5  ;;  %v4320_v49 = vmul.f32 1.442695, %v4298_v54  ;;  %v4328_v28 = vmul.f32 1.442695, %v4302_v0  ;;  %v664_v29 = vadd.f32 %v11055_v57, %v11054_v22 }
 0x62c   : > { %v5053_v2 = vpop.eup %5052  ;;  %v4336_v60 = vmul.f32 1.442695, %v4306_v42  ;;  %v11056_v0 = vld [vmem:[#allocation70_spill] sm:$0xff]  ;;  %v11057_v42 = vld [vmem:[#allocation17_spill] sm:$0xff] }
 0x62d   : > { %v5055_v55 = vpop.eup %5054  ;;  %5060 = vpow2.f32 %v4312_v20  ;;  %v661_v20 = vadd.f32 %v11057_v42, %v11056_v0  ;;  %v5307_v42 = vld [vmem:[%s5573_s13 + $0x58] sm:$0xff] }
 0x62e   : > { %v4367_v11 = vadd.f32 %v5055_v55, %v5053_v2  ;;  %5062 = vpow2.f32 %v4320_v49  ;;  %v5057_v17 = vpop.eup %5056 }
 0x62f   : > { %5064 = vpow2.f32 %v4328_v28  ;;  %v11058_v28 = vld [vmem:[#allocation54_spill] sm:$0xff] }
 0x630   : > { %v4368_v63 = vadd.f32 %v5057_v17, %v4367_v11  ;;  %v5059_v18 = vpop.eup %5058  ;;  %5066 = vpow2.f32 %v4336_v60 }
 0x632   : > { %v4369_v53 = vadd.f32 %v5059_v18, %v4368_v63  ;;  %4932 = vmatmul.msk.f32.gmra.mxu0 %vm1863_vm9, %v9854_v4  ;;  %4936 = vmatmul.msk.f32.gmra.mxu1 %vm1863_vm9, %v9854_v4  ;;  %v11060_v63 = vld [vmem:[#allocation14_spill] sm:$0xff] }
 0x633   : > { %v9830_v56 = vpop.eup %5060 }
 0x634   : > { %v9832_v40 = vpop.eup %5062  ;;  %v4370_v58 = vrot.slane %v4369_v53, 4 }
 0x635   : > { %v4358_v38 = vadd.f32 %v9832_v40, %v9830_v56  ;;  %v9836_v9 = vpop.eup %5064 }
 0x636   : > { %v4371_v36 = vadd.f32 %v4370_v58, %v4369_v53  ;;  %v9839_v51 = vpop.eup %5066 }
 0x637   : > { %v4359_v32 = vadd.f32 %v9836_v9, %v4358_v38 }
 0x638   : > { %v4372_v27 = vrot.slane %v4371_v36, 2 }
 0x639   : > { %v4360_v59 = vadd.f32 %v9839_v51, %v4359_v32 }
 0x63a   : > { %v4373_v35 = vadd.f32 %v4372_v27, %v4371_v36  ;;  %4933 = vmatmul.msk.f32.gmra.mxu0 %vm1863_vm9, %v4466_v46  ;;  %4937 = vmatmul.msk.f32.gmra.mxu1 %vm1863_vm9, %v4466_v46 }
 0x63b   : > { %v4361_v19 = vrot.slane %v4360_v59, 4 }
 0x63c   : > { %v4374_v62 = vrot.slane %v4373_v35, 1 }
 0x63d   : > { %v4362_v44 = vadd.f32 %v4361_v19, %v4360_v59  ;;  %v11061_v59 = vld [vmem:[#allocation51_spill] sm:$0xff] }
 0x63e   : > { %v4375_v21 = vadd.f32 %v4374_v62, %v4373_v35  ;;  %v611_v35 = vadd.f32 %v11061_v59, %v11054_v22  ;;  %v4467_v19 = vld [vmem:[%s9977_s4 + $0x18] sm:$0xff]  ;;  %v11063_v62 = vld [vmem:[#allocation45_spill] sm:$0xff] }
 0x63f   : > { %v4363_v16 = vrot.slane %v4362_v44, 2  ;;  %v5305_v22 = vld [vmem:[%s5573_s13 + $0x38] sm:$0xff] }
 0x640   : > { %5068 = vrcp.f32 %v4375_v21  ;;  %v4429_v37 = vand.u32 2147483648, %v4375_v21  ;;  %v4427_v1 = vand.u32 2147483647, %v4375_v21  ;;  %vm4423_vm2 = vweird.f32 %v4375_v21 }
 0x641   : > { %v4364_v50 = vadd.f32 %v4363_v16, %v4362_v44 }
 0x642   : > { %v4430_v10 = vor.u32 1.1754944e-38, %v4429_v37  ;;  %vm4428_vm4 = vcmp.eq.f32.partialorder %v4427_v1, 8.507059e+37  ;;  %4934 = vmatmul.msk.f32.gmra.mxu0 %vm1863_vm9, %v4467_v19  ;;  %4938 = vmatmul.msk.f32.gmra.mxu1 %vm1863_vm9, %v4467_v19  ;;  %v5297_v37 = vld [vmem:[%s5573_s13 + $0x20] sm:$0xff] }
 0x643   : > { %v4365_v43 = vrot.slane %v4364_v50, 1 }
 0x645   : > { %v4366_v26 = vadd.f32 %v4365_v43, %v4364_v50 }
 0x646   : > { %v5069_v31 = vpop.eup %5068 }
 0x647   : > { %5070 = vrcp.f32 %v4366_v26  ;;  %v4419_v25 = vmul.f32 %v5069_v31, %v4375_v21  ;;  %vm4424_vm1 = vweird.f32 %v5069_v31  ;;  %v4415_v6 = vand.u32 2147483648, %v4366_v26 }
 0x648   : > { %vm4425_vm3 = vmor %vm4423_vm2, %vm4424_vm1  ;;  %v4413_v61 = vand.u32 2147483647, %v4366_v26  ;;  %vm4409_vm7 = vweird.f32 %v4366_v26 }
 0x649   : > { %v4420_v13 = vsub.f32 1.0, %v4419_v25  ;;  %v4416_v49 = vor.u32 1.1754944e-38, %v4415_v6  ;;  %v5302_v6 = vld [vmem:[%s5573_s13 + $0x68] sm:$0xff] }
 0x64a   : > { %vm4414_vm10 = vcmp.eq.f32.partialorder %v4413_v61, 8.507059e+37  ;;  %v5304_v61 = vld [vmem:[%s5573_s13 + $0x10] sm:$0xff] }
 0x64b   : > { %v4421_v8 = vmul.f32 %v5069_v31, %v4420_v13 }
 0x64d   : > { %v5071_v24 = vpop.eup %5070  ;;  %v4422_v3 = vadd.f32 %v5069_v31, %v4421_v8  ;;  %v5298_v8 = vld [vmem:[%s5573_s13 + $0x28] sm:$0xff] }
 0x64e   : > { %v4405_v33 = vmul.f32 %v5071_v24, %v4366_v26  ;;  %vm4410_vm6 = vweird.f32 %v5071_v24  ;;  %v5296_v26 = vld [vmem:[%s5573_s13 + $0x8] sm:$0xff] }
 0x64f   : > { %v4426_v41 = vsel %vm4425_vm3, %v5069_v31, %v4422_v3  ;;  %vm4411_vm8 = vmor %vm4409_vm7, %vm4410_vm6 }
 0x650   : > { %v4431_v15 = vsel %vm4428_vm4, %v4430_v10, %v4426_v41  ;;  %v4406_v52 = vsub.f32 1.0, %v4405_v33  ;;  %v5299_v10 = vld [vmem:[%s5573_s13 + $0x40] sm:$0xff]  ;;  %v5300_v41 = vld [vmem:[%s5573_s13 + $0x48] sm:$0xff] }
 0x651   : > { %v4447_v45 = vmul.f32 %v5059_v18, %v4431_v15  ;;  %v4443_v12 = vmul.f32 %v5057_v17, %v4431_v15  ;;  %v4439_v14 = vmul.f32 %v5055_v55, %v4431_v15  ;;  %v4435_v39 = vmul.f32 %v5053_v2, %v4431_v15  ;;  %v11059_v17 = vld [vmem:[#allocation72_spill] sm:$0xff] }
 0x652   : > { %v4407_v34 = vmul.f32 %v5071_v24, %v4406_v52  ;;  %v614_v55 = vadd.f32 %v11058_v28, %v11052_v48  ;;  %v658_v18 = vadd.f32 %v11060_v63, %v11059_v17  ;;  %v605_v44 = vadd.f32 %v11063_v62, %v11059_v17  ;;  %v5310_v63 = vld [vmem:[%s5573_s13 + $0x70] sm:$0xff] }
 0x653   : > { %v4463_v7 = vmul.f32 %v4447_v45, %v667_v30  ;;  %v4459_v54 = vmul.f32 %v4443_v12, %v664_v29  ;;  %v4455_v11 = vmul.f32 %v4439_v14, %v661_v20  ;;  %v5301_v30 = vld [vmem:[%s5573_s13 + $0x60] sm:$0xff]  ;;  %v5303_v14 = vld [vmem:[%s5573_s13 + $0x18] sm:$0xff] }
 0x654   : > { %v4408_v5 = vadd.f32 %v5071_v24, %v4407_v34  ;;  %v4451_v32 = vmul.f32 %v4435_v39, %v658_v18 }
 0x655   : > { %4579 = vmatpush.msra.mxu3 %v4463_v7 }
 0x656   : > { %v4412_v2 = vsel %vm4411_vm8, %v5071_v24, %v4408_v5  ;;  %v5306_v5 = vld [vmem:[%s5573_s13 + $0x30] sm:$0xff] }
 0x657   : > { %4580 = vmatpush.msra.mxu3 %v4459_v54  ;;  %v4417_v60 = vsel %vm4414_vm10, %v4416_v49, %v4412_v2  ;;  %v5308_v2 = vld [vmem:[%s5573_s13 + $0x50] sm:$0xff] }
 0x658   : > { %v4446_v53 = vmul.f32 %v9839_v51, %v4417_v60  ;;  %v4442_v58 = vmul.f32 %v9836_v9, %v4417_v60  ;;  %v4438_v38 = vmul.f32 %v9832_v40, %v4417_v60  ;;  %v4434_v36 = vmul.f32 %v9830_v56, %v4417_v60  ;;  %v11062_v9 = vld [vmem:[#allocation47_spill] sm:$0xff] }
 0x659   : > { %4581 = vmatpush.msra.mxu3 %v4455_v11  ;;  %v608_v40 = vadd.f32 %v11062_v9, %v11056_v0  ;;  %v5309_v11 = vld [vmem:[%s5573_s13 + $0x78] sm:$0xff] }
 0x65a   : > { %v4462_v27 = vmul.f32 %v4446_v53, %v614_v55  ;;  %v4458_v51 = vmul.f32 %v4442_v58, %v611_v35  ;;  %v4450_v21 = vmul.f32 %v4434_v36, %v605_v44 }
 0x65b   : > { %4582 = vmatpush.msra.mxu3 %v4451_v32  ;;  %v4454_v56 = vmul.f32 %v4438_v38, %v608_v40 }
 0x65c   : > { %4550 = vmatpush.msra.mxu2 %v4462_v27  ;;  %4943 = vmatmul.msk.f32.vlgmr.msra.gmra.mxu3 %vm1863_vm9, %v9845_v23 }
 0x65e   : > { %4551 = vmatpush.msra.mxu2 %v4458_v51 }
 0x660   : > { %4552 = vmatpush.msra.mxu2 %v4454_v56 }
 0x662   : > { %4553 = vmatpush.msra.mxu2 %v4450_v21 }
 0x663   : > { %4939 = vmatmul.msk.f32.vlgmr.msra.gmra.mxu2 %vm1863_vm9, %v9845_v23  ;;  %v5295_v23 = vld [vmem:[%s5573_s13] sm:$0xff] }
 0x664   : > { %4944 = vmatmul.msk.f32.gmra.mxu3 %vm1863_vm9, %v9854_v4 }
 0x66b   : > { %4940 = vmatmul.msk.f32.gmra.mxu2 %vm1863_vm9, %v9854_v4 }
 0x66c   : > { %4945 = vmatmul.msk.f32.gmra.mxu3 %vm1863_vm9, %v4466_v46 }
 0x673   : > { %4941 = vmatmul.msk.f32.gmra.mxu2 %vm1863_vm9, %v4466_v46 }
 0x674   : > { %4946 = vmatmul.msk.f32.gmra.mxu3 %vm1863_vm9, %v4467_v19 }
 0x67b   : > { %4942 = vmatmul.msk.f32.gmra.mxu2 %vm1863_vm9, %v4467_v19 }
 0x6a7   : > { %v4497_v16 = vpop.f32.mrf.mxu0  ;;  %v4526_v50 = vpop.f32.mrf.mxu1 }
 0x6a8   : > { %v4596_v43 = vadd.f32 %v5295_v23, %v4497_v16  ;;  %v4597_v31 = vadd.f32 %v5296_v26, %v4526_v50 }
 0x6aa   : > { %4612 = vst [vmem:[%s9907_s12] sm:$0xff] %v4596_v43 }
 0x6ab   : > { %4613 = vst [vmem:[%s9907_s12 + $0x8] sm:$0xff] %v4597_v31 }
 0x6af   : > { %v4500_v25 = vpop.f32.mrf.mxu0  ;;  %v4529_v13 = vpop.f32.mrf.mxu1 }
 0x6b0   : > { %v4600_v4 = vadd.f32 %v5297_v37, %v4500_v25  ;;  %v4601_v1 = vadd.f32 %v5298_v8, %v4529_v13 }
 0x6b2   : > { %4616 = vst [vmem:[%s9907_s12 + $0x20] sm:$0xff] %v4600_v4 }
 0x6b3   : > { %4617 = vst [vmem:[%s9907_s12 + $0x28] sm:$0xff] %v4601_v1 }
 0x6b7   : > { %v4503_v24 = vpop.f32.mrf.mxu0  ;;  %v4532_v3 = vpop.f32.mrf.mxu1 }
 0x6b8   : > { %v4604_v33 = vadd.f32 %v5299_v10, %v4503_v24  ;;  %v4605_v48 = vadd.f32 %v5300_v41, %v4532_v3 }
 0x6ba   : > { %4620 = vst [vmem:[%s9907_s12 + $0x40] sm:$0xff] %v4604_v33 }
 0x6bb   : > { %4621 = vst [vmem:[%s9907_s12 + $0x48] sm:$0xff] %v4605_v48 }
 0x6bf   : > { %v4506_v47 = vpop.f32.mrf.mxu0  ;;  %v4535_v52 = vpop.f32.mrf.mxu1 }
 0x6c0   : > { %v4608_v15 = vadd.f32 %v5301_v30, %v4506_v47  ;;  %v4609_v45 = vadd.f32 %v5302_v6, %v4535_v52 }
 0x6c2   : > { %4624 = vst [vmem:[%s9907_s12 + $0x60] sm:$0xff] %v4608_v15 }
 0x6c3   : > { %4625 = vst [vmem:[%s9907_s12 + $0x68] sm:$0xff] %v4609_v45 }
 0x6df   : > { %v4584_v12 = vpop.f32.mrf.mxu3 }
 0x6e0   : > { %v4599_v39 = vadd.f32 %v5303_v14, %v4584_v12 }
 0x6e2   : > { %4615 = vst [vmem:[%s9907_s12 + $0x18] sm:$0xff] %v4599_v39 }
 0x6e6   : > { %v4555_v34 = vpop.f32.mrf.mxu2 }
 0x6e7   : > { %v4598_v46 = vadd.f32 %v5304_v61, %v4555_v34  ;;  %v4587_v7 = vpop.f32.mrf.mxu3 }
 0x6e8   : > { %v4603_v57 = vadd.f32 %v5305_v22, %v4587_v7 }
 0x6e9   : > { %4614 = vst [vmem:[%s9907_s12 + $0x10] sm:$0xff] %v4598_v46 }
 0x6ea   : > { %4619 = vst [vmem:[%s9907_s12 + $0x38] sm:$0xff] %v4603_v57 }
 0x6ee   : > { %v4558_v29 = vpop.f32.mrf.mxu2 }
 0x6ef   : > { %v4602_v54 = vadd.f32 %v5306_v5, %v4558_v29  ;;  %v4590_v0 = vpop.f32.mrf.mxu3 }
 0x6f0   : > { %v4607_v20 = vadd.f32 %v5307_v42, %v4590_v0 }
 0x6f1   : > { %4618 = vst [vmem:[%s9907_s12 + $0x30] sm:$0xff] %v4602_v54 }
 0x6f2   : > { %4623 = vst [vmem:[%s9907_s12 + $0x58] sm:$0xff] %v4607_v20 }
 0x6f6   : > { %v4561_v49 = vpop.f32.mrf.mxu2 }
 0x6f7   : > { %v4606_v28 = vadd.f32 %v5308_v2, %v4561_v49  ;;  %v4593_v55 = vpop.f32.mrf.mxu3 }
 0x6f8   : > { %v4611_v60 = vadd.f32 %v5309_v11, %v4593_v55 }
 0x6f9   : > { %4622 = vst [vmem:[%s9907_s12 + $0x50] sm:$0xff] %v4606_v28 }
 0x6fa   : > { %4627 = vst [vmem:[%s9907_s12 + $0x78] sm:$0xff] %v4611_v60 }
 0x6fe   : > { %v4564_v17 = vpop.f32.mrf.mxu2 }
 0x6ff   : > { %v4610_v18 = vadd.f32 %v5310_v63, %v4564_v17 }
 0x701   : > { %4626 = vst [vmem:[%s9907_s12 + $0x70] sm:$0xff] %v4610_v18 }
 0x702   : > { %5398 = shalt.err (!%p5395_p8)
}
 0x703   : > { %s5458_s13 = smov 512   ;;  %s5459_s16 = smov 32  }
 0x704   : > { %4962 = dma.vmem_to_hbm [thread:$0]  (%p5533_p5), %s4642_s19, 2048, %s4644_s20, %s4629_s25, %s5458_s13, %s5458_s13, %s5459_s16  }
 0x705 PF: > { %p4979_p9 = scmp.ge.s32.totalorder %s5441_s24, 2  ;;  %s4658_s12 = sand.u32 1, %s5429_s21  }
 0x706   : > { %s4659_s14 = scalar_lea.sflag [#allocation5], %s4658_s12 }
 0x707   : > { %p4972_p10 = pnand %p4979_p9, %p5537_p6 }
 0x709   : > { %p4973_p11 = pneg %p4972_p10 }
 0x70b   : > { %5424 = dma.done.wait (%p4973_p11), %s4659_s14, 2048  }
 0x70c   : > { %5426 = vsyncadd (%p4973_p11), %s4659_s14, 4294965248  ;;  %p18_p12 = scmp.ge.s32.totalorder %s5520_s27, 4   ;;  %s11064_s21 = smov %s5433_s22 }
 0x70d   : > { %s11065_s22 = smov %s5437_s23  ;;  %s11066_s23 = smov %s5531_s30 }
 0x70e   : > { %s11067_s24 = smov %s5520_s27  ;;  %20 = sbr.rel (!%p18_p12) target bundleno = 5 (0x5), region = 88 }
 0x713   :  { %4665 = vsyncpa [#allocation4], 1 }
 0x714   :  { %4667 = vsyncpa [#allocation4 + $0x1], 1 }
 0x715   :  { %4668 = vsyncpa [#allocation7], 1 }
 0x716   :  { %4669 = vsyncpa [#allocation5], 1 }
 0x717   :  { %4671 = vsyncpa [#allocation5 + $0x1], 1 }

</bundles_post_ra>
